<compile_context>
chip_gen: v5e
topology: v5e:2x2
jax: 0.10.0
libtpu: 0.0.40
codegen_flags: <defaults>
</compile_context>

<pallas_src>
import jax
import jax.numpy as jnp
from jax.experimental import pallas as pl
from jax.experimental.pallas import tpu as pltpu

EPS = 1e-5
KSIZE = 5  # conv kernel size for both convs (padding = 2)


def _fused_cnn_kernel(xw_ref, w1_ref, g1_ref, be1_ref,
                      w2_ref, g2_ref, be2_ref,
                      wfc_ref, gfc_ref, befc_ref,
                      out_ref,
                      s1_ref, p1pad_ref):
    f32 = jnp.float32
    N, HP, W, K = xw_ref.shape            # (2, 20, 16, 5)
    H = HP - (K - 1)                      # 16
    C1 = w1_ref.shape[-1]                 # 16
    C2 = w2_ref.shape[-1]                 # 32
    NCLS = wfc_ref.shape[-1]              # 10
    H2, W2 = H // 2, W // 2               # 8, 8
    H4, W4 = H2 // 2, W2 // 2             # 4, 4
    M1 = N * H * W                        # 512
    M2 = N * H2 * W2                      # 128

    def bn_fold(acc, g, be):
        # Training-mode BatchNorm over rows (= batch*spatial per channel),
        # biased variance, folded into a single FMA.
        mean = jnp.mean(acc, axis=0, keepdims=True)
        var = jnp.mean((acc - mean) ** 2, axis=0, keepdims=True)
        scale = g * jax.lax.rsqrt(var + EPS)
        shift = be - mean * scale
        return acc * scale + shift

    # ---------------- stage 1: conv1 (5 tap matmuls) + BN1 + ReLU -------------
    acc1 = jnp.dot(xw_ref[:, 0:H, :, :].reshape(M1, K), w1_ref[0],
                   preferred_element_type=f32)
    for dh in range(1, K):
        acc1 = acc1 + jnp.dot(xw_ref[:, dh:dh + H, :, :].reshape(M1, K),
                              w1_ref[dh], preferred_element_type=f32)
    y1 = jnp.maximum(bn_fold(acc1, g1_ref[...], be1_ref[...]), 0.0)   # (M1, C1)
    y1_4d = y1.reshape(N, H, W, C1)

    # ---------------- maxpool1 (2x2) -> zero-padded stage-2 input -------------
    for ho in range(H2):                                              # pool H
        s1_ref[:, ho:ho + 1] = jnp.maximum(y1_4d[:, 2 * ho:2 * ho + 1],
                                           y1_4d[:, 2 * ho + 1:2 * ho + 2])
    p1pad_ref[...] = jnp.zeros(p1pad_ref.shape, f32)                  # padding=2
    for wo in range(W2):                                              # pool W
        col = jnp.maximum(s1_ref[:, :, 2 * wo:2 * wo + 1, :],
                          s1_ref[:, :, 2 * wo + 1:2 * wo + 2, :])     # (N,H2,1,C1)
        p1pad_ref[:, 2:2 + H2, 2 + wo:3 + wo, :] = col

    # ---------------- stage 2: conv2 (25 tap matmuls) + BN2 + ReLU ------------
    acc2 = jnp.zeros((M2, C2), f32)
    for dh in range(K):
        for dw in range(K):
            xs = p1pad_ref[:, dh:dh + H2, dw:dw + W2, :].reshape(M2, C1)
            acc2 = acc2 + jnp.dot(xs, w2_ref[dh * K + dw],
                                  preferred_element_type=f32)
    y2 = jnp.maximum(bn_fold(acc2, g2_ref[...], be2_ref[...]), 0.0)   # (M2, C2)
    y2_4d = y2.reshape(N, H2, W2, C2)

    # ---------------- maxpool2 (2x2) + fc1, all on register values ------------
    # out[n, k] = sum_{ho,wo} pooled[n,ho,wo,:] @ Wfc[(ho,wo)]   (torch (c,h,w)
    # flatten order handled by the wrapper's weight regrouping).
    accf = jnp.zeros((N, NCLS), f32)
    for ho in range(H4):
        rowm = jnp.maximum(y2_4d[:, 2 * ho:2 * ho + 1],
                           y2_4d[:, 2 * ho + 1:2 * ho + 2])           # (N,1,W2,C2)
        for wo in range(W4):
            xo = jnp.maximum(rowm[:, :, 2 * wo:2 * wo + 1, :],
                             rowm[:, :, 2 * wo + 1:2 * wo + 2, :]).reshape(N, C2)
            accf = accf + jnp.dot(xo, wfc_ref[ho * W4 + wo],
                                  preferred_element_type=f32)

    # ---------------- BN1d over the batch dimension ---------------------------
    out_ref[...] = bn_fold(accf, gfc_ref[...], befc_ref[...])


def _full_spec(shape):
    # single block == full array (exempt from the (8,128) block constraint)
    return pl.BlockSpec(shape, lambda: (0,) * len(shape))


@jax.jit
def cnn_batch_forward(x_nchw, params):
    n, cin, h, w = x_nchw.shape
    c1 = params["w1"].shape[0]
    c2 = params["w2"].shape[0]
    ncls = params["wfc"].shape[0]
    h4, w4 = h // 4, w // 4

    # Input prep (O(K * input) layout-only work): pad for conv1 (padding=2) and
    # stack a 5-wide sliding window along W so the Cin=1 first conv becomes 5
    # lane-contiguous matmuls inside the kernel (no 25x im2col in HBM).
    x = x_nchw[:, 0]                                            # (N, H, W)
    xpad = jnp.pad(x, ((0, 0), (2, 2), (2, 2)))                 # (N, H+4, W+4)
    xw = jnp.stack([xpad[:, :, d:d + w] for d in range(KSIZE)], axis=-1)

    # Weight re-layout: tap-major, channels-last.
    w1 = jnp.transpose(params["w1"][:, 0], (1, 2, 0))           # (5,5,C1) [dh,dw,co]
    w2 = jnp.transpose(params["w2"], (2, 3, 1, 0)).reshape(KSIZE * KSIZE, c1, c2)
    # fc weight: torch flatten order is (c, ho, wo); regroup into per-(ho,wo) blocks.
    wfc = jnp.transpose(params["wfc"].reshape(ncls, c2, h4, w4),
                        (2, 3, 1, 0)).reshape(h4 * w4, c2, ncls)

    g1 = params["g1"].reshape(1, c1)
    be1 = params["be1"].reshape(1, c1)
    g2 = params["g2"].reshape(1, c2)
    be2 = params["be2"].reshape(1, c2)
    gfc = params["gfc"].reshape(1, ncls)
    befc = params["befc"].reshape(1, ncls)
    # NOTE: b1 / b2 / bfc are intentionally NOT passed: training-mode BatchNorm
    # right after each layer subtracts the batch mean, which cancels any
    # per-channel constant bias exactly.

    args = (xw, w1, g1, be1, w2, g2, be2, wfc, gfc, befc)

    return pl.pallas_call(
        _fused_cnn_kernel,
        out_shape=jax.ShapeDtypeStruct((n, ncls), jnp.float32),
        in_specs=[_full_spec(a.shape) for a in args],
        out_specs=_full_spec((n, ncls)),
        scratch_shapes=[
            pltpu.VMEM((n, h // 2, w, c1), jnp.float32),                 # H-pooled stage 1
            pltpu.VMEM((n, h // 2 + 4, w // 2 + 4, c1), jnp.float32),    # padded stage-2 input
        ],
        compiler_params=pltpu.CompilerParams(
            vmem_limit_bytes=32 * 1024 * 1024),
    )(*args)


def init_params(key, out_1=16, out_2=32, num_classes=10, in_spatial=16):
    ks = jax.random.split(key, 8)
    feat = out_2 * (in_spatial // 4) * (in_spatial // 4)
    p = {}
    p["w1"] = 0.1 * jax.random.normal(ks[0], (out_1, 1, KSIZE, KSIZE), jnp.float32)
    p["b1"] = 0.05 * jax.random.normal(ks[1], (out_1,), jnp.float32)   # cancelled by BN
    p["g1"] = 1.0 + 0.1 * jax.random.normal(ks[2], (out_1,), jnp.float32)
    p["be1"] = 0.1 * jax.random.normal(ks[3], (out_1,), jnp.float32)

    p["w2"] = 0.1 * jax.random.normal(ks[4], (out_2, out_1, KSIZE, KSIZE), jnp.float32)
    p["b2"] = 0.05 * jax.random.normal(ks[5], (out_2,), jnp.float32)   # cancelled by BN
    p["g2"] = jnp.linspace(0.8, 1.2, out_2, dtype=jnp.float32)
    p["be2"] = jnp.linspace(-0.1, 0.1, out_2, dtype=jnp.float32)

    p["wfc"] = 0.05 * jax.random.normal(ks[6], (num_classes, feat), jnp.float32)
    p["bfc"] = 0.02 * jax.random.normal(ks[7], (num_classes,), jnp.float32)  # cancelled by BN
    p["gfc"] = jnp.linspace(0.9, 1.1, num_classes, dtype=jnp.float32)
    p["befc"] = jnp.linspace(-0.05, 0.05, num_classes, dtype=jnp.float32)
    return p


if __name__ == "__main__":
    key = jax.random.PRNGKey(0)
    k_x, k_p = jax.random.split(key)
    # Input spatial 16x16 so that out_2*4*4 matches fc1's expected feature count.
    x = jax.random.normal(k_x, (2, 1, 16, 16), jnp.float32)  # NCHW, like PyTorch
    params = init_params(k_p, out_1=16, out_2=32, num_classes=10, in_spatial=16)

    out = cnn_batch_forward(x, params)
    out = jax.block_until_ready(out)
    assert out.shape == (2, 10) and out.dtype == jnp.float32
    assert bool(jnp.all(jnp.isfinite(out)))
    print("KERNEL_OK")
</pallas_src>

<mosaic_0001>
module attributes {stable_mosaic.version = 11 : i64} {
  func.func @_fused_cnn_kernel(%arg0: memref<2x20x16x5xf32, #tpu.memory_space<vmem>>, %arg1: memref<5x5x16xf32, #tpu.memory_space<vmem>>, %arg2: memref<1x16xf32, #tpu.memory_space<vmem>>, %arg3: memref<1x16xf32, #tpu.memory_space<vmem>>, %arg4: memref<25x16x32xf32, #tpu.memory_space<vmem>>, %arg5: memref<1x32xf32, #tpu.memory_space<vmem>>, %arg6: memref<1x32xf32, #tpu.memory_space<vmem>>, %arg7: memref<16x32x10xf32, #tpu.memory_space<vmem>>, %arg8: memref<1x10xf32, #tpu.memory_space<vmem>>, %arg9: memref<1x10xf32, #tpu.memory_space<vmem>>, %arg10: memref<2x10xf32, #tpu.memory_space<vmem>>, %arg11: memref<2x8x16x16xf32, #tpu.memory_space<vmem>>, %arg12: memref<2x12x12x16xf32, #tpu.memory_space<vmem>>) attributes {dimension_semantics = [], scalar_prefetch = 0 : i64, scratch_operands = 2 : i64, tpu.core_type = #tpu.core_type<tc>} {
    %c0 = arith.constant 0 : index
    %c0_0 = arith.constant 0 : index
    %c0_1 = arith.constant 0 : index
    %c0_2 = arith.constant 0 : index
    %0 = vector.load %arg0[%c0, %c0_0, %c0_1, %c0_2] : memref<2x20x16x5xf32, #tpu.memory_space<vmem>>, vector<2x16x16x5xf32>
    %1 = vector.shape_cast %0 : vector<2x16x16x5xf32> to vector<512x5xf32>
    %c0_3 = arith.constant 0 : index
    %c0_4 = arith.constant 0 : index
    %c0_5 = arith.constant 0 : index
    %2 = vector.load %arg1[%c0_3, %c0_4, %c0_5] : memref<5x5x16xf32, #tpu.memory_space<vmem>>, vector<1x5x16xf32>
    %3 = vector.shape_cast %2 : vector<1x5x16xf32> to vector<5x16xf32>
    %cst = arith.constant dense<0.000000e+00> : vector<512x16xf32>
    %4 = tpu.matmul %1, %3, %cst {dimension_numbers = #tpu.dot_dimension_numbers<[1], [0], [0], [1], [0, 0, 1, 1], [], []>} : vector<512x5xf32>, vector<5x16xf32>, vector<512x16xf32> -> vector<512x16xf32>
    %c0_6 = arith.constant 0 : index
    %c1 = arith.constant 1 : index
    %c0_7 = arith.constant 0 : index
    %c0_8 = arith.constant 0 : index
    %5 = vector.load %arg0[%c0_6, %c1, %c0_7, %c0_8] : memref<2x20x16x5xf32, #tpu.memory_space<vmem>>, vector<2x16x16x5xf32>
    %6 = vector.shape_cast %5 : vector<2x16x16x5xf32> to vector<512x5xf32>
    %c1_9 = arith.constant 1 : index
    %c0_10 = arith.constant 0 : index
    %c0_11 = arith.constant 0 : index
    %7 = vector.load %arg1[%c1_9, %c0_10, %c0_11] : memref<5x5x16xf32, #tpu.memory_space<vmem>>, vector<1x5x16xf32>
    %8 = vector.shape_cast %7 : vector<1x5x16xf32> to vector<5x16xf32>
    %cst_12 = arith.constant dense<0.000000e+00> : vector<512x16xf32>
    %9 = tpu.matmul %6, %8, %cst_12 {dimension_numbers = #tpu.dot_dimension_numbers<[1], [0], [0], [1], [0, 0, 1, 1], [], []>} : vector<512x5xf32>, vector<5x16xf32>, vector<512x16xf32> -> vector<512x16xf32>
    %10 = arith.addf %4, %9 : vector<512x16xf32>
    %c0_13 = arith.constant 0 : index
    %c2 = arith.constant 2 : index
    %c0_14 = arith.constant 0 : index
    %c0_15 = arith.constant 0 : index
    %11 = vector.load %arg0[%c0_13, %c2, %c0_14, %c0_15] : memref<2x20x16x5xf32, #tpu.memory_space<vmem>>, vector<2x16x16x5xf32>
    %12 = vector.shape_cast %11 : vector<2x16x16x5xf32> to vector<512x5xf32>
    %c2_16 = arith.constant 2 : index
    %c0_17 = arith.constant 0 : index
    %c0_18 = arith.constant 0 : index
    %13 = vector.load %arg1[%c2_16, %c0_17, %c0_18] : memref<5x5x16xf32, #tpu.memory_space<vmem>>, vector<1x5x16xf32>
    %14 = vector.shape_cast %13 : vector<1x5x16xf32> to vector<5x16xf32>
    %cst_19 = arith.constant dense<0.000000e+00> : vector<512x16xf32>
    %15 = tpu.matmul %12, %14, %cst_19 {dimension_numbers = #tpu.dot_dimension_numbers<[1], [0], [0], [1], [0, 0, 1, 1], [], []>} : vector<512x5xf32>, vector<5x16xf32>, vector<512x16xf32> -> vector<512x16xf32>
    %16 = arith.addf %10, %15 : vector<512x16xf32>
    %c0_20 = arith.constant 0 : index
    %c3 = arith.constant 3 : index
    %c0_21 = arith.constant 0 : index
    %c0_22 = arith.constant 0 : index
    %17 = vector.load %arg0[%c0_20, %c3, %c0_21, %c0_22] : memref<2x20x16x5xf32, #tpu.memory_space<vmem>>, vector<2x16x16x5xf32>
    %18 = vector.shape_cast %17 : vector<2x16x16x5xf32> to vector<512x5xf32>
    %c3_23 = arith.constant 3 : index
    %c0_24 = arith.constant 0 : index
    %c0_25 = arith.constant 0 : index
    %19 = vector.load %arg1[%c3_23, %c0_24, %c0_25] : memref<5x5x16xf32, #tpu.memory_space<vmem>>, vector<1x5x16xf32>
    %20 = vector.shape_cast %19 : vector<1x5x16xf32> to vector<5x16xf32>
    %cst_26 = arith.constant dense<0.000000e+00> : vector<512x16xf32>
    %21 = tpu.matmul %18, %20, %cst_26 {dimension_numbers = #tpu.dot_dimension_numbers<[1], [0], [0], [1], [0, 0, 1, 1], [], []>} : vector<512x5xf32>, vector<5x16xf32>, vector<512x16xf32> -> vector<512x16xf32>
    %22 = arith.addf %16, %21 : vector<512x16xf32>
    %c0_27 = arith.constant 0 : index
    %c4 = arith.constant 4 : index
    %c0_28 = arith.constant 0 : index
    %c0_29 = arith.constant 0 : index
    %23 = vector.load %arg0[%c0_27, %c4, %c0_28, %c0_29] : memref<2x20x16x5xf32, #tpu.memory_space<vmem>>, vector<2x16x16x5xf32>
    %24 = vector.shape_cast %23 : vector<2x16x16x5xf32> to vector<512x5xf32>
    %c4_30 = arith.constant 4 : index
    %c0_31 = arith.constant 0 : index
    %c0_32 = arith.constant 0 : index
    %25 = vector.load %arg1[%c4_30, %c0_31, %c0_32] : memref<5x5x16xf32, #tpu.memory_space<vmem>>, vector<1x5x16xf32>
    %26 = vector.shape_cast %25 : vector<1x5x16xf32> to vector<5x16xf32>
    %cst_33 = arith.constant dense<0.000000e+00> : vector<512x16xf32>
    %27 = tpu.matmul %24, %26, %cst_33 {dimension_numbers = #tpu.dot_dimension_numbers<[1], [0], [0], [1], [0, 0, 1, 1], [], []>} : vector<512x5xf32>, vector<5x16xf32>, vector<512x16xf32> -> vector<512x16xf32>
    %28 = arith.addf %22, %27 : vector<512x16xf32>
    %c0_34 = arith.constant 0 : index
    %c0_35 = arith.constant 0 : index
    %29 = vector.load %arg2[%c0_34, %c0_35] : memref<1x16xf32, #tpu.memory_space<vmem>>, vector<1x16xf32>
    %c0_36 = arith.constant 0 : index
    %c0_37 = arith.constant 0 : index
    %30 = vector.load %arg3[%c0_36, %c0_37] : memref<1x16xf32, #tpu.memory_space<vmem>>, vector<1x16xf32>
    %cst_38 = arith.constant dense<0.000000e+00> : vector<16xf32>
    %31 = vector.multi_reduction <add>, %28, %cst_38 [0] : vector<512x16xf32> to vector<16xf32>
    %32 = vector.shape_cast %31 : vector<16xf32> to vector<1x16xf32>
    %cst_39 = arith.constant 5.120000e+02 : f32
    %33 = vector.broadcast %cst_39 : f32 to vector<1x16xf32>
    %34 = arith.divf %32, %33 : vector<1x16xf32>
    %35 = vector.broadcast %34 : vector<1x16xf32> to vector<512x16xf32>
    %36 = arith.subf %28, %35 : vector<512x16xf32>
    %37 = arith.mulf %36, %36 : vector<512x16xf32>
    %cst_40 = arith.constant dense<0.000000e+00> : vector<16xf32>
    %38 = vector.multi_reduction <add>, %37, %cst_40 [0] : vector<512x16xf32> to vector<16xf32>
    %39 = vector.shape_cast %38 : vector<16xf32> to vector<1x16xf32>
    %cst_41 = arith.constant 5.120000e+02 : f32
    %40 = vector.broadcast %cst_41 : f32 to vector<1x16xf32>
    %41 = arith.divf %39, %40 : vector<1x16xf32>
    %cst_42 = arith.constant 9.99999974E-6 : f32
    %42 = vector.broadcast %cst_42 : f32 to vector<1x16xf32>
    %43 = arith.addf %41, %42 : vector<1x16xf32>
    %44 = math.rsqrt %43 : vector<1x16xf32>
    %45 = arith.mulf %29, %44 : vector<1x16xf32>
    %46 = arith.mulf %34, %45 : vector<1x16xf32>
    %47 = arith.subf %30, %46 : vector<1x16xf32>
    %48 = vector.broadcast %45 : vector<1x16xf32> to vector<512x16xf32>
    %49 = arith.mulf %28, %48 : vector<512x16xf32>
    %50 = vector.broadcast %47 : vector<1x16xf32> to vector<512x16xf32>
    %51 = arith.addf %49, %50 : vector<512x16xf32>
    %cst_43 = arith.constant 0.000000e+00 : f32
    %52 = vector.broadcast %cst_43 : f32 to vector<512x16xf32>
    %53 = arith.maximumf %51, %52 : vector<512x16xf32>
    %54 = vector.shape_cast %53 : vector<512x16xf32> to vector<2x16x16x16xf32>
    %55 = vector.extract_strided_slice %54 {offsets = [0, 0, 0, 0], sizes = [2, 1, 16, 16], strides = [1, 1, 1, 1]} : vector<2x16x16x16xf32> to vector<2x1x16x16xf32>
    %56 = vector.extract_strided_slice %54 {offsets = [0, 1, 0, 0], sizes = [2, 1, 16, 16], strides = [1, 1, 1, 1]} : vector<2x16x16x16xf32> to vector<2x1x16x16xf32>
    %57 = arith.maximumf %55, %56 : vector<2x1x16x16xf32>
    %c0_44 = arith.constant 0 : index
    %c0_45 = arith.constant 0 : index
    %c0_46 = arith.constant 0 : index
    %c0_47 = arith.constant 0 : index
    %58 = vector.load %arg11[%c0_44, %c0_45, %c0_46, %c0_47] : memref<2x8x16x16xf32, #tpu.memory_space<vmem>>, vector<2x1x16x16xf32>
    tpu.vector_store %arg11[%c0_44, %c0_45, %c0_46, %c0_47], %57 {strides = array<i32>} : memref<2x8x16x16xf32, #tpu.memory_space<vmem>>, vector<2x1x16x16xf32>,
    %59 = vector.extract_strided_slice %54 {offsets = [0, 2, 0, 0], sizes = [2, 1, 16, 16], strides = [1, 1, 1, 1]} : vector<2x16x16x16xf32> to vector<2x1x16x16xf32>
    %60 = vector.extract_strided_slice %54 {offsets = [0, 3, 0, 0], sizes = [2, 1, 16, 16], strides = [1, 1, 1, 1]} : vector<2x16x16x16xf32> to vector<2x1x16x16xf32>
    %61 = arith.maximumf %59, %60 : vector<2x1x16x16xf32>
    %c0_48 = arith.constant 0 : index
    %c1_49 = arith.constant 1 : index
    %c0_50 = arith.constant 0 : index
    %c0_51 = arith.constant 0 : index
    %62 = vector.load %arg11[%c0_48, %c1_49, %c0_50, %c0_51] : memref<2x8x16x16xf32, #tpu.memory_space<vmem>>, vector<2x1x16x16xf32>
    tpu.vector_store %arg11[%c0_48, %c1_49, %c0_50, %c0_51], %61 {strides = array<i32>} : memref<2x8x16x16xf32, #tpu.memory_space<vmem>>, vector<2x1x16x16xf32>,
    %63 = vector.extract_strided_slice %54 {offsets = [0, 4, 0, 0], sizes = [2, 1, 16, 16], strides = [1, 1, 1, 1]} : vector<2x16x16x16xf32> to vector<2x1x16x16xf32>
    %64 = vector.extract_strided_slice %54 {offsets = [0, 5, 0, 0], sizes = [2, 1, 16, 16], strides = [1, 1, 1, 1]} : vector<2x16x16x16xf32> to vector<2x1x16x16xf32>
    %65 = arith.maximumf %63, %64 : vector<2x1x16x16xf32>
    %c0_52 = arith.constant 0 : index
    %c2_53 = arith.constant 2 : index
    %c0_54 = arith.constant 0 : index
    %c0_55 = arith.constant 0 : index
    %66 = vector.load %arg11[%c0_52, %c2_53, %c0_54, %c0_55] : memref<2x8x16x16xf32, #tpu.memory_space<vmem>>, vector<2x1x16x16xf32>
    tpu.vector_store %arg11[%c0_52, %c2_53, %c0_54, %c0_55], %65 {strides = array<i32>} : memref<2x8x16x16xf32, #tpu.memory_space<vmem>>, vector<2x1x16x16xf32>,
    %67 = vector.extract_strided_slice %54 {offsets = [0, 6, 0, 0], sizes = [2, 1, 16, 16], strides = [1, 1, 1, 1]} : vector<2x16x16x16xf32> to vector<2x1x16x16xf32>
    %68 = vector.extract_strided_slice %54 {offsets = [0, 7, 0, 0], sizes = [2, 1, 16, 16], strides = [1, 1, 1, 1]} : vector<2x16x16x16xf32> to vector<2x1x16x16xf32>
    %69 = arith.maximumf %67, %68 : vector<2x1x16x16xf32>
    %c0_56 = arith.constant 0 : index
    %c3_57 = arith.constant 3 : index
    %c0_58 = arith.constant 0 : index
    %c0_59 = arith.constant 0 : index
    %70 = vector.load %arg11[%c0_56, %c3_57, %c0_58, %c0_59] : memref<2x8x16x16xf32, #tpu.memory_space<vmem>>, vector<2x1x16x16xf32>
    tpu.vector_store %arg11[%c0_56, %c3_57, %c0_58, %c0_59], %69 {strides = array<i32>} : memref<2x8x16x16xf32, #tpu.memory_space<vmem>>, vector<2x1x16x16xf32>,
    %71 = vector.extract_strided_slice %54 {offsets = [0, 8, 0, 0], sizes = [2, 1, 16, 16], strides = [1, 1, 1, 1]} : vector<2x16x16x16xf32> to vector<2x1x16x16xf32>
    %72 = vector.extract_strided_slice %54 {offsets = [0, 9, 0, 0], sizes = [2, 1, 16, 16], strides = [1, 1, 1, 1]} : vector<2x16x16x16xf32> to vector<2x1x16x16xf32>
    %73 = arith.maximumf %71, %72 : vector<2x1x16x16xf32>
    %c0_60 = arith.constant 0 : index
    %c4_61 = arith.constant 4 : index
    %c0_62 = arith.constant 0 : index
    %c0_63 = arith.constant 0 : index
    %74 = vector.load %arg11[%c0_60, %c4_61, %c0_62, %c0_63] : memref<2x8x16x16xf32, #tpu.memory_space<vmem>>, vector<2x1x16x16xf32>
    tpu.vector_store %arg11[%c0_60, %c4_61, %c0_62, %c0_63], %73 {strides = array<i32>} : memref<2x8x16x16xf32, #tpu.memory_space<vmem>>, vector<2x1x16x16xf32>,
    %75 = vector.extract_strided_slice %54 {offsets = [0, 10, 0, 0], sizes = [2, 1, 16, 16], strides = [1, 1, 1, 1]} : vector<2x16x16x16xf32> to vector<2x1x16x16xf32>
    %76 = vector.extract_strided_slice %54 {offsets = [0, 11, 0, 0], sizes = [2, 1, 16, 16], strides = [1, 1, 1, 1]} : vector<2x16x16x16xf32> to vector<2x1x16x16xf32>
    %77 = arith.maximumf %75, %76 : vector<2x1x16x16xf32>
    %c0_64 = arith.constant 0 : index
    %c5 = arith.constant 5 : index
    %c0_65 = arith.constant 0 : index
    %c0_66 = arith.constant 0 : index
    %78 = vector.load %arg11[%c0_64, %c5, %c0_65, %c0_66] : memref<2x8x16x16xf32, #tpu.memory_space<vmem>>, vector<2x1x16x16xf32>
    tpu.vector_store %arg11[%c0_64, %c5, %c0_65, %c0_66], %77 {strides = array<i32>} : memref<2x8x16x16xf32, #tpu.memory_space<vmem>>, vector<2x1x16x16xf32>,
    %79 = vector.extract_strided_slice %54 {offsets = [0, 12, 0, 0], sizes = [2, 1, 16, 16], strides = [1, 1, 1, 1]} : vector<2x16x16x16xf32> to vector<2x1x16x16xf32>
    %80 = vector.extract_strided_slice %54 {offsets = [0, 13, 0, 0], sizes = [2, 1, 16, 16], strides = [1, 1, 1, 1]} : vector<2x16x16x16xf32> to vector<2x1x16x16xf32>
    %81 = arith.maximumf %79, %80 : vector<2x1x16x16xf32>
    %c0_67 = arith.constant 0 : index
    %c6 = arith.constant 6 : index
    %c0_68 = arith.constant 0 : index
    %c0_69 = arith.constant 0 : index
    %82 = vector.load %arg11[%c0_67, %c6, %c0_68, %c0_69] : memref<2x8x16x16xf32, #tpu.memory_space<vmem>>, vector<2x1x16x16xf32>
    tpu.vector_store %arg11[%c0_67, %c6, %c0_68, %c0_69], %81 {strides = array<i32>} : memref<2x8x16x16xf32, #tpu.memory_space<vmem>>, vector<2x1x16x16xf32>,
    %83 = vector.extract_strided_slice %54 {offsets = [0, 14, 0, 0], sizes = [2, 1, 16, 16], strides = [1, 1, 1, 1]} : vector<2x16x16x16xf32> to vector<2x1x16x16xf32>
    %84 = vector.extract_strided_slice %54 {offsets = [0, 15, 0, 0], sizes = [2, 1, 16, 16], strides = [1, 1, 1, 1]} : vector<2x16x16x16xf32> to vector<2x1x16x16xf32>
    %85 = arith.maximumf %83, %84 : vector<2x1x16x16xf32>
    %c0_70 = arith.constant 0 : index
    %c7 = arith.constant 7 : index
    %c0_71 = arith.constant 0 : index
    %c0_72 = arith.constant 0 : index
    %86 = vector.load %arg11[%c0_70, %c7, %c0_71, %c0_72] : memref<2x8x16x16xf32, #tpu.memory_space<vmem>>, vector<2x1x16x16xf32>
    tpu.vector_store %arg11[%c0_70, %c7, %c0_71, %c0_72], %85 {strides = array<i32>} : memref<2x8x16x16xf32, #tpu.memory_space<vmem>>, vector<2x1x16x16xf32>,
    %cst_73 = arith.constant 0.000000e+00 : f32
    %87 = vector.broadcast %cst_73 : f32 to vector<2x12x12x16xf32>
    %c0_74 = arith.constant 0 : index
    %c0_75 = arith.constant 0 : index
    %c0_76 = arith.constant 0 : index
    %c0_77 = arith.constant 0 : index
    %88 = vector.load %arg12[%c0_74, %c0_75, %c0_76, %c0_77] : memref<2x12x12x16xf32, #tpu.memory_space<vmem>>, vector<2x12x12x16xf32>
    tpu.vector_store %arg12[%c0_74, %c0_75, %c0_76, %c0_77], %87 {strides = array<i32>} : memref<2x12x12x16xf32, #tpu.memory_space<vmem>>, vector<2x12x12x16xf32>,
    %c0_78 = arith.constant 0 : index
    %c0_79 = arith.constant 0 : index
    %c0_80 = arith.constant 0 : index
    %c0_81 = arith.constant 0 : index
    %89 = vector.load %arg11[%c0_78, %c0_79, %c0_80, %c0_81] : memref<2x8x16x16xf32, #tpu.memory_space<vmem>>, vector<2x8x1x16xf32>
    %c0_82 = arith.constant 0 : index
    %c0_83 = arith.constant 0 : index
    %c1_84 = arith.constant 1 : index
    %c0_85 = arith.constant 0 : index
    %90 = vector.load %arg11[%c0_82, %c0_83, %c1_84, %c0_85] : memref<2x8x16x16xf32, #tpu.memory_space<vmem>>, vector<2x8x1x16xf32>
    %91 = arith.maximumf %89, %90 : vector<2x8x1x16xf32>
    %c0_86 = arith.constant 0 : index
    %c2_87 = arith.constant 2 : index
    %c2_88 = arith.constant 2 : index
    %c0_89 = arith.constant 0 : index
    %92 = vector.load %arg12[%c0_86, %c2_87, %c2_88, %c0_89] : memref<2x12x12x16xf32, #tpu.memory_space<vmem>>, vector<2x8x1x16xf32>
    tpu.vector_store %arg12[%c0_86, %c2_87, %c2_88, %c0_89], %91 {strides = array<i32>} : memref<2x12x12x16xf32, #tpu.memory_space<vmem>>, vector<2x8x1x16xf32>,
    %c0_90 = arith.constant 0 : index
    %c0_91 = arith.constant 0 : index
    %c2_92 = arith.constant 2 : index
    %c0_93 = arith.constant 0 : index
    %93 = vector.load %arg11[%c0_90, %c0_91, %c2_92, %c0_93] : memref<2x8x16x16xf32, #tpu.memory_space<vmem>>, vector<2x8x1x16xf32>
    %c0_94 = arith.constant 0 : index
    %c0_95 = arith.constant 0 : index
    %c3_96 = arith.constant 3 : index
    %c0_97 = arith.constant 0 : index
    %94 = vector.load %arg11[%c0_94, %c0_95, %c3_96, %c0_97] : memref<2x8x16x16xf32, #tpu.memory_space<vmem>>, vector<2x8x1x16xf32>
    %95 = arith.maximumf %93, %94 : vector<2x8x1x16xf32>
    %c0_98 = arith.constant 0 : index
    %c2_99 = arith.constant 2 : index
    %c3_100 = arith.constant 3 : index
    %c0_101 = arith.constant 0 : index
    %96 = vector.load %arg12[%c0_98, %c2_99, %c3_100, %c0_101] : memref<2x12x12x16xf32, #tpu.memory_space<vmem>>, vector<2x8x1x16xf32>
    tpu.vector_store %arg12[%c0_98, %c2_99, %c3_100, %c0_101], %95 {strides = array<i32>} : memref<2x12x12x16xf32, #tpu.memory_space<vmem>>, vector<2x8x1x16xf32>,
    %c0_102 = arith.constant 0 : index
    %c0_103 = arith.constant 0 : index
    %c4_104 = arith.constant 4 : index
    %c0_105 = arith.constant 0 : index
    %97 = vector.load %arg11[%c0_102, %c0_103, %c4_104, %c0_105] : memref<2x8x16x16xf32, #tpu.memory_space<vmem>>, vector<2x8x1x16xf32>
    %c0_106 = arith.constant 0 : index
    %c0_107 = arith.constant 0 : index
    %c5_108 = arith.constant 5 : index
    %c0_109 = arith.constant 0 : index
    %98 = vector.load %arg11[%c0_106, %c0_107, %c5_108, %c0_109] : memref<2x8x16x16xf32, #tpu.memory_space<vmem>>, vector<2x8x1x16xf32>
    %99 = arith.maximumf %97, %98 : vector<2x8x1x16xf32>
    %c0_110 = arith.constant 0 : index
    %c2_111 = arith.constant 2 : index
    %c4_112 = arith.constant 4 : index
    %c0_113 = arith.constant 0 : index
    %100 = vector.load %arg12[%c0_110, %c2_111, %c4_112, %c0_113] : memref<2x12x12x16xf32, #tpu.memory_space<vmem>>, vector<2x8x1x16xf32>
    tpu.vector_store %arg12[%c0_110, %c2_111, %c4_112, %c0_113], %99 {strides = array<i32>} : memref<2x12x12x16xf32, #tpu.memory_space<vmem>>, vector<2x8x1x16xf32>,
    %c0_114 = arith.constant 0 : index
    %c0_115 = arith.constant 0 : index
    %c6_116 = arith.constant 6 : index
    %c0_117 = arith.constant 0 : index
    %101 = vector.load %arg11[%c0_114, %c0_115, %c6_116, %c0_117] : memref<2x8x16x16xf32, #tpu.memory_space<vmem>>, vector<2x8x1x16xf32>
    %c0_118 = arith.constant 0 : index
    %c0_119 = arith.constant 0 : index
    %c7_120 = arith.constant 7 : index
    %c0_121 = arith.constant 0 : index
    %102 = vector.load %arg11[%c0_118, %c0_119, %c7_120, %c0_121] : memref<2x8x16x16xf32, #tpu.memory_space<vmem>>, vector<2x8x1x16xf32>
    %103 = arith.maximumf %101, %102 : vector<2x8x1x16xf32>
    %c0_122 = arith.constant 0 : index
    %c2_123 = arith.constant 2 : index
    %c5_124 = arith.constant 5 : index
    %c0_125 = arith.constant 0 : index
    %104 = vector.load %arg12[%c0_122, %c2_123, %c5_124, %c0_125] : memref<2x12x12x16xf32, #tpu.memory_space<vmem>>, vector<2x8x1x16xf32>
    tpu.vector_store %arg12[%c0_122, %c2_123, %c5_124, %c0_125], %103 {strides = array<i32>} : memref<2x12x12x16xf32, #tpu.memory_space<vmem>>, vector<2x8x1x16xf32>,
    %c0_126 = arith.constant 0 : index
    %c0_127 = arith.constant 0 : index
    %c8 = arith.constant 8 : index
    %c0_128 = arith.constant 0 : index
    %105 = vector.load %arg11[%c0_126, %c0_127, %c8, %c0_128] : memref<2x8x16x16xf32, #tpu.memory_space<vmem>>, vector<2x8x1x16xf32>
    %c0_129 = arith.constant 0 : index
    %c0_130 = arith.constant 0 : index
    %c9 = arith.constant 9 : index
    %c0_131 = arith.constant 0 : index
    %106 = vector.load %arg11[%c0_129, %c0_130, %c9, %c0_131] : memref<2x8x16x16xf32, #tpu.memory_space<vmem>>, vector<2x8x1x16xf32>
    %107 = arith.maximumf %105, %106 : vector<2x8x1x16xf32>
    %c0_132 = arith.constant 0 : index
    %c2_133 = arith.constant 2 : index
    %c6_134 = arith.constant 6 : index
    %c0_135 = arith.constant 0 : index
    %108 = vector.load %arg12[%c0_132, %c2_133, %c6_134, %c0_135] : memref<2x12x12x16xf32, #tpu.memory_space<vmem>>, vector<2x8x1x16xf32>
    tpu.vector_store %arg12[%c0_132, %c2_133, %c6_134, %c0_135], %107 {strides = array<i32>} : memref<2x12x12x16xf32, #tpu.memory_space<vmem>>, vector<2x8x1x16xf32>,
    %c0_136 = arith.constant 0 : index
    %c0_137 = arith.constant 0 : index
    %c10 = arith.constant 10 : index
    %c0_138 = arith.constant 0 : index
    %109 = vector.load %arg11[%c0_136, %c0_137, %c10, %c0_138] : memref<2x8x16x16xf32, #tpu.memory_space<vmem>>, vector<2x8x1x16xf32>
    %c0_139 = arith.constant 0 : index
    %c0_140 = arith.constant 0 : index
    %c11 = arith.constant 11 : index
    %c0_141 = arith.constant 0 : index
    %110 = vector.load %arg11[%c0_139, %c0_140, %c11, %c0_141] : memref<2x8x16x16xf32, #tpu.memory_space<vmem>>, vector<2x8x1x16xf32>
    %111 = arith.maximumf %109, %110 : vector<2x8x1x16xf32>
    %c0_142 = arith.constant 0 : index
    %c2_143 = arith.constant 2 : index
    %c7_144 = arith.constant 7 : index
    %c0_145 = arith.constant 0 : index
    %112 = vector.load %arg12[%c0_142, %c2_143, %c7_144, %c0_145] : memref<2x12x12x16xf32, #tpu.memory_space<vmem>>, vector<2x8x1x16xf32>
    tpu.vector_store %arg12[%c0_142, %c2_143, %c7_144, %c0_145], %111 {strides = array<i32>} : memref<2x12x12x16xf32, #tpu.memory_space<vmem>>, vector<2x8x1x16xf32>,
    %c0_146 = arith.constant 0 : index
    %c0_147 = arith.constant 0 : index
    %c12 = arith.constant 12 : index
    %c0_148 = arith.constant 0 : index
    %113 = vector.load %arg11[%c0_146, %c0_147, %c12, %c0_148] : memref<2x8x16x16xf32, #tpu.memory_space<vmem>>, vector<2x8x1x16xf32>
    %c0_149 = arith.constant 0 : index
    %c0_150 = arith.constant 0 : index
    %c13 = arith.constant 13 : index
    %c0_151 = arith.constant 0 : index
    %114 = vector.load %arg11[%c0_149, %c0_150, %c13, %c0_151] : memref<2x8x16x16xf32, #tpu.memory_space<vmem>>, vector<2x8x1x16xf32>
    %115 = arith.maximumf %113, %114 : vector<2x8x1x16xf32>
    %c0_152 = arith.constant 0 : index
    %c2_153 = arith.constant 2 : index
    %c8_154 = arith.constant 8 : index
    %c0_155 = arith.constant 0 : index
    %116 = vector.load %arg12[%c0_152, %c2_153, %c8_154, %c0_155] : memref<2x12x12x16xf32, #tpu.memory_space<vmem>>, vector<2x8x1x16xf32>
    tpu.vector_store %arg12[%c0_152, %c2_153, %c8_154, %c0_155], %115 {strides = array<i32>} : memref<2x12x12x16xf32, #tpu.memory_space<vmem>>, vector<2x8x1x16xf32>,
    %c0_156 = arith.constant 0 : index
    %c0_157 = arith.constant 0 : index
    %c14 = arith.constant 14 : index
    %c0_158 = arith.constant 0 : index
    %117 = vector.load %arg11[%c0_156, %c0_157, %c14, %c0_158] : memref<2x8x16x16xf32, #tpu.memory_space<vmem>>, vector<2x8x1x16xf32>
    %c0_159 = arith.constant 0 : index
    %c0_160 = arith.constant 0 : index
    %c15 = arith.constant 15 : index
    %c0_161 = arith.constant 0 : index
    %118 = vector.load %arg11[%c0_159, %c0_160, %c15, %c0_161] : memref<2x8x16x16xf32, #tpu.memory_space<vmem>>, vector<2x8x1x16xf32>
    %119 = arith.maximumf %117, %118 : vector<2x8x1x16xf32>
    %c0_162 = arith.constant 0 : index
    %c2_163 = arith.constant 2 : index
    %c9_164 = arith.constant 9 : index
    %c0_165 = arith.constant 0 : index
    %120 = vector.load %arg12[%c0_162, %c2_163, %c9_164, %c0_165] : memref<2x12x12x16xf32, #tpu.memory_space<vmem>>, vector<2x8x1x16xf32>
    tpu.vector_store %arg12[%c0_162, %c2_163, %c9_164, %c0_165], %119 {strides = array<i32>} : memref<2x12x12x16xf32, #tpu.memory_space<vmem>>, vector<2x8x1x16xf32>,
    %cst_166 = arith.constant 0.000000e+00 : f32
    %121 = vector.broadcast %cst_166 : f32 to vector<128x32xf32>
    %c0_167 = arith.constant 0 : index
    %c0_168 = arith.constant 0 : index
    %c0_169 = arith.constant 0 : index
    %c0_170 = arith.constant 0 : index
    %122 = vector.load %arg12[%c0_167, %c0_168, %c0_169, %c0_170] : memref<2x12x12x16xf32, #tpu.memory_space<vmem>>, vector<2x8x8x16xf32>
    %123 = vector.shape_cast %122 : vector<2x8x8x16xf32> to vector<128x16xf32>
    %c0_171 = arith.constant 0 : index
    %c0_172 = arith.constant 0 : index
    %c0_173 = arith.constant 0 : index
    %124 = vector.load %arg4[%c0_171, %c0_172, %c0_173] : memref<25x16x32xf32, #tpu.memory_space<vmem>>, vector<1x16x32xf32>
    %125 = vector.shape_cast %124 : vector<1x16x32xf32> to vector<16x32xf32>
    %cst_174 = arith.constant dense<0.000000e+00> : vector<128x32xf32>
    %126 = tpu.matmul %123, %125, %cst_174 {dimension_numbers = #tpu.dot_dimension_numbers<[1], [0], [0], [1], [0, 0, 1, 1], [], []>} : vector<128x16xf32>, vector<16x32xf32>, vector<128x32xf32> -> vector<128x32xf32>
    %127 = arith.addf %121, %126 : vector<128x32xf32>
    %c0_175 = arith.constant 0 : index
    %c0_176 = arith.constant 0 : index
    %c1_177 = arith.constant 1 : index
    %c0_178 = arith.constant 0 : index
    %128 = vector.load %arg12[%c0_175, %c0_176, %c1_177, %c0_178] : memref<2x12x12x16xf32, #tpu.memory_space<vmem>>, vector<2x8x8x16xf32>
    %129 = vector.shape_cast %128 : vector<2x8x8x16xf32> to vector<128x16xf32>
    %c1_179 = arith.constant 1 : index
    %c0_180 = arith.constant 0 : index
    %c0_181 = arith.constant 0 : index
    %130 = vector.load %arg4[%c1_179, %c0_180, %c0_181] : memref<25x16x32xf32, #tpu.memory_space<vmem>>, vector<1x16x32xf32>
    %131 = vector.shape_cast %130 : vector<1x16x32xf32> to vector<16x32xf32>
    %cst_182 = arith.constant dense<0.000000e+00> : vector<128x32xf32>
    %132 = tpu.matmul %129, %131, %cst_182 {dimension_numbers = #tpu.dot_dimension_numbers<[1], [0], [0], [1], [0, 0, 1, 1], [], []>} : vector<128x16xf32>, vector<16x32xf32>, vector<128x32xf32> -> vector<128x32xf32>
    %133 = arith.addf %127, %132 : vector<128x32xf32>
    %c0_183 = arith.constant 0 : index
    %c0_184 = arith.constant 0 : index
    %c2_185 = arith.constant 2 : index
    %c0_186 = arith.constant 0 : index
    %134 = vector.load %arg12[%c0_183, %c0_184, %c2_185, %c0_186] : memref<2x12x12x16xf32, #tpu.memory_space<vmem>>, vector<2x8x8x16xf32>
    %135 = vector.shape_cast %134 : vector<2x8x8x16xf32> to vector<128x16xf32>
    %c2_187 = arith.constant 2 : index
    %c0_188 = arith.constant 0 : index
    %c0_189 = arith.constant 0 : index
    %136 = vector.load %arg4[%c2_187, %c0_188, %c0_189] : memref<25x16x32xf32, #tpu.memory_space<vmem>>, vector<1x16x32xf32>
    %137 = vector.shape_cast %136 : vector<1x16x32xf32> to vector<16x32xf32>
    %cst_190 = arith.constant dense<0.000000e+00> : vector<128x32xf32>
    %138 = tpu.matmul %135, %137, %cst_190 {dimension_numbers = #tpu.dot_dimension_numbers<[1], [0], [0], [1], [0, 0, 1, 1], [], []>} : vector<128x16xf32>, vector<16x32xf32>, vector<128x32xf32> -> vector<128x32xf32>
    %139 = arith.addf %133, %138 : vector<128x32xf32>
    %c0_191 = arith.constant 0 : index
    %c0_192 = arith.constant 0 : index
    %c3_193 = arith.constant 3 : index
    %c0_194 = arith.constant 0 : index
    %140 = vector.load %arg12[%c0_191, %c0_192, %c3_193, %c0_194] : memref<2x12x12x16xf32, #tpu.memory_space<vmem>>, vector<2x8x8x16xf32>
    %141 = vector.shape_cast %140 : vector<2x8x8x16xf32> to vector<128x16xf32>
    %c3_195 = arith.constant 3 : index
    %c0_196 = arith.constant 0 : index
    %c0_197 = arith.constant 0 : index
    %142 = vector.load %arg4[%c3_195, %c0_196, %c0_197] : memref<25x16x32xf32, #tpu.memory_space<vmem>>, vector<1x16x32xf32>
    %143 = vector.shape_cast %142 : vector<1x16x32xf32> to vector<16x32xf32>
    %cst_198 = arith.constant dense<0.000000e+00> : vector<128x32xf32>
    %144 = tpu.matmul %141, %143, %cst_198 {dimension_numbers = #tpu.dot_dimension_numbers<[1], [0], [0], [1], [0, 0, 1, 1], [], []>} : vector<128x16xf32>, vector<16x32xf32>, vector<128x32xf32> -> vector<128x32xf32>
    %145 = arith.addf %139, %144 : vector<128x32xf32>
    %c0_199 = arith.constant 0 : index
    %c0_200 = arith.constant 0 : index
    %c4_201 = arith.constant 4 : index
    %c0_202 = arith.constant 0 : index
    %146 = vector.load %arg12[%c0_199, %c0_200, %c4_201, %c0_202] : memref<2x12x12x16xf32, #tpu.memory_space<vmem>>, vector<2x8x8x16xf32>
    %147 = vector.shape_cast %146 : vector<2x8x8x16xf32> to vector<128x16xf32>
    %c4_203 = arith.constant 4 : index
    %c0_204 = arith.constant 0 : index
    %c0_205 = arith.constant 0 : index
    %148 = vector.load %arg4[%c4_203, %c0_204, %c0_205] : memref<25x16x32xf32, #tpu.memory_space<vmem>>, vector<1x16x32xf32>
    %149 = vector.shape_cast %148 : vector<1x16x32xf32> to vector<16x32xf32>
    %cst_206 = arith.constant dense<0.000000e+00> : vector<128x32xf32>
    %150 = tpu.matmul %147, %149, %cst_206 {dimension_numbers = #tpu.dot_dimension_numbers<[1], [0], [0], [1], [0, 0, 1, 1], [], []>} : vector<128x16xf32>, vector<16x32xf32>, vector<128x32xf32> -> vector<128x32xf32>
    %151 = arith.addf %145, %150 : vector<128x32xf32>
    %c0_207 = arith.constant 0 : index
    %c1_208 = arith.constant 1 : index
    %c0_209 = arith.constant 0 : index
    %c0_210 = arith.constant 0 : index
    %152 = vector.load %arg12[%c0_207, %c1_208, %c0_209, %c0_210] : memref<2x12x12x16xf32, #tpu.memory_space<vmem>>, vector<2x8x8x16xf32>
    %153 = vector.shape_cast %152 : vector<2x8x8x16xf32> to vector<128x16xf32>
    %c5_211 = arith.constant 5 : index
    %c0_212 = arith.constant 0 : index
    %c0_213 = arith.constant 0 : index
    %154 = vector.load %arg4[%c5_211, %c0_212, %c0_213] : memref<25x16x32xf32, #tpu.memory_space<vmem>>, vector<1x16x32xf32>
    %155 = vector.shape_cast %154 : vector<1x16x32xf32> to vector<16x32xf32>
    %cst_214 = arith.constant dense<0.000000e+00> : vector<128x32xf32>
    %156 = tpu.matmul %153, %155, %cst_214 {dimension_numbers = #tpu.dot_dimension_numbers<[1], [0], [0], [1], [0, 0, 1, 1], [], []>} : vector<128x16xf32>, vector<16x32xf32>, vector<128x32xf32> -> vector<128x32xf32>
    %157 = arith.addf %151, %156 : vector<128x32xf32>
    %c0_215 = arith.constant 0 : index
    %c1_216 = arith.constant 1 : index
    %c1_217 = arith.constant 1 : index
    %c0_218 = arith.constant 0 : index
    %158 = vector.load %arg12[%c0_215, %c1_216, %c1_217, %c0_218] : memref<2x12x12x16xf32, #tpu.memory_space<vmem>>, vector<2x8x8x16xf32>
    %159 = vector.shape_cast %158 : vector<2x8x8x16xf32> to vector<128x16xf32>
    %c6_219 = arith.constant 6 : index
    %c0_220 = arith.constant 0 : index
    %c0_221 = arith.constant 0 : index
    %160 = vector.load %arg4[%c6_219, %c0_220, %c0_221] : memref<25x16x32xf32, #tpu.memory_space<vmem>>, vector<1x16x32xf32>
    %161 = vector.shape_cast %160 : vector<1x16x32xf32> to vector<16x32xf32>
    %cst_222 = arith.constant dense<0.000000e+00> : vector<128x32xf32>
    %162 = tpu.matmul %159, %161, %cst_222 {dimension_numbers = #tpu.dot_dimension_numbers<[1], [0], [0], [1], [0, 0, 1, 1], [], []>} : vector<128x16xf32>, vector<16x32xf32>, vector<128x32xf32> -> vector<128x32xf32>
    %163 = arith.addf %157, %162 : vector<128x32xf32>
    %c0_223 = arith.constant 0 : index
    %c1_224 = arith.constant 1 : index
    %c2_225 = arith.constant 2 : index
    %c0_226 = arith.constant 0 : index
    %164 = vector.load %arg12[%c0_223, %c1_224, %c2_225, %c0_226] : memref<2x12x12x16xf32, #tpu.memory_space<vmem>>, vector<2x8x8x16xf32>
    %165 = vector.shape_cast %164 : vector<2x8x8x16xf32> to vector<128x16xf32>
    %c7_227 = arith.constant 7 : index
    %c0_228 = arith.constant 0 : index
    %c0_229 = arith.constant 0 : index
    %166 = vector.load %arg4[%c7_227, %c0_228, %c0_229] : memref<25x16x32xf32, #tpu.memory_space<vmem>>, vector<1x16x32xf32>
    %167 = vector.shape_cast %166 : vector<1x16x32xf32> to vector<16x32xf32>
    %cst_230 = arith.constant dense<0.000000e+00> : vector<128x32xf32>
    %168 = tpu.matmul %165, %167, %cst_230 {dimension_numbers = #tpu.dot_dimension_numbers<[1], [0], [0], [1], [0, 0, 1, 1], [], []>} : vector<128x16xf32>, vector<16x32xf32>, vector<128x32xf32> -> vector<128x32xf32>
    %169 = arith.addf %163, %168 : vector<128x32xf32>
    %c0_231 = arith.constant 0 : index
    %c1_232 = arith.constant 1 : index
    %c3_233 = arith.constant 3 : index
    %c0_234 = arith.constant 0 : index
    %170 = vector.load %arg12[%c0_231, %c1_232, %c3_233, %c0_234] : memref<2x12x12x16xf32, #tpu.memory_space<vmem>>, vector<2x8x8x16xf32>
    %171 = vector.shape_cast %170 : vector<2x8x8x16xf32> to vector<128x16xf32>
    %c8_235 = arith.constant 8 : index
    %c0_236 = arith.constant 0 : index
    %c0_237 = arith.constant 0 : index
    %172 = vector.load %arg4[%c8_235, %c0_236, %c0_237] : memref<25x16x32xf32, #tpu.memory_space<vmem>>, vector<1x16x32xf32>
    %173 = vector.shape_cast %172 : vector<1x16x32xf32> to vector<16x32xf32>
    %cst_238 = arith.constant dense<0.000000e+00> : vector<128x32xf32>
    %174 = tpu.matmul %171, %173, %cst_238 {dimension_numbers = #tpu.dot_dimension_numbers<[1], [0], [0], [1], [0, 0, 1, 1], [], []>} : vector<128x16xf32>, vector<16x32xf32>, vector<128x32xf32> -> vector<128x32xf32>
    %175 = arith.addf %169, %174 : vector<128x32xf32>
    %c0_239 = arith.constant 0 : index
    %c1_240 = arith.constant 1 : index
    %c4_241 = arith.constant 4 : index
    %c0_242 = arith.constant 0 : index
    %176 = vector.load %arg12[%c0_239, %c1_240, %c4_241, %c0_242] : memref<2x12x12x16xf32, #tpu.memory_space<vmem>>, vector<2x8x8x16xf32>
    %177 = vector.shape_cast %176 : vector<2x8x8x16xf32> to vector<128x16xf32>
    %c9_243 = arith.constant 9 : index
    %c0_244 = arith.constant 0 : index
    %c0_245 = arith.constant 0 : index
    %178 = vector.load %arg4[%c9_243, %c0_244, %c0_245] : memref<25x16x32xf32, #tpu.memory_space<vmem>>, vector<1x16x32xf32>
    %179 = vector.shape_cast %178 : vector<1x16x32xf32> to vector<16x32xf32>
    %cst_246 = arith.constant dense<0.000000e+00> : vector<128x32xf32>
    %180 = tpu.matmul %177, %179, %cst_246 {dimension_numbers = #tpu.dot_dimension_numbers<[1], [0], [0], [1], [0, 0, 1, 1], [], []>} : vector<128x16xf32>, vector<16x32xf32>, vector<128x32xf32> -> vector<128x32xf32>
    %181 = arith.addf %175, %180 : vector<128x32xf32>
    %c0_247 = arith.constant 0 : index
    %c2_248 = arith.constant 2 : index
    %c0_249 = arith.constant 0 : index
    %c0_250 = arith.constant 0 : index
    %182 = vector.load %arg12[%c0_247, %c2_248, %c0_249, %c0_250] : memref<2x12x12x16xf32, #tpu.memory_space<vmem>>, vector<2x8x8x16xf32>
    %183 = vector.shape_cast %182 : vector<2x8x8x16xf32> to vector<128x16xf32>
    %c10_251 = arith.constant 10 : index
    %c0_252 = arith.constant 0 : index
    %c0_253 = arith.constant 0 : index
    %184 = vector.load %arg4[%c10_251, %c0_252, %c0_253] : memref<25x16x32xf32, #tpu.memory_space<vmem>>, vector<1x16x32xf32>
    %185 = vector.shape_cast %184 : vector<1x16x32xf32> to vector<16x32xf32>
    %cst_254 = arith.constant dense<0.000000e+00> : vector<128x32xf32>
    %186 = tpu.matmul %183, %185, %cst_254 {dimension_numbers = #tpu.dot_dimension_numbers<[1], [0], [0], [1], [0, 0, 1, 1], [], []>} : vector<128x16xf32>, vector<16x32xf32>, vector<128x32xf32> -> vector<128x32xf32>
    %187 = arith.addf %181, %186 : vector<128x32xf32>
    %c0_255 = arith.constant 0 : index
    %c2_256 = arith.constant 2 : index
    %c1_257 = arith.constant 1 : index
    %c0_258 = arith.constant 0 : index
    %188 = vector.load %arg12[%c0_255, %c2_256, %c1_257, %c0_258] : memref<2x12x12x16xf32, #tpu.memory_space<vmem>>, vector<2x8x8x16xf32>
    %189 = vector.shape_cast %188 : vector<2x8x8x16xf32> to vector<128x16xf32>
    %c11_259 = arith.constant 11 : index
    %c0_260 = arith.constant 0 : index
    %c0_261 = arith.constant 0 : index
    %190 = vector.load %arg4[%c11_259, %c0_260, %c0_261] : memref<25x16x32xf32, #tpu.memory_space<vmem>>, vector<1x16x32xf32>
    %191 = vector.shape_cast %190 : vector<1x16x32xf32> to vector<16x32xf32>
    %cst_262 = arith.constant dense<0.000000e+00> : vector<128x32xf32>
    %192 = tpu.matmul %189, %191, %cst_262 {dimension_numbers = #tpu.dot_dimension_numbers<[1], [0], [0], [1], [0, 0, 1, 1], [], []>} : vector<128x16xf32>, vector<16x32xf32>, vector<128x32xf32> -> vector<128x32xf32>
    %193 = arith.addf %187, %192 : vector<128x32xf32>
    %c0_263 = arith.constant 0 : index
    %c2_264 = arith.constant 2 : index
    %c2_265 = arith.constant 2 : index
    %c0_266 = arith.constant 0 : index
    %194 = vector.load %arg12[%c0_263, %c2_264, %c2_265, %c0_266] : memref<2x12x12x16xf32, #tpu.memory_space<vmem>>, vector<2x8x8x16xf32>
    %195 = vector.shape_cast %194 : vector<2x8x8x16xf32> to vector<128x16xf32>
    %c12_267 = arith.constant 12 : index
    %c0_268 = arith.constant 0 : index
    %c0_269 = arith.constant 0 : index
    %196 = vector.load %arg4[%c12_267, %c0_268, %c0_269] : memref<25x16x32xf32, #tpu.memory_space<vmem>>, vector<1x16x32xf32>
    %197 = vector.shape_cast %196 : vector<1x16x32xf32> to vector<16x32xf32>
    %cst_270 = arith.constant dense<0.000000e+00> : vector<128x32xf32>
    %198 = tpu.matmul %195, %197, %cst_270 {dimension_numbers = #tpu.dot_dimension_numbers<[1], [0], [0], [1], [0, 0, 1, 1], [], []>} : vector<128x16xf32>, vector<16x32xf32>, vector<128x32xf32> -> vector<128x32xf32>
    %199 = arith.addf %193, %198 : vector<128x32xf32>
    %c0_271 = arith.constant 0 : index
    %c2_272 = arith.constant 2 : index
    %c3_273 = arith.constant 3 : index
    %c0_274 = arith.constant 0 : index
    %200 = vector.load %arg12[%c0_271, %c2_272, %c3_273, %c0_274] : memref<2x12x12x16xf32, #tpu.memory_space<vmem>>, vector<2x8x8x16xf32>
    %201 = vector.shape_cast %200 : vector<2x8x8x16xf32> to vector<128x16xf32>
    %c13_275 = arith.constant 13 : index
    %c0_276 = arith.constant 0 : index
    %c0_277 = arith.constant 0 : index
    %202 = vector.load %arg4[%c13_275, %c0_276, %c0_277] : memref<25x16x32xf32, #tpu.memory_space<vmem>>, vector<1x16x32xf32>
    %203 = vector.shape_cast %202 : vector<1x16x32xf32> to vector<16x32xf32>
    %cst_278 = arith.constant dense<0.000000e+00> : vector<128x32xf32>
    %204 = tpu.matmul %201, %203, %cst_278 {dimension_numbers = #tpu.dot_dimension_numbers<[1], [0], [0], [1], [0, 0, 1, 1], [], []>} : vector<128x16xf32>, vector<16x32xf32>, vector<128x32xf32> -> vector<128x32xf32>
    %205 = arith.addf %199, %204 : vector<128x32xf32>
    %c0_279 = arith.constant 0 : index
    %c2_280 = arith.constant 2 : index
    %c4_281 = arith.constant 4 : index
    %c0_282 = arith.constant 0 : index
    %206 = vector.load %arg12[%c0_279, %c2_280, %c4_281, %c0_282] : memref<2x12x12x16xf32, #tpu.memory_space<vmem>>, vector<2x8x8x16xf32>
    %207 = vector.shape_cast %206 : vector<2x8x8x16xf32> to vector<128x16xf32>
    %c14_283 = arith.constant 14 : index
    %c0_284 = arith.constant 0 : index
    %c0_285 = arith.constant 0 : index
    %208 = vector.load %arg4[%c14_283, %c0_284, %c0_285] : memref<25x16x32xf32, #tpu.memory_space<vmem>>, vector<1x16x32xf32>
    %209 = vector.shape_cast %208 : vector<1x16x32xf32> to vector<16x32xf32>
    %cst_286 = arith.constant dense<0.000000e+00> : vector<128x32xf32>
    %210 = tpu.matmul %207, %209, %cst_286 {dimension_numbers = #tpu.dot_dimension_numbers<[1], [0], [0], [1], [0, 0, 1, 1], [], []>} : vector<128x16xf32>, vector<16x32xf32>, vector<128x32xf32> -> vector<128x32xf32>
    %211 = arith.addf %205, %210 : vector<128x32xf32>
    %c0_287 = arith.constant 0 : index
    %c3_288 = arith.constant 3 : index
    %c0_289 = arith.constant 0 : index
    %c0_290 = arith.constant 0 : index
    %212 = vector.load %arg12[%c0_287, %c3_288, %c0_289, %c0_290] : memref<2x12x12x16xf32, #tpu.memory_space<vmem>>, vector<2x8x8x16xf32>
    %213 = vector.shape_cast %212 : vector<2x8x8x16xf32> to vector<128x16xf32>
    %c15_291 = arith.constant 15 : index
    %c0_292 = arith.constant 0 : index
    %c0_293 = arith.constant 0 : index
    %214 = vector.load %arg4[%c15_291, %c0_292, %c0_293] : memref<25x16x32xf32, #tpu.memory_space<vmem>>, vector<1x16x32xf32>
    %215 = vector.shape_cast %214 : vector<1x16x32xf32> to vector<16x32xf32>
    %cst_294 = arith.constant dense<0.000000e+00> : vector<128x32xf32>
    %216 = tpu.matmul %213, %215, %cst_294 {dimension_numbers = #tpu.dot_dimension_numbers<[1], [0], [0], [1], [0, 0, 1, 1], [], []>} : vector<128x16xf32>, vector<16x32xf32>, vector<128x32xf32> -> vector<128x32xf32>
    %217 = arith.addf %211, %216 : vector<128x32xf32>
    %c0_295 = arith.constant 0 : index
    %c3_296 = arith.constant 3 : index
    %c1_297 = arith.constant 1 : index
    %c0_298 = arith.constant 0 : index
    %218 = vector.load %arg12[%c0_295, %c3_296, %c1_297, %c0_298] : memref<2x12x12x16xf32, #tpu.memory_space<vmem>>, vector<2x8x8x16xf32>
    %219 = vector.shape_cast %218 : vector<2x8x8x16xf32> to vector<128x16xf32>
    %c16 = arith.constant 16 : index
    %c0_299 = arith.constant 0 : index
    %c0_300 = arith.constant 0 : index
    %220 = vector.load %arg4[%c16, %c0_299, %c0_300] : memref<25x16x32xf32, #tpu.memory_space<vmem>>, vector<1x16x32xf32>
    %221 = vector.shape_cast %220 : vector<1x16x32xf32> to vector<16x32xf32>
    %cst_301 = arith.constant dense<0.000000e+00> : vector<128x32xf32>
    %222 = tpu.matmul %219, %221, %cst_301 {dimension_numbers = #tpu.dot_dimension_numbers<[1], [0], [0], [1], [0, 0, 1, 1], [], []>} : vector<128x16xf32>, vector<16x32xf32>, vector<128x32xf32> -> vector<128x32xf32>
    %223 = arith.addf %217, %222 : vector<128x32xf32>
    %c0_302 = arith.constant 0 : index
    %c3_303 = arith.constant 3 : index
    %c2_304 = arith.constant 2 : index
    %c0_305 = arith.constant 0 : index
    %224 = vector.load %arg12[%c0_302, %c3_303, %c2_304, %c0_305] : memref<2x12x12x16xf32, #tpu.memory_space<vmem>>, vector<2x8x8x16xf32>
    %225 = vector.shape_cast %224 : vector<2x8x8x16xf32> to vector<128x16xf32>
    %c17 = arith.constant 17 : index
    %c0_306 = arith.constant 0 : index
    %c0_307 = arith.constant 0 : index
    %226 = vector.load %arg4[%c17, %c0_306, %c0_307] : memref<25x16x32xf32, #tpu.memory_space<vmem>>, vector<1x16x32xf32>
    %227 = vector.shape_cast %226 : vector<1x16x32xf32> to vector<16x32xf32>
    %cst_308 = arith.constant dense<0.000000e+00> : vector<128x32xf32>
    %228 = tpu.matmul %225, %227, %cst_308 {dimension_numbers = #tpu.dot_dimension_numbers<[1], [0], [0], [1], [0, 0, 1, 1], [], []>} : vector<128x16xf32>, vector<16x32xf32>, vector<128x32xf32> -> vector<128x32xf32>
    %229 = arith.addf %223, %228 : vector<128x32xf32>
    %c0_309 = arith.constant 0 : index
    %c3_310 = arith.constant 3 : index
    %c3_311 = arith.constant 3 : index
    %c0_312 = arith.constant 0 : index
    %230 = vector.load %arg12[%c0_309, %c3_310, %c3_311, %c0_312] : memref<2x12x12x16xf32, #tpu.memory_space<vmem>>, vector<2x8x8x16xf32>
    %231 = vector.shape_cast %230 : vector<2x8x8x16xf32> to vector<128x16xf32>
    %c18 = arith.constant 18 : index
    %c0_313 = arith.constant 0 : index
    %c0_314 = arith.constant 0 : index
    %232 = vector.load %arg4[%c18, %c0_313, %c0_314] : memref<25x16x32xf32, #tpu.memory_space<vmem>>, vector<1x16x32xf32>
    %233 = vector.shape_cast %232 : vector<1x16x32xf32> to vector<16x32xf32>
    %cst_315 = arith.constant dense<0.000000e+00> : vector<128x32xf32>
    %234 = tpu.matmul %231, %233, %cst_315 {dimension_numbers = #tpu.dot_dimension_numbers<[1], [0], [0], [1], [0, 0, 1, 1], [], []>} : vector<128x16xf32>, vector<16x32xf32>, vector<128x32xf32> -> vector<128x32xf32>
    %235 = arith.addf %229, %234 : vector<128x32xf32>
    %c0_316 = arith.constant 0 : index
    %c3_317 = arith.constant 3 : index
    %c4_318 = arith.constant 4 : index
    %c0_319 = arith.constant 0 : index
    %236 = vector.load %arg12[%c0_316, %c3_317, %c4_318, %c0_319] : memref<2x12x12x16xf32, #tpu.memory_space<vmem>>, vector<2x8x8x16xf32>
    %237 = vector.shape_cast %236 : vector<2x8x8x16xf32> to vector<128x16xf32>
    %c19 = arith.constant 19 : index
    %c0_320 = arith.constant 0 : index
    %c0_321 = arith.constant 0 : index
    %238 = vector.load %arg4[%c19, %c0_320, %c0_321] : memref<25x16x32xf32, #tpu.memory_space<vmem>>, vector<1x16x32xf32>
    %239 = vector.shape_cast %238 : vector<1x16x32xf32> to vector<16x32xf32>
    %cst_322 = arith.constant dense<0.000000e+00> : vector<128x32xf32>
    %240 = tpu.matmul %237, %239, %cst_322 {dimension_numbers = #tpu.dot_dimension_numbers<[1], [0], [0], [1], [0, 0, 1, 1], [], []>} : vector<128x16xf32>, vector<16x32xf32>, vector<128x32xf32> -> vector<128x32xf32>
    %241 = arith.addf %235, %240 : vector<128x32xf32>
    %c0_323 = arith.constant 0 : index
    %c4_324 = arith.constant 4 : index
    %c0_325 = arith.constant 0 : index
    %c0_326 = arith.constant 0 : index
    %242 = vector.load %arg12[%c0_323, %c4_324, %c0_325, %c0_326] : memref<2x12x12x16xf32, #tpu.memory_space<vmem>>, vector<2x8x8x16xf32>
    %243 = vector.shape_cast %242 : vector<2x8x8x16xf32> to vector<128x16xf32>
    %c20 = arith.constant 20 : index
    %c0_327 = arith.constant 0 : index
    %c0_328 = arith.constant 0 : index
    %244 = vector.load %arg4[%c20, %c0_327, %c0_328] : memref<25x16x32xf32, #tpu.memory_space<vmem>>, vector<1x16x32xf32>
    %245 = vector.shape_cast %244 : vector<1x16x32xf32> to vector<16x32xf32>
    %cst_329 = arith.constant dense<0.000000e+00> : vector<128x32xf32>
    %246 = tpu.matmul %243, %245, %cst_329 {dimension_numbers = #tpu.dot_dimension_numbers<[1], [0], [0], [1], [0, 0, 1, 1], [], []>} : vector<128x16xf32>, vector<16x32xf32>, vector<128x32xf32> -> vector<128x32xf32>
    %247 = arith.addf %241, %246 : vector<128x32xf32>
    %c0_330 = arith.constant 0 : index
    %c4_331 = arith.constant 4 : index
    %c1_332 = arith.constant 1 : index
    %c0_333 = arith.constant 0 : index
    %248 = vector.load %arg12[%c0_330, %c4_331, %c1_332, %c0_333] : memref<2x12x12x16xf32, #tpu.memory_space<vmem>>, vector<2x8x8x16xf32>
    %249 = vector.shape_cast %248 : vector<2x8x8x16xf32> to vector<128x16xf32>
    %c21 = arith.constant 21 : index
    %c0_334 = arith.constant 0 : index
    %c0_335 = arith.constant 0 : index
    %250 = vector.load %arg4[%c21, %c0_334, %c0_335] : memref<25x16x32xf32, #tpu.memory_space<vmem>>, vector<1x16x32xf32>
    %251 = vector.shape_cast %250 : vector<1x16x32xf32> to vector<16x32xf32>
    %cst_336 = arith.constant dense<0.000000e+00> : vector<128x32xf32>
    %252 = tpu.matmul %249, %251, %cst_336 {dimension_numbers = #tpu.dot_dimension_numbers<[1], [0], [0], [1], [0, 0, 1, 1], [], []>} : vector<128x16xf32>, vector<16x32xf32>, vector<128x32xf32> -> vector<128x32xf32>
    %253 = arith.addf %247, %252 : vector<128x32xf32>
    %c0_337 = arith.constant 0 : index
    %c4_338 = arith.constant 4 : index
    %c2_339 = arith.constant 2 : index
    %c0_340 = arith.constant 0 : index
    %254 = vector.load %arg12[%c0_337, %c4_338, %c2_339, %c0_340] : memref<2x12x12x16xf32, #tpu.memory_space<vmem>>, vector<2x8x8x16xf32>
    %255 = vector.shape_cast %254 : vector<2x8x8x16xf32> to vector<128x16xf32>
    %c22 = arith.constant 22 : index
    %c0_341 = arith.constant 0 : index
    %c0_342 = arith.constant 0 : index
    %256 = vector.load %arg4[%c22, %c0_341, %c0_342] : memref<25x16x32xf32, #tpu.memory_space<vmem>>, vector<1x16x32xf32>
    %257 = vector.shape_cast %256 : vector<1x16x32xf32> to vector<16x32xf32>
    %cst_343 = arith.constant dense<0.000000e+00> : vector<128x32xf32>
    %258 = tpu.matmul %255, %257, %cst_343 {dimension_numbers = #tpu.dot_dimension_numbers<[1], [0], [0], [1], [0, 0, 1, 1], [], []>} : vector<128x16xf32>, vector<16x32xf32>, vector<128x32xf32> -> vector<128x32xf32>
    %259 = arith.addf %253, %258 : vector<128x32xf32>
    %c0_344 = arith.constant 0 : index
    %c4_345 = arith.constant 4 : index
    %c3_346 = arith.constant 3 : index
    %c0_347 = arith.constant 0 : index
    %260 = vector.load %arg12[%c0_344, %c4_345, %c3_346, %c0_347] : memref<2x12x12x16xf32, #tpu.memory_space<vmem>>, vector<2x8x8x16xf32>
    %261 = vector.shape_cast %260 : vector<2x8x8x16xf32> to vector<128x16xf32>
    %c23 = arith.constant 23 : index
    %c0_348 = arith.constant 0 : index
    %c0_349 = arith.constant 0 : index
    %262 = vector.load %arg4[%c23, %c0_348, %c0_349] : memref<25x16x32xf32, #tpu.memory_space<vmem>>, vector<1x16x32xf32>
    %263 = vector.shape_cast %262 : vector<1x16x32xf32> to vector<16x32xf32>
    %cst_350 = arith.constant dense<0.000000e+00> : vector<128x32xf32>
    %264 = tpu.matmul %261, %263, %cst_350 {dimension_numbers = #tpu.dot_dimension_numbers<[1], [0], [0], [1], [0, 0, 1, 1], [], []>} : vector<128x16xf32>, vector<16x32xf32>, vector<128x32xf32> -> vector<128x32xf32>
    %265 = arith.addf %259, %264 : vector<128x32xf32>
    %c0_351 = arith.constant 0 : index
    %c4_352 = arith.constant 4 : index
    %c4_353 = arith.constant 4 : index
    %c0_354 = arith.constant 0 : index
    %266 = vector.load %arg12[%c0_351, %c4_352, %c4_353, %c0_354] : memref<2x12x12x16xf32, #tpu.memory_space<vmem>>, vector<2x8x8x16xf32>
    %267 = vector.shape_cast %266 : vector<2x8x8x16xf32> to vector<128x16xf32>
    %c24 = arith.constant 24 : index
    %c0_355 = arith.constant 0 : index
    %c0_356 = arith.constant 0 : index
    %268 = vector.load %arg4[%c24, %c0_355, %c0_356] : memref<25x16x32xf32, #tpu.memory_space<vmem>>, vector<1x16x32xf32>
    %269 = vector.shape_cast %268 : vector<1x16x32xf32> to vector<16x32xf32>
    %cst_357 = arith.constant dense<0.000000e+00> : vector<128x32xf32>
    %270 = tpu.matmul %267, %269, %cst_357 {dimension_numbers = #tpu.dot_dimension_numbers<[1], [0], [0], [1], [0, 0, 1, 1], [], []>} : vector<128x16xf32>, vector<16x32xf32>, vector<128x32xf32> -> vector<128x32xf32>
    %271 = arith.addf %265, %270 : vector<128x32xf32>
    %c0_358 = arith.constant 0 : index
    %c0_359 = arith.constant 0 : index
    %272 = vector.load %arg5[%c0_358, %c0_359] : memref<1x32xf32, #tpu.memory_space<vmem>>, vector<1x32xf32>
    %c0_360 = arith.constant 0 : index
    %c0_361 = arith.constant 0 : index
    %273 = vector.load %arg6[%c0_360, %c0_361] : memref<1x32xf32, #tpu.memory_space<vmem>>, vector<1x32xf32>
    %cst_362 = arith.constant dense<0.000000e+00> : vector<32xf32>
    %274 = vector.multi_reduction <add>, %271, %cst_362 [0] : vector<128x32xf32> to vector<32xf32>
    %275 = vector.shape_cast %274 : vector<32xf32> to vector<1x32xf32>
    %cst_363 = arith.constant 1.280000e+02 : f32
    %276 = vector.broadcast %cst_363 : f32 to vector<1x32xf32>
    %277 = arith.divf %275, %276 : vector<1x32xf32>
    %278 = vector.broadcast %277 : vector<1x32xf32> to vector<128x32xf32>
    %279 = arith.subf %271, %278 : vector<128x32xf32>
    %280 = arith.mulf %279, %279 : vector<128x32xf32>
    %cst_364 = arith.constant dense<0.000000e+00> : vector<32xf32>
    %281 = vector.multi_reduction <add>, %280, %cst_364 [0] : vector<128x32xf32> to vector<32xf32>
    %282 = vector.shape_cast %281 : vector<32xf32> to vector<1x32xf32>
    %cst_365 = arith.constant 1.280000e+02 : f32
    %283 = vector.broadcast %cst_365 : f32 to vector<1x32xf32>
    %284 = arith.divf %282, %283 : vector<1x32xf32>
    %cst_366 = arith.constant 9.99999974E-6 : f32
    %285 = vector.broadcast %cst_366 : f32 to vector<1x32xf32>
    %286 = arith.addf %284, %285 : vector<1x32xf32>
    %287 = math.rsqrt %286 : vector<1x32xf32>
    %288 = arith.mulf %272, %287 : vector<1x32xf32>
    %289 = arith.mulf %277, %288 : vector<1x32xf32>
    %290 = arith.subf %273, %289 : vector<1x32xf32>
    %291 = vector.broadcast %288 : vector<1x32xf32> to vector<128x32xf32>
    %292 = arith.mulf %271, %291 : vector<128x32xf32>
    %293 = vector.broadcast %290 : vector<1x32xf32> to vector<128x32xf32>
    %294 = arith.addf %292, %293 : vector<128x32xf32>
    %cst_367 = arith.constant 0.000000e+00 : f32
    %295 = vector.broadcast %cst_367 : f32 to vector<128x32xf32>
    %296 = arith.maximumf %294, %295 : vector<128x32xf32>
    %297 = vector.shape_cast %296 : vector<128x32xf32> to vector<2x8x8x32xf32>
    %cst_368 = arith.constant 0.000000e+00 : f32
    %298 = vector.broadcast %cst_368 : f32 to vector<2x10xf32>
    %299 = vector.extract_strided_slice %297 {offsets = [0, 0, 0, 0], sizes = [2, 1, 8, 32], strides = [1, 1, 1, 1]} : vector<2x8x8x32xf32> to vector<2x1x8x32xf32>
    %300 = vector.extract_strided_slice %297 {offsets = [0, 1, 0, 0], sizes = [2, 1, 8, 32], strides = [1, 1, 1, 1]} : vector<2x8x8x32xf32> to vector<2x1x8x32xf32>
    %301 = arith.maximumf %299, %300 : vector<2x1x8x32xf32>
    %302 = vector.extract_strided_slice %301 {offsets = [0, 0, 0, 0], sizes = [2, 1, 1, 32], strides = [1, 1, 1, 1]} : vector<2x1x8x32xf32> to vector<2x1x1x32xf32>
    %303 = vector.extract_strided_slice %301 {offsets = [0, 0, 1, 0], sizes = [2, 1, 1, 32], strides = [1, 1, 1, 1]} : vector<2x1x8x32xf32> to vector<2x1x1x32xf32>
    %304 = arith.maximumf %302, %303 : vector<2x1x1x32xf32>
    %305 = vector.shape_cast %304 : vector<2x1x1x32xf32> to vector<2x32xf32>
    %c0_369 = arith.constant 0 : index
    %c0_370 = arith.constant 0 : index
    %c0_371 = arith.constant 0 : index
    %306 = vector.load %arg7[%c0_369, %c0_370, %c0_371] : memref<16x32x10xf32, #tpu.memory_space<vmem>>, vector<1x32x10xf32>
    %307 = vector.shape_cast %306 : vector<1x32x10xf32> to vector<32x10xf32>
    %cst_372 = arith.constant dense<0.000000e+00> : vector<2x10xf32>
    %308 = tpu.matmul %305, %307, %cst_372 {dimension_numbers = #tpu.dot_dimension_numbers<[1], [0], [0], [1], [0, 0, 1, 1], [], []>} : vector<2x32xf32>, vector<32x10xf32>, vector<2x10xf32> -> vector<2x10xf32>
    %309 = arith.addf %298, %308 : vector<2x10xf32>
    %310 = vector.extract_strided_slice %301 {offsets = [0, 0, 2, 0], sizes = [2, 1, 1, 32], strides = [1, 1, 1, 1]} : vector<2x1x8x32xf32> to vector<2x1x1x32xf32>
    %311 = vector.extract_strided_slice %301 {offsets = [0, 0, 3, 0], sizes = [2, 1, 1, 32], strides = [1, 1, 1, 1]} : vector<2x1x8x32xf32> to vector<2x1x1x32xf32>
    %312 = arith.maximumf %310, %311 : vector<2x1x1x32xf32>
    %313 = vector.shape_cast %312 : vector<2x1x1x32xf32> to vector<2x32xf32>
    %c1_373 = arith.constant 1 : index
    %c0_374 = arith.constant 0 : index
    %c0_375 = arith.constant 0 : index
    %314 = vector.load %arg7[%c1_373, %c0_374, %c0_375] : memref<16x32x10xf32, #tpu.memory_space<vmem>>, vector<1x32x10xf32>
    %315 = vector.shape_cast %314 : vector<1x32x10xf32> to vector<32x10xf32>
    %cst_376 = arith.constant dense<0.000000e+00> : vector<2x10xf32>
    %316 = tpu.matmul %313, %315, %cst_376 {dimension_numbers = #tpu.dot_dimension_numbers<[1], [0], [0], [1], [0, 0, 1, 1], [], []>} : vector<2x32xf32>, vector<32x10xf32>, vector<2x10xf32> -> vector<2x10xf32>
    %317 = arith.addf %309, %316 : vector<2x10xf32>
    %318 = vector.extract_strided_slice %301 {offsets = [0, 0, 4, 0], sizes = [2, 1, 1, 32], strides = [1, 1, 1, 1]} : vector<2x1x8x32xf32> to vector<2x1x1x32xf32>
    %319 = vector.extract_strided_slice %301 {offsets = [0, 0, 5, 0], sizes = [2, 1, 1, 32], strides = [1, 1, 1, 1]} : vector<2x1x8x32xf32> to vector<2x1x1x32xf32>
    %320 = arith.maximumf %318, %319 : vector<2x1x1x32xf32>
    %321 = vector.shape_cast %320 : vector<2x1x1x32xf32> to vector<2x32xf32>
    %c2_377 = arith.constant 2 : index
    %c0_378 = arith.constant 0 : index
    %c0_379 = arith.constant 0 : index
    %322 = vector.load %arg7[%c2_377, %c0_378, %c0_379] : memref<16x32x10xf32, #tpu.memory_space<vmem>>, vector<1x32x10xf32>
    %323 = vector.shape_cast %322 : vector<1x32x10xf32> to vector<32x10xf32>
    %cst_380 = arith.constant dense<0.000000e+00> : vector<2x10xf32>
    %324 = tpu.matmul %321, %323, %cst_380 {dimension_numbers = #tpu.dot_dimension_numbers<[1], [0], [0], [1], [0, 0, 1, 1], [], []>} : vector<2x32xf32>, vector<32x10xf32>, vector<2x10xf32> -> vector<2x10xf32>
    %325 = arith.addf %317, %324 : vector<2x10xf32>
    %326 = vector.extract_strided_slice %301 {offsets = [0, 0, 6, 0], sizes = [2, 1, 1, 32], strides = [1, 1, 1, 1]} : vector<2x1x8x32xf32> to vector<2x1x1x32xf32>
    %327 = vector.extract_strided_slice %301 {offsets = [0, 0, 7, 0], sizes = [2, 1, 1, 32], strides = [1, 1, 1, 1]} : vector<2x1x8x32xf32> to vector<2x1x1x32xf32>
    %328 = arith.maximumf %326, %327 : vector<2x1x1x32xf32>
    %329 = vector.shape_cast %328 : vector<2x1x1x32xf32> to vector<2x32xf32>
    %c3_381 = arith.constant 3 : index
    %c0_382 = arith.constant 0 : index
    %c0_383 = arith.constant 0 : index
    %330 = vector.load %arg7[%c3_381, %c0_382, %c0_383] : memref<16x32x10xf32, #tpu.memory_space<vmem>>, vector<1x32x10xf32>
    %331 = vector.shape_cast %330 : vector<1x32x10xf32> to vector<32x10xf32>
    %cst_384 = arith.constant dense<0.000000e+00> : vector<2x10xf32>
    %332 = tpu.matmul %329, %331, %cst_384 {dimension_numbers = #tpu.dot_dimension_numbers<[1], [0], [0], [1], [0, 0, 1, 1], [], []>} : vector<2x32xf32>, vector<32x10xf32>, vector<2x10xf32> -> vector<2x10xf32>
    %333 = arith.addf %325, %332 : vector<2x10xf32>
    %334 = vector.extract_strided_slice %297 {offsets = [0, 2, 0, 0], sizes = [2, 1, 8, 32], strides = [1, 1, 1, 1]} : vector<2x8x8x32xf32> to vector<2x1x8x32xf32>
    %335 = vector.extract_strided_slice %297 {offsets = [0, 3, 0, 0], sizes = [2, 1, 8, 32], strides = [1, 1, 1, 1]} : vector<2x8x8x32xf32> to vector<2x1x8x32xf32>
    %336 = arith.maximumf %334, %335 : vector<2x1x8x32xf32>
    %337 = vector.extract_strided_slice %336 {offsets = [0, 0, 0, 0], sizes = [2, 1, 1, 32], strides = [1, 1, 1, 1]} : vector<2x1x8x32xf32> to vector<2x1x1x32xf32>
    %338 = vector.extract_strided_slice %336 {offsets = [0, 0, 1, 0], sizes = [2, 1, 1, 32], strides = [1, 1, 1, 1]} : vector<2x1x8x32xf32> to vector<2x1x1x32xf32>
    %339 = arith.maximumf %337, %338 : vector<2x1x1x32xf32>
    %340 = vector.shape_cast %339 : vector<2x1x1x32xf32> to vector<2x32xf32>
    %c4_385 = arith.constant 4 : index
    %c0_386 = arith.constant 0 : index
    %c0_387 = arith.constant 0 : index
    %341 = vector.load %arg7[%c4_385, %c0_386, %c0_387] : memref<16x32x10xf32, #tpu.memory_space<vmem>>, vector<1x32x10xf32>
    %342 = vector.shape_cast %341 : vector<1x32x10xf32> to vector<32x10xf32>
    %cst_388 = arith.constant dense<0.000000e+00> : vector<2x10xf32>
    %343 = tpu.matmul %340, %342, %cst_388 {dimension_numbers = #tpu.dot_dimension_numbers<[1], [0], [0], [1], [0, 0, 1, 1], [], []>} : vector<2x32xf32>, vector<32x10xf32>, vector<2x10xf32> -> vector<2x10xf32>
    %344 = arith.addf %333, %343 : vector<2x10xf32>
    %345 = vector.extract_strided_slice %336 {offsets = [0, 0, 2, 0], sizes = [2, 1, 1, 32], strides = [1, 1, 1, 1]} : vector<2x1x8x32xf32> to vector<2x1x1x32xf32>
    %346 = vector.extract_strided_slice %336 {offsets = [0, 0, 3, 0], sizes = [2, 1, 1, 32], strides = [1, 1, 1, 1]} : vector<2x1x8x32xf32> to vector<2x1x1x32xf32>
    %347 = arith.maximumf %345, %346 : vector<2x1x1x32xf32>
    %348 = vector.shape_cast %347 : vector<2x1x1x32xf32> to vector<2x32xf32>
    %c5_389 = arith.constant 5 : index
    %c0_390 = arith.constant 0 : index
    %c0_391 = arith.constant 0 : index
    %349 = vector.load %arg7[%c5_389, %c0_390, %c0_391] : memref<16x32x10xf32, #tpu.memory_space<vmem>>, vector<1x32x10xf32>
    %350 = vector.shape_cast %349 : vector<1x32x10xf32> to vector<32x10xf32>
    %cst_392 = arith.constant dense<0.000000e+00> : vector<2x10xf32>
    %351 = tpu.matmul %348, %350, %cst_392 {dimension_numbers = #tpu.dot_dimension_numbers<[1], [0], [0], [1], [0, 0, 1, 1], [], []>} : vector<2x32xf32>, vector<32x10xf32>, vector<2x10xf32> -> vector<2x10xf32>
    %352 = arith.addf %344, %351 : vector<2x10xf32>
    %353 = vector.extract_strided_slice %336 {offsets = [0, 0, 4, 0], sizes = [2, 1, 1, 32], strides = [1, 1, 1, 1]} : vector<2x1x8x32xf32> to vector<2x1x1x32xf32>
    %354 = vector.extract_strided_slice %336 {offsets = [0, 0, 5, 0], sizes = [2, 1, 1, 32], strides = [1, 1, 1, 1]} : vector<2x1x8x32xf32> to vector<2x1x1x32xf32>
    %355 = arith.maximumf %353, %354 : vector<2x1x1x32xf32>
    %356 = vector.shape_cast %355 : vector<2x1x1x32xf32> to vector<2x32xf32>
    %c6_393 = arith.constant 6 : index
    %c0_394 = arith.constant 0 : index
    %c0_395 = arith.constant 0 : index
    %357 = vector.load %arg7[%c6_393, %c0_394, %c0_395] : memref<16x32x10xf32, #tpu.memory_space<vmem>>, vector<1x32x10xf32>
    %358 = vector.shape_cast %357 : vector<1x32x10xf32> to vector<32x10xf32>
    %cst_396 = arith.constant dense<0.000000e+00> : vector<2x10xf32>
    %359 = tpu.matmul %356, %358, %cst_396 {dimension_numbers = #tpu.dot_dimension_numbers<[1], [0], [0], [1], [0, 0, 1, 1], [], []>} : vector<2x32xf32>, vector<32x10xf32>, vector<2x10xf32> -> vector<2x10xf32>
    %360 = arith.addf %352, %359 : vector<2x10xf32>
    %361 = vector.extract_strided_slice %336 {offsets = [0, 0, 6, 0], sizes = [2, 1, 1, 32], strides = [1, 1, 1, 1]} : vector<2x1x8x32xf32> to vector<2x1x1x32xf32>
    %362 = vector.extract_strided_slice %336 {offsets = [0, 0, 7, 0], sizes = [2, 1, 1, 32], strides = [1, 1, 1, 1]} : vector<2x1x8x32xf32> to vector<2x1x1x32xf32>
    %363 = arith.maximumf %361, %362 : vector<2x1x1x32xf32>
    %364 = vector.shape_cast %363 : vector<2x1x1x32xf32> to vector<2x32xf32>
    %c7_397 = arith.constant 7 : index
    %c0_398 = arith.constant 0 : index
    %c0_399 = arith.constant 0 : index
    %365 = vector.load %arg7[%c7_397, %c0_398, %c0_399] : memref<16x32x10xf32, #tpu.memory_space<vmem>>, vector<1x32x10xf32>
    %366 = vector.shape_cast %365 : vector<1x32x10xf32> to vector<32x10xf32>
    %cst_400 = arith.constant dense<0.000000e+00> : vector<2x10xf32>
    %367 = tpu.matmul %364, %366, %cst_400 {dimension_numbers = #tpu.dot_dimension_numbers<[1], [0], [0], [1], [0, 0, 1, 1], [], []>} : vector<2x32xf32>, vector<32x10xf32>, vector<2x10xf32> -> vector<2x10xf32>
    %368 = arith.addf %360, %367 : vector<2x10xf32>
    %369 = vector.extract_strided_slice %297 {offsets = [0, 4, 0, 0], sizes = [2, 1, 8, 32], strides = [1, 1, 1, 1]} : vector<2x8x8x32xf32> to vector<2x1x8x32xf32>
    %370 = vector.extract_strided_slice %297 {offsets = [0, 5, 0, 0], sizes = [2, 1, 8, 32], strides = [1, 1, 1, 1]} : vector<2x8x8x32xf32> to vector<2x1x8x32xf32>
    %371 = arith.maximumf %369, %370 : vector<2x1x8x32xf32>
    %372 = vector.extract_strided_slice %371 {offsets = [0, 0, 0, 0], sizes = [2, 1, 1, 32], strides = [1, 1, 1, 1]} : vector<2x1x8x32xf32> to vector<2x1x1x32xf32>
    %373 = vector.extract_strided_slice %371 {offsets = [0, 0, 1, 0], sizes = [2, 1, 1, 32], strides = [1, 1, 1, 1]} : vector<2x1x8x32xf32> to vector<2x1x1x32xf32>
    %374 = arith.maximumf %372, %373 : vector<2x1x1x32xf32>
    %375 = vector.shape_cast %374 : vector<2x1x1x32xf32> to vector<2x32xf32>
    %c8_401 = arith.constant 8 : index
    %c0_402 = arith.constant 0 : index
    %c0_403 = arith.constant 0 : index
    %376 = vector.load %arg7[%c8_401, %c0_402, %c0_403] : memref<16x32x10xf32, #tpu.memory_space<vmem>>, vector<1x32x10xf32>
    %377 = vector.shape_cast %376 : vector<1x32x10xf32> to vector<32x10xf32>
    %cst_404 = arith.constant dense<0.000000e+00> : vector<2x10xf32>
    %378 = tpu.matmul %375, %377, %cst_404 {dimension_numbers = #tpu.dot_dimension_numbers<[1], [0], [0], [1], [0, 0, 1, 1], [], []>} : vector<2x32xf32>, vector<32x10xf32>, vector<2x10xf32> -> vector<2x10xf32>
    %379 = arith.addf %368, %378 : vector<2x10xf32>
    %380 = vector.extract_strided_slice %371 {offsets = [0, 0, 2, 0], sizes = [2, 1, 1, 32], strides = [1, 1, 1, 1]} : vector<2x1x8x32xf32> to vector<2x1x1x32xf32>
    %381 = vector.extract_strided_slice %371 {offsets = [0, 0, 3, 0], sizes = [2, 1, 1, 32], strides = [1, 1, 1, 1]} : vector<2x1x8x32xf32> to vector<2x1x1x32xf32>
    %382 = arith.maximumf %380, %381 : vector<2x1x1x32xf32>
    %383 = vector.shape_cast %382 : vector<2x1x1x32xf32> to vector<2x32xf32>
    %c9_405 = arith.constant 9 : index
    %c0_406 = arith.constant 0 : index
    %c0_407 = arith.constant 0 : index
    %384 = vector.load %arg7[%c9_405, %c0_406, %c0_407] : memref<16x32x10xf32, #tpu.memory_space<vmem>>, vector<1x32x10xf32>
    %385 = vector.shape_cast %384 : vector<1x32x10xf32> to vector<32x10xf32>
    %cst_408 = arith.constant dense<0.000000e+00> : vector<2x10xf32>
    %386 = tpu.matmul %383, %385, %cst_408 {dimension_numbers = #tpu.dot_dimension_numbers<[1], [0], [0], [1], [0, 0, 1, 1], [], []>} : vector<2x32xf32>, vector<32x10xf32>, vector<2x10xf32> -> vector<2x10xf32>
    %387 = arith.addf %379, %386 : vector<2x10xf32>
    %388 = vector.extract_strided_slice %371 {offsets = [0, 0, 4, 0], sizes = [2, 1, 1, 32], strides = [1, 1, 1, 1]} : vector<2x1x8x32xf32> to vector<2x1x1x32xf32>
    %389 = vector.extract_strided_slice %371 {offsets = [0, 0, 5, 0], sizes = [2, 1, 1, 32], strides = [1, 1, 1, 1]} : vector<2x1x8x32xf32> to vector<2x1x1x32xf32>
    %390 = arith.maximumf %388, %389 : vector<2x1x1x32xf32>
    %391 = vector.shape_cast %390 : vector<2x1x1x32xf32> to vector<2x32xf32>
    %c10_409 = arith.constant 10 : index
    %c0_410 = arith.constant 0 : index
    %c0_411 = arith.constant 0 : index
    %392 = vector.load %arg7[%c10_409, %c0_410, %c0_411] : memref<16x32x10xf32, #tpu.memory_space<vmem>>, vector<1x32x10xf32>
    %393 = vector.shape_cast %392 : vector<1x32x10xf32> to vector<32x10xf32>
    %cst_412 = arith.constant dense<0.000000e+00> : vector<2x10xf32>
    %394 = tpu.matmul %391, %393, %cst_412 {dimension_numbers = #tpu.dot_dimension_numbers<[1], [0], [0], [1], [0, 0, 1, 1], [], []>} : vector<2x32xf32>, vector<32x10xf32>, vector<2x10xf32> -> vector<2x10xf32>
    %395 = arith.addf %387, %394 : vector<2x10xf32>
    %396 = vector.extract_strided_slice %371 {offsets = [0, 0, 6, 0], sizes = [2, 1, 1, 32], strides = [1, 1, 1, 1]} : vector<2x1x8x32xf32> to vector<2x1x1x32xf32>
    %397 = vector.extract_strided_slice %371 {offsets = [0, 0, 7, 0], sizes = [2, 1, 1, 32], strides = [1, 1, 1, 1]} : vector<2x1x8x32xf32> to vector<2x1x1x32xf32>
    %398 = arith.maximumf %396, %397 : vector<2x1x1x32xf32>
    %399 = vector.shape_cast %398 : vector<2x1x1x32xf32> to vector<2x32xf32>
    %c11_413 = arith.constant 11 : index
    %c0_414 = arith.constant 0 : index
    %c0_415 = arith.constant 0 : index
    %400 = vector.load %arg7[%c11_413, %c0_414, %c0_415] : memref<16x32x10xf32, #tpu.memory_space<vmem>>, vector<1x32x10xf32>
    %401 = vector.shape_cast %400 : vector<1x32x10xf32> to vector<32x10xf32>
    %cst_416 = arith.constant dense<0.000000e+00> : vector<2x10xf32>
    %402 = tpu.matmul %399, %401, %cst_416 {dimension_numbers = #tpu.dot_dimension_numbers<[1], [0], [0], [1], [0, 0, 1, 1], [], []>} : vector<2x32xf32>, vector<32x10xf32>, vector<2x10xf32> -> vector<2x10xf32>
    %403 = arith.addf %395, %402 : vector<2x10xf32>
    %404 = vector.extract_strided_slice %297 {offsets = [0, 6, 0, 0], sizes = [2, 1, 8, 32], strides = [1, 1, 1, 1]} : vector<2x8x8x32xf32> to vector<2x1x8x32xf32>
    %405 = vector.extract_strided_slice %297 {offsets = [0, 7, 0, 0], sizes = [2, 1, 8, 32], strides = [1, 1, 1, 1]} : vector<2x8x8x32xf32> to vector<2x1x8x32xf32>
    %406 = arith.maximumf %404, %405 : vector<2x1x8x32xf32>
    %407 = vector.extract_strided_slice %406 {offsets = [0, 0, 0, 0], sizes = [2, 1, 1, 32], strides = [1, 1, 1, 1]} : vector<2x1x8x32xf32> to vector<2x1x1x32xf32>
    %408 = vector.extract_strided_slice %406 {offsets = [0, 0, 1, 0], sizes = [2, 1, 1, 32], strides = [1, 1, 1, 1]} : vector<2x1x8x32xf32> to vector<2x1x1x32xf32>
    %409 = arith.maximumf %407, %408 : vector<2x1x1x32xf32>
    %410 = vector.shape_cast %409 : vector<2x1x1x32xf32> to vector<2x32xf32>
    %c12_417 = arith.constant 12 : index
    %c0_418 = arith.constant 0 : index
    %c0_419 = arith.constant 0 : index
    %411 = vector.load %arg7[%c12_417, %c0_418, %c0_419] : memref<16x32x10xf32, #tpu.memory_space<vmem>>, vector<1x32x10xf32>
    %412 = vector.shape_cast %411 : vector<1x32x10xf32> to vector<32x10xf32>
    %cst_420 = arith.constant dense<0.000000e+00> : vector<2x10xf32>
    %413 = tpu.matmul %410, %412, %cst_420 {dimension_numbers = #tpu.dot_dimension_numbers<[1], [0], [0], [1], [0, 0, 1, 1], [], []>} : vector<2x32xf32>, vector<32x10xf32>, vector<2x10xf32> -> vector<2x10xf32>
    %414 = arith.addf %403, %413 : vector<2x10xf32>
    %415 = vector.extract_strided_slice %406 {offsets = [0, 0, 2, 0], sizes = [2, 1, 1, 32], strides = [1, 1, 1, 1]} : vector<2x1x8x32xf32> to vector<2x1x1x32xf32>
    %416 = vector.extract_strided_slice %406 {offsets = [0, 0, 3, 0], sizes = [2, 1, 1, 32], strides = [1, 1, 1, 1]} : vector<2x1x8x32xf32> to vector<2x1x1x32xf32>
    %417 = arith.maximumf %415, %416 : vector<2x1x1x32xf32>
    %418 = vector.shape_cast %417 : vector<2x1x1x32xf32> to vector<2x32xf32>
    %c13_421 = arith.constant 13 : index
    %c0_422 = arith.constant 0 : index
    %c0_423 = arith.constant 0 : index
    %419 = vector.load %arg7[%c13_421, %c0_422, %c0_423] : memref<16x32x10xf32, #tpu.memory_space<vmem>>, vector<1x32x10xf32>
    %420 = vector.shape_cast %419 : vector<1x32x10xf32> to vector<32x10xf32>
    %cst_424 = arith.constant dense<0.000000e+00> : vector<2x10xf32>
    %421 = tpu.matmul %418, %420, %cst_424 {dimension_numbers = #tpu.dot_dimension_numbers<[1], [0], [0], [1], [0, 0, 1, 1], [], []>} : vector<2x32xf32>, vector<32x10xf32>, vector<2x10xf32> -> vector<2x10xf32>
    %422 = arith.addf %414, %421 : vector<2x10xf32>
    %423 = vector.extract_strided_slice %406 {offsets = [0, 0, 4, 0], sizes = [2, 1, 1, 32], strides = [1, 1, 1, 1]} : vector<2x1x8x32xf32> to vector<2x1x1x32xf32>
    %424 = vector.extract_strided_slice %406 {offsets = [0, 0, 5, 0], sizes = [2, 1, 1, 32], strides = [1, 1, 1, 1]} : vector<2x1x8x32xf32> to vector<2x1x1x32xf32>
    %425 = arith.maximumf %423, %424 : vector<2x1x1x32xf32>
    %426 = vector.shape_cast %425 : vector<2x1x1x32xf32> to vector<2x32xf32>
    %c14_425 = arith.constant 14 : index
    %c0_426 = arith.constant 0 : index
    %c0_427 = arith.constant 0 : index
    %427 = vector.load %arg7[%c14_425, %c0_426, %c0_427] : memref<16x32x10xf32, #tpu.memory_space<vmem>>, vector<1x32x10xf32>
    %428 = vector.shape_cast %427 : vector<1x32x10xf32> to vector<32x10xf32>
    %cst_428 = arith.constant dense<0.000000e+00> : vector<2x10xf32>
    %429 = tpu.matmul %426, %428, %cst_428 {dimension_numbers = #tpu.dot_dimension_numbers<[1], [0], [0], [1], [0, 0, 1, 1], [], []>} : vector<2x32xf32>, vector<32x10xf32>, vector<2x10xf32> -> vector<2x10xf32>
    %430 = arith.addf %422, %429 : vector<2x10xf32>
    %431 = vector.extract_strided_slice %406 {offsets = [0, 0, 6, 0], sizes = [2, 1, 1, 32], strides = [1, 1, 1, 1]} : vector<2x1x8x32xf32> to vector<2x1x1x32xf32>
    %432 = vector.extract_strided_slice %406 {offsets = [0, 0, 7, 0], sizes = [2, 1, 1, 32], strides = [1, 1, 1, 1]} : vector<2x1x8x32xf32> to vector<2x1x1x32xf32>
    %433 = arith.maximumf %431, %432 : vector<2x1x1x32xf32>
    %434 = vector.shape_cast %433 : vector<2x1x1x32xf32> to vector<2x32xf32>
    %c15_429 = arith.constant 15 : index
    %c0_430 = arith.constant 0 : index
    %c0_431 = arith.constant 0 : index
    %435 = vector.load %arg7[%c15_429, %c0_430, %c0_431] : memref<16x32x10xf32, #tpu.memory_space<vmem>>, vector<1x32x10xf32>
    %436 = vector.shape_cast %435 : vector<1x32x10xf32> to vector<32x10xf32>
    %cst_432 = arith.constant dense<0.000000e+00> : vector<2x10xf32>
    %437 = tpu.matmul %434, %436, %cst_432 {dimension_numbers = #tpu.dot_dimension_numbers<[1], [0], [0], [1], [0, 0, 1, 1], [], []>} : vector<2x32xf32>, vector<32x10xf32>, vector<2x10xf32> -> vector<2x10xf32>
    %438 = arith.addf %430, %437 : vector<2x10xf32>
    %c0_433 = arith.constant 0 : index
    %c0_434 = arith.constant 0 : index
    %439 = vector.load %arg8[%c0_433, %c0_434] : memref<1x10xf32, #tpu.memory_space<vmem>>, vector<1x10xf32>
    %c0_435 = arith.constant 0 : index
    %c0_436 = arith.constant 0 : index
    %440 = vector.load %arg9[%c0_435, %c0_436] : memref<1x10xf32, #tpu.memory_space<vmem>>, vector<1x10xf32>
    %cst_437 = arith.constant dense<0.000000e+00> : vector<10xf32>
    %441 = vector.multi_reduction <add>, %438, %cst_437 [0] : vector<2x10xf32> to vector<10xf32>
    %442 = vector.shape_cast %441 : vector<10xf32> to vector<1x10xf32>
    %cst_438 = arith.constant 2.000000e+00 : f32
    %443 = vector.broadcast %cst_438 : f32 to vector<1x10xf32>
    %444 = arith.divf %442, %443 : vector<1x10xf32>
    %445 = vector.broadcast %444 : vector<1x10xf32> to vector<2x10xf32>
    %446 = arith.subf %438, %445 : vector<2x10xf32>
    %447 = arith.mulf %446, %446 : vector<2x10xf32>
    %cst_439 = arith.constant dense<0.000000e+00> : vector<10xf32>
    %448 = vector.multi_reduction <add>, %447, %cst_439 [0] : vector<2x10xf32> to vector<10xf32>
    %449 = vector.shape_cast %448 : vector<10xf32> to vector<1x10xf32>
    %cst_440 = arith.constant 2.000000e+00 : f32
    %450 = vector.broadcast %cst_440 : f32 to vector<1x10xf32>
    %451 = arith.divf %449, %450 : vector<1x10xf32>
    %cst_441 = arith.constant 9.99999974E-6 : f32
    %452 = vector.broadcast %cst_441 : f32 to vector<1x10xf32>
    %453 = arith.addf %451, %452 : vector<1x10xf32>
    %454 = math.rsqrt %453 : vector<1x10xf32>
    %455 = arith.mulf %439, %454 : vector<1x10xf32>
    %456 = arith.mulf %444, %455 : vector<1x10xf32>
    %457 = arith.subf %440, %456 : vector<1x10xf32>
    %458 = vector.broadcast %455 : vector<1x10xf32> to vector<2x10xf32>
    %459 = arith.mulf %438, %458 : vector<2x10xf32>
    %460 = vector.broadcast %457 : vector<1x10xf32> to vector<2x10xf32>
    %461 = arith.addf %459, %460 : vector<2x10xf32>
    %c0_442 = arith.constant 0 : index
    %c0_443 = arith.constant 0 : index
    %462 = vector.load %arg10[%c0_442, %c0_443] : memref<2x10xf32, #tpu.memory_space<vmem>>, vector<2x10xf32>
    tpu.vector_store %arg10[%c0_442, %c0_443], %461 {strides = array<i32>} : memref<2x10xf32, #tpu.memory_space<vmem>>, vector<2x10xf32>,
    return
  }
}

</mosaic_0001>

<bundles_post_ra>
// kernel: cnn_batch_forward.1
= control target key start
LH: loop header
LB: loop body
LE: loop exit
PB: predicated region body
PF: predicated region fallthrough
CT: control target
= control target key end

     0   :  { %vm361_vm0 = vcmask 1044480   ;;  %vm168_vm1 = vcmask 39936   ;;  %s14237_s0 = inlined_call_operand.vmem [shape: f32[2,20,16,5], index: 0, kind: input, shape index: {}]   ;;  %s14238_s1 = inlined_call_operand.vmem [shape: f32[5,5,16], index: 1, kind: input, shape index: {}]   ;;  %s14239_s2 = inlined_call_operand.vmem [shape: f32[1,16], index: 2, kind: input, shape index: {}]   ;;  %s14240_s3 = inlined_call_operand.vmem [shape: f32[1,16], index: 3, kind: input, shape index: {}]   ;;  %s14241_s4 = inlined_call_operand.vmem [shape: f32[25,16,32], index: 4, kind: input, shape index: {}]   ;;  %s14242_s5 = inlined_call_operand.vmem [shape: f32[1,32], index: 5, kind: input, shape index: {}]   ;;  %s14243_s6 = inlined_call_operand.vmem [shape: f32[1,32], index: 6, kind: input, shape index: {}]   ;;  %s14244_s7 = inlined_call_operand.vmem [shape: f32[16,32,10], index: 7, kind: input, shape index: {}]   ;;  %s14245_s8 = inlined_call_operand.vmem [shape: f32[1,10], index: 8, kind: input, shape index: {}]   ;;  %s14246_s9 = inlined_call_operand.vmem [shape: f32[1,10], index: 9, kind: input, shape index: {}]   ;;  %s14247_s10 = inlined_call_operand.hbm [shape: f32[2,10], index: 10, kind: output, shape index: {}]  }
   0x1   :  { %v8360_v0 = vld [vmem:[%s14238_s1 + $0x8] sm:$0x1f]  ;;  %v8296_v1 = vld [vmem:[%s14237_s0 + $0x10] sm:$0xff]  ;;  %v8354_v3 = vld [vmem:[%s14237_s0 + $0x220] sm:$0xff] }
   0x2   :  { %v8352_v2 = vld [vmem:[%s14237_s0 + $0x210] sm:$0xff]  ;;  %8361 = vmatpush.msk.msra.mxu0 %vm361_vm0, %v8360_v0  ;;  %9405 = vmatpush.msk.msra.mxu1 %vm361_vm0, %v8360_v0  ;;  %v8815_v4 = vld [vmem:[%s14238_s1 + $0x20] sm:$0x1f]  ;;  %v8357_v5 = vld [vmem:[%s14237_s0 + $0x238] sm:$0xff] }
   0x3   :  { %9406 = vmatpush.msk.msra.mxu2 %vm361_vm0, %v8360_v0  ;;  %8362 = vmatmul.msk.f32.vlgmr.msra.gmra.mxu0 %vm168_vm1, %v8296_v1  ;;  %v100_v6 = vld [vmem:[%s14238_s1] sm:$0x1f]  ;;  %v8555_v7 = vld [vmem:[%s14238_s1 + $0x10] sm:$0x1f]  ;;  %v8685_v8 = vld [vmem:[%s14238_s1 + $0x18] sm:$0x1f] }
   0x4   :  { %8418 = vmatmul.msk.f32.vlgmr.msra.gmra.mxu1 %vm168_vm1, %v8352_v2  ;;  %8420 = vmatmul.msk.f32.vlgmr.msra.gmra.mxu2 %vm168_vm1, %v8354_v3  ;;  %v8297_v9 = vld [vmem:[%s14237_s0 + $0x18] sm:$0xff] }
   0x5   :  { %8816 = vmatpush.msk.msrb.mxu0 %vm361_vm0, %v8815_v4  ;;  %9407 = vmatpush.msk.msra.mxu3 %vm361_vm0, %v8360_v0 }
   0x6   :  { %8423 = vmatmul.msk.f32.vlgmr.msra.gmra.mxu3 %vm168_vm1, %v8357_v5  ;;  %8426 = vmatpush.msk.msrb.mxu1 %vm361_vm0, %v100_v6 }
   0x7   :  { %8556 = vmatpush.msk.msrb.mxu2 %vm361_vm0, %v8555_v7  ;;  %8686 = vmatpush.msk.msrb.mxu3 %vm361_vm0, %v8685_v8 }
   0x8   :  { %15 = vsyncpa [#allocation5], 0  ;;  %v8353_v10 = vld [vmem:[%s14237_s0 + $0x218] sm:$0xff]  ;;  %v8355_v11 = vld [vmem:[%s14237_s0 + $0x228] sm:$0xff]  ;;  %vm2585_vm2 = vcmask 130048   ;;  %vm3273_vm7 = vcmask 125952  }
   0x9   :  { %v8358_v12 = vld [vmem:[%s14237_s0 + $0x240] sm:$0xff]  ;;  %v8356_v14 = vld [vmem:[%s14237_s0 + $0x230] sm:$0xff]  ;;  %v8359_v16 = vld [vmem:[%s14237_s0 + $0x248] sm:$0xff]  ;;  %vm3370_vm8 = vcmask 122880   ;;  %vm7507_vm9 = vcmask 261120   ;;  %vm7714_vm14 = vcmask 1041409  }
   0xa   :  { %v8298_v13 = vld [vmem:[%s14237_s0 + $0x20] sm:$0xff]  ;;  %v8299_v17 = vld [vmem:[%s14237_s0 + $0x28] sm:$0xff]  ;;  %v8621_v19 = vld [vmem:[%s14237_s0 + $0x30] sm:$0xff]  ;;  %vm8231_vm15 = vcmask 74752   ;;  %s9455_s26 = smov [#allocation4]   ;;  %s8287_s30 = sshll.u32 %s14247_s10, 4  ;;  %s8288_s30 = int_to_ptr.hbm [resolvable:$true] %s8287_s30 }
   0xb   :  { %8363 = vmatmul.msk.f32.gmra.mxu0 %vm168_vm1, %v8297_v9  ;;  %v36_v15 = vld [vmem:[%s14237_s0] sm:$0xff]  ;;  %v37_v18 = vld [vmem:[%s14237_s0 + $0x8] sm:$0xff]  ;;  %v8622_v20 = vld [vmem:[%s14237_s0 + $0x38] sm:$0xff]  ;;  %s8285_s27 = sshll.u32 %s9455_s26, 4  ;;  %s8286_s27 = int_to_ptr.vmem [resolvable:$true] %s8285_s27 }
   0xc   :  { %8419 = vmatmul.msk.f32.gmra.mxu1 %vm168_vm1, %v8353_v10  ;;  %8421 = vmatmul.msk.f32.gmra.mxu2 %vm168_vm1, %v8355_v11  ;;  %v8623_v21 = vld [vmem:[%s14237_s0 + $0x40] sm:$0xff]  ;;  %v8624_v22 = vld [vmem:[%s14237_s0 + $0x48] sm:$0xff]  ;;  %v8625_v23 = vld [vmem:[%s14237_s0 + $0x50] sm:$0xff] }
   0xd   :  { %v8626_v24 = vld [vmem:[%s14237_s0 + $0x58] sm:$0xff]  ;;  %v8627_v25 = vld [vmem:[%s14237_s0 + $0x60] sm:$0xff]  ;;  %v8628_v26 = vld [vmem:[%s14237_s0 + $0x68] sm:$0xff] }
   0xe   :  { %8424 = vmatmul.msk.f32.gmra.mxu3 %vm168_vm1, %v8358_v12  ;;  %v8629_v27 = vld [vmem:[%s14237_s0 + $0x70] sm:$0xff]  ;;  %v8630_v28 = vld [vmem:[%s14237_s0 + $0x78] sm:$0xff]  ;;  %v8631_v29 = vld [vmem:[%s14237_s0 + $0x80] sm:$0xff] }
   0xf   :  { %v8632_v30 = vld [vmem:[%s14237_s0 + $0x88] sm:$0xff]  ;;  %v8633_v31 = vld [vmem:[%s14237_s0 + $0x90] sm:$0xff]  ;;  %v8634_v34 = vld [vmem:[%s14237_s0 + $0x98] sm:$0xff] }
  0x10   :  { %v8635_v39 = vld [vmem:[%s14237_s0 + $0xa0] sm:$0xff]  ;;  %v8636_v44 = vld [vmem:[%s14237_s0 + $0xa8] sm:$0xff]  ;;  %v8637_v49 = vld [vmem:[%s14237_s0 + $0xb0] sm:$0xff] }
  0x11   :  { %v8638_v57 = vld [vmem:[%s14237_s0 + $0xb8] sm:$0xff] }
  0x13   :  { %8364 = vmatmul.msk.f32.gmra.mxu0 %vm168_vm1, %v8298_v13 }
  0x14   :  { %8422 = vmatmul.msk.f32.gmra.mxu2 %vm168_vm1, %v8356_v14  ;;  %8427 = vmatmul.msk.f32.vlgmr.msrb.gmra.mxu1 %vm168_vm1, %v36_v15 }
  0x16   :  { %8425 = vmatmul.msk.f32.gmra.mxu3 %vm168_vm1, %v8359_v16 }
  0x1b   :  { %8365 = vmatmul.msk.f32.gmra.mxu0 %vm168_vm1, %v8299_v17 }
  0x1c   :  { %8428 = vmatmul.msk.f32.gmra.mxu1 %vm168_vm1, %v37_v18  ;;  %8557 = vmatmul.msk.f32.vlgmr.msrb.gmra.mxu2 %vm168_vm1, %v8298_v13 }
  0x1e   :  { %8687 = vmatmul.msk.f32.vlgmr.msrb.gmra.mxu3 %vm168_vm1, %v8621_v19 }
  0x23   :  { %8366 = vmatmul.msk.f32.gmra.mxu0 %vm168_vm1, %v8621_v19 }
  0x24   :  { %8429 = vmatmul.msk.f32.gmra.mxu1 %vm168_vm1, %v8296_v1  ;;  %8558 = vmatmul.msk.f32.gmra.mxu2 %vm168_vm1, %v8299_v17  ;;  %v8639_v1 = vld [vmem:[%s14237_s0 + $0xc0] sm:$0xff] }
  0x26   :  { %8688 = vmatmul.msk.f32.gmra.mxu3 %vm168_vm1, %v8622_v20 }
  0x2b   :  { %8367 = vmatmul.msk.f32.gmra.mxu0 %vm168_vm1, %v8622_v20 }
  0x2c   :  { %8430 = vmatmul.msk.f32.gmra.mxu1 %vm168_vm1, %v8297_v9  ;;  %8559 = vmatmul.msk.f32.gmra.mxu2 %vm168_vm1, %v8621_v19  ;;  %v8640_v9 = vld [vmem:[%s14237_s0 + $0xc8] sm:$0xff] }
  0x2e   :  { %8689 = vmatmul.msk.f32.gmra.mxu3 %vm168_vm1, %v8623_v21 }
  0x33   :  { %8368 = vmatmul.msk.f32.gmra.mxu0 %vm168_vm1, %v8623_v21 }
  0x34   :  { %8431 = vmatmul.msk.f32.gmra.mxu1 %vm168_vm1, %v8298_v13  ;;  %8560 = vmatmul.msk.f32.gmra.mxu2 %vm168_vm1, %v8622_v20 }
  0x36   :  { %8690 = vmatmul.msk.f32.gmra.mxu3 %vm168_vm1, %v8624_v22 }
  0x3b   :  { %8369 = vmatmul.msk.f32.gmra.mxu0 %vm168_vm1, %v8624_v22 }
  0x3c   :  { %8432 = vmatmul.msk.f32.gmra.mxu1 %vm168_vm1, %v8299_v17  ;;  %8561 = vmatmul.msk.f32.gmra.mxu2 %vm168_vm1, %v8623_v21  ;;  %v8641_v17 = vld [vmem:[%s14237_s0 + $0xd0] sm:$0xff] }
  0x3e   :  { %8691 = vmatmul.msk.f32.gmra.mxu3 %vm168_vm1, %v8625_v23 }
  0x43   :  { %8370 = vmatmul.msk.f32.gmra.mxu0 %vm168_vm1, %v8625_v23 }
  0x44   :  { %8433 = vmatmul.msk.f32.gmra.mxu1 %vm168_vm1, %v8621_v19  ;;  %8562 = vmatmul.msk.f32.gmra.mxu2 %vm168_vm1, %v8624_v22 }
  0x46   :  { %8692 = vmatmul.msk.f32.gmra.mxu3 %vm168_vm1, %v8626_v24 }
  0x4b   :  { %8371 = vmatmul.msk.f32.gmra.mxu0 %vm168_vm1, %v8626_v24 }
  0x4c   :  { %8434 = vmatmul.msk.f32.gmra.mxu1 %vm168_vm1, %v8622_v20  ;;  %8563 = vmatmul.msk.f32.gmra.mxu2 %vm168_vm1, %v8625_v23 }
  0x4e   :  { %8693 = vmatmul.msk.f32.gmra.mxu3 %vm168_vm1, %v8627_v25 }
  0x53   :  { %8372 = vmatmul.msk.f32.gmra.mxu0 %vm168_vm1, %v8627_v25 }
  0x54   :  { %8435 = vmatmul.msk.f32.gmra.mxu1 %vm168_vm1, %v8623_v21  ;;  %8564 = vmatmul.msk.f32.gmra.mxu2 %vm168_vm1, %v8626_v24 }
  0x56   :  { %8694 = vmatmul.msk.f32.gmra.mxu3 %vm168_vm1, %v8628_v26 }
  0x5b   :  { %8373 = vmatmul.msk.f32.gmra.mxu0 %vm168_vm1, %v8628_v26 }
  0x5c   :  { %8436 = vmatmul.msk.f32.gmra.mxu1 %vm168_vm1, %v8624_v22  ;;  %8565 = vmatmul.msk.f32.gmra.mxu2 %vm168_vm1, %v8627_v25 }
  0x5e   :  { %8695 = vmatmul.msk.f32.gmra.mxu3 %vm168_vm1, %v8629_v27 }
  0x63   :  { %8374 = vmatmul.msk.f32.gmra.mxu0 %vm168_vm1, %v8629_v27 }
  0x64   :  { %8437 = vmatmul.msk.f32.gmra.mxu1 %vm168_vm1, %v8625_v23  ;;  %8566 = vmatmul.msk.f32.gmra.mxu2 %vm168_vm1, %v8628_v26 }
  0x66   :  { %8696 = vmatmul.msk.f32.gmra.mxu3 %vm168_vm1, %v8630_v28 }
  0x6b   :  { %8375 = vmatmul.msk.f32.gmra.mxu0 %vm168_vm1, %v8630_v28 }
  0x6c   :  { %8438 = vmatmul.msk.f32.gmra.mxu1 %vm168_vm1, %v8626_v24  ;;  %8567 = vmatmul.msk.f32.gmra.mxu2 %vm168_vm1, %v8629_v27 }
  0x6e   :  { %8697 = vmatmul.msk.f32.gmra.mxu3 %vm168_vm1, %v8631_v29 }
  0x73   :  { %8376 = vmatmul.msk.f32.gmra.mxu0 %vm168_vm1, %v8631_v29 }
  0x74   :  { %8439 = vmatmul.msk.f32.gmra.mxu1 %vm168_vm1, %v8627_v25  ;;  %8568 = vmatmul.msk.f32.gmra.mxu2 %vm168_vm1, %v8630_v28  ;;  %v8642_v25 = vld [vmem:[%s14237_s0 + $0xd8] sm:$0xff] }
  0x76   :  { %8698 = vmatmul.msk.f32.gmra.mxu3 %vm168_vm1, %v8632_v30 }
  0x7b   :  { %8377 = vmatmul.msk.f32.gmra.mxu0 %vm168_vm1, %v8632_v30 }
  0x7c   :  { %8440 = vmatmul.msk.f32.gmra.mxu1 %vm168_vm1, %v8628_v26  ;;  %8569 = vmatmul.msk.f32.gmra.mxu2 %vm168_vm1, %v8631_v29 }
  0x7e   :  { %8699 = vmatmul.msk.f32.gmra.mxu3 %vm168_vm1, %v8633_v31 }
  0x80   :  { %v382_v32 = vpop.f32.mrf.mxu0 }
  0x81   :  { %v9679_v33 = vpop.f32.mrf.mxu1 }
  0x82   :  { %14362 = vst [vmem:[#allocation7_spill] sm:$0xff] %v9679_v33  ;;  %v10251_v33 = vld [vmem:[%s14237_s0 + $0x260] sm:$0xff] }
  0x83   :  { %8378 = vmatmul.msk.f32.gmra.mxu0 %vm168_vm1, %v8633_v31 }
  0x84   :  { %8441 = vmatmul.msk.f32.gmra.mxu1 %vm168_vm1, %v8629_v27  ;;  %8570 = vmatmul.msk.f32.gmra.mxu2 %vm168_vm1, %v8632_v30 }
  0x86   :  { %8700 = vmatmul.msk.f32.gmra.mxu3 %vm168_vm1, %v8634_v34 }
  0x87   :  { %v9688_v35 = vpop.f32.mrf.mxu2 }
  0x88   :  { %14363 = vst [vmem:[#allocation8_spill] sm:$0xff] %v9688_v35  ;;  %v385_v36 = vpop.f32.mrf.mxu0  ;;  %v10234_v35 = vld [vmem:[%s14237_s0 + $0x258] sm:$0xff] }
  0x89   :  { %v9690_v37 = vpop.f32.mrf.mxu1  ;;  %v9692_v38 = vpop.f32.mrf.mxu3 }
  0x8a   :  { %14364 = vst [vmem:[#allocation9_spill] sm:$0xff] %v9690_v37 }
  0x8b   :  { %14365 = vst [vmem:[#allocation10_spill] sm:$0xff] %v9692_v38  ;;  %8379 = vmatmul.msk.f32.gmra.mxu0 %vm168_vm1, %v8634_v34 }
  0x8c   :  { %8442 = vmatmul.msk.f32.gmra.mxu1 %vm168_vm1, %v8630_v28  ;;  %8571 = vmatmul.msk.f32.gmra.mxu2 %vm168_vm1, %v8633_v31 }
  0x8e   :  { %8701 = vmatmul.msk.f32.gmra.mxu3 %vm168_vm1, %v8635_v39 }
  0x8f   :  { %v9701_v40 = vpop.f32.mrf.mxu2 }
  0x90   :  { %14366 = vst [vmem:[#allocation11_spill] sm:$0xff] %v9701_v40  ;;  %v388_v41 = vpop.f32.mrf.mxu0 }
  0x91   :  { %v9703_v42 = vpop.f32.mrf.mxu3  ;;  %v786_v43 = vpop.f32.mrf.mxu1 }
  0x92   :  { %14367 = vst [vmem:[#allocation12_spill] sm:$0xff] %v9703_v42  ;;  %v787_v50 = vadd.f32 %v786_v43, %v382_v32  ;;  %v10200_v42 = vld [vmem:[%s14237_s0 + $0x248] sm:$0xff] }
  0x93   :  { %8380 = vmatmul.msk.f32.gmra.mxu0 %vm168_vm1, %v8635_v39 }
  0x94   :  { %8443 = vmatmul.msk.f32.gmra.mxu1 %vm168_vm1, %v8631_v29  ;;  %8572 = vmatmul.msk.f32.gmra.mxu2 %vm168_vm1, %v8634_v34 }
  0x96   :  { %8702 = vmatmul.msk.f32.gmra.mxu3 %vm168_vm1, %v8636_v44 }
  0x97   :  { %v9712_v45 = vpop.f32.mrf.mxu2 }
  0x98   :  { %14368 = vst [vmem:[#allocation13_spill] sm:$0xff] %v9712_v45  ;;  %v391_v46 = vpop.f32.mrf.mxu0  ;;  %v10217_v45 = vld [vmem:[%s14237_s0 + $0x250] sm:$0xff] }
  0x99   :  { %v9714_v47 = vpop.f32.mrf.mxu3  ;;  %v789_v48 = vpop.f32.mrf.mxu1 }
  0x9a   :  { %14369 = vst [vmem:[#allocation14_spill] sm:$0xff] %v9714_v47  ;;  %v790_v58 = vadd.f32 %v789_v48, %v385_v36 }
  0x9b   :  { %8381 = vmatmul.msk.f32.gmra.mxu0 %vm168_vm1, %v8636_v44 }
  0x9c   :  { %8444 = vmatmul.msk.f32.gmra.mxu1 %vm168_vm1, %v8632_v30  ;;  %8573 = vmatmul.msk.f32.gmra.mxu2 %vm168_vm1, %v8635_v39 }
  0x9e   :  { %8703 = vmatmul.msk.f32.gmra.mxu3 %vm168_vm1, %v8637_v49 }
  0x9f   :  { %v1257_v51 = vpop.f32.mrf.mxu2 }
  0xa0   :  { %v1449_v52 = vadd.f32 %v1257_v51, %v787_v50  ;;  %v394_v53 = vpop.f32.mrf.mxu0 }
  0xa1   :  { %v792_v54 = vpop.f32.mrf.mxu1  ;;  %v1792_v55 = vpop.f32.mrf.mxu3 }
  0xa2   :  { %v9723_v56 = vadd.f32 %v1792_v55, %v1449_v52  ;;  %v793_v2 = vadd.f32 %v792_v54, %v388_v41 }
  0xa3   :  { %8382 = vmatmul.msk.f32.gmra.mxu0 %vm168_vm1, %v8637_v49 }
  0xa4   :  { %8445 = vmatmul.msk.f32.gmra.mxu1 %vm168_vm1, %v8633_v31  ;;  %8574 = vmatmul.msk.f32.gmra.mxu2 %vm168_vm1, %v8636_v44 }
  0xa6   :  { %8704 = vmatmul.msk.f32.gmra.mxu3 %vm168_vm1, %v8638_v57 }
  0xa7   :  { %v1260_v59 = vpop.f32.mrf.mxu2 }
  0xa8   :  { %v1450_v60 = vadd.f32 %v1260_v59, %v790_v58  ;;  %v397_v61 = vpop.f32.mrf.mxu0  ;;  %v8645_v58 = vld [vmem:[%s14237_s0 + $0xf0] sm:$0xff] }
  0xa9   :  { %v795_v62 = vpop.f32.mrf.mxu1  ;;  %v1795_v63 = vpop.f32.mrf.mxu3 }
  0xaa   :  { %v9732_v0 = vadd.f32 %v1795_v63, %v1450_v60  ;;  %v796_v10 = vadd.f32 %v795_v62, %v391_v46 }
  0xab   :  { %8383 = vmatmul.msk.f32.gmra.mxu0 %vm168_vm1, %v8638_v57 }
  0xac   :  { %8446 = vmatmul.msk.f32.gmra.mxu1 %vm168_vm1, %v8634_v34  ;;  %8575 = vmatmul.msk.f32.gmra.mxu2 %vm168_vm1, %v8637_v49  ;;  %v8643_v34 = vld [vmem:[%s14237_s0 + $0xe0] sm:$0xff] }
  0xae   :  { %8705 = vmatmul.msk.f32.gmra.mxu3 %vm168_vm1, %v8639_v1 }
  0xaf   :  { %v1263_v3 = vpop.f32.mrf.mxu2 }
  0xb0   :  { %v1451_v4 = vadd.f32 %v1263_v3, %v793_v2  ;;  %v400_v5 = vpop.f32.mrf.mxu0  ;;  %v9801_v3 = vld [vmem:[%s14237_s0 + $0xf8] sm:$0xff] }
  0xb1   :  { %v798_v6 = vpop.f32.mrf.mxu1  ;;  %v1798_v7 = vpop.f32.mrf.mxu3 }
  0xb2   :  { %v9741_v8 = vadd.f32 %v1798_v7, %v1451_v4  ;;  %v799_v18 = vadd.f32 %v798_v6, %v394_v53 }
  0xb3   :  { %8384 = vmatmul.msk.f32.gmra.mxu0 %vm168_vm1, %v8639_v1 }
  0xb4   :  { %8447 = vmatmul.msk.f32.gmra.mxu1 %vm168_vm1, %v8635_v39  ;;  %8576 = vmatmul.msk.f32.gmra.mxu2 %vm168_vm1, %v8638_v57 }
  0xb6   :  { %8706 = vmatmul.msk.f32.gmra.mxu3 %vm168_vm1, %v8640_v9 }
  0xb7   :  { %v1266_v11 = vpop.f32.mrf.mxu2 }
  0xb8   :  { %v1452_v12 = vadd.f32 %v1266_v11, %v796_v10  ;;  %v403_v13 = vpop.f32.mrf.mxu0 }
  0xb9   :  { %v801_v14 = vpop.f32.mrf.mxu1  ;;  %v1801_v15 = vpop.f32.mrf.mxu3 }
  0xba   :  { %v9750_v16 = vadd.f32 %v1801_v15, %v1452_v12  ;;  %v802_v26 = vadd.f32 %v801_v14, %v397_v61  ;;  %v8647_v12 = vld [vmem:[%s14237_s0 + $0x100] sm:$0xff] }
  0xbb   :  { %8385 = vmatmul.msk.f32.gmra.mxu0 %vm168_vm1, %v8640_v9 }
  0xbc   :  { %8448 = vmatmul.msk.f32.gmra.mxu1 %vm168_vm1, %v8636_v44  ;;  %8577 = vmatmul.msk.f32.gmra.mxu2 %vm168_vm1, %v8639_v1 }
  0xbe   :  { %8707 = vmatmul.msk.f32.gmra.mxu3 %vm168_vm1, %v8641_v17 }
  0xbf   :  { %v1269_v19 = vpop.f32.mrf.mxu2 }
  0xc0   :  { %v1453_v20 = vadd.f32 %v1269_v19, %v799_v18  ;;  %v406_v21 = vpop.f32.mrf.mxu0 }
  0xc1   :  { %v804_v22 = vpop.f32.mrf.mxu1  ;;  %v1804_v23 = vpop.f32.mrf.mxu3 }
  0xc2   :  { %v9759_v24 = vadd.f32 %v1804_v23, %v1453_v20  ;;  %v805_v36 = vadd.f32 %v804_v22, %v400_v5 }
  0xc3   :  { %8386 = vmatmul.msk.f32.gmra.mxu0 %vm168_vm1, %v8641_v17 }
  0xc4   :  { %8449 = vmatmul.msk.f32.gmra.mxu1 %vm168_vm1, %v8637_v49  ;;  %8578 = vmatmul.msk.f32.gmra.mxu2 %vm168_vm1, %v8640_v9  ;;  %v8644_v49 = vld [vmem:[%s14237_s0 + $0xe8] sm:$0xff] }
  0xc6   :  { %8708 = vmatmul.msk.f32.gmra.mxu3 %vm168_vm1, %v8642_v25 }
  0xc7   :  { %v1272_v27 = vpop.f32.mrf.mxu2 }
  0xc8   :  { %v1454_v28 = vadd.f32 %v1272_v27, %v802_v26  ;;  %v409_v29 = vpop.f32.mrf.mxu0 }
  0xc9   :  { %v807_v30 = vpop.f32.mrf.mxu1  ;;  %v1807_v31 = vpop.f32.mrf.mxu3 }
  0xca   :  { %v9768_v32 = vadd.f32 %v1807_v31, %v1454_v28  ;;  %v808_v50 = vadd.f32 %v807_v30, %v403_v13  ;;  %v8649_v30 = vld [vmem:[%s14237_s0 + $0x110] sm:$0xff] }
  0xcb   :  { %8387 = vmatmul.msk.f32.gmra.mxu0 %vm168_vm1, %v8642_v25 }
  0xcc   :  { %8450 = vmatmul.msk.f32.gmra.mxu1 %vm168_vm1, %v8638_v57  ;;  %8579 = vmatmul.msk.f32.gmra.mxu2 %vm168_vm1, %v8641_v17 }
  0xce   :  { %8709 = vmatmul.msk.f32.gmra.mxu3 %vm168_vm1, %v8643_v34 }
  0xcf   :  { %v1275_v39 = vpop.f32.mrf.mxu2 }
  0xd0   :  { %v1455_v41 = vadd.f32 %v1275_v39, %v805_v36  ;;  %v412_v43 = vpop.f32.mrf.mxu0 }
  0xd1   :  { %v810_v44 = vpop.f32.mrf.mxu1  ;;  %v1810_v46 = vpop.f32.mrf.mxu3 }
  0xd2   :  { %v9777_v48 = vadd.f32 %v1810_v46, %v1455_v41  ;;  %v811_v59 = vadd.f32 %v810_v44, %v406_v21  ;;  %v8648_v21 = vld [vmem:[%s14237_s0 + $0x108] sm:$0xff]  ;;  %v8328_v41 = vld [vmem:[%s14237_s0 + $0x150] sm:$0xff] }
  0xd3   :  { %8388 = vmatmul.msk.f32.gmra.mxu0 %vm168_vm1, %v8643_v34 }
  0xd4   :  { %8451 = vmatmul.msk.f32.gmra.mxu1 %vm168_vm1, %v8639_v1  ;;  %8580 = vmatmul.msk.f32.gmra.mxu2 %vm168_vm1, %v8642_v25 }
  0xd6   :  { %8710 = vmatmul.msk.f32.gmra.mxu3 %vm168_vm1, %v8644_v49 }
  0xd7   :  { %v1278_v51 = vpop.f32.mrf.mxu2 }
  0xd8   :  { %v1456_v52 = vadd.f32 %v1278_v51, %v808_v50  ;;  %v415_v53 = vpop.f32.mrf.mxu0 }
  0xd9   :  { %v813_v54 = vpop.f32.mrf.mxu1  ;;  %v1813_v55 = vpop.f32.mrf.mxu3 }
  0xda   :  { %v9786_v57 = vadd.f32 %v1813_v55, %v1456_v52  ;;  %v814_v4 = vadd.f32 %v813_v54, %v409_v29  ;;  %v8329_v54 = vld [vmem:[%s14237_s0 + $0x158] sm:$0xff] }
  0xdb   :  { %8389 = vmatmul.msk.f32.gmra.mxu0 %vm168_vm1, %v8644_v49 }
  0xdc   :  { %8452 = vmatmul.msk.f32.gmra.mxu1 %vm168_vm1, %v8640_v9  ;;  %8581 = vmatmul.msk.f32.gmra.mxu2 %vm168_vm1, %v8643_v34 }
  0xde   :  { %8711 = vmatmul.msk.f32.gmra.mxu3 %vm168_vm1, %v8645_v58 }
  0xdf   :  { %v1281_v60 = vpop.f32.mrf.mxu2 }
  0xe0   :  { %v1457_v61 = vadd.f32 %v1281_v60, %v811_v59  ;;  %v418_v62 = vpop.f32.mrf.mxu0 }
  0xe1   :  { %v816_v63 = vpop.f32.mrf.mxu1  ;;  %v1816_v1 = vpop.f32.mrf.mxu3 }
  0xe2   :  { %v9795_v2 = vadd.f32 %v1816_v1, %v1457_v61  ;;  %v817_v13 = vadd.f32 %v816_v63, %v412_v43 }
  0xe3   :  { %8390 = vmatmul.msk.f32.gmra.mxu0 %vm168_vm1, %v8645_v58 }
  0xe4   :  { %8453 = vmatmul.msk.f32.gmra.mxu1 %vm168_vm1, %v8641_v17  ;;  %8582 = vmatmul.msk.f32.gmra.mxu2 %vm168_vm1, %v8644_v49 }
  0xe6   :  { %8712 = vmatmul.msk.f32.gmra.mxu3 %vm168_vm1, %v9801_v3 }
  0xe7   :  { %v1284_v5 = vpop.f32.mrf.mxu2 }
  0xe8   :  { %v1458_v6 = vadd.f32 %v1284_v5, %v814_v4  ;;  %v421_v7 = vpop.f32.mrf.mxu0  ;;  %v8330_v4 = vld [vmem:[%s14237_s0 + $0x160] sm:$0xff] }
  0xe9   :  { %v819_v9 = vpop.f32.mrf.mxu1  ;;  %v1819_v10 = vpop.f32.mrf.mxu3 }
  0xea   :  { %v9807_v11 = vadd.f32 %v1819_v10, %v1458_v6  ;;  %v820_v22 = vadd.f32 %v819_v9, %v415_v53 }
  0xeb   :  { %8391 = vmatmul.msk.f32.gmra.mxu0 %vm168_vm1, %v9801_v3 }
  0xec   :  { %8454 = vmatmul.msk.f32.gmra.mxu1 %vm168_vm1, %v8642_v25  ;;  %8583 = vmatmul.msk.f32.gmra.mxu2 %vm168_vm1, %v8645_v58 }
  0xee   :  { %8713 = vmatmul.msk.f32.gmra.mxu3 %vm168_vm1, %v8647_v12 }
  0xef   :  { %v1287_v14 = vpop.f32.mrf.mxu2 }
  0xf0   :  { %v1459_v15 = vadd.f32 %v1287_v14, %v817_v13  ;;  %v424_v17 = vpop.f32.mrf.mxu0 }
  0xf1   :  { %v822_v18 = vpop.f32.mrf.mxu1  ;;  %v1822_v19 = vpop.f32.mrf.mxu3 }
  0xf2   :  { %v9817_v20 = vadd.f32 %v1822_v19, %v1459_v15  ;;  %v823_v31 = vadd.f32 %v822_v18, %v418_v62  ;;  %v8331_v15 = vld [vmem:[%s14237_s0 + $0x168] sm:$0xff] }
  0xf3   :  { %8392 = vmatmul.msk.f32.gmra.mxu0 %vm168_vm1, %v8647_v12  ;;  %v69_v19 = vld [vmem:[%s14237_s0 + $0x148] sm:$0xff] }
  0xf4   :  { %8455 = vmatmul.msk.f32.gmra.mxu1 %vm168_vm1, %v8643_v34  ;;  %8584 = vmatmul.msk.f32.gmra.mxu2 %vm168_vm1, %v9801_v3 }
  0xf6   :  { %8714 = vmatmul.msk.f32.gmra.mxu3 %vm168_vm1, %v8648_v21 }
  0xf7   :  { %v1290_v23 = vpop.f32.mrf.mxu2 }
  0xf8   :  { %v1460_v25 = vadd.f32 %v1290_v23, %v820_v22  ;;  %v427_v26 = vpop.f32.mrf.mxu0  ;;  %v8653_v22 = vld [vmem:[%s14237_s0 + $0x170] sm:$0xff] }
  0xf9   :  { %v825_v27 = vpop.f32.mrf.mxu1  ;;  %v1825_v28 = vpop.f32.mrf.mxu3 }
  0xfa   :  { %v9827_v29 = vadd.f32 %v1825_v28, %v1460_v25  ;;  %v826_v50 = vadd.f32 %v825_v27, %v421_v7  ;;  %v68_v7 = vld [vmem:[%s14237_s0 + $0x140] sm:$0xff] }
  0xfb   :  { %8393 = vmatmul.msk.f32.gmra.mxu0 %vm168_vm1, %v8648_v21 }
  0xfc   :  { %8456 = vmatmul.msk.f32.gmra.mxu1 %vm168_vm1, %v8644_v49  ;;  %8585 = vmatmul.msk.f32.gmra.mxu2 %vm168_vm1, %v8647_v12  ;;  %v8650_v49 = vld [vmem:[%s14237_s0 + $0x118] sm:$0xff] }
  0xfe   :  { %8715 = vmatmul.msk.f32.gmra.mxu3 %vm168_vm1, %v8649_v30 }
  0xff   :  { %v1293_v34 = vpop.f32.mrf.mxu2 }
 0x100   :  { %v1461_v36 = vadd.f32 %v1293_v34, %v823_v31  ;;  %v430_v39 = vpop.f32.mrf.mxu0  ;;  %v8654_v34 = vld [vmem:[%s14237_s0 + $0x178] sm:$0xff] }
 0x101   :  { %v828_v43 = vpop.f32.mrf.mxu1  ;;  %v1828_v44 = vpop.f32.mrf.mxu3 }
 0x102   :  { %v9839_v46 = vadd.f32 %v1828_v44, %v1461_v36  ;;  %v829_v61 = vadd.f32 %v828_v43, %v424_v17 }
 0x103   :  { %8394 = vmatmul.msk.f32.gmra.mxu0 %vm168_vm1, %v8328_v41 }
 0x104   :  { %8457 = vmatmul.msk.f32.gmra.mxu1 %vm168_vm1, %v8645_v58  ;;  %8586 = vmatmul.msk.f32.gmra.mxu2 %vm168_vm1, %v8648_v21  ;;  %v8651_v58 = vld [vmem:[%s14237_s0 + $0x120] sm:$0xff] }
 0x106   :  { %8716 = vmatmul.msk.f32.gmra.mxu3 %vm168_vm1, %v8650_v49 }
 0x107   :  { %v1296_v51 = vpop.f32.mrf.mxu2 }
 0x108   :  { %v1462_v52 = vadd.f32 %v1296_v51, %v826_v50  ;;  %v433_v53 = vpop.f32.mrf.mxu0 }
 0x109   :  { %v831_v55 = vpop.f32.mrf.mxu1  ;;  %v1831_v59 = vpop.f32.mrf.mxu3 }
 0x10a   :  { %v9851_v60 = vadd.f32 %v1831_v59, %v1462_v52  ;;  %v832_v10 = vadd.f32 %v831_v55, %v427_v26  ;;  %v8655_v52 = vld [vmem:[%s14237_s0 + $0x180] sm:$0xff] }
 0x10b   :  { %8395 = vmatmul.msk.f32.gmra.mxu0 %vm168_vm1, %v8329_v54 }
 0x10c   :  { %8458 = vmatmul.msk.f32.gmra.mxu1 %vm168_vm1, %v9801_v3  ;;  %8587 = vmatmul.msk.f32.gmra.mxu2 %vm168_vm1, %v8649_v30  ;;  %v8652_v3 = vld [vmem:[%s14237_s0 + $0x128] sm:$0xff] }
 0x10e   :  { %8717 = vmatmul.msk.f32.gmra.mxu3 %vm168_vm1, %v8651_v58 }
 0x10f   :  { %v1299_v62 = vpop.f32.mrf.mxu2 }
 0x110   :  { %v1463_v63 = vadd.f32 %v1299_v62, %v829_v61  ;;  %v436_v1 = vpop.f32.mrf.mxu0 }
 0x111   :  { %v834_v5 = vpop.f32.mrf.mxu1  ;;  %v1834_v6 = vpop.f32.mrf.mxu3 }
 0x112   :  { %v9867_v9 = vadd.f32 %v1834_v6, %v1463_v63  ;;  %v835_v23 = vadd.f32 %v834_v5, %v430_v39  ;;  %v8656_v63 = vld [vmem:[%s14237_s0 + $0x188] sm:$0xff] }
 0x113   :  { %8396 = vmatmul.msk.f32.gmra.mxu0 %vm168_vm1, %v8330_v4 }
 0x114   :  { %8459 = vmatmul.msk.f32.gmra.mxu1 %vm168_vm1, %v68_v7  ;;  %8588 = vmatmul.msk.f32.gmra.mxu2 %vm168_vm1, %v8650_v49 }
 0x116   :  { %8718 = vmatmul.msk.f32.gmra.mxu3 %vm168_vm1, %v8652_v3 }
 0x117   :  { %v1302_v12 = vpop.f32.mrf.mxu2 }
 0x118   :  { %v1464_v13 = vadd.f32 %v1302_v12, %v832_v10  ;;  %v439_v14 = vpop.f32.mrf.mxu0  ;;  %v8657_v12 = vld [vmem:[%s14237_s0 + $0x190] sm:$0xff] }
 0x119   :  { %v837_v17 = vpop.f32.mrf.mxu1  ;;  %v1837_v18 = vpop.f32.mrf.mxu3 }
 0x11a   :  { %v9882_v21 = vadd.f32 %v1837_v18, %v1464_v13  ;;  %v838_v36 = vadd.f32 %v837_v17, %v433_v53 }
 0x11b   :  { %8397 = vmatmul.msk.f32.gmra.mxu0 %vm168_vm1, %v8331_v15 }
 0x11c   :  { %8460 = vmatmul.msk.f32.gmra.mxu1 %vm168_vm1, %v69_v19  ;;  %8589 = vmatmul.msk.f32.gmra.mxu2 %vm168_vm1, %v8330_v4 }
 0x11e   :  { %8719 = vmatmul.msk.f32.gmra.mxu3 %vm168_vm1, %v8653_v22 }
 0x11f   :  { %v1305_v25 = vpop.f32.mrf.mxu2 }
 0x120   :  { %v1465_v26 = vadd.f32 %v1305_v25, %v835_v23  ;;  %v442_v27 = vpop.f32.mrf.mxu0  ;;  %v8658_v25 = vld [vmem:[%s14237_s0 + $0x198] sm:$0xff] }
 0x121   :  { %v840_v28 = vpop.f32.mrf.mxu1  ;;  %v1840_v30 = vpop.f32.mrf.mxu3 }
 0x122   :  { %v9891_v31 = vadd.f32 %v1840_v30, %v1465_v26 }
 0x123   :  { %8398 = vmatmul.msk.f32.gmra.mxu0 %vm168_vm1, %v8653_v22 }
 0x124   :  { %8461 = vmatmul.msk.f32.gmra.mxu1 %vm168_vm1, %v8328_v41  ;;  %8590 = vmatmul.msk.f32.gmra.mxu2 %vm168_vm1, %v8331_v15  ;;  %v841_v41 = vadd.f32 %v840_v28, %v436_v1 }
 0x126   :  { %8720 = vmatmul.msk.f32.gmra.mxu3 %vm168_vm1, %v8654_v34 }
 0x127   :  { %v1308_v39 = vpop.f32.mrf.mxu2 }
 0x128   :  { %v1466_v43 = vadd.f32 %v1308_v39, %v838_v36  ;;  %v445_v44 = vpop.f32.mrf.mxu0 }
 0x129   :  { %v843_v49 = vpop.f32.mrf.mxu1  ;;  %v1843_v50 = vpop.f32.mrf.mxu3 }
 0x12a   :  { %v9900_v51 = vadd.f32 %v1843_v50, %v1466_v43  ;;  %v8659_v43 = vld [vmem:[%s14237_s0 + $0x1a0] sm:$0xff] }
 0x12b   :  { %8399 = vmatmul.msk.f32.gmra.mxu0 %vm168_vm1, %v8654_v34 }
 0x12c   :  { %8462 = vmatmul.msk.f32.gmra.mxu1 %vm168_vm1, %v8329_v54  ;;  %8591 = vmatmul.msk.f32.gmra.mxu2 %vm168_vm1, %v8653_v22  ;;  %v844_v54 = vadd.f32 %v843_v49, %v439_v14 }
 0x12e   :  { %8721 = vmatmul.msk.f32.gmra.mxu3 %vm168_vm1, %v8655_v52 }
 0x12f   :  { %v1311_v53 = vpop.f32.mrf.mxu2 }
 0x130   :  { %v1467_v55 = vadd.f32 %v1311_v53, %v841_v41  ;;  %v448_v59 = vpop.f32.mrf.mxu0 }
 0x131   :  { %v846_v58 = vpop.f32.mrf.mxu1  ;;  %v1846_v61 = vpop.f32.mrf.mxu3 }
 0x132   :  { %v9909_v62 = vadd.f32 %v1846_v61, %v1467_v55 }
 0x133   :  { %8400 = vmatmul.msk.f32.gmra.mxu0 %vm168_vm1, %v8655_v52 }
 0x134   :  { %8463 = vmatmul.msk.f32.gmra.mxu1 %vm168_vm1, %v8330_v4  ;;  %8592 = vmatmul.msk.f32.gmra.mxu2 %vm168_vm1, %v8654_v34  ;;  %v847_v4 = vadd.f32 %v846_v58, %v442_v27  ;;  %v8660_v58 = vld [vmem:[%s14237_s0 + $0x1a8] sm:$0xff] }
 0x136   :  { %8722 = vmatmul.msk.f32.gmra.mxu3 %vm168_vm1, %v8656_v63 }
 0x137   :  { %v1314_v1 = vpop.f32.mrf.mxu2 }
 0x138   :  { %v1468_v5 = vadd.f32 %v1314_v1, %v844_v54  ;;  %v451_v6 = vpop.f32.mrf.mxu0 }
 0x139   :  { %v849_v7 = vpop.f32.mrf.mxu1  ;;  %v1849_v3 = vpop.f32.mrf.mxu3 }
 0x13a   :  { %v9918_v10 = vadd.f32 %v1849_v3, %v1468_v5  ;;  %v8661_v3 = vld [vmem:[%s14237_s0 + $0x1b0] sm:$0xff] }
 0x13b   :  { %8401 = vmatmul.msk.f32.gmra.mxu0 %vm168_vm1, %v8656_v63 }
 0x13c   :  { %8464 = vmatmul.msk.f32.gmra.mxu1 %vm168_vm1, %v8331_v15  ;;  %8593 = vmatmul.msk.f32.gmra.mxu2 %vm168_vm1, %v8655_v52  ;;  %v850_v15 = vadd.f32 %v849_v7, %v445_v44 }
 0x13e   :  { %8723 = vmatmul.msk.f32.gmra.mxu3 %vm168_vm1, %v8657_v12 }
 0x13f   :  { %v1317_v13 = vpop.f32.mrf.mxu2 }
 0x140   :  { %v1469_v14 = vadd.f32 %v1317_v13, %v847_v4  ;;  %v454_v17 = vpop.f32.mrf.mxu0 }
 0x141   :  { %v852_v18 = vpop.f32.mrf.mxu1  ;;  %v1852_v19 = vpop.f32.mrf.mxu3 }
 0x142   :  { %v9927_v23 = vadd.f32 %v1852_v19, %v1469_v14 }
 0x143   :  { %8402 = vmatmul.msk.f32.gmra.mxu0 %vm168_vm1, %v8657_v12 }
 0x144   :  { %8465 = vmatmul.msk.f32.gmra.mxu1 %vm168_vm1, %v8653_v22  ;;  %8594 = vmatmul.msk.f32.gmra.mxu2 %vm168_vm1, %v8656_v63  ;;  %v853_v22 = vadd.f32 %v852_v18, %v448_v59 }
 0x146   :  { %8724 = vmatmul.msk.f32.gmra.mxu3 %vm168_vm1, %v8658_v25 }
 0x147   :  { %v1320_v26 = vpop.f32.mrf.mxu2 }
 0x148   :  { %v1470_v27 = vadd.f32 %v1320_v26, %v850_v15  ;;  %v457_v28 = vpop.f32.mrf.mxu0  ;;  %v8662_v15 = vld [vmem:[%s14237_s0 + $0x1b8] sm:$0xff] }
 0x149   :  { %v855_v30 = vpop.f32.mrf.mxu1  ;;  %v1855_v36 = vpop.f32.mrf.mxu3 }
 0x14a   :  { %v9936_v39 = vadd.f32 %v1855_v36, %v1470_v27 }
 0x14b   :  { %8403 = vmatmul.msk.f32.gmra.mxu0 %vm168_vm1, %v8658_v25 }
 0x14c   :  { %14370 = vst [vmem:[#allocation15_spill] sm:$0xff] %v9936_v39  ;;  %8466 = vmatmul.msk.f32.gmra.mxu1 %vm168_vm1, %v8654_v34  ;;  %8595 = vmatmul.msk.f32.gmra.mxu2 %vm168_vm1, %v8657_v12  ;;  %v856_v34 = vadd.f32 %v855_v30, %v451_v6 }
 0x14e   :  { %8725 = vmatmul.msk.f32.gmra.mxu3 %vm168_vm1, %v8659_v43 }
 0x14f   :  { %v1323_v44 = vpop.f32.mrf.mxu2 }
 0x150   :  { %v1471_v49 = vadd.f32 %v1323_v44, %v853_v22  ;;  %v460_v50 = vpop.f32.mrf.mxu0  ;;  %v8663_v44 = vld [vmem:[%s14237_s0 + $0x1c0] sm:$0xff] }
 0x151   :  { %v858_v41 = vpop.f32.mrf.mxu1  ;;  %v1858_v53 = vpop.f32.mrf.mxu3 }
 0x152   :  { %v9945_v55 = vadd.f32 %v1858_v53, %v1471_v49 }
 0x153   :  { %8404 = vmatmul.msk.f32.gmra.mxu0 %vm168_vm1, %v8659_v43 }
 0x154   :  { %14371 = vst [vmem:[#allocation16_spill] sm:$0xff] %v9945_v55  ;;  %8467 = vmatmul.msk.f32.gmra.mxu1 %vm168_vm1, %v8655_v52  ;;  %8596 = vmatmul.msk.f32.gmra.mxu2 %vm168_vm1, %v8658_v25  ;;  %v859_v52 = vadd.f32 %v858_v41, %v454_v17  ;;  %v8789_v55 = vld [vmem:[%s14237_s0 + $0x1b0] sm:$0xff] }
 0x156   :  { %8726 = vmatmul.msk.f32.gmra.mxu3 %vm168_vm1, %v8660_v58 }
 0x157   :  { %v1326_v59 = vpop.f32.mrf.mxu2 }
 0x158   :  { %v1472_v61 = vadd.f32 %v1326_v59, %v856_v34  ;;  %v463_v54 = vpop.f32.mrf.mxu0 }
 0x159   :  { %v861_v1 = vpop.f32.mrf.mxu1  ;;  %v1861_v5 = vpop.f32.mrf.mxu3 }
 0x15a   :  { %v9954_v7 = vadd.f32 %v1861_v5, %v1472_v61  ;;  %v8664_v61 = vld [vmem:[%s14237_s0 + $0x1c8] sm:$0xff] }
 0x15b   :  { %8405 = vmatmul.msk.f32.gmra.mxu0 %vm168_vm1, %v8660_v58 }
 0x15c   :  { %14372 = vst [vmem:[#allocation17_spill] sm:$0xff] %v9954_v7  ;;  %8468 = vmatmul.msk.f32.gmra.mxu1 %vm168_vm1, %v8656_v63  ;;  %8597 = vmatmul.msk.f32.gmra.mxu2 %vm168_vm1, %v8659_v43  ;;  %v862_v63 = vadd.f32 %v861_v1, %v457_v28 }
 0x15e   :  { %8727 = vmatmul.msk.f32.gmra.mxu3 %vm168_vm1, %v8661_v3 }
 0x15f   :  { %v1329_v6 = vpop.f32.mrf.mxu2 }
 0x160   :  { %v1473_v4 = vadd.f32 %v1329_v6, %v859_v52  ;;  %v466_v13 = vpop.f32.mrf.mxu0 }
 0x161   :  { %v864_v14 = vpop.f32.mrf.mxu1  ;;  %v1864_v18 = vpop.f32.mrf.mxu3 }
 0x162   :  { %v9963_v19 = vadd.f32 %v1864_v18, %v1473_v4 }
 0x163   :  { %8406 = vmatmul.msk.f32.gmra.mxu0 %vm168_vm1, %v8661_v3 }
 0x164   :  { %14373 = vst [vmem:[#allocation18_spill] sm:$0xff] %v9963_v19  ;;  %8469 = vmatmul.msk.f32.gmra.mxu1 %vm168_vm1, %v8657_v12  ;;  %8598 = vmatmul.msk.f32.gmra.mxu2 %vm168_vm1, %v8660_v58  ;;  %v865_v12 = vadd.f32 %v864_v14, %v460_v50  ;;  %v8665_v14 = vld [vmem:[%s14237_s0 + $0x1d0] sm:$0xff] }
 0x166   :  { %8728 = vmatmul.msk.f32.gmra.mxu3 %vm168_vm1, %v8662_v15 }
 0x167   :  { %v1332_v17 = vpop.f32.mrf.mxu2 }
 0x168   :  { %v1474_v26 = vadd.f32 %v1332_v17, %v862_v63  ;;  %v469_v27 = vpop.f32.mrf.mxu0 }
 0x169   :  { %v867_v30 = vpop.f32.mrf.mxu1  ;;  %v1867_v36 = vpop.f32.mrf.mxu3 }
 0x16a   :  { %v9972_v22 = vadd.f32 %v1867_v36, %v1474_v26  ;;  %v8666_v36 = vld [vmem:[%s14237_s0 + $0x1d8] sm:$0xff] }
 0x16b   :  { %8407 = vmatmul.msk.f32.gmra.mxu0 %vm168_vm1, %v8662_v15 }
 0x16c   :  { %14374 = vst [vmem:[#allocation19_spill] sm:$0xff] %v9972_v22  ;;  %8470 = vmatmul.msk.f32.gmra.mxu1 %vm168_vm1, %v8658_v25  ;;  %8599 = vmatmul.msk.f32.gmra.mxu2 %vm168_vm1, %v8661_v3  ;;  %v868_v25 = vadd.f32 %v867_v30, %v463_v54  ;;  %v8916_v22 = vld [vmem:[%s14241_s4 + $0x28] sm:$0xff] }
 0x16d   :  { %4179 = vmatpush.msra.mxu3 %v8916_v22  ;;  %v8790_v22 = vld [vmem:[%s14237_s0 + $0x1b8] sm:$0xff] }
 0x16e   :  { %8729 = vmatmul.msk.f32.gmra.mxu3 %vm168_vm1, %v8663_v44 }
 0x16f   :  { %v1335_v28 = vpop.f32.mrf.mxu2 }
 0x170   :  { %v1475_v49 = vadd.f32 %v1335_v28, %v865_v12  ;;  %v472_v41 = vpop.f32.mrf.mxu0 }
 0x171   :  { %v870_v53 = vpop.f32.mrf.mxu1  ;;  %v1870_v34 = vpop.f32.mrf.mxu3 }
 0x172   :  { %v9981_v59 = vadd.f32 %v1870_v34, %v1475_v49 }
 0x173   :  { %8408 = vmatmul.msk.f32.gmra.mxu0 %vm168_vm1, %v8663_v44 }
 0x174   :  { %14375 = vst [vmem:[#allocation20_spill] sm:$0xff] %v9981_v59  ;;  %8471 = vmatmul.msk.f32.gmra.mxu1 %vm168_vm1, %v8659_v43  ;;  %8600 = vmatmul.msk.f32.gmra.mxu2 %vm168_vm1, %v8662_v15  ;;  %v871_v43 = vadd.f32 %v870_v53, %v466_v13 }
 0x176   :  { %8730 = vmatmul.msk.f32.gmra.mxu3 %vm168_vm1, %v8664_v61 }
 0x177   :  { %v1338_v50 = vpop.f32.mrf.mxu2 }
 0x178   :  { %v1476_v1 = vadd.f32 %v1338_v50, %v868_v25  ;;  %v475_v5 = vpop.f32.mrf.mxu0  ;;  %v8667_v25 = vld [vmem:[%s14237_s0 + $0x1e0] sm:$0xff] }
 0x179   :  { %v873_v52 = vpop.f32.mrf.mxu1  ;;  %v1873_v6 = vpop.f32.mrf.mxu3 }
 0x17a   :  { %v9990_v4 = vadd.f32 %v1873_v6, %v1476_v1 }
 0x17b   :  { %8409 = vmatmul.msk.f32.gmra.mxu0 %vm168_vm1, %v8664_v61 }
 0x17c   :  { %14376 = vst [vmem:[#allocation21_spill] sm:$0xff] %v9990_v4  ;;  %8472 = vmatmul.msk.f32.gmra.mxu1 %vm168_vm1, %v8660_v58  ;;  %8601 = vmatmul.msk.f32.gmra.mxu2 %vm168_vm1, %v8663_v44  ;;  %v874_v58 = vadd.f32 %v873_v52, %v469_v27 }
 0x17e   :  { %8731 = vmatmul.msk.f32.gmra.mxu3 %vm168_vm1, %v8665_v14 }
 0x17f   :  { %v1341_v54 = vpop.f32.mrf.mxu2 }
 0x180   :  { %v1477_v18 = vadd.f32 %v1341_v54, %v871_v43  ;;  %v478_v63 = vpop.f32.mrf.mxu0  ;;  %v8668_v54 = vld [vmem:[%s14237_s0 + $0x1e8] sm:$0xff] }
 0x181   :  { %v876_v17 = vpop.f32.mrf.mxu1  ;;  %v1876_v26 = vpop.f32.mrf.mxu3 }
 0x182   :  { %v9999_v30 = vadd.f32 %v1876_v26, %v1477_v18 }
 0x183   :  { %8410 = vmatmul.msk.f32.gmra.mxu0 %vm168_vm1, %v8665_v14 }
 0x184   :  { %14377 = vst [vmem:[#allocation22_spill] sm:$0xff] %v9999_v30  ;;  %8473 = vmatmul.msk.f32.gmra.mxu1 %vm168_vm1, %v8661_v3  ;;  %8602 = vmatmul.msk.f32.gmra.mxu2 %vm168_vm1, %v8664_v61  ;;  %v877_v3 = vadd.f32 %v876_v17, %v472_v41 }
 0x186   :  { %8732 = vmatmul.msk.f32.gmra.mxu3 %vm168_vm1, %v8666_v36 }
 0x187   :  { %v1344_v13 = vpop.f32.mrf.mxu2 }
 0x188   :  { %v1478_v12 = vadd.f32 %v1344_v13, %v874_v58  ;;  %v481_v28 = vpop.f32.mrf.mxu0 }
 0x189   :  { %v879_v49 = vpop.f32.mrf.mxu1  ;;  %v1879_v53 = vpop.f32.mrf.mxu3 }
 0x18a   :  { %v10008_v34 = vadd.f32 %v1879_v53, %v1478_v12  ;;  %v8669_v12 = vld [vmem:[%s14237_s0 + $0x1f0] sm:$0xff] }
 0x18b   :  { %8411 = vmatmul.msk.f32.gmra.mxu0 %vm168_vm1, %v8666_v36 }
 0x18c   :  { %14378 = vst [vmem:[#allocation23_spill] sm:$0xff] %v10008_v34  ;;  %8474 = vmatmul.msk.f32.gmra.mxu1 %vm168_vm1, %v8662_v15  ;;  %8603 = vmatmul.msk.f32.gmra.mxu2 %vm168_vm1, %v8665_v14  ;;  %v880_v15 = vadd.f32 %v879_v49, %v475_v5 }
 0x18e   :  { %8733 = vmatmul.msk.f32.gmra.mxu3 %vm168_vm1, %v8667_v25 }
 0x18f   :  { %v1347_v27 = vpop.f32.mrf.mxu2 }
 0x190   :  { %v1479_v50 = vadd.f32 %v1347_v27, %v877_v3  ;;  %v484_v1 = vpop.f32.mrf.mxu0 }
 0x191   :  { %v882_v52 = vpop.f32.mrf.mxu1  ;;  %v1882_v6 = vpop.f32.mrf.mxu3 }
 0x192   :  { %v10017_v43 = vadd.f32 %v1882_v6, %v1479_v50  ;;  %v8670_v6 = vld [vmem:[%s14237_s0 + $0x1f8] sm:$0xff] }
 0x193   :  { %8412 = vmatmul.msk.f32.gmra.mxu0 %vm168_vm1, %v8667_v25 }
 0x194   :  { %14379 = vst [vmem:[#allocation24_spill] sm:$0xff] %v10017_v43  ;;  %8475 = vmatmul.msk.f32.gmra.mxu1 %vm168_vm1, %v8663_v44  ;;  %8604 = vmatmul.msk.f32.gmra.mxu2 %vm168_vm1, %v8666_v36  ;;  %v883_v44 = vadd.f32 %v882_v52, %v478_v63 }
 0x196   :  { %8734 = vmatmul.msk.f32.gmra.mxu3 %vm168_vm1, %v8668_v54 }
 0x197   :  { %v1350_v41 = vpop.f32.mrf.mxu2 }
 0x198   :  { %v1480_v18 = vadd.f32 %v1350_v41, %v880_v15  ;;  %v487_v17 = vpop.f32.mrf.mxu0 }
 0x199   :  { %v885_v26 = vpop.f32.mrf.mxu1  ;;  %v1885_v58 = vpop.f32.mrf.mxu3 }
 0x19a   :  { %v10026_v13 = vadd.f32 %v1885_v58, %v1480_v18 }
 0x19b   :  { %8413 = vmatmul.msk.f32.gmra.mxu0 %vm168_vm1, %v8668_v54 }
 0x19c   :  { %14380 = vst [vmem:[#allocation25_spill] sm:$0xff] %v10026_v13  ;;  %8476 = vmatmul.msk.f32.gmra.mxu1 %vm168_vm1, %v8664_v61  ;;  %8605 = vmatmul.msk.f32.gmra.mxu2 %vm168_vm1, %v8667_v25  ;;  %v886_v61 = vadd.f32 %v885_v26, %v481_v28 }
 0x19e   :  { %8735 = vmatmul.msk.f32.gmra.mxu3 %vm168_vm1, %v8669_v12 }
 0x19f   :  { %v1353_v5 = vpop.f32.mrf.mxu2 }
 0x1a0   :  { %v1481_v49 = vadd.f32 %v1353_v5, %v883_v44  ;;  %v490_v53 = vpop.f32.mrf.mxu0  ;;  %v10050_v44 = vld [vmem:[%s14237_s0 + $0x200] sm:$0xff] }
 0x1a1   :  { %v888_v3 = vpop.f32.mrf.mxu1  ;;  %v1888_v27 = vpop.f32.mrf.mxu3 }
 0x1a2   :  { %v10035_v50 = vadd.f32 %v1888_v27, %v1481_v49 }
 0x1a3   :  { %8414 = vmatmul.msk.f32.gmra.mxu0 %vm168_vm1, %v8669_v12 }
 0x1a4   :  { %14381 = vst [vmem:[#allocation26_spill] sm:$0xff] %v10035_v50  ;;  %8477 = vmatmul.msk.f32.gmra.mxu1 %vm168_vm1, %v8665_v14  ;;  %8606 = vmatmul.msk.f32.gmra.mxu2 %vm168_vm1, %v8668_v54  ;;  %v889_v14 = vadd.f32 %v888_v3, %v484_v1 }
 0x1a6   :  { %8736 = vmatmul.msk.f32.gmra.mxu3 %vm168_vm1, %v8670_v6 }
 0x1a7   :  { %v1356_v63 = vpop.f32.mrf.mxu2 }
 0x1a8   :  { %v1482_v52 = vadd.f32 %v1356_v63, %v886_v61  ;;  %v493_v15 = vpop.f32.mrf.mxu0  ;;  %v10063_v61 = vld [vmem:[%s14237_s0 + $0x208] sm:$0xff] }
 0x1a9   :  { %v1891_v41 = vpop.f32.mrf.mxu3  ;;  %v891_v58 = vpop.f32.mrf.mxu1 }
 0x1aa   :  { %v10044_v18 = vadd.f32 %v1891_v41, %v1482_v52  ;;  %v892_v1 = vadd.f32 %v891_v58, %v487_v17 }
 0x1ab   :  { %8415 = vmatmul.msk.f32.gmra.mxu0 %vm168_vm1, %v8670_v6 }
 0x1ac   :  { %14382 = vst [vmem:[#allocation27_spill] sm:$0xff] %v10044_v18  ;;  %8478 = vmatmul.msk.f32.gmra.mxu1 %vm168_vm1, %v8666_v36  ;;  %8607 = vmatmul.msk.f32.gmra.mxu2 %vm168_vm1, %v8669_v12 }
 0x1ae   :  { %8737 = vmatmul.msk.f32.gmra.mxu3 %vm168_vm1, %v10050_v44 }
 0x1af   :  { %v1359_v28 = vpop.f32.mrf.mxu2 }
 0x1b0   :  { %v1483_v26 = vadd.f32 %v1359_v28, %v889_v14  ;;  %v496_v5 = vpop.f32.mrf.mxu0 }
 0x1b1   :  { %v1894_v49 = vpop.f32.mrf.mxu3  ;;  %v894_v36 = vpop.f32.mrf.mxu1 }
 0x1b2   :  { %v10056_v27 = vadd.f32 %v1894_v49, %v1483_v26  ;;  %v895_v17 = vadd.f32 %v894_v36, %v490_v53 }
 0x1b3   :  { %8416 = vmatmul.msk.f32.gmra.mxu0 %vm168_vm1, %v10050_v44 }
 0x1b4   :  { %14383 = vst [vmem:[#allocation28_spill] sm:$0xff] %v10056_v27  ;;  %8479 = vmatmul.msk.f32.gmra.mxu1 %vm168_vm1, %v8667_v25  ;;  %8608 = vmatmul.msk.f32.gmra.mxu2 %vm168_vm1, %v8670_v6  ;;  %v10076_v25 = vld [vmem:[%s14237_s0 + $0x210] sm:$0xff] }
 0x1b6   :  { %8738 = vmatmul.msk.f32.gmra.mxu3 %vm168_vm1, %v10063_v61 }
 0x1b7   :  { %v1362_v3 = vpop.f32.mrf.mxu2 }
 0x1b8   :  { %v1484_v63 = vadd.f32 %v1362_v3, %v892_v1  ;;  %v499_v52 = vpop.f32.mrf.mxu0  ;;  %v8751_v1 = vld [vmem:[%s14237_s0 + $0x40] sm:$0xff] }
 0x1b9   :  { %v1897_v41 = vpop.f32.mrf.mxu3  ;;  %v897_v58 = vpop.f32.mrf.mxu1 }
 0x1ba   :  { %v10069_v14 = vadd.f32 %v1897_v41, %v1484_v63  ;;  %v898_v53 = vadd.f32 %v897_v58, %v493_v15 }
 0x1bb   :  { %8417 = vmatmul.msk.f32.gmra.mxu0 %vm168_vm1, %v10063_v61 }
 0x1bc   :  { %14384 = vst [vmem:[#allocation29_spill] sm:$0xff] %v10069_v14  ;;  %8480 = vmatmul.msk.f32.gmra.mxu1 %vm168_vm1, %v8668_v54  ;;  %8609 = vmatmul.msk.f32.gmra.mxu2 %vm168_vm1, %v10050_v44  ;;  %v10094_v54 = vld [vmem:[%s14237_s0 + $0x218] sm:$0xff] }
 0x1be   :  { %8739 = vmatmul.msk.f32.gmra.mxu3 %vm168_vm1, %v10076_v25 }
 0x1bf   :  { %v1365_v28 = vpop.f32.mrf.mxu2 }
 0x1c0   :  { %v1485_v26 = vadd.f32 %v1365_v28, %v895_v17  ;;  %v10083_v49 = vpop.f32.mrf.mxu0  ;;  %v8752_v28 = vld [vmem:[%s14237_s0 + $0x48] sm:$0xff] }
 0x1c1   :  { %14385 = vst [vmem:[#allocation30_spill] sm:$0xff] %v10083_v49  ;;  %v1900_v3 = vpop.f32.mrf.mxu3 }
 0x1c2   :  { %v10088_v63 = vadd.f32 %v1900_v3, %v1485_v26  ;;  %v900_v26 = vpop.f32.mrf.mxu1 }
 0x1c3   :  { %8817 = vmatmul.msk.f32.vlgmr.msrb.gmra.mxu0 %vm168_vm1, %v8751_v1  ;;  %v901_v15 = vadd.f32 %v900_v26, %v496_v5 }
 0x1c4   :  { %14386 = vst [vmem:[#allocation31_spill] sm:$0xff] %v10088_v63  ;;  %8481 = vmatmul.msk.f32.gmra.mxu1 %vm168_vm1, %v8669_v12  ;;  %8610 = vmatmul.msk.f32.gmra.mxu2 %vm168_vm1, %v10063_v61  ;;  %v10112_v12 = vld [vmem:[%s14237_s0 + $0x220] sm:$0xff] }
 0x1c6   :  { %8740 = vmatmul.msk.f32.gmra.mxu3 %vm168_vm1, %v10094_v54 }
 0x1c7   :  { %v1368_v36 = vpop.f32.mrf.mxu2 }
 0x1c8   :  { %v1486_v41 = vadd.f32 %v1368_v36, %v898_v53  ;;  %v10101_v17 = vpop.f32.mrf.mxu0 }
 0x1c9   :  { %14387 = vst [vmem:[#allocation32_spill] sm:$0xff] %v10101_v17  ;;  %v1903_v1 = vpop.f32.mrf.mxu3 }
 0x1ca   :  { %v10106_v3 = vadd.f32 %v1903_v1, %v1486_v41  ;;  %v8753_v41 = vld [vmem:[%s14237_s0 + $0x50] sm:$0xff]  ;;  %v903_v47 = vpop.f32.mrf.mxu1 }
 0x1cb   :  { %8818 = vmatmul.msk.f32.gmra.mxu0 %vm168_vm1, %v8752_v28  ;;  %v904_v5 = vadd.f32 %v903_v47, %v499_v52  ;;  %v10149_v47 = vld [vmem:[%s14237_s0 + $0x230] sm:$0xff] }
 0x1cc   :  { %14388 = vst [vmem:[#allocation33_spill] sm:$0xff] %v10106_v3  ;;  %8482 = vmatmul.msk.f32.gmra.mxu1 %vm168_vm1, %v8670_v6  ;;  %8611 = vmatmul.msk.f32.gmra.mxu2 %vm168_vm1, %v10076_v25  ;;  %v10130_v6 = vld [vmem:[%s14237_s0 + $0x228] sm:$0xff] }
 0x1ce   :  { %8741 = vmatmul.msk.f32.gmra.mxu3 %vm168_vm1, %v10112_v12 }
 0x1cf   :  { %v1371_v58 = vpop.f32.mrf.mxu2 }
 0x1d0   :  { %v1487_v53 = vadd.f32 %v1371_v58, %v901_v15  ;;  %v10119_v36 = vpop.f32.mrf.mxu0 }
 0x1d1   :  { %14389 = vst [vmem:[#allocation34_spill] sm:$0xff] %v10119_v36  ;;  %v1906_v28 = vpop.f32.mrf.mxu3 }
 0x1d2   :  { %v10124_v1 = vadd.f32 %v1906_v28, %v1487_v53  ;;  %v8754_v53 = vld [vmem:[%s14237_s0 + $0x58] sm:$0xff] }
 0x1d3   :  { %8819 = vmatmul.msk.f32.gmra.mxu0 %vm168_vm1, %v8753_v41 }
 0x1d4   :  { %14390 = vst [vmem:[#allocation35_spill] sm:$0xff] %v10124_v1  ;;  %8483 = vmatmul.msk.f32.gmra.mxu1 %vm168_vm1, %v10050_v44  ;;  %8612 = vmatmul.msk.f32.gmra.mxu2 %vm168_vm1, %v10094_v54 }
 0x1d6   :  { %8742 = vmatmul.msk.f32.gmra.mxu3 %vm168_vm1, %v10130_v6 }
 0x1d7   :  { %v1374_v26 = vpop.f32.mrf.mxu2 }
 0x1d8   :  { %v1488_v15 = vadd.f32 %v1374_v26, %v904_v5  ;;  %v10138_v58 = vpop.f32.mrf.mxu0  ;;  %v8755_v5 = vld [vmem:[%s14237_s0 + $0x60] sm:$0xff]  ;;  %v10166_v26 = vld [vmem:[%s14237_s0 + $0x238] sm:$0xff] }
 0x1d9   :  { %14391 = vst [vmem:[#allocation36_spill] sm:$0xff] %v10138_v58  ;;  %v1909_v41 = vpop.f32.mrf.mxu3 }
 0x1da   :  { %v10143_v28 = vadd.f32 %v1909_v41, %v1488_v15  ;;  %v10183_v41 = vld [vmem:[%s14237_s0 + $0x240] sm:$0xff] }
 0x1db   :  { %8820 = vmatmul.msk.f32.gmra.mxu0 %vm168_vm1, %v8754_v53  ;;  %v8756_v53 = vld [vmem:[%s14237_s0 + $0x68] sm:$0xff] }
 0x1dc   :  { %14392 = vst [vmem:[#allocation37_spill] sm:$0xff] %v10143_v28  ;;  %8484 = vmatmul.msk.f32.gmra.mxu1 %vm168_vm1, %v10063_v61  ;;  %8613 = vmatmul.msk.f32.gmra.mxu2 %vm168_vm1, %v10112_v12 }
 0x1de   :  { %8743 = vmatmul.msk.f32.gmra.mxu3 %vm168_vm1, %v10149_v47 }
 0x1e0   :  { %v10157_v52 = vpop.f32.mrf.mxu0 }
 0x1e1   :  { %14393 = vst [vmem:[#allocation38_spill] sm:$0xff] %v10157_v52 }
 0x1e3   :  { %8821 = vmatmul.msk.f32.gmra.mxu0 %vm168_vm1, %v8755_v5 }
 0x1e4   :  { %8485 = vmatmul.msk.f32.gmra.mxu1 %vm168_vm1, %v10076_v25  ;;  %8614 = vmatmul.msk.f32.gmra.mxu2 %vm168_vm1, %v10130_v6 }
 0x1e6   :  { %8744 = vmatmul.msk.f32.gmra.mxu3 %vm168_vm1, %v10166_v26 }
 0x1e8   :  { %v10174_v15 = vpop.f32.mrf.mxu0 }
 0x1e9   :  { %14394 = vst [vmem:[#allocation39_spill] sm:$0xff] %v10174_v15 }
 0x1eb   :  { %8822 = vmatmul.msk.f32.gmra.mxu0 %vm168_vm1, %v8756_v53  ;;  %v8757_v53 = vld [vmem:[%s14237_s0 + $0x70] sm:$0xff] }
 0x1ec   :  { %8486 = vmatmul.msk.f32.gmra.mxu1 %vm168_vm1, %v10094_v54  ;;  %8615 = vmatmul.msk.f32.gmra.mxu2 %vm168_vm1, %v10149_v47 }
 0x1ee   :  { %8745 = vmatmul.msk.f32.gmra.mxu3 %vm168_vm1, %v10183_v41 }
 0x1f0   :  { %v10191_v5 = vpop.f32.mrf.mxu0 }
 0x1f1   :  { %14395 = vst [vmem:[#allocation40_spill] sm:$0xff] %v10191_v5  ;;  %v8763_v5 = vld [vmem:[%s14237_s0 + $0xa0] sm:$0xff] }
 0x1f3   :  { %8823 = vmatmul.msk.f32.gmra.mxu0 %vm168_vm1, %v8757_v53  ;;  %v8758_v53 = vld [vmem:[%s14237_s0 + $0x78] sm:$0xff] }
 0x1f4   :  { %8487 = vmatmul.msk.f32.gmra.mxu1 %vm168_vm1, %v10112_v12  ;;  %8616 = vmatmul.msk.f32.gmra.mxu2 %vm168_vm1, %v10166_v26 }
 0x1f6   :  { %8746 = vmatmul.msk.f32.gmra.mxu3 %vm168_vm1, %v10200_v42 }
 0x1f8   :  { %v10208_v38 = vpop.f32.mrf.mxu0 }
 0x1f9   :  { %14396 = vst [vmem:[#allocation41_spill] sm:$0xff] %v10208_v38 }
 0x1fb   :  { %8824 = vmatmul.msk.f32.gmra.mxu0 %vm168_vm1, %v8758_v53  ;;  %v8759_v53 = vld [vmem:[%s14237_s0 + $0x80] sm:$0xff] }
 0x1fc   :  { %8488 = vmatmul.msk.f32.gmra.mxu1 %vm168_vm1, %v10130_v6  ;;  %8617 = vmatmul.msk.f32.gmra.mxu2 %vm168_vm1, %v10183_v41 }
 0x1fe   :  { %8747 = vmatmul.msk.f32.gmra.mxu3 %vm168_vm1, %v10217_v45 }
 0x200   :  { %v10225_v40 = vpop.f32.mrf.mxu0 }
 0x201   :  { %14397 = vst [vmem:[#allocation42_spill] sm:$0xff] %v10225_v40  ;;  %v10268_v40 = vld [vmem:[%s14237_s0 + $0x268] sm:$0xff] }
 0x203   :  { %8825 = vmatmul.msk.f32.gmra.mxu0 %vm168_vm1, %v8759_v53  ;;  %v8760_v53 = vld [vmem:[%s14237_s0 + $0x88] sm:$0xff] }
 0x204   :  { %8489 = vmatmul.msk.f32.gmra.mxu1 %vm168_vm1, %v10149_v47  ;;  %8618 = vmatmul.msk.f32.gmra.mxu2 %vm168_vm1, %v10200_v42 }
 0x206   :  { %8748 = vmatmul.msk.f32.gmra.mxu3 %vm168_vm1, %v10234_v35 }
 0x208   :  { %v10242_v37 = vpop.f32.mrf.mxu0 }
 0x209   :  { %14398 = vst [vmem:[#allocation43_spill] sm:$0xff] %v10242_v37 }
 0x20b   :  { %8826 = vmatmul.msk.f32.gmra.mxu0 %vm168_vm1, %v8760_v53  ;;  %v8761_v53 = vld [vmem:[%s14237_s0 + $0x90] sm:$0xff] }
 0x20c   :  { %8490 = vmatmul.msk.f32.gmra.mxu1 %vm168_vm1, %v10166_v26  ;;  %8619 = vmatmul.msk.f32.gmra.mxu2 %vm168_vm1, %v10217_v45 }
 0x20e   :  { %8749 = vmatmul.msk.f32.gmra.mxu3 %vm168_vm1, %v10251_v33 }
 0x210   :  { %v10259_v37 = vpop.f32.mrf.mxu0 }
 0x211   :  { %14399 = vst [vmem:[#allocation44_spill] sm:$0xff] %v10259_v37  ;;  %v8762_v37 = vld [vmem:[%s14237_s0 + $0x98] sm:$0xff] }
 0x213   :  { %8827 = vmatmul.msk.f32.gmra.mxu0 %vm168_vm1, %v8761_v53 }
 0x214   :  { %8620 = vmatmul.msk.f32.gmra.mxu2 %vm168_vm1, %v10234_v35 }
 0x216   :  { %8750 = vmatmul.msk.f32.gmra.mxu3 %vm168_vm1, %v10268_v40 }
 0x218   :  { %v10274_v38 = vpop.f32.mrf.mxu0 }
 0x219   :  { %14400 = vst [vmem:[#allocation45_spill] sm:$0xff] %v10274_v38  ;;  %v8764_v38 = vld [vmem:[%s14237_s0 + $0xa8] sm:$0xff] }
 0x21b   :  { %8828 = vmatmul.msk.f32.gmra.mxu0 %vm168_vm1, %v8762_v37  ;;  %v8765_v37 = vld [vmem:[%s14237_s0 + $0xb0] sm:$0xff] }
 0x220   :  { %v10280_v53 = vpop.f32.mrf.mxu0 }
 0x221   :  { %14401 = vst [vmem:[#allocation46_spill] sm:$0xff] %v10280_v53 }
 0x223   :  { %8829 = vmatmul.msk.f32.gmra.mxu0 %vm168_vm1, %v8763_v5  ;;  %v8766_v5 = vld [vmem:[%s14237_s0 + $0xb8] sm:$0xff] }
 0x228   :  { %v10286_v15 = vpop.f32.mrf.mxu0 }
 0x229   :  { %14402 = vst [vmem:[#allocation47_spill] sm:$0xff] %v10286_v15 }
 0x22b   :  { %8830 = vmatmul.msk.f32.gmra.mxu0 %vm168_vm1, %v8764_v38  ;;  %v8767_v38 = vld [vmem:[%s14237_s0 + $0xc0] sm:$0xff] }
 0x230   :  { %v10292_v52 = vpop.f32.mrf.mxu0 }
 0x231   :  { %14403 = vst [vmem:[#allocation48_spill] sm:$0xff] %v10292_v52 }
 0x233   :  { %8831 = vmatmul.msk.f32.gmra.mxu0 %vm168_vm1, %v8765_v37  ;;  %v8768_v37 = vld [vmem:[%s14237_s0 + $0xc8] sm:$0xff] }
 0x238   :  { %v10298_v53 = vpop.f32.mrf.mxu0 }
 0x239   :  { %14404 = vst [vmem:[#allocation49_spill] sm:$0xff] %v10298_v53 }
 0x23b   :  { %8832 = vmatmul.msk.f32.gmra.mxu0 %vm168_vm1, %v8766_v5  ;;  %v8769_v5 = vld [vmem:[%s14237_s0 + $0xd0] sm:$0xff] }
 0x240   :  { %v10304_v15 = vpop.f32.mrf.mxu0 }
 0x243   :  { %8833 = vmatmul.msk.f32.gmra.mxu0 %vm168_vm1, %v8767_v38  ;;  %v8770_v38 = vld [vmem:[%s14237_s0 + $0xd8] sm:$0xff] }
 0x248   :  { %v10310_v52 = vpop.f32.mrf.mxu0 }
 0x24b   :  { %8834 = vmatmul.msk.f32.gmra.mxu0 %vm168_vm1, %v8768_v37  ;;  %v8771_v37 = vld [vmem:[%s14237_s0 + $0xe0] sm:$0xff] }
 0x250   :  { %v10316_v53 = vpop.f32.mrf.mxu0 }
 0x253   :  { %8835 = vmatmul.msk.f32.gmra.mxu0 %vm168_vm1, %v8769_v5  ;;  %v8772_v5 = vld [vmem:[%s14237_s0 + $0xe8] sm:$0xff] }
 0x258   :  { %v10322_v28 = vpop.f32.mrf.mxu0 }
 0x25b   :  { %8836 = vmatmul.msk.f32.gmra.mxu0 %vm168_vm1, %v8770_v38  ;;  %v8773_v38 = vld [vmem:[%s14237_s0 + $0xf0] sm:$0xff] }
 0x260   :  { %v10328_v58 = vpop.f32.mrf.mxu0 }
 0x263   :  { %8837 = vmatmul.msk.f32.gmra.mxu0 %vm168_vm1, %v8771_v37  ;;  %v8774_v37 = vld [vmem:[%s14237_s0 + $0xf8] sm:$0xff] }
 0x268   :  { %v10334_v1 = vpop.f32.mrf.mxu0 }
 0x26b   :  { %8838 = vmatmul.msk.f32.gmra.mxu0 %vm168_vm1, %v8772_v5  ;;  %v8775_v5 = vld [vmem:[%s14237_s0 + $0x100] sm:$0xff] }
 0x270   :  { %v10340_v36 = vpop.f32.mrf.mxu0 }
 0x273   :  { %8839 = vmatmul.msk.f32.gmra.mxu0 %vm168_vm1, %v8773_v38  ;;  %v8776_v38 = vld [vmem:[%s14237_s0 + $0x108] sm:$0xff] }
 0x278   :  { %v10346_v3 = vpop.f32.mrf.mxu0 }
 0x27b   :  { %8840 = vmatmul.msk.f32.gmra.mxu0 %vm168_vm1, %v8774_v37  ;;  %v8777_v37 = vld [vmem:[%s14237_s0 + $0x110] sm:$0xff] }
 0x280   :  { %v10352_v17 = vpop.f32.mrf.mxu0 }
 0x283   :  { %8841 = vmatmul.msk.f32.gmra.mxu0 %vm168_vm1, %v8775_v5  ;;  %v8778_v5 = vld [vmem:[%s14237_s0 + $0x118] sm:$0xff] }
 0x288   :  { %v10358_v63 = vpop.f32.mrf.mxu0 }
 0x28b   :  { %8842 = vmatmul.msk.f32.gmra.mxu0 %vm168_vm1, %v8776_v38  ;;  %v8779_v38 = vld [vmem:[%s14237_s0 + $0x120] sm:$0xff] }
 0x290   :  { %v10364_v49 = vpop.f32.mrf.mxu0 }
 0x293   :  { %8843 = vmatmul.msk.f32.gmra.mxu0 %vm168_vm1, %v8777_v37  ;;  %v8780_v37 = vld [vmem:[%s14237_s0 + $0x128] sm:$0xff] }
 0x298   :  { %v10370_v14 = vpop.f32.mrf.mxu0 }
 0x29b   :  { %8844 = vmatmul.msk.f32.gmra.mxu0 %vm168_vm1, %v8778_v5  ;;  %v8781_v5 = vld [vmem:[%s14237_s0 + $0x130] sm:$0xff] }
 0x2a0   :  { %v10376_v27 = vpop.f32.mrf.mxu0 }
 0x2a3   :  { %8845 = vmatmul.msk.f32.gmra.mxu0 %vm168_vm1, %v8779_v38  ;;  %v8782_v38 = vld [vmem:[%s14237_s0 + $0x138] sm:$0xff] }
 0x2a8   :  { %v10382_v18 = vpop.f32.mrf.mxu0 }
 0x2ab   :  { %8846 = vmatmul.msk.f32.gmra.mxu0 %vm168_vm1, %v8780_v37  ;;  %v8783_v37 = vld [vmem:[%s14237_s0 + $0x180] sm:$0xff] }
 0x2b0   :  { %v10388_v50 = vpop.f32.mrf.mxu0 }
 0x2b3   :  { %8847 = vmatmul.msk.f32.gmra.mxu0 %vm168_vm1, %v8781_v5  ;;  %v8784_v5 = vld [vmem:[%s14237_s0 + $0x188] sm:$0xff] }
 0x2b8   :  { %v10394_v13 = vpop.f32.mrf.mxu0 }
 0x2bb   :  { %8848 = vmatmul.msk.f32.gmra.mxu0 %vm168_vm1, %v8782_v38  ;;  %v8785_v38 = vld [vmem:[%s14237_s0 + $0x190] sm:$0xff] }
 0x2c0   :  { %v10400_v43 = vpop.f32.mrf.mxu0 }
 0x2c3   :  { %8849 = vmatmul.msk.f32.gmra.mxu0 %vm168_vm1, %v8783_v37  ;;  %v8786_v37 = vld [vmem:[%s14237_s0 + $0x198] sm:$0xff] }
 0x2c8   :  { %v10406_v34 = vpop.f32.mrf.mxu0 }
 0x2cb   :  { %8850 = vmatmul.msk.f32.gmra.mxu0 %vm168_vm1, %v8784_v5  ;;  %v8787_v5 = vld [vmem:[%s14237_s0 + $0x1a0] sm:$0xff] }
 0x2d0   :  { %v10412_v30 = vpop.f32.mrf.mxu0 }
 0x2d3   :  { %8851 = vmatmul.msk.f32.gmra.mxu0 %vm168_vm1, %v8785_v38  ;;  %v3852_v38 = vld [vmem:[%s14241_s4 + $0x8] sm:$0xff] }
 0x2d4   :  { %4047 = vmatpush.msra.mxu2 %v3852_v38 }
 0x2d8   :  { %v10418_v4 = vpop.f32.mrf.mxu0 }
 0x2db   :  { %8852 = vmatmul.msk.f32.gmra.mxu0 %vm168_vm1, %v8786_v37  ;;  %v8882_v37 = vld [vmem:[%s14241_s4 + $0x18] sm:$0xff] }
 0x2dc   :  { %3934 = vmatpush.msra.mxu1 %v8882_v37  ;;  %v8791_v37 = vld [vmem:[%s14237_s0 + $0x1c0] sm:$0xff] }
 0x2e0   :  { %v10424_v59 = vpop.f32.mrf.mxu0 }
 0x2e3   :  { %8853 = vmatmul.msk.f32.gmra.mxu0 %vm168_vm1, %v8787_v5  ;;  %v8788_v5 = vld [vmem:[%s14237_s0 + $0x1a8] sm:$0xff] }
 0x2e8   :  { %v10439_v19 = vpop.f32.mrf.mxu0 }
 0x2eb   :  { %8854 = vmatmul.msk.f32.gmra.mxu0 %vm168_vm1, %v8788_v5 }
 0x2f0   :  { %v10445_v7 = vpop.f32.mrf.mxu0 }
 0x2f1   :  { %14405 = vst [vmem:[#allocation50_spill] sm:$0xff] %v10445_v7  ;;  %v10519_v7 = vpop.f32.mrf.mxu3 }
 0x2f2   :  { %14419 = vst [vmem:[#allocation64_spill] sm:$0xff] %v10519_v7 }
 0x2f3   :  { %8855 = vmatmul.msk.f32.gmra.mxu0 %vm168_vm1, %v8789_v55  ;;  %v8792_v55 = vld [vmem:[%s14237_s0 + $0x1c8] sm:$0xff] }
 0x2f8   :  { %v10451_v39 = vpop.f32.mrf.mxu0 }
 0x2f9   :  { %14406 = vst [vmem:[#allocation51_spill] sm:$0xff] %v10451_v39 }
 0x2fb   :  { %8856 = vmatmul.msk.f32.gmra.mxu0 %vm168_vm1, %v8790_v22  ;;  %v8793_v22 = vld [vmem:[%s14237_s0 + $0x1d0] sm:$0xff] }
 0x300   :  { %v10457_v38 = vpop.f32.mrf.mxu0 }
 0x301   :  { %14407 = vst [vmem:[#allocation52_spill] sm:$0xff] %v10457_v38 }
 0x303   :  { %8857 = vmatmul.msk.f32.gmra.mxu0 %vm168_vm1, %v8791_v37  ;;  %v8794_v37 = vld [vmem:[%s14237_s0 + $0x1d8] sm:$0xff] }
 0x308   :  { %v10463_v5 = vpop.f32.mrf.mxu0 }
 0x309   :  { %14408 = vst [vmem:[#allocation53_spill] sm:$0xff] %v10463_v5 }
 0x30b   :  { %8858 = vmatmul.msk.f32.gmra.mxu0 %vm168_vm1, %v8792_v55  ;;  %v8795_v55 = vld [vmem:[%s14237_s0 + $0x1e0] sm:$0xff] }
 0x310   :  { %v10469_v39 = vpop.f32.mrf.mxu0 }
 0x311   :  { %14409 = vst [vmem:[#allocation54_spill] sm:$0xff] %v10469_v39 }
 0x313   :  { %8859 = vmatmul.msk.f32.gmra.mxu0 %vm168_vm1, %v8793_v22  ;;  %v8796_v22 = vld [vmem:[%s14237_s0 + $0x1e8] sm:$0xff] }
 0x318   :  { %v10475_v38 = vpop.f32.mrf.mxu0 }
 0x319   :  { %14410 = vst [vmem:[#allocation55_spill] sm:$0xff] %v10475_v38 }
 0x31b   :  { %8860 = vmatmul.msk.f32.gmra.mxu0 %vm168_vm1, %v8794_v37  ;;  %v8797_v37 = vld [vmem:[%s14237_s0 + $0x1f0] sm:$0xff] }
 0x320   :  { %v10481_v5 = vpop.f32.mrf.mxu0 }
 0x321   :  { %14411 = vst [vmem:[#allocation56_spill] sm:$0xff] %v10481_v5 }
 0x323   :  { %8861 = vmatmul.msk.f32.gmra.mxu0 %vm168_vm1, %v8795_v55  ;;  %v8798_v55 = vld [vmem:[%s14237_s0 + $0x1f8] sm:$0xff] }
 0x328   :  { %v10487_v39 = vpop.f32.mrf.mxu0 }
 0x329   :  { %14412 = vst [vmem:[#allocation57_spill] sm:$0xff] %v10487_v39 }
 0x32b   :  { %8862 = vmatmul.msk.f32.gmra.mxu0 %vm168_vm1, %v8796_v22 }
 0x330   :  { %v10493_v38 = vpop.f32.mrf.mxu0 }
 0x331   :  { %14413 = vst [vmem:[#allocation58_spill] sm:$0xff] %v10493_v38  ;;  %v10513_v38 = vpop.f32.mrf.mxu1 }
 0x332   :  { %14416 = vst [vmem:[#allocation61_spill] sm:$0xff] %v10513_v38 }
 0x333   :  { %8863 = vmatmul.msk.f32.gmra.mxu0 %vm168_vm1, %v8797_v37  ;;  %v10515_v37 = vpop.f32.mrf.mxu2 }
 0x334   :  { %14417 = vst [vmem:[#allocation62_spill] sm:$0xff] %v10515_v37 }
 0x338   :  { %v10499_v5 = vpop.f32.mrf.mxu0 }
 0x339   :  { %14414 = vst [vmem:[#allocation59_spill] sm:$0xff] %v10499_v5 }
 0x33b   :  { %8864 = vmatmul.msk.f32.gmra.mxu0 %vm168_vm1, %v8798_v55  ;;  %v10523_v55 = vpop.f32.mrf.mxu1 }
 0x340   :  { %v10505_v39 = vpop.f32.mrf.mxu0 }
 0x341   :  { %14415 = vst [vmem:[#allocation60_spill] sm:$0xff] %v10505_v39  ;;  %v10525_v39 = vpop.f32.mrf.mxu2 }
 0x342   :  { %14420 = vst [vmem:[#allocation65_spill] sm:$0xff] %v10525_v39 }
 0x343   :  { %8865 = vmatmul.msk.f32.gmra.mxu0 %vm168_vm1, %v10050_v44  ;;  %v10533_v38 = vpop.f32.mrf.mxu1 }
 0x344   :  { %14422 = vst [vmem:[#allocation67_spill] sm:$0xff] %v10533_v38 }
 0x348   :  { %v10509_v22 = vpop.f32.mrf.mxu0 }
 0x34b   :  { %8866 = vmatmul.msk.f32.gmra.mxu0 %vm168_vm1, %v10063_v61  ;;  %v10531_v61 = vpop.f32.mrf.mxu3  ;;  %v10545_v39 = vpop.f32.mrf.mxu1 }
 0x34c   :  { %14421 = vst [vmem:[#allocation66_spill] sm:$0xff] %v10531_v61 }
 0x350   :  { %v10517_v5 = vpop.f32.mrf.mxu0 }
 0x351   :  { %14418 = vst [vmem:[#allocation63_spill] sm:$0xff] %v10517_v5  ;;  %v10537_v5 = vpop.f32.mrf.mxu2 }
 0x352   :  { %14423 = vst [vmem:[#allocation68_spill] sm:$0xff] %v10537_v5 }
 0x353   :  { %8867 = vmatmul.msk.f32.gmra.mxu0 %vm168_vm1, %v10076_v25  ;;  %v10541_v25 = vpop.f32.mrf.mxu3  ;;  %v10557_v5 = vpop.f32.mrf.mxu1 }
 0x354   :  { %14424 = vst [vmem:[#allocation69_spill] sm:$0xff] %v10541_v25 }
 0x355   :  { %14428 = vst [vmem:[#allocation73_spill] sm:$0xff] %v10557_v5 }
 0x358   :  { %v10527_v44 = vpop.f32.mrf.mxu0 }
 0x35b   :  { %8868 = vmatmul.msk.f32.gmra.mxu0 %vm168_vm1, %v10094_v54  ;;  %v10549_v54 = vpop.f32.mrf.mxu2  ;;  %v10551_v61 = vpop.f32.mrf.mxu3 }
 0x35c   :  { %14426 = vst [vmem:[#allocation71_spill] sm:$0xff] %v10549_v54 }
 0x35d   :  { %14427 = vst [vmem:[#allocation72_spill] sm:$0xff] %v10551_v61 }
 0x360   :  { %v10535_v37 = vpop.f32.mrf.mxu0 }
 0x363   :  { %8869 = vmatmul.msk.f32.gmra.mxu0 %vm168_vm1, %v10112_v12  ;;  %v10559_v12 = vpop.f32.mrf.mxu2 }
 0x364   :  { %14429 = vst [vmem:[#allocation74_spill] sm:$0xff] %v10559_v12 }
 0x368   :  { %v10543_v7 = vpop.f32.mrf.mxu0 }
 0x369   :  { %14425 = vst [vmem:[#allocation70_spill] sm:$0xff] %v10543_v7  ;;  %v10563_v7 = vpop.f32.mrf.mxu3 }
 0x36a   :  { %14431 = vst [vmem:[#allocation76_spill] sm:$0xff] %v10563_v7 }
 0x36b   :  { %8870 = vmatmul.msk.f32.gmra.mxu0 %vm168_vm1, %v10130_v6  ;;  %v10567_v6 = vpop.f32.mrf.mxu1  ;;  %v10569_v54 = vpop.f32.mrf.mxu2 }
 0x36c   :  { %14432 = vst [vmem:[#allocation77_spill] sm:$0xff] %v10569_v54 }
 0x370   :  { %v10553_v38 = vpop.f32.mrf.mxu0 }
 0x373   :  { %8871 = vmatmul.msk.f32.gmra.mxu0 %vm168_vm1, %v10149_v47  ;;  %v10575_v47 = vpop.f32.mrf.mxu3  ;;  %v10577_v5 = vpop.f32.mrf.mxu1 }
 0x374   :  { %14433 = vst [vmem:[#allocation78_spill] sm:$0xff] %v10575_v47 }
 0x375   :  { %14434 = vst [vmem:[#allocation79_spill] sm:$0xff] %v10577_v5 }
 0x378   :  { %v10561_v25 = vpop.f32.mrf.mxu0 }
 0x379   :  { %14430 = vst [vmem:[#allocation75_spill] sm:$0xff] %v10561_v25  ;;  %v10581_v25 = vpop.f32.mrf.mxu2 }
 0x37a   :  { %14435 = vst [vmem:[#allocation80_spill] sm:$0xff] %v10581_v25 }
 0x37b   :  { %8872 = vmatmul.msk.f32.gmra.mxu0 %vm168_vm1, %v10166_v26  ;;  %v10585_v26 = vpop.f32.mrf.mxu3  ;;  %v10589_v54 = vpop.f32.mrf.mxu1 }
 0x37c   :  { %14436 = vst [vmem:[#allocation81_spill] sm:$0xff] %v10585_v26 }
 0x380   :  { %v10571_v61 = vpop.f32.mrf.mxu0 }
 0x383   :  { %8873 = vmatmul.msk.f32.gmra.mxu0 %vm168_vm1, %v10183_v41  ;;  %v10593_v41 = vpop.f32.mrf.mxu2  ;;  %v10595_v47 = vpop.f32.mrf.mxu3 }
 0x384   :  { %14438 = vst [vmem:[#allocation83_spill] sm:$0xff] %v10593_v41  ;;  %v10601_v25 = vpop.f32.mrf.mxu1 }
 0x385   :  { %14439 = vst [vmem:[#allocation84_spill] sm:$0xff] %v10595_v47 }
 0x386   :  { %14440 = vst [vmem:[#allocation85_spill] sm:$0xff] %v10601_v25 }
 0x388   :  { %v10579_v12 = vpop.f32.mrf.mxu0 }
 0x38b   :  { %8874 = vmatmul.msk.f32.gmra.mxu0 %vm168_vm1, %v10200_v42  ;;  %v10603_v42 = vpop.f32.mrf.mxu2 }
 0x38c   :  { %14441 = vst [vmem:[#allocation86_spill] sm:$0xff] %v10603_v42 }
 0x390   :  { %v10587_v7 = vpop.f32.mrf.mxu0 }
 0x391   :  { %14437 = vst [vmem:[#allocation82_spill] sm:$0xff] %v10587_v7  ;;  %v10607_v7 = vpop.f32.mrf.mxu3 }
 0x392   :  { %14442 = vst [vmem:[#allocation87_spill] sm:$0xff] %v10607_v7  ;;  %v8813_v7 = vld [vmem:[%s14237_s0 + $0x270] sm:$0xff] }
 0x393   :  { %8875 = vmatmul.msk.f32.gmra.mxu0 %vm168_vm1, %v10217_v45  ;;  %v10611_v45 = vpop.f32.mrf.mxu1  ;;  %v10613_v41 = vpop.f32.mrf.mxu2 }
 0x394   :  { %14443 = vst [vmem:[#allocation88_spill] sm:$0xff] %v10611_v45 }
 0x395   :  { %14444 = vst [vmem:[#allocation89_spill] sm:$0xff] %v10613_v41 }
 0x398   :  { %v10597_v5 = vpop.f32.mrf.mxu0 }
 0x39b   :  { %8876 = vmatmul.msk.f32.gmra.mxu0 %vm168_vm1, %v10234_v35  ;;  %v10619_v35 = vpop.f32.mrf.mxu3  ;;  %v10621_v25 = vpop.f32.mrf.mxu1 }
 0x39c   :  { %14446 = vst [vmem:[#allocation91_spill] sm:$0xff] %v10619_v35 }
 0x39d   :  { %14447 = vst [vmem:[#allocation92_spill] sm:$0xff] %v10621_v25 }
 0x3a0   :  { %v10605_v26 = vpop.f32.mrf.mxu0 }
 0x3a3   :  { %8877 = vmatmul.msk.f32.gmra.mxu0 %vm168_vm1, %v10251_v33  ;;  %v10628_v33 = vpop.f32.mrf.mxu2  ;;  %v10631_v41 = vpop.f32.mrf.mxu3 }
 0x3a4   :  { %14449 = vst [vmem:[#allocation94_spill] sm:$0xff] %v10631_v41  ;;  %v10638_v35 = vpop.f32.mrf.mxu1  ;;  %v10653_v41 = vadd.f32 %v10304_v15, %v9723_v56 }
 0x3a5   :  { %14451 = vst [vmem:[#allocation96_spill] sm:$0xff] %v10638_v35 }
 0x3a6   :  { %14454 = vst [vmem:[#allocation99_spill] sm:$0xff] %v10653_v41  ;;  %v2586_v56 = vsel %vm2585_vm2, %v10653_v41, 0.0 }
 0x3a8   :  { %v10615_v47 = vpop.f32.mrf.mxu0 }
 0x3a9   :  { %14445 = vst [vmem:[#allocation90_spill] sm:$0xff] %v10615_v47 }
 0x3ab   :  { %8878 = vmatmul.msk.f32.gmra.mxu0 %vm168_vm1, %v10268_v40  ;;  %v8814_v40 = vld [vmem:[%s14237_s0 + $0x278] sm:$0xff]  ;;  %v10643_v25 = vpop.f32.mrf.mxu3 }
 0x3ac   :  { %14452 = vst [vmem:[#allocation97_spill] sm:$0xff] %v10643_v25  ;;  %v10659_v35 = vpop.f32.mrf.mxu1  ;;  %v10665_v25 = vadd.f32 %v10322_v28, %v9750_v16  ;;  %v10683_v16 = vadd.f32 %v10334_v1, %v9768_v32 }
 0x3ae   :  { %14456 = vst [vmem:[#allocation101_spill] sm:$0xff] %v10665_v25 }
 0x3af   :  { %14458 = vst [vmem:[#allocation103_spill] sm:$0xff] %v10683_v16 }
 0x3b0   :  { %v10623_v42 = vpop.f32.mrf.mxu0 }
 0x3b1   :  { %14448 = vst [vmem:[#allocation93_spill] sm:$0xff] %v10623_v42  ;;  %v10641_v42 = vpop.f32.mrf.mxu2 }
 0x3b3   :  { %8879 = vmatmul.msk.f32.gmra.mxu0 %vm168_vm1, %v8813_v7  ;;  %v10649_v7 = vadd.f32 %v10310_v52, %v9732_v0  ;;  %v10685_v28 = vpop.f32.mrf.mxu3 }
 0x3b4   :  { %v10699_v32 = vpop.f32.mrf.mxu1 }
 0x3b5   :  { %14453 = vst [vmem:[#allocation98_spill] sm:$0xff] %v10649_v7 }
 0x3b8   :  { %v10633_v47 = vpop.f32.mrf.mxu0 }
 0x3b9   :  { %14450 = vst [vmem:[#allocation95_spill] sm:$0xff] %v10633_v47  ;;  %v10657_v47 = vadd.f32 %v10316_v53, %v9741_v8  ;;  %v10667_v0 = vpop.f32.mrf.mxu2  ;;  %v10675_v8 = vadd.f32 %v10328_v58, %v9759_v24  ;;  %v10691_v24 = vadd.f32 %v10340_v36, %v9777_v48 }
 0x3bb   :  { %8880 = vmatmul.msk.f32.gmra.mxu0 %vm168_vm1, %v8814_v40  ;;  %14455 = vst [vmem:[#allocation100_spill] sm:$0xff] %v10657_v47  ;;  %v2587_v40 = vsel %vm2585_vm2, %v10649_v7, 0.0  ;;  %v2589_v52 = vsel %vm2585_vm2, %v10657_v47, 0.0  ;;  %v2591_v7 = vsel %vm2585_vm2, %v10665_v25, 0.0  ;;  %v2593_v47 = vsel %vm2585_vm2, %v10675_v8, 0.0 }
 0x3bc   :  { %14457 = vst [vmem:[#allocation102_spill] sm:$0xff] %v10675_v8  ;;  %v2588_v15 = vadd.f32 %v2587_v40, %v2586_v56  ;;  %v2595_v40 = vsel %vm2585_vm2, %v10683_v16, 0.0  ;;  %v10697_v56 = vadd.f32 %v10346_v3, %v9786_v57  ;;  %v10715_v57 = vadd.f32 %v10358_v63, %v9807_v11 }
 0x3bd   :  { %14459 = vst [vmem:[#allocation104_spill] sm:$0xff] %v10691_v24 }
 0x3be   :  { %v2590_v41 = vadd.f32 %v2589_v52, %v2588_v15  ;;  %14460 = vst [vmem:[#allocation105_spill] sm:$0xff] %v10697_v56  ;;  %v2597_v52 = vsel %vm2585_vm2, %v10691_v24, 0.0  ;;  %v10705_v15 = vadd.f32 %v10352_v17, %v9795_v2  ;;  %v10721_v2 = vadd.f32 %v10364_v49, %v9817_v20  ;;  %v10723_v17 = vpop.f32.mrf.mxu3  ;;  %v10737_v20 = vpop.f32.mrf.mxu1 }
 0x3bf   :  { %14462 = vst [vmem:[#allocation107_spill] sm:$0xff] %v10715_v57 }
 0x3c0   :  { %v10645_v45 = vpop.f32.mrf.mxu0  ;;  %v2592_v58 = vadd.f32 %v2591_v7, %v2590_v41  ;;  %14461 = vst [vmem:[#allocation106_spill] sm:$0xff] %v10705_v15  ;;  %v2599_v7 = vsel %vm2585_vm2, %v10697_v56, 0.0  ;;  %v2605_v63 = vsel %vm2585_vm2, %v10721_v2, 0.0 }
 0x3c1   :  { %v10707_v48 = vpop.f32.mrf.mxu2  ;;  %14463 = vst [vmem:[#allocation108_spill] sm:$0xff] %v10721_v2 }
 0x3c2   :  { %v2594_v1 = vadd.f32 %v2593_v47, %v2592_v58  ;;  %v2601_v47 = vsel %vm2585_vm2, %v10705_v15, 0.0 }
 0x3c4   :  { %v2596_v36 = vadd.f32 %v2595_v40, %v2594_v1  ;;  %v2603_v40 = vsel %vm2585_vm2, %v10715_v57, 0.0  ;;  %v10729_v1 = vadd.f32 %v10370_v14, %v9827_v29  ;;  %v10745_v29 = vadd.f32 %v10382_v18, %v9851_v60 }
 0x3c6   :  { %v2598_v3 = vadd.f32 %v2597_v52, %v2596_v36  ;;  %14464 = vst [vmem:[#allocation109_spill] sm:$0xff] %v10729_v1  ;;  %v10735_v52 = vadd.f32 %v10376_v27, %v9839_v46  ;;  %v10753_v46 = vadd.f32 %v10388_v50, %v9867_v9  ;;  %v10761_v60 = vpop.f32.mrf.mxu3 }
 0x3c7   :  { %14466 = vst [vmem:[#allocation111_spill] sm:$0xff] %v10745_v29 }
 0x3c8   :  { %v10677_v53 = vpop.f32.mrf.mxu0  ;;  %v2600_v58 = vadd.f32 %v2599_v7, %v2598_v3  ;;  %14465 = vst [vmem:[#allocation110_spill] sm:$0xff] %v10735_v52  ;;  %v2607_v7 = vsel %vm2585_vm2, %v10729_v1, 0.0  ;;  %v14503_v1 = vld [vmem:[#allocation25_spill] sm:$0xff] }
 0x3c9   :  { %v10747_v14 = vpop.f32.mrf.mxu2  ;;  %14467 = vst [vmem:[#allocation112_spill] sm:$0xff] %v10753_v46 }
 0x3ca   :  { %v2602_v11 = vadd.f32 %v2601_v47, %v2600_v58  ;;  %v2609_v47 = vsel %vm2585_vm2, %v10735_v52, 0.0  ;;  %v2611_v58 = vsel %vm2585_vm2, %v10745_v29, 0.0  ;;  %v14501_v52 = vld [vmem:[#allocation58_spill] sm:$0xff] }
 0x3cc   :  { %v2604_v49 = vadd.f32 %v2603_v40, %v2602_v11  ;;  %v10759_v40 = vadd.f32 %v10394_v13, %v9882_v21  ;;  %v2613_v11 = vsel %vm2585_vm2, %v10753_v46, 0.0  ;;  %v10775_v21 = vadd.f32 %v10406_v34, %v9900_v51  ;;  %v10777_v13 = vpop.f32.mrf.mxu1  ;;  %v8915_v51 = vld [vmem:[%s14241_s4 + $0x20] sm:$0xff]  ;;  %v8881_v34 = vld [vmem:[%s14241_s4 + $0x10] sm:$0xff] }
 0x3cd   :  { %4180 = vmatpush.msra.mxu3 %v8915_v51  ;;  %3935 = vmatpush.msra.mxu1 %v8881_v34  ;;  %v14476_v51 = vld [vmem:[#allocation16_spill] sm:$0xff]  ;;  %v14477_v34 = vld [vmem:[#allocation50_spill] sm:$0xff] }
 0x3ce   :  { %v2606_v3 = vadd.f32 %v2605_v63, %v2604_v49  ;;  %14468 = vst [vmem:[#allocation113_spill] sm:$0xff] %v10759_v40  ;;  %v10767_v63 = vadd.f32 %v10400_v43, %v9891_v31  ;;  %v2615_v49 = vsel %vm2585_vm2, %v10759_v40, 0.0  ;;  %v10783_v31 = vadd.f32 %v10412_v30, %v9909_v62  ;;  %v14489_v40 = vld [vmem:[#allocation54_spill] sm:$0xff] }
 0x3cf   :  { %14470 = vst [vmem:[#allocation115_spill] sm:$0xff] %v10775_v21  ;;  %v10800_v62 = vadd.f32 %v10418_v4, %v9918_v10  ;;  %v14474_v4 = vld [vmem:[#allocation15_spill] sm:$0xff] }
 0x3d0   :  { %v10709_v41 = vpop.f32.mrf.mxu0  ;;  %v2608_v27 = vadd.f32 %v2607_v7, %v2606_v3  ;;  %14469 = vst [vmem:[#allocation114_spill] sm:$0xff] %v10767_v63  ;;  %v2617_v3 = vsel %vm2585_vm2, %v10767_v63, 0.0 }
 0x3d1   :  { %14471 = vst [vmem:[#allocation116_spill] sm:$0xff] %v10783_v31  ;;  %v10785_v43 = vpop.f32.mrf.mxu2  ;;  %v2623_v10 = vsel %vm2585_vm2, %v10800_v62, 0.0 }
 0x3d2   :  { %v2610_v18 = vadd.f32 %v2609_v47, %v2608_v27  ;;  %v3851_v27 = vld [vmem:[%s14241_s4] sm:$0xff]  ;;  %14472 = vst [vmem:[#allocation117_spill] sm:$0xff] %v10800_v62 }
 0x3d3   :  { %4048 = vmatpush.msra.mxu2 %v3851_v27  ;;  %v10816_v27 = vadd.f32 %v10439_v19, %v14474_v4  ;;  %v14480_v62 = vld [vmem:[#allocation51_spill] sm:$0xff]  ;;  %v14482_v4 = vld [vmem:[#allocation18_spill] sm:$0xff] }
 0x3d4   :  { %v2612_v9 = vadd.f32 %v2611_v58, %v2610_v18  ;;  %v2619_v58 = vsel %vm2585_vm2, %v10775_v21, 0.0  ;;  %v2621_v18 = vsel %vm2585_vm2, %v10783_v31, 0.0  ;;  %v14479_v31 = vld [vmem:[#allocation17_spill] sm:$0xff] }
 0x3d5   :  { %14475 = vst [vmem:[#allocation15_spill] sm:$0xff] %v10816_v27  ;;  %v10830_v21 = vadd.f32 %v14480_v62, %v14479_v31 }
 0x3d6   :  { %v2614_v7 = vadd.f32 %v2613_v11, %v2612_v9  ;;  %v10806_v11 = vadd.f32 %v10424_v59, %v9927_v23  ;;  %v10808_v9 = vpop.f32.mrf.mxu3  ;;  %v10822_v23 = vadd.f32 %v14477_v34, %v14476_v51  ;;  %v10824_v59 = vpop.f32.mrf.mxu1 }
 0x3d7   :  { %14481 = vst [vmem:[#allocation50_spill] sm:$0xff] %v10830_v21 }
 0x3d8   :  { %v10739_v36 = vpop.f32.mrf.mxu0  ;;  %v2616_v47 = vadd.f32 %v2615_v49, %v2614_v7  ;;  %14473 = vst [vmem:[#allocation118_spill] sm:$0xff] %v10806_v11 }
 0x3d9   :  { %14478 = vst [vmem:[#allocation16_spill] sm:$0xff] %v10822_v23  ;;  %v10832_v19 = vpop.f32.mrf.mxu2 }
 0x3da   :  { %v2618_v30 = vadd.f32 %v2617_v3, %v2616_v47  ;;  %v2625_v47 = vsel %vm2585_vm2, %v10806_v11, 0.0  ;;  %v14483_v11 = vld [vmem:[#allocation52_spill] sm:$0xff] }
 0x3db   :  { %v10838_v51 = vadd.f32 %v14483_v11, %v14482_v4  ;;  %v14491_v4 = vld [vmem:[#allocation21_spill] sm:$0xff] }
 0x3dc   :  { %v2620_v49 = vadd.f32 %v2619_v58, %v2618_v30  ;;  %v2627_v30 = vsel %vm2585_vm2, %v10816_v27, 0.0  ;;  %v14486_v27 = vld [vmem:[#allocation53_spill] sm:$0xff] }
 0x3dd   :  { %14484 = vst [vmem:[#allocation17_spill] sm:$0xff] %v10838_v51 }
 0x3de   :  { %v2622_v3 = vadd.f32 %v2621_v18, %v2620_v49  ;;  %v2629_v49 = vsel %vm2585_vm2, %v10822_v23, 0.0  ;;  %v10848_v62 = vpop.f32.mrf.mxu3  ;;  %v14488_v23 = vld [vmem:[#allocation20_spill] sm:$0xff] }
 0x3df   :  { %v10854_v11 = vadd.f32 %v14489_v40, %v14488_v23 }
 0x3e0   :  { %v10769_v50 = vpop.f32.mrf.mxu0  ;;  %v2624_v58 = vadd.f32 %v2623_v10, %v2622_v3  ;;  %v2631_v10 = vsel %vm2585_vm2, %v10830_v21, 0.0  ;;  %v14485_v3 = vld [vmem:[#allocation19_spill] sm:$0xff] }
 0x3e1   :  { %v10846_v31 = vadd.f32 %v14486_v27, %v14485_v3  ;;  %14490 = vst [vmem:[#allocation18_spill] sm:$0xff] %v10854_v11  ;;  %v14492_v21 = vld [vmem:[#allocation55_spill] sm:$0xff]  ;;  %v10862_v27 = vpop.f32.mrf.mxu1  ;;  %v10870_v40 = vpop.f32.mrf.mxu2 }
 0x3e2   :  { %v2626_v18 = vadd.f32 %v2625_v47, %v2624_v58  ;;  %v2633_v58 = vsel %vm2585_vm2, %v10838_v51, 0.0  ;;  %v10860_v46 = vadd.f32 %v14492_v21, %v14491_v4  ;;  %v14495_v51 = vld [vmem:[#allocation56_spill] sm:$0xff]  ;;  %v14497_v21 = vld [vmem:[#allocation23_spill] sm:$0xff]  ;;  %v14498_v4 = vld [vmem:[#allocation57_spill] sm:$0xff] }
 0x3e3   :  { %14487 = vst [vmem:[#allocation51_spill] sm:$0xff] %v10846_v31 }
 0x3e4   :  { %v2628_v34 = vadd.f32 %v2627_v30, %v2626_v18  ;;  %v2635_v18 = vsel %vm2585_vm2, %v10846_v31, 0.0  ;;  %14493 = vst [vmem:[#allocation52_spill] sm:$0xff] %v10860_v46  ;;  %v10878_v31 = vadd.f32 %v14498_v4, %v14497_v21  ;;  %v14507_v4 = vld [vmem:[#allocation60_spill] sm:$0xff] }
 0x3e6   :  { %v2630_v47 = vadd.f32 %v2629_v49, %v2628_v34  ;;  %v2637_v49 = vsel %vm2585_vm2, %v10854_v11, 0.0  ;;  %v14494_v34 = vld [vmem:[#allocation22_spill] sm:$0xff]  ;;  %14499 = vst [vmem:[#allocation53_spill] sm:$0xff] %v10878_v31  ;;  %v14500_v11 = vld [vmem:[#allocation24_spill] sm:$0xff] }
 0x3e7   :  { %v10868_v29 = vadd.f32 %v14495_v51, %v14494_v34  ;;  %v10884_v51 = vadd.f32 %v14501_v52, %v14500_v11  ;;  %v10886_v34 = vpop.f32.mrf.mxu3 }
 0x3e8   :  { %v10810_v7 = vpop.f32.mrf.mxu0  ;;  %v2632_v30 = vadd.f32 %v2631_v10, %v2630_v47  ;;  %v2639_v47 = vsel %vm2585_vm2, %v10860_v46, 0.0  ;;  %v14504_v46 = vld [vmem:[#allocation59_spill] sm:$0xff] }
 0x3e9   :  { %14496 = vst [vmem:[#allocation19_spill] sm:$0xff] %v10868_v29  ;;  %v10892_v2 = vadd.f32 %v14504_v46, %v14503_v1  ;;  %v10900_v52 = vpop.f32.mrf.mxu1  ;;  %v10910_v46 = vpop.f32.mrf.mxu2 }
 0x3ea   :  { %v2634_v3 = vadd.f32 %v2633_v58, %v2632_v30  ;;  %v2641_v30 = vsel %vm2585_vm2, %v10868_v29, 0.0  ;;  %14502 = vst [vmem:[#allocation20_spill] sm:$0xff] %v10884_v51 }
 0x3eb   :  { %14505 = vst [vmem:[#allocation54_spill] sm:$0xff] %v10892_v2 }
 0x3ec   :  { %v2636_v23 = vadd.f32 %v2635_v18, %v2634_v3  ;;  %v2643_v3 = vsel %vm2585_vm2, %v10878_v31, 0.0  ;;  %v14514_v31 = vld [vmem:[#allocation29_spill] sm:$0xff] }
 0x3ee   :  { %v2638_v58 = vadd.f32 %v2637_v49, %v2636_v23  ;;  %v2645_v49 = vsel %vm2585_vm2, %v10884_v51, 0.0  ;;  %v14506_v23 = vld [vmem:[#allocation26_spill] sm:$0xff] }
 0x3ef   :  { %v10898_v29 = vadd.f32 %v14507_v4, %v14506_v23  ;;  %v14511_v23 = vld [vmem:[#allocation28_spill] sm:$0xff]  ;;  %v14512_v4 = vld [vmem:[#allocation63_spill] sm:$0xff]  ;;  %v10926_v56 = vpop.f32.mrf.mxu3 }
 0x3f0   :  { %v10840_v63 = vpop.f32.mrf.mxu0  ;;  %v2640_v18 = vadd.f32 %v2639_v47, %v2638_v58  ;;  %v2647_v47 = vsel %vm2585_vm2, %v10892_v2, 0.0  ;;  %v14509_v58 = vld [vmem:[#allocation27_spill] sm:$0xff]  ;;  %v10916_v51 = vadd.f32 %v14512_v4, %v14511_v23  ;;  %v10922_v2 = vadd.f32 %v10527_v44, %v14514_v31  ;;  %14518 = vst [vmem:[#allocation23_spill] sm:$0xff] %v10926_v56  ;;  %v14523_v44 = vld [vmem:[#allocation32_spill] sm:$0xff] }
 0x3f1   :  { %14508 = vst [vmem:[#allocation21_spill] sm:$0xff] %v10898_v29  ;;  %v10908_v1 = vadd.f32 %v10509_v22, %v14509_v58  ;;  %v14516_v22 = vld [vmem:[#allocation30_spill] sm:$0xff]  ;;  %v14517_v58 = vld [vmem:[#allocation61_spill] sm:$0xff]  ;;  %v910_v31 = vadd.f32 %v10523_v55, %v14523_v44  ;;  %v14532_v44 = vld [vmem:[#allocation64_spill] sm:$0xff]  ;;  %v10957_v8 = vpop.f32.mrf.mxu2 }
 0x3f2   :  { %v2642_v21 = vadd.f32 %v2641_v30, %v2640_v18  ;;  %v2649_v18 = vsel %vm2585_vm2, %v10898_v29, 0.0  ;;  %14513 = vst [vmem:[#allocation22_spill] sm:$0xff] %v10916_v51  ;;  %v907_v15 = vadd.f32 %v14517_v58, %v14516_v22  ;;  %v14519_v29 = vld [vmem:[#allocation31_spill] sm:$0xff]  ;;  %v2655_v22 = vsel %vm2585_vm2, %v10922_v2, 0.0  ;;  %v14524_v58 = vld [vmem:[#allocation33_spill] sm:$0xff] }
 0x3f3   :  { %14510 = vst [vmem:[#allocation55_spill] sm:$0xff] %v10908_v1  ;;  %v10932_v23 = vadd.f32 %v10535_v37, %v14519_v29  ;;  %v14527_v37 = vld [vmem:[#allocation34_spill] sm:$0xff]  ;;  %v14528_v29 = vld [vmem:[#allocation67_spill] sm:$0xff] }
 0x3f4   :  { %v2644_v11 = vadd.f32 %v2643_v3, %v2642_v21  ;;  %v2651_v21 = vsel %vm2585_vm2, %v10908_v1, 0.0  ;;  %14515 = vst [vmem:[#allocation56_spill] sm:$0xff] %v10922_v2  ;;  %v913_v16 = vadd.f32 %v14528_v29, %v14527_v37  ;;  %v14535_v37 = vld [vmem:[#allocation37_spill] sm:$0xff]  ;;  %v14536_v29 = vld [vmem:[#allocation75_spill] sm:$0xff] }
 0x3f5   :  { %14520 = vst [vmem:[#allocation57_spill] sm:$0xff] %v10932_v23  ;;  %v14541_v56 = vld [vmem:[#allocation71_spill] sm:$0xff] }
 0x3f6   :  { %v2646_v30 = vadd.f32 %v2645_v49, %v2644_v11  ;;  %v2653_v11 = vsel %vm2585_vm2, %v10916_v51, 0.0  ;;  %v10945_v51 = vpop.f32.mrf.mxu1 }
 0x3f8   :  { %v10872_v10 = vpop.f32.mrf.mxu0  ;;  %v2648_v3 = vadd.f32 %v2647_v47, %v2646_v30  ;;  %v14521_v47 = vld [vmem:[#allocation62_spill] sm:$0xff] }
 0x3f9   :  { %v1489_v30 = vadd.f32 %v14521_v47, %v907_v15  ;;  %v14529_v15 = vld [vmem:[#allocation65_spill] sm:$0xff]  ;;  %v14530_v47 = vld [vmem:[#allocation35_spill] sm:$0xff] }
 0x3fa   :  { %v2650_v49 = vadd.f32 %v2649_v18, %v2648_v3  ;;  %v14525_v18 = vld [vmem:[#allocation70_spill] sm:$0xff]  ;;  %v10954_v55 = vadd.f32 %v10553_v38, %v14530_v47  ;;  %v14539_v38 = vld [vmem:[#allocation73_spill] sm:$0xff] }
 0x3fb   :  { %v10943_v3 = vadd.f32 %v14525_v18, %v14524_v58  ;;  %v2024_v2 = vadd.f32 %v14532_v44, %v1489_v30  ;;  %v14533_v18 = vld [vmem:[#allocation36_spill] sm:$0xff]  ;;  %v14540_v30 = vld [vmem:[#allocation66_spill] sm:$0xff] }
 0x3fc   :  { %v2652_v4 = vadd.f32 %v2651_v21, %v2650_v49  ;;  %v1490_v21 = vadd.f32 %v14529_v15, %v910_v31  ;;  %v2657_v49 = vsel %vm2585_vm2, %v10932_v23, 0.0  ;;  %14531 = vst [vmem:[#allocation25_spill] sm:$0xff] %v10954_v55  ;;  %v10966_v15 = vadd.f32 %v14536_v29, %v14535_v37  ;;  %v14538_v23 = vld [vmem:[#allocation38_spill] sm:$0xff]  ;;  %v10980_v29 = vpop.f32.mrf.mxu3 }
 0x3fd   :  { %14526 = vst [vmem:[#allocation58_spill] sm:$0xff] %v10943_v3  ;;  %v2659_v31 = vsel %vm2585_vm2, %v10943_v3, 0.0  ;;  %v919_v47 = vadd.f32 %v14539_v38, %v14538_v23  ;;  %v14548_v38 = vld [vmem:[#allocation72_spill] sm:$0xff] }
 0x3fe   :  { %v2654_v24 = vadd.f32 %v2653_v11, %v2652_v4  ;;  %v916_v11 = vadd.f32 %v10545_v39, %v14533_v18  ;;  %v14534_v4 = vld [vmem:[#allocation68_spill] sm:$0xff]  ;;  %14537 = vst [vmem:[#allocation59_spill] sm:$0xff] %v10966_v15  ;;  %v2025_v44 = vadd.f32 %v14540_v30, %v1490_v21  ;;  %v2661_v39 = vsel %vm2585_vm2, %v10954_v55, 0.0 }
 0x3ff   :  { %v1491_v25 = vadd.f32 %v14534_v4, %v913_v16  ;;  %v10975_v16 = vadd.f32 %v10571_v61, %v2024_v2  ;;  %v14544_v4 = vld [vmem:[#allocation74_spill] sm:$0xff]  ;;  %v14547_v61 = vld [vmem:[#allocation77_spill] sm:$0xff]  ;;  %v14549_v30 = vld [vmem:[#allocation40_spill] sm:$0xff] }
 0x400   :  { %v10902_v57 = vpop.f32.mrf.mxu0  ;;  %v2656_v58 = vadd.f32 %v2655_v22, %v2654_v24  ;;  %v1492_v24 = vadd.f32 %v14541_v56, %v916_v11  ;;  %v14543_v22 = vld [vmem:[#allocation39_spill] sm:$0xff]  ;;  %v1493_v37 = vadd.f32 %v14544_v4, %v919_v47  ;;  %v2663_v56 = vsel %vm2585_vm2, %v10966_v15, 0.0  ;;  %v11000_v15 = vpop.f32.mrf.mxu1 }
 0x401   :  { %14542 = vst [vmem:[#allocation26_spill] sm:$0xff] %v10975_v16  ;;  %v922_v18 = vadd.f32 %v10567_v6, %v14543_v22  ;;  %v14550_v47 = vld [vmem:[#allocation79_spill] sm:$0xff] }
 0x402   :  { %v2027_v6 = vadd.f32 %v14548_v38, %v1492_v24  ;;  %v925_v22 = vadd.f32 %v14550_v47, %v14549_v30  ;;  %v14557_v38 = vld [vmem:[#allocation78_spill] sm:$0xff] }
 0x403   :  { %v1494_v2 = vadd.f32 %v14547_v61, %v922_v18 }
 0x404   :  { %v11008_v61 = vadd.f32 %v10597_v5, %v2027_v6  ;;  %v11035_v55 = vpop.f32.mrf.mxu3 }
 0x405   :  { %v2029_v30 = vadd.f32 %v14557_v38, %v1494_v2  ;;  %v14563_v2 = vld [vmem:[#allocation81_spill] sm:$0xff] }
 0x406   :  { %14556 = vst [vmem:[#allocation28_spill] sm:$0xff] %v11008_v61 }
 0x408   :  { %v10935_v1 = vpop.f32.mrf.mxu0 }
 0x409   :  { %14522 = vst [vmem:[#allocation24_spill] sm:$0xff] %v10935_v1  ;;  %v2658_v1 = vadd.f32 %v2657_v49, %v2656_v58  ;;  %v14545_v49 = vld [vmem:[#allocation69_spill] sm:$0xff]  ;;  %v10988_v58 = vadd.f32 %v10579_v12, %v2025_v44 }
 0x40a   :  { %v2026_v21 = vadd.f32 %v14545_v49, %v1491_v25  ;;  %v14553_v25 = vld [vmem:[#allocation76_spill] sm:$0xff]  ;;  %v14554_v44 = vld [vmem:[#allocation41_spill] sm:$0xff] }
 0x40b   :  { %v2660_v3 = vadd.f32 %v2659_v31, %v2658_v1  ;;  %14546 = vst [vmem:[#allocation60_spill] sm:$0xff] %v10988_v58  ;;  %v2665_v1 = vsel %vm2585_vm2, %v10975_v16, 0.0  ;;  %v14551_v31 = vld [vmem:[#allocation82_spill] sm:$0xff]  ;;  %v2028_v49 = vadd.f32 %v14553_v25, %v1493_v37  ;;  %v928_v18 = vadd.f32 %v10589_v54, %v14554_v44  ;;  %v14561_v44 = vld [vmem:[#allocation43_spill] sm:$0xff] }
 0x40c   :  { %v10997_v4 = vadd.f32 %v14551_v31, %v2026_v21  ;;  %v2667_v24 = vsel %vm2585_vm2, %v10988_v58, 0.0  ;;  %v11011_v21 = vpop.f32.mrf.mxu2  ;;  %v14558_v37 = vld [vmem:[#allocation42_spill] sm:$0xff]  ;;  %v14559_v31 = vld [vmem:[#allocation85_spill] sm:$0xff] }
 0x40d   :  { %v2662_v11 = vadd.f32 %v2661_v39, %v2660_v3  ;;  %v14555_v3 = vld [vmem:[#allocation80_spill] sm:$0xff]  ;;  %v931_v25 = vadd.f32 %v14559_v31, %v14558_v37  ;;  %v2671_v37 = vsel %vm2585_vm2, %v11008_v61, 0.0  ;;  %v14572_v61 = vld [vmem:[#allocation45_spill] sm:$0xff] }
 0x40e   :  { %14552 = vst [vmem:[#allocation27_spill] sm:$0xff] %v10997_v4  ;;  %v1495_v39 = vadd.f32 %v14555_v3, %v925_v22  ;;  %v2669_v54 = vsel %vm2585_vm2, %v10997_v4, 0.0  ;;  %v11019_v22 = vadd.f32 %v10605_v26, %v2028_v49  ;;  %v14562_v3 = vld [vmem:[#allocation88_spill] sm:$0xff]  ;;  %v14568_v49 = vld [vmem:[#allocation89_spill] sm:$0xff] }
 0x40f   :  { %v2664_v12 = vadd.f32 %v2663_v56, %v2662_v11  ;;  %v14560_v56 = vld [vmem:[#allocation83_spill] sm:$0xff]  ;;  %v934_v5 = vadd.f32 %v14562_v3, %v14561_v44  ;;  %v14567_v4 = vld [vmem:[#allocation92_spill] sm:$0xff] }
 0x410   :  { %v10982_v23 = vpop.f32.mrf.mxu0  ;;  %v1496_v11 = vadd.f32 %v14560_v56, %v928_v18  ;;  %v2030_v38 = vadd.f32 %v14563_v2, %v1495_v39  ;;  %v14565_v18 = vld [vmem:[#allocation90_spill] sm:$0xff]  ;;  %v14566_v56 = vld [vmem:[#allocation44_spill] sm:$0xff]  ;;  %v2673_v39 = vsel %vm2585_vm2, %v11019_v22, 0.0 }
 0x411   :  { %v2666_v47 = vadd.f32 %v2665_v1, %v2664_v12  ;;  %v14564_v1 = vld [vmem:[#allocation86_spill] sm:$0xff]  ;;  %v11030_v31 = vadd.f32 %v14565_v18, %v2029_v30  ;;  %v937_v26 = vadd.f32 %v14567_v4, %v14566_v56  ;;  %v1498_v16 = vadd.f32 %v14568_v49, %v934_v5  ;;  %v14573_v4 = vld [vmem:[#allocation96_spill] sm:$0xff] }
 0x412   :  { %v1497_v12 = vadd.f32 %v14564_v1, %v931_v25  ;;  %v14570_v25 = vld [vmem:[#allocation93_spill] sm:$0xff]  ;;  %v14571_v1 = vld [vmem:[#allocation87_spill] sm:$0xff]  ;;  %v940_v56 = vadd.f32 %v14573_v4, %v14572_v61 }
 0x413   :  { %v2668_v6 = vadd.f32 %v2667_v24, %v2666_v47  ;;  %v14569_v47 = vld [vmem:[#allocation84_spill] sm:$0xff]  ;;  %v11041_v3 = vadd.f32 %v14570_v25, %v2030_v38  ;;  %v1499_v2 = vadd.f32 %v10628_v33, %v937_v26  ;;  %v2675_v5 = vsel %vm2585_vm2, %v11030_v31, 0.0  ;;  %v14576_v25 = vld [vmem:[#allocation46_spill] sm:$0xff]  ;;  %v14578_v4 = vld [vmem:[#allocation47_spill] sm:$0xff] }
 0x414   :  { %v2031_v44 = vadd.f32 %v14569_v47, %v1496_v11  ;;  %v2032_v18 = vadd.f32 %v14571_v1, %v1497_v12  ;;  %v14575_v11 = vld [vmem:[#allocation91_spill] sm:$0xff]  ;;  %v11053_v47 = vpop.f32.mrf.mxu1  ;;  %v943_v33 = vadd.f32 %v10659_v35, %v14576_v25  ;;  %v14577_v26 = vld [vmem:[#allocation94_spill] sm:$0xff] }
 0x415   :  { %v2670_v24 = vadd.f32 %v2669_v54, %v2668_v6  ;;  %v14574_v54 = vld [vmem:[#allocation95_spill] sm:$0xff]  ;;  %v2033_v49 = vadd.f32 %v14575_v11, %v1498_v16  ;;  %v2677_v12 = vsel %vm2585_vm2, %v11041_v3, 0.0 }
 0x416   :  { %v11050_v6 = vadd.f32 %v14574_v54, %v2031_v44  ;;  %v11061_v61 = vadd.f32 %v10645_v45, %v2032_v18  ;;  %v11064_v44 = vpop.f32.mrf.mxu2  ;;  %v1501_v35 = vadd.f32 %v10667_v0, %v943_v33  ;;  %v14579_v45 = vld [vmem:[#allocation48_spill] sm:$0xff]  ;;  %v14581_v0 = vld [vmem:[#allocation49_spill] sm:$0xff] }
 0x417   :  { %v2672_v30 = vadd.f32 %v2671_v37, %v2670_v24  ;;  %v1500_v37 = vadd.f32 %v10641_v42, %v940_v56  ;;  %v2034_v24 = vadd.f32 %v14577_v26, %v1499_v2  ;;  %v949_v18 = vadd.f32 %v10737_v20, %v14579_v45  ;;  %v14580_v56 = vld [vmem:[#allocation97_spill] sm:$0xff]  ;;  %v14582_v26 = vld [vmem:[#allocation7_spill] sm:$0xff] }
 0x418   :  { %v11023_v58 = vpop.f32.mrf.mxu0  ;;  %v2679_v42 = vsel %vm2585_vm2, %v11050_v6, 0.0  ;;  %v2681_v11 = vsel %vm2585_vm2, %v11061_v61, 0.0  ;;  %v2036_v20 = vadd.f32 %v10685_v28, %v1501_v35 }
 0x419   :  { %v2674_v38 = vadd.f32 %v2673_v39, %v2672_v30  ;;  %v946_v39 = vadd.f32 %v10699_v32, %v14578_v4  ;;  %v11074_v30 = vadd.f32 %v10677_v53, %v2033_v49  ;;  %v2035_v54 = vadd.f32 %v14580_v56, %v1500_v37  ;;  %v1975_v49 = vpop.f32.mrf.mxu3  ;;  %v14585_v56 = vld [vmem:[#allocation11_spill] sm:$0xff] }
 0x41a   :  { %v11083_v32 = vadd.f32 %v10709_v41, %v2034_v24  ;;  %v1503_v53 = vadd.f32 %v10747_v14, %v949_v18  ;;  %v11101_v24 = vadd.f32 %v10769_v50, %v2036_v20  ;;  %v14584_v18 = vld [vmem:[#allocation8_spill] sm:$0xff] }
 0x41b   :  { %v2676_v1 = vadd.f32 %v2675_v5, %v2674_v38  ;;  %v1502_v5 = vadd.f32 %v10707_v48, %v946_v39  ;;  %v952_v38 = vadd.f32 %v10777_v13, %v14581_v0  ;;  %v2683_v33 = vsel %vm2585_vm2, %v11074_v30, 0.0  ;;  %v14583_v39 = vld [vmem:[#allocation9_spill] sm:$0xff] }
 0x41c   :  { %v11092_v48 = vadd.f32 %v10739_v36, %v2035_v54  ;;  %v955_v13 = vadd.f32 %v10824_v59, %v14582_v26  ;;  %v2685_v14 = vsel %vm2585_vm2, %v11083_v32, 0.0  ;;  %v2038_v28 = vadd.f32 %v10761_v60, %v1503_v53 }
 0x41d   :  { %v2678_v2 = vadd.f32 %v2677_v12, %v2676_v1  ;;  %v1504_v37 = vadd.f32 %v10785_v43, %v952_v38  ;;  %v2037_v41 = vadd.f32 %v10723_v17, %v1502_v5  ;;  %v972_v1 = vpop.f32.mrf.mxu1  ;;  %v958_v43 = vadd.f32 %v10862_v27, %v14583_v39 }
 0x41e   :  { %v1505_v35 = vadd.f32 %v10832_v19, %v955_v13  ;;  %v2687_v17 = vsel %vm2585_vm2, %v11092_v48, 0.0  ;;  %v1443_v50 = vpop.f32.mrf.mxu2  ;;  %v961_v60 = vadd.f32 %v10900_v52, %v14584_v18  ;;  %v2689_v27 = vsel %vm2585_vm2, %v11101_v24, 0.0 }
 0x41f   :  { %v2680_v25 = vadd.f32 %v2679_v42, %v2678_v2  ;;  %v11110_v59 = vadd.f32 %v10810_v7, %v2037_v41  ;;  %v2039_v42 = vadd.f32 %v10808_v9, %v1504_v37  ;;  %v1506_v2 = vadd.f32 %v10870_v40, %v958_v43  ;;  %v14586_v40 = vld [vmem:[#allocation13_spill] sm:$0xff]  ;;  %v14589_v41 = vld [vmem:[#allocation24_spill] sm:$0xff] }
 0x420   :  { %v11066_v16 = vpop.f32.mrf.mxu0  ;;  %v11119_v19 = vadd.f32 %v10840_v63, %v2038_v28  ;;  %v964_v54 = vadd.f32 %v10945_v51, %v14585_v56  ;;  %v2040_v5 = vadd.f32 %v10848_v62, %v1505_v35  ;;  %v1507_v9 = vadd.f32 %v10910_v46, %v961_v60 }
 0x421   :  { %v2682_v12 = vadd.f32 %v2681_v11, %v2680_v25  ;;  %v2691_v11 = vsel %vm2585_vm2, %v11110_v59, 0.0  ;;  %v11128_v52 = vadd.f32 %v10872_v10, %v2039_v42  ;;  %v967_v0 = vadd.f32 %v11000_v15, %v14586_v40  ;;  %v1978_v38 = vpop.f32.mrf.mxu3 }
 0x422   :  { %v1508_v63 = vadd.f32 %v10957_v8, %v964_v54  ;;  %v2041_v51 = vadd.f32 %v10886_v34, %v1506_v2  ;;  %v2693_v62 = vsel %vm2585_vm2, %v11119_v19, 0.0  ;;  %v11137_v46 = vadd.f32 %v10902_v57, %v2040_v5 }
 0x423   :  { %v2684_v4 = vadd.f32 %v2683_v33, %v2682_v12  ;;  %v1509_v25 = vadd.f32 %v11011_v21, %v967_v0  ;;  %v14587_v33 = vld [vmem:[#allocation23_spill] sm:$0xff]  ;;  %v14588_v12 = vld [vmem:[#allocation10_spill] sm:$0xff]  ;;  %v2695_v8 = vsel %vm2585_vm2, %v11128_v52, 0.0 }
 0x424   :  { %v2042_v37 = vadd.f32 %v14587_v33, %v1507_v9  ;;  %v970_v15 = vadd.f32 %v11053_v47, %v14588_v12  ;;  %v11146_v34 = vadd.f32 %v14589_v41, %v2041_v51  ;;  %v2043_v26 = vadd.f32 %v10980_v29, %v1508_v63 }
 0x425   :  { %v2686_v45 = vadd.f32 %v2685_v14, %v2684_v4  ;;  %v975_v13 = vpop.f32.mrf.mxu1  ;;  %v14590_v14 = vld [vmem:[#allocation12_spill] sm:$0xff]  ;;  %v2697_v4 = vsel %vm2585_vm2, %v11137_v46, 0.0  ;;  %v2044_v47 = vadd.f32 %v11035_v55, %v1509_v25 }
 0x426   :  { %v973_v28 = vadd.f32 %v972_v1, %v14590_v14  ;;  %v1510_v21 = vadd.f32 %v11064_v44, %v970_v15  ;;  %v11154_v39 = vadd.f32 %v10982_v23, %v2042_v37  ;;  %v1446_v43 = vpop.f32.mrf.mxu2  ;;  %v2699_v29 = vsel %vm2585_vm2, %v11146_v34, 0.0 }
 0x427   :  { %v2688_v7 = vadd.f32 %v2687_v17, %v2686_v45  ;;  %v14592_v17 = vld [vmem:[#allocation14_spill] sm:$0xff]  ;;  %v11161_v1 = vadd.f32 %v11023_v58, %v2043_v26  ;;  %v11166_v2 = vadd.f32 %v11066_v16, %v2044_v47 }
 0x428   :  { %v2510_v36 = vpop.f32.mrf.mxu0  ;;  %14591 = vst [vmem:[#allocation63_spill] sm:$0xff] %v11154_v39  ;;  %v976_v42 = vadd.f32 %v975_v13, %v14592_v17  ;;  %v1511_v45 = vadd.f32 %v1443_v50, %v973_v28  ;;  %v2045_v18 = vadd.f32 %v1975_v49, %v1510_v21  ;;  %v2701_v23 = vsel %vm2585_vm2, %v11154_v39, 0.0  ;;  %v14596_v28 = vld [vmem:[#allocation99_spill] sm:$0xff]  ;;  %v14599_v17 = vld [vmem:[#allocation101_spill] sm:$0xff] }
 0x429   :  { %v2690_v53 = vadd.f32 %v2689_v27, %v2688_v7  ;;  %14593 = vst [vmem:[#allocation29_spill] sm:$0xff] %v11161_v1  ;;  %v1981_v55 = vpop.f32.mrf.mxu3  ;;  %v2703_v50 = vsel %vm2585_vm2, %v11161_v1, 0.0  ;;  %v2705_v49 = vsel %vm2585_vm2, %v11166_v2, 0.0 }
 0x42a   :  { %v1512_v60 = vadd.f32 %v1446_v43, %v976_v42  ;;  %14594 = vst [vmem:[#allocation30_spill] sm:$0xff] %v11166_v2  ;;  %v2046_v56 = vadd.f32 %v1978_v38, %v1511_v45  ;;  %v11170_v54 = vadd.f32 %v2510_v36, %v2045_v18  ;;  %v14598_v43 = vld [vmem:[#allocation100_spill] sm:$0xff] }
 0x42b   :  { %v2692_v20 = vadd.f32 %v2691_v11, %v2690_v53 }
 0x42c   :  { %v2047_v5 = vadd.f32 %v1981_v55, %v1512_v60  ;;  %v2707_v16 = vsel %vm2585_vm2, %v11170_v54, 0.0 }
 0x42d   :  { %v2694_v57 = vadd.f32 %v2693_v62, %v2692_v20  ;;  %v9451_v62 = vmov 512.0  }
 0x42e   :  { %9413 = vrcp.f32 %v9451_v62 }
 0x42f   :  { %v2696_v35 = vadd.f32 %v2695_v8, %v2694_v57 }
 0x430   :  { %v2513_v10 = vpop.f32.mrf.mxu0 }
 0x431   :  { %v2698_v44 = vadd.f32 %v2697_v4, %v2696_v35  ;;  %v11174_v9 = vadd.f32 %v2513_v10, %v2046_v56  ;;  %v14597_v4 = vld [vmem:[#allocation98_spill] sm:$0xff] }
 0x433   :  { %v2700_v27 = vadd.f32 %v2699_v29, %v2698_v44  ;;  %14595 = vst [vmem:[#allocation61_spill] sm:$0xff] %v11174_v9  ;;  %v2709_v63 = vsel %vm2585_vm2, %v11174_v9, 0.0  ;;  %v14600_v44 = vld [vmem:[#allocation102_spill] sm:$0xff] }
 0x434   :  { %v9414_v20 = vpop.eup %9413 }
 0x435   :  { %v2702_v7 = vadd.f32 %v2701_v23, %v2700_v27  ;;  %v2720_v33 = vmul.f32 512.0, %v9414_v20  ;;  %vm2724_vm3 = vweird.f32 %v9414_v20  ;;  %v14601_v23 = vld [vmem:[#allocation103_spill] sm:$0xff] }
 0x437   :  { %v2704_v11 = vadd.f32 %v2703_v50, %v2702_v7  ;;  %v2721_v12 = vsub.f32 1.0, %v2720_v33  ;;  %v14605_v33 = vld [vmem:[#allocation107_spill] sm:$0xff] }
 0x438   :  { %v2516_v58 = vpop.f32.mrf.mxu0 }
 0x439   :  { %v11178_v40 = vadd.f32 %v2516_v58, %v2047_v5  ;;  %v2706_v0 = vadd.f32 %v2705_v49, %v2704_v11  ;;  %v2722_v8 = vmul.f32 %v9414_v20, %v2721_v12  ;;  %v14602_v58 = vld [vmem:[#allocation104_spill] sm:$0xff] }
 0x43b   :  { %v2708_v36 = vadd.f32 %v2707_v16, %v2706_v0  ;;  %v2711_v38 = vsel %vm2585_vm2, %v11178_v40, 0.0  ;;  %v2723_v26 = vadd.f32 %v9414_v20, %v2722_v8  ;;  %v14603_v0 = vld [vmem:[#allocation105_spill] sm:$0xff] }
 0x43d   :  { %v2710_v53 = vadd.f32 %v2709_v63, %v2708_v36  ;;  %v11184_v57 = vsel %vm2724_vm3, %v9414_v20, %v2723_v26 }
 0x43f   :  { %v2712_v51 = vadd.f32 %v2711_v38, %v2710_v53 }
 0x441   :  { %v2713_v25 = vrot.slane %v2712_v51, 4 }
 0x443   :  { %v2714_v10 = vadd.f32 %v2713_v25, %v2712_v51  ;;  %v14604_v51 = vld [vmem:[#allocation106_spill] sm:$0xff] }
 0x445   :  { %v2715_v37 = vrot.slane %v2714_v10, 2 }
 0x447   :  { %v2716_v15 = vadd.f32 %v2715_v37, %v2714_v10 }
 0x449   :  { %v2717_v41 = vrot.slane %v2716_v15, 1 }
 0x44b   :  { %v2718_v13 = vadd.f32 %v2717_v41, %v2716_v15  ;;  %v14606_v41 = vld [vmem:[#allocation108_spill] sm:$0xff] }
 0x44d   :  { %v11187_v14 = vmul.f32 %v11184_v57, %v2718_v13 }
 0x44f   :  { %v2727_v21 = vsub.f32 %v14596_v28, %v11187_v14  ;;  %v2728_v47 = vsub.f32 %v14597_v4, %v11187_v14  ;;  %v2729_v35 = vsub.f32 %v14598_v43, %v11187_v14  ;;  %v2730_v42 = vsub.f32 %v14599_v17, %v11187_v14 }
 0x450   :  { %v2731_v18 = vsub.f32 %v14600_v44, %v11187_v14  ;;  %v2732_v55 = vsub.f32 %v14601_v23, %v11187_v14  ;;  %v2733_v5 = vsub.f32 %v14602_v58, %v11187_v14  ;;  %v2734_v63 = vsub.f32 %v14603_v0, %v11187_v14 }
 0x451   :  { %v2791_v45 = vmul.f32 %v2727_v21, %v2727_v21  ;;  %v2792_v29 = vmul.f32 %v2728_v47, %v2728_v47  ;;  %v2793_v60 = vmul.f32 %v2729_v35, %v2729_v35  ;;  %v2794_v27 = vmul.f32 %v2730_v42, %v2730_v42  ;;  %v14607_v35 = vld [vmem:[#allocation109_spill] sm:$0xff] }
 0x452   :  { %v2795_v49 = vmul.f32 %v2731_v18, %v2731_v18  ;;  %v2796_v36 = vmul.f32 %v2732_v55, %v2732_v55  ;;  %v2735_v62 = vsub.f32 %v14604_v51, %v11187_v14  ;;  %v2797_v25 = vmul.f32 %v2733_v5, %v2733_v5 }
 0x453   :  { %v2855_v56 = vsel %vm2585_vm2, %v2791_v45, 0.0  ;;  %v2856_v50 = vsel %vm2585_vm2, %v2792_v29, 0.0  ;;  %v2858_v11 = vsel %vm2585_vm2, %v2793_v60, 0.0  ;;  %v2860_v38 = vsel %vm2585_vm2, %v2794_v27, 0.0  ;;  %v14608_v60 = vld [vmem:[#allocation110_spill] sm:$0xff] }
 0x454   :  { %v2857_v7 = vadd.f32 %v2856_v50, %v2855_v56  ;;  %v2862_v20 = vsel %vm2585_vm2, %v2795_v49, 0.0  ;;  %v2736_v37 = vsub.f32 %v14605_v33, %v11187_v14  ;;  %v2798_v12 = vmul.f32 %v2734_v63, %v2734_v63  ;;  %v14610_v63 = vld [vmem:[#allocation112_spill] sm:$0xff] }
 0x455   :  { %v2864_v15 = vsel %vm2585_vm2, %v2796_v36, 0.0  ;;  %v2737_v26 = vsub.f32 %v14606_v41, %v11187_v14  ;;  %v2799_v13 = vmul.f32 %v2735_v62, %v2735_v62  ;;  %v2866_v21 = vsel %vm2585_vm2, %v2797_v25, 0.0  ;;  %v14611_v25 = vld [vmem:[#allocation113_spill] sm:$0xff] }
 0x456   :  { %v2859_v16 = vadd.f32 %v2858_v11, %v2857_v7  ;;  %v2738_v42 = vsub.f32 %v14607_v35, %v11187_v14  ;;  %v2800_v45 = vmul.f32 %v2736_v37, %v2736_v37  ;;  %v2868_v29 = vsel %vm2585_vm2, %v2798_v12, 0.0  ;;  %v14609_v7 = vld [vmem:[#allocation111_spill] sm:$0xff] }
 0x457   :  { %v2739_v55 = vsub.f32 %v14608_v60, %v11187_v14  ;;  %v2801_v27 = vmul.f32 %v2737_v26, %v2737_v26  ;;  %v2870_v56 = vsel %vm2585_vm2, %v2799_v13, 0.0  ;;  %v2740_v5 = vsub.f32 %v14609_v7, %v11187_v14 }
 0x458   :  { %v2861_v53 = vadd.f32 %v2860_v38, %v2859_v16  ;;  %v2802_v49 = vmul.f32 %v2738_v42, %v2738_v42  ;;  %v2872_v11 = vsel %vm2585_vm2, %v2800_v45, 0.0  ;;  %v2741_v36 = vsub.f32 %v14610_v63, %v11187_v14 }
 0x459   :  { %v2803_v38 = vmul.f32 %v2739_v55, %v2739_v55  ;;  %v14614_v55 = vld [vmem:[#allocation116_spill] sm:$0xff] }
 0x45a   :  { %v2863_v10 = vadd.f32 %v2862_v20, %v2861_v53  ;;  %v2874_v53 = vsel %vm2585_vm2, %v2801_v27, 0.0  ;;  %v2742_v20 = vsub.f32 %v14611_v25, %v11187_v14  ;;  %v2876_v37 = vsel %vm2585_vm2, %v2802_v49, 0.0  ;;  %v14615_v49 = vld [vmem:[#allocation117_spill] sm:$0xff] }
 0x45b   :  { %v2805_v26 = vmul.f32 %v2741_v36, %v2741_v36  ;;  %v2878_v13 = vsel %vm2585_vm2, %v2803_v38, 0.0  ;;  %v2745_v27 = vsub.f32 %v14614_v55, %v11187_v14 }
 0x45c   :  { %v2865_v8 = vadd.f32 %v2864_v15, %v2863_v10  ;;  %v2804_v10 = vmul.f32 %v2740_v5, %v2740_v5  ;;  %v14612_v15 = vld [vmem:[#allocation114_spill] sm:$0xff]  ;;  %v2806_v45 = vmul.f32 %v2742_v20, %v2742_v20 }
 0x45d   :  { %v2809_v20 = vmul.f32 %v2745_v27, %v2745_v27 }
 0x45e   :  { %v2867_v47 = vadd.f32 %v2866_v21, %v2865_v8  ;;  %v2743_v8 = vsub.f32 %v14612_v15, %v11187_v14  ;;  %v2884_v36 = vsel %vm2585_vm2, %v2806_v45, 0.0 }
 0x45f   :  { %v2890_v45 = vsel %vm2585_vm2, %v2809_v20, 0.0 }
 0x460   :  { %v2869_v18 = vadd.f32 %v2868_v29, %v2867_v47  ;;  %v14613_v47 = vld [vmem:[#allocation115_spill] sm:$0xff]  ;;  %v2880_v29 = vsel %vm2585_vm2, %v2804_v10, 0.0 }
 0x461   :  { %v2744_v42 = vsub.f32 %v14613_v47, %v11187_v14 }
 0x462   :  { %v2871_v50 = vadd.f32 %v2870_v56, %v2869_v18  ;;  %v2807_v56 = vmul.f32 %v2743_v8, %v2743_v8 }
 0x464   :  { %v2873_v16 = vadd.f32 %v2872_v11, %v2871_v50  ;;  %v2882_v50 = vsel %vm2585_vm2, %v2805_v26, 0.0  ;;  %v2746_v11 = vsub.f32 %v14615_v49, %v11187_v14  ;;  %v2886_v10 = vsel %vm2585_vm2, %v2807_v56, 0.0 }
 0x466   :  { %v2875_v62 = vadd.f32 %v2874_v53, %v2873_v16  ;;  %v2808_v16 = vmul.f32 %v2744_v42, %v2744_v42  ;;  %v14616_v53 = vld [vmem:[#allocation118_spill] sm:$0xff] }
 0x468   :  { %v2877_v12 = vadd.f32 %v2876_v37, %v2875_v62  ;;  %v2747_v62 = vsub.f32 %v14616_v53, %v11187_v14  ;;  %v2888_v26 = vsel %vm2585_vm2, %v2808_v16, 0.0 }
 0x46a   :  { %v2879_v21 = vadd.f32 %v2878_v13, %v2877_v12  ;;  %v14617_v12 = vld [vmem:[#allocation15_spill] sm:$0xff]  ;;  %v2810_v13 = vmul.f32 %v2746_v11, %v2746_v11 }
 0x46b   :  { %v2748_v8 = vsub.f32 %v14617_v12, %v11187_v14 }
 0x46c   :  { %v2881_v18 = vadd.f32 %v2880_v29, %v2879_v21  ;;  %v14618_v29 = vld [vmem:[#allocation16_spill] sm:$0xff]  ;;  %v2892_v56 = vsel %vm2585_vm2, %v2810_v13, 0.0 }
 0x46d   :  { %v2749_v42 = vsub.f32 %v14618_v29, %v11187_v14 }
 0x46e   :  { %v2883_v5 = vadd.f32 %v2882_v50, %v2881_v18  ;;  %v2811_v18 = vmul.f32 %v2747_v62, %v2747_v62 }
 0x46f   :  { %v2813_v12 = vmul.f32 %v2749_v42, %v2749_v42 }
 0x470   :  { %v2885_v38 = vadd.f32 %v2884_v36, %v2883_v5  ;;  %v14619_v5 = vld [vmem:[#allocation50_spill] sm:$0xff]  ;;  %v2812_v36 = vmul.f32 %v2748_v8, %v2748_v8  ;;  %v2894_v16 = vsel %vm2585_vm2, %v2811_v18, 0.0 }
 0x471   :  { %v2750_v27 = vsub.f32 %v14619_v5, %v11187_v14  ;;  %v2898_v13 = vsel %vm2585_vm2, %v2813_v12, 0.0 }
 0x472   :  { %v2887_v37 = vadd.f32 %v2886_v10, %v2885_v38  ;;  %v14620_v10 = vld [vmem:[#allocation17_spill] sm:$0xff]  ;;  %v2896_v20 = vsel %vm2585_vm2, %v2812_v36, 0.0 }
 0x473   :  { %v2751_v11 = vsub.f32 %v14620_v10, %v11187_v14  ;;  %v2814_v29 = vmul.f32 %v2750_v27, %v2750_v27 }
 0x474   :  { %v2889_v21 = vadd.f32 %v2888_v26, %v2887_v37  ;;  %v14621_v26 = vld [vmem:[#allocation51_spill] sm:$0xff] }
 0x475   :  { %v2752_v62 = vsub.f32 %v14621_v26, %v11187_v14  ;;  %v2815_v5 = vmul.f32 %v2751_v11, %v2751_v11  ;;  %v2900_v18 = vsel %vm2585_vm2, %v2814_v29, 0.0 }
 0x476   :  { %v2891_v50 = vadd.f32 %v2890_v45, %v2889_v21  ;;  %v14622_v45 = vld [vmem:[#allocation18_spill] sm:$0xff] }
 0x477   :  { %v2753_v8 = vsub.f32 %v14622_v45, %v11187_v14  ;;  %v2816_v10 = vmul.f32 %v2752_v62, %v2752_v62  ;;  %v2902_v36 = vsel %vm2585_vm2, %v2815_v5, 0.0 }
 0x478   :  { %v2893_v38 = vadd.f32 %v2892_v56, %v2891_v50  ;;  %v14623_v56 = vld [vmem:[#allocation52_spill] sm:$0xff] }
 0x479   :  { %v2754_v42 = vsub.f32 %v14623_v56, %v11187_v14  ;;  %v2817_v26 = vmul.f32 %v2753_v8, %v2753_v8  ;;  %v2904_v12 = vsel %vm2585_vm2, %v2816_v10, 0.0 }
 0x47a   :  { %v2895_v37 = vadd.f32 %v2894_v16, %v2893_v38  ;;  %v14624_v16 = vld [vmem:[#allocation19_spill] sm:$0xff] }
 0x47b   :  { %v2755_v27 = vsub.f32 %v14624_v16, %v11187_v14  ;;  %v2818_v45 = vmul.f32 %v2754_v42, %v2754_v42  ;;  %v2906_v29 = vsel %vm2585_vm2, %v2817_v26, 0.0 }
 0x47c   :  { %v2897_v21 = vadd.f32 %v2896_v20, %v2895_v37  ;;  %v14625_v20 = vld [vmem:[#allocation53_spill] sm:$0xff] }
 0x47d   :  { %v2756_v11 = vsub.f32 %v14625_v20, %v11187_v14  ;;  %v2819_v56 = vmul.f32 %v2755_v27, %v2755_v27  ;;  %v2908_v5 = vsel %vm2585_vm2, %v2818_v45, 0.0 }
 0x47e   :  { %v2899_v50 = vadd.f32 %v2898_v13, %v2897_v21  ;;  %v14626_v13 = vld [vmem:[#allocation20_spill] sm:$0xff] }
 0x47f   :  { %v2757_v62 = vsub.f32 %v14626_v13, %v11187_v14  ;;  %v2820_v16 = vmul.f32 %v2756_v11, %v2756_v11  ;;  %v2910_v10 = vsel %vm2585_vm2, %v2819_v56, 0.0 }
 0x480   :  { %v2901_v38 = vadd.f32 %v2900_v18, %v2899_v50  ;;  %v14627_v18 = vld [vmem:[#allocation54_spill] sm:$0xff] }
 0x481   :  { %v2758_v8 = vsub.f32 %v14627_v18, %v11187_v14  ;;  %v2821_v20 = vmul.f32 %v2757_v62, %v2757_v62  ;;  %v2912_v26 = vsel %vm2585_vm2, %v2820_v16, 0.0 }
 0x482   :  { %v2903_v37 = vadd.f32 %v2902_v36, %v2901_v38  ;;  %v14628_v36 = vld [vmem:[#allocation21_spill] sm:$0xff] }
 0x483   :  { %v2759_v42 = vsub.f32 %v14628_v36, %v11187_v14  ;;  %v2822_v13 = vmul.f32 %v2758_v8, %v2758_v8  ;;  %v2914_v45 = vsel %vm2585_vm2, %v2821_v20, 0.0 }
 0x484   :  { %v2905_v21 = vadd.f32 %v2904_v12, %v2903_v37  ;;  %v14629_v12 = vld [vmem:[#allocation55_spill] sm:$0xff] }
 0x485   :  { %v2760_v27 = vsub.f32 %v14629_v12, %v11187_v14  ;;  %v2823_v18 = vmul.f32 %v2759_v42, %v2759_v42  ;;  %v2916_v56 = vsel %vm2585_vm2, %v2822_v13, 0.0 }
 0x486   :  { %v2907_v50 = vadd.f32 %v2906_v29, %v2905_v21  ;;  %v14630_v29 = vld [vmem:[#allocation22_spill] sm:$0xff] }
 0x487   :  { %v2761_v11 = vsub.f32 %v14630_v29, %v11187_v14  ;;  %v2824_v36 = vmul.f32 %v2760_v27, %v2760_v27  ;;  %v2918_v16 = vsel %vm2585_vm2, %v2823_v18, 0.0 }
 0x488   :  { %v2909_v38 = vadd.f32 %v2908_v5, %v2907_v50  ;;  %v14631_v5 = vld [vmem:[#allocation56_spill] sm:$0xff] }
 0x489   :  { %v2762_v62 = vsub.f32 %v14631_v5, %v11187_v14  ;;  %v2825_v12 = vmul.f32 %v2761_v11, %v2761_v11  ;;  %v2920_v20 = vsel %vm2585_vm2, %v2824_v36, 0.0 }
 0x48a   :  { %v2911_v37 = vadd.f32 %v2910_v10, %v2909_v38  ;;  %v14632_v10 = vld [vmem:[#allocation57_spill] sm:$0xff] }
 0x48b   :  { %v2763_v8 = vsub.f32 %v14632_v10, %v11187_v14  ;;  %v2826_v29 = vmul.f32 %v2762_v62, %v2762_v62  ;;  %v2922_v13 = vsel %vm2585_vm2, %v2825_v12, 0.0 }
 0x48c   :  { %v2913_v21 = vadd.f32 %v2912_v26, %v2911_v37  ;;  %v14633_v26 = vld [vmem:[#allocation58_spill] sm:$0xff] }
 0x48d   :  { %v2764_v42 = vsub.f32 %v14633_v26, %v11187_v14  ;;  %v2827_v5 = vmul.f32 %v2763_v8, %v2763_v8  ;;  %v2924_v18 = vsel %vm2585_vm2, %v2826_v29, 0.0 }
 0x48e   :  { %v2915_v50 = vadd.f32 %v2914_v45, %v2913_v21  ;;  %v14634_v45 = vld [vmem:[#allocation25_spill] sm:$0xff] }
 0x48f   :  { %v2765_v27 = vsub.f32 %v14634_v45, %v11187_v14  ;;  %v2828_v10 = vmul.f32 %v2764_v42, %v2764_v42  ;;  %v2926_v36 = vsel %vm2585_vm2, %v2827_v5, 0.0 }
 0x490   :  { %v2917_v38 = vadd.f32 %v2916_v56, %v2915_v50  ;;  %v14635_v56 = vld [vmem:[#allocation59_spill] sm:$0xff] }
 0x491   :  { %v2766_v11 = vsub.f32 %v14635_v56, %v11187_v14  ;;  %v2829_v26 = vmul.f32 %v2765_v27, %v2765_v27  ;;  %v2928_v12 = vsel %vm2585_vm2, %v2828_v10, 0.0 }
 0x492   :  { %v2919_v37 = vadd.f32 %v2918_v16, %v2917_v38  ;;  %v14636_v16 = vld [vmem:[#allocation26_spill] sm:$0xff] }
 0x493   :  { %v2767_v62 = vsub.f32 %v14636_v16, %v11187_v14  ;;  %v2830_v45 = vmul.f32 %v2766_v11, %v2766_v11  ;;  %v2930_v29 = vsel %vm2585_vm2, %v2829_v26, 0.0  ;;  %v2771_v11 = vsub.f32 %v11019_v22, %v11187_v14 }
 0x494   :  { %v2921_v21 = vadd.f32 %v2920_v20, %v2919_v37  ;;  %v14637_v20 = vld [vmem:[#allocation60_spill] sm:$0xff] }
 0x495   :  { %v2768_v8 = vsub.f32 %v14637_v20, %v11187_v14  ;;  %v2831_v56 = vmul.f32 %v2767_v62, %v2767_v62  ;;  %v2932_v5 = vsel %vm2585_vm2, %v2830_v45, 0.0  ;;  %v2772_v62 = vsub.f32 %v11030_v31, %v11187_v14 }
 0x496   :  { %v2923_v50 = vadd.f32 %v2922_v13, %v2921_v21  ;;  %v14638_v13 = vld [vmem:[#allocation27_spill] sm:$0xff] }
 0x497   :  { %v2769_v42 = vsub.f32 %v14638_v13, %v11187_v14  ;;  %v2832_v16 = vmul.f32 %v2768_v8, %v2768_v8  ;;  %v2934_v10 = vsel %vm2585_vm2, %v2831_v56, 0.0  ;;  %v2773_v8 = vsub.f32 %v11041_v3, %v11187_v14 }
 0x498   :  { %v2925_v38 = vadd.f32 %v2924_v18, %v2923_v50  ;;  %v14639_v18 = vld [vmem:[#allocation28_spill] sm:$0xff] }
 0x499   :  { %v2770_v27 = vsub.f32 %v14639_v18, %v11187_v14  ;;  %v2936_v26 = vsel %vm2585_vm2, %v2832_v16, 0.0 }
 0x49a   :  { %v2927_v37 = vadd.f32 %v2926_v36, %v2925_v38  ;;  %v2833_v36 = vmul.f32 %v2769_v42, %v2769_v42  ;;  %v2774_v42 = vsub.f32 %v11050_v6, %v11187_v14 }
 0x49c   :  { %v2929_v21 = vadd.f32 %v2928_v12, %v2927_v37  ;;  %v2834_v12 = vmul.f32 %v2770_v27, %v2770_v27  ;;  %v2938_v45 = vsel %vm2585_vm2, %v2833_v36, 0.0  ;;  %v2775_v27 = vsub.f32 %v11061_v61, %v11187_v14 }
 0x49e   :  { %v2931_v50 = vadd.f32 %v2930_v29, %v2929_v21  ;;  %v2835_v29 = vmul.f32 %v2771_v11, %v2771_v11  ;;  %v2940_v56 = vsel %vm2585_vm2, %v2834_v12, 0.0  ;;  %v2776_v11 = vsub.f32 %v11074_v30, %v11187_v14 }
 0x4a0   :  { %v2933_v38 = vadd.f32 %v2932_v5, %v2931_v50  ;;  %v2836_v5 = vmul.f32 %v2772_v62, %v2772_v62  ;;  %v2942_v16 = vsel %vm2585_vm2, %v2835_v29, 0.0  ;;  %v2777_v62 = vsub.f32 %v11083_v32, %v11187_v14 }
 0x4a2   :  { %v2935_v37 = vadd.f32 %v2934_v10, %v2933_v38  ;;  %v2837_v10 = vmul.f32 %v2773_v8, %v2773_v8  ;;  %v2944_v36 = vsel %vm2585_vm2, %v2836_v5, 0.0  ;;  %v2778_v8 = vsub.f32 %v11092_v48, %v11187_v14 }
 0x4a4   :  { %v2937_v21 = vadd.f32 %v2936_v26, %v2935_v37  ;;  %v2838_v26 = vmul.f32 %v2774_v42, %v2774_v42  ;;  %v2946_v12 = vsel %vm2585_vm2, %v2837_v10, 0.0  ;;  %v2779_v42 = vsub.f32 %v11101_v24, %v11187_v14 }
 0x4a6   :  { %v2939_v50 = vadd.f32 %v2938_v45, %v2937_v21  ;;  %v2839_v45 = vmul.f32 %v2775_v27, %v2775_v27  ;;  %v2948_v29 = vsel %vm2585_vm2, %v2838_v26, 0.0  ;;  %v2780_v27 = vsub.f32 %v11110_v59, %v11187_v14 }
 0x4a8   :  { %v2941_v38 = vadd.f32 %v2940_v56, %v2939_v50  ;;  %v2840_v56 = vmul.f32 %v2776_v11, %v2776_v11  ;;  %v2950_v5 = vsel %vm2585_vm2, %v2839_v45, 0.0  ;;  %v2781_v11 = vsub.f32 %v11119_v19, %v11187_v14 }
 0x4aa   :  { %v2943_v37 = vadd.f32 %v2942_v16, %v2941_v38  ;;  %v2841_v16 = vmul.f32 %v2777_v62, %v2777_v62  ;;  %v2952_v10 = vsel %vm2585_vm2, %v2840_v56, 0.0  ;;  %v2782_v62 = vsub.f32 %v11128_v52, %v11187_v14 }
 0x4ac   :  { %v2945_v21 = vadd.f32 %v2944_v36, %v2943_v37  ;;  %v2842_v36 = vmul.f32 %v2778_v8, %v2778_v8  ;;  %v2954_v26 = vsel %vm2585_vm2, %v2841_v16, 0.0  ;;  %v2783_v8 = vsub.f32 %v11137_v46, %v11187_v14 }
 0x4ae   :  { %v2947_v50 = vadd.f32 %v2946_v12, %v2945_v21  ;;  %v2843_v12 = vmul.f32 %v2779_v42, %v2779_v42  ;;  %v2956_v45 = vsel %vm2585_vm2, %v2842_v36, 0.0  ;;  %v2784_v42 = vsub.f32 %v11146_v34, %v11187_v14 }
 0x4b0   :  { %v2949_v38 = vadd.f32 %v2948_v29, %v2947_v50  ;;  %v2844_v29 = vmul.f32 %v2780_v27, %v2780_v27  ;;  %v2958_v56 = vsel %vm2585_vm2, %v2843_v12, 0.0  ;;  %v2785_v27 = vsub.f32 %v11154_v39, %v11187_v14 }
 0x4b2   :  { %v2951_v37 = vadd.f32 %v2950_v5, %v2949_v38  ;;  %v2845_v5 = vmul.f32 %v2781_v11, %v2781_v11  ;;  %v2960_v16 = vsel %vm2585_vm2, %v2844_v29, 0.0  ;;  %v2786_v11 = vsub.f32 %v11161_v1, %v11187_v14 }
 0x4b4   :  { %v2953_v21 = vadd.f32 %v2952_v10, %v2951_v37  ;;  %v2846_v10 = vmul.f32 %v2782_v62, %v2782_v62  ;;  %v2962_v36 = vsel %vm2585_vm2, %v2845_v5, 0.0  ;;  %v2787_v62 = vsub.f32 %v11166_v2, %v11187_v14 }
 0x4b6   :  { %v2955_v50 = vadd.f32 %v2954_v26, %v2953_v21  ;;  %v2847_v26 = vmul.f32 %v2783_v8, %v2783_v8  ;;  %v2964_v12 = vsel %vm2585_vm2, %v2846_v10, 0.0  ;;  %v2788_v8 = vsub.f32 %v11170_v54, %v11187_v14 }
 0x4b8   :  { %v2957_v38 = vadd.f32 %v2956_v45, %v2955_v50  ;;  %v2848_v45 = vmul.f32 %v2784_v42, %v2784_v42  ;;  %v2966_v29 = vsel %vm2585_vm2, %v2847_v26, 0.0  ;;  %v2789_v42 = vsub.f32 %v11174_v9, %v11187_v14 }
 0x4ba   :  { %v2959_v37 = vadd.f32 %v2958_v56, %v2957_v38  ;;  %v2849_v56 = vmul.f32 %v2785_v27, %v2785_v27  ;;  %v2968_v5 = vsel %vm2585_vm2, %v2848_v45, 0.0  ;;  %v2790_v27 = vsub.f32 %v11178_v40, %v11187_v14 }
 0x4bc   :  { %v2961_v21 = vadd.f32 %v2960_v16, %v2959_v37  ;;  %v2850_v16 = vmul.f32 %v2786_v11, %v2786_v11  ;;  %v2970_v10 = vsel %vm2585_vm2, %v2849_v56, 0.0  ;;  %v2854_v45 = vmul.f32 %v2790_v27, %v2790_v27 }
 0x4be   :  { %v2963_v50 = vadd.f32 %v2962_v36, %v2961_v21  ;;  %v2851_v36 = vmul.f32 %v2787_v62, %v2787_v62  ;;  %v2972_v26 = vsel %vm2585_vm2, %v2850_v16, 0.0  ;;  %v2980_v56 = vsel %vm2585_vm2, %v2854_v45, 0.0 }
 0x4c0   :  { %v2965_v38 = vadd.f32 %v2964_v12, %v2963_v50  ;;  %v2852_v12 = vmul.f32 %v2788_v8, %v2788_v8  ;;  %v2974_v11 = vsel %vm2585_vm2, %v2851_v36, 0.0 }
 0x4c2   :  { %v2967_v37 = vadd.f32 %v2966_v29, %v2965_v38  ;;  %v2853_v29 = vmul.f32 %v2789_v42, %v2789_v42 }
 0x4c4   :  { %v2969_v21 = vadd.f32 %v2968_v5, %v2967_v37  ;;  %v2976_v37 = vsel %vm2585_vm2, %v2852_v12, 0.0  ;;  %v2978_v62 = vsel %vm2585_vm2, %v2853_v29, 0.0 }
 0x4c6   :  { %v2971_v50 = vadd.f32 %v2970_v10, %v2969_v21 }
 0x4c8   :  { %v2973_v38 = vadd.f32 %v2972_v26, %v2971_v50 }
 0x4ca   :  { %v2975_v2 = vadd.f32 %v2974_v11, %v2973_v38  ;;  %v2584_v11 = vld [vmem:[%s14240_s3] sm:$0x1] }
 0x4cc   :  { %v2977_v5 = vadd.f32 %v2976_v37, %v2975_v2  ;;  %v9096_v2 = vld [vmem:[%s14241_s4 + $0xc8] sm:$0xff] }
 0x4cd   :  { %5660 = vmatpush.msra.mxu0 %v9096_v2 }
 0x4ce   :  { %v2979_v9 = vadd.f32 %v2978_v62, %v2977_v5  ;;  %v14340_v5 = vmov 0.0  }
 0x4cf   :  { %3272 = vst.msk [vmem:[#allocation3] sm:$0xff] %vm2585_vm2, %v14340_v5 }
 0x4d0   :  { %v2981_v21 = vadd.f32 %v2980_v56, %v2979_v9  ;;  %3275 = vst.msk [vmem:[#allocation3 + $0x10] sm:$0xff] %vm2585_vm2, %v14340_v5 }
 0x4d1   :  { %3277 = vst.msk [vmem:[#allocation3 + $0x20] sm:$0xff] %vm2585_vm2, %v14340_v5 }
 0x4d2   :  { %v2982_v10 = vrot.slane %v2981_v21, 4  ;;  %3279 = vst.msk [vmem:[#allocation3 + $0x30] sm:$0xff] %vm2585_vm2, %v14340_v5 }
 0x4d3   :  { %3281 = vst.msk [vmem:[#allocation3 + $0x40] sm:$0xff] %vm2585_vm2, %v14340_v5 }
 0x4d4   :  { %v2983_v1 = vadd.f32 %v2982_v10, %v2981_v21  ;;  %3283 = vst.msk [vmem:[#allocation3 + $0x50] sm:$0xff] %vm2585_vm2, %v14340_v5 }
 0x4d5   :  { %3285 = vst.msk [vmem:[#allocation3 + $0x60] sm:$0xff] %vm2585_vm2, %v14340_v5 }
 0x4d6   :  { %v2984_v8 = vrot.slane %v2983_v1, 2  ;;  %3287 = vst.msk [vmem:[#allocation3 + $0x70] sm:$0xff] %vm2585_vm2, %v14340_v5 }
 0x4d7   :  { %3289 = vst.msk [vmem:[#allocation3 + $0x80] sm:$0xff] %vm2585_vm2, %v14340_v5 }
 0x4d8   :  { %v2985_v39 = vadd.f32 %v2984_v8, %v2983_v1  ;;  %v2583_v1 = vld [vmem:[%s14239_s2] sm:$0x1]  ;;  %3291 = vst.msk [vmem:[#allocation3 + $0x90] sm:$0xff] %vm2585_vm2, %v14340_v5 }
 0x4d9   :  { %3293 = vst.msk [vmem:[#allocation3 + $0xa0] sm:$0xff] %vm2585_vm2, %v14340_v5 }
 0x4da   :  { %v2986_v16 = vrot.slane %v2985_v39, 1  ;;  %3295 = vst.msk [vmem:[#allocation3 + $0xb0] sm:$0xff] %vm2585_vm2, %v14340_v5 }
 0x4db   :  { %3297 = vst.msk [vmem:[#allocation3 + $0xc0] sm:$0xff] %vm2585_vm2, %v14340_v5 }
 0x4dc   :  { %v2987_v50 = vadd.f32 %v2986_v16, %v2985_v39  ;;  %v3835_v16 = vld [vmem:[#allocation3] sm:$0xff]  ;;  %3299 = vst.msk [vmem:[#allocation3 + $0xd0] sm:$0xff] %vm2585_vm2, %v14340_v5 }
 0x4dd   :  { %8899 = vmatmul.msk.f32.vlgmr.msra.gmra.mxu2 %vm2585_vm2, %v3835_v16  ;;  %3301 = vst.msk [vmem:[#allocation3 + $0xe0] sm:$0xff] %vm2585_vm2, %v14340_v5 }
 0x4de   :  { %v2988_v42 = vmul.f32 %v2987_v50, %v11184_v57  ;;  %3303 = vst.msk [vmem:[#allocation3 + $0xf0] sm:$0xff] %vm2585_vm2, %v14340_v5 }
 0x4df   :  { %3305 = vst.msk [vmem:[#allocation3 + $0x100] sm:$0xff] %vm2585_vm2, %v14340_v5 }
 0x4e0   :  { %v2989_v36 = vadd.f32 1e-05, %v2988_v42  ;;  %3307 = vst.msk [vmem:[#allocation3 + $0x110] sm:$0xff] %vm2585_vm2, %v14340_v5 }
 0x4e1   :  { %3309 = vst.msk [vmem:[#allocation3 + $0x120] sm:$0xff] %vm2585_vm2, %v14340_v5 }
 0x4e2   :  { %9415 = vrsqrt.f32 %v2989_v36  ;;  %vm2996_vm5 = vweird.f32 %v2989_v36  ;;  %3311 = vst.msk [vmem:[#allocation3 + $0x130] sm:$0xff] %vm2585_vm2, %v14340_v5 }
 0x4e3   :  { %3313 = vst.msk [vmem:[#allocation3 + $0x140] sm:$0xff] %vm2585_vm2, %v14340_v5 }
 0x4e4   :  { %3315 = vst.msk [vmem:[#allocation3 + $0x150] sm:$0xff] %vm2585_vm2, %v14340_v5 }
 0x4e5   :  { %3317 = vst.msk [vmem:[#allocation3 + $0x160] sm:$0xff] %vm2585_vm2, %v14340_v5 }
 0x4e6   :  { %3319 = vst.msk [vmem:[#allocation3 + $0x170] sm:$0xff] %vm2585_vm2, %v14340_v5  ;;  %v14667_v5 = vld [vmem:[#allocation63_spill] sm:$0xff] }
 0x4e8   :  { %v9416_v27 = vpop.eup %9415 }
 0x4e9   :  { %v2991_v26 = vmul.f32 %v9416_v27, %v2989_v36  ;;  %vm2997_vm4 = vweird.f32 %v9416_v27 }
 0x4ea   :  { %vm2998_vm6 = vmor %vm2996_vm5, %vm2997_vm4 }
 0x4eb   :  { %v2992_v12 = vmul.f32 %v9416_v27, %v2991_v26 }
 0x4ed   :  { %v2993_v38 = vmul.f32 0.5, %v2992_v12 }
 0x4ef   :  { %v2994_v9 = vsub.f32 1.5, %v2993_v38 }
 0x4f1   :  { %v2995_v39 = vmul.f32 %v9416_v27, %v2994_v9 }
 0x4f3   :  { %v2999_v57 = vsel %vm2998_vm6, %v9416_v27, %v2995_v39 }
 0x4f4   :  { %v3000_v29 = vmul.f32 %v2999_v57, %v2583_v1  ;;  %v14646_v57 = vld [vmem:[#allocation18_spill] sm:$0xff] }
 0x4f6   :  { %v3001_v45 = vmul.f32 %v3000_v29, %v11187_v14  ;;  %v11392_v37 = vperm.slane %v3000_v29, 0 }
 0x4f8   :  { %v3002_v62 = vsub.f32 %v2584_v11, %v3001_v45  ;;  %v3067_v56 = vmul.f32 %v11392_v37, %v11170_v54  ;;  %v3069_v21 = vmul.f32 %v11392_v37, %v11178_v40  ;;  %v11426_v42 = vmul.f32 %v11392_v37, %v14596_v28  ;;  %v14647_v11 = vld [vmem:[#allocation52_spill] sm:$0xff] }
 0x4f9   :  { %v11430_v36 = vmul.f32 %v11392_v37, %v14597_v4  ;;  %v11434_v27 = vmul.f32 %v11392_v37, %v14598_v43  ;;  %v11438_v26 = vmul.f32 %v11392_v37, %v14599_v17  ;;  %v11442_v2 = vmul.f32 %v11392_v37, %v14600_v44 }
 0x4fa   :  { %v11404_v14 = vperm.slane %v3002_v62, 0  ;;  %v11448_v28 = vmul.f32 %v11392_v37, %v14601_v23  ;;  %v11452_v4 = vmul.f32 %v11392_v37, %v14602_v58  ;;  %v11456_v43 = vmul.f32 %v11392_v37, %v14603_v0  ;;  %v14648_v62 = vld [vmem:[#allocation19_spill] sm:$0xff] }
 0x4fb   :  { %v11460_v17 = vmul.f32 %v11392_v37, %v14604_v51  ;;  %v11466_v44 = vmul.f32 %v11392_v37, %v14605_v33  ;;  %v11470_v23 = vmul.f32 %v11392_v37, %v14606_v41  ;;  %v11474_v58 = vmul.f32 %v11392_v37, %v14607_v35 }
 0x4fc   :  { %v3134_v10 = vadd.f32 %v11404_v14, %v3067_v56  ;;  %v3136_v8 = vadd.f32 %v11404_v14, %v3069_v21  ;;  %v11478_v0 = vmul.f32 %v11392_v37, %v14608_v60  ;;  %v11484_v51 = vmul.f32 %v11392_v37, %v14609_v7  ;;  %v14649_v21 = vld [vmem:[#allocation53_spill] sm:$0xff] }
 0x4fd   :  { %v11488_v33 = vmul.f32 %v11392_v37, %v14610_v63  ;;  %v11492_v41 = vmul.f32 %v11392_v37, %v14611_v25  ;;  %v11496_v35 = vmul.f32 %v11392_v37, %v14612_v15  ;;  %v11502_v60 = vmul.f32 %v11392_v37, %v14613_v47  ;;  %v14640_v15 = vld [vmem:[#allocation15_spill] sm:$0xff]  ;;  %v14641_v47 = vld [vmem:[#allocation16_spill] sm:$0xff] }
 0x4fe   :  { %v3198_v54 = vmax.f32 %v3134_v10, 0.0  ;;  %v3200_v40 = vmax.f32 %v3136_v8, 0.0  ;;  %v11506_v7 = vmul.f32 %v11392_v37, %v14614_v55  ;;  %v11510_v63 = vmul.f32 %v11392_v37, %v14615_v49  ;;  %v14642_v55 = vld [vmem:[#allocation50_spill] sm:$0xff]  ;;  %v14644_v49 = vld [vmem:[#allocation17_spill] sm:$0xff]  ;;  %v14650_v8 = vld [vmem:[#allocation20_spill] sm:$0xff] }
 0x4ff   :  { %v11514_v25 = vmul.f32 %v11392_v37, %v14616_v53  ;;  %v11520_v12 = vmul.f32 %v11392_v37, %v14640_v15  ;;  %v11524_v38 = vmul.f32 %v11392_v37, %v14641_v47  ;;  %v11528_v9 = vmul.f32 %v11392_v37, %v14642_v55  ;;  %v14645_v53 = vld [vmem:[#allocation51_spill] sm:$0xff] }
 0x500   :  { %v3266_v50 = vmax.f32 %v3198_v54, %v3200_v40  ;;  %v3030_v1 = vmul.f32 %v11392_v37, %v14644_v49  ;;  %v3031_v39 = vmul.f32 %v11392_v37, %v14645_v53  ;;  %v3032_v29 = vmul.f32 %v11392_v37, %v14646_v57  ;;  %v14651_v40 = vld [vmem:[#allocation54_spill] sm:$0xff]  ;;  %v14653_v47 = vld [vmem:[#allocation55_spill] sm:$0xff]  ;;  %v14655_v57 = vld [vmem:[#allocation56_spill] sm:$0xff] }
 0x501   :  { %14643 = vst [vmem:[#allocation31_spill] sm:$0xff] %v11528_v9  ;;  %v3033_v45 = vmul.f32 %v11392_v37, %v14647_v11  ;;  %v3034_v56 = vmul.f32 %v11392_v37, %v14648_v62  ;;  %v3035_v10 = vmul.f32 %v11392_v37, %v14649_v21  ;;  %v3036_v54 = vmul.f32 %v11392_v37, %v14650_v8  ;;  %v14654_v49 = vld [vmem:[#allocation22_spill] sm:$0xff]  ;;  %v14657_v62 = vld [vmem:[#allocation57_spill] sm:$0xff] }
 0x502   :  { %3271 = vst.msk [vmem:[#allocation2 + $0xf8] sm:$0xff] %vm2585_vm2, %v3266_v50  ;;  %v3037_v16 = vmul.f32 %v11392_v37, %v14651_v40  ;;  %v14652_v50 = vld [vmem:[#allocation21_spill] sm:$0xff]  ;;  %v11558_v55 = vmul.f32 %v11392_v37, %v14653_v47  ;;  %v11562_v53 = vmul.f32 %v11392_v37, %v14654_v49  ;;  %v11566_v11 = vmul.f32 %v11392_v37, %v14655_v57  ;;  %v14658_v8 = vld [vmem:[#allocation58_spill] sm:$0xff]  ;;  %v14660_v49 = vld [vmem:[#allocation59_spill] sm:$0xff] }
 0x503   :  { %v11552_v15 = vmul.f32 %v11392_v37, %v14652_v50  ;;  %v11570_v21 = vmul.f32 %v11392_v37, %v14657_v62  ;;  %v11576_v40 = vmul.f32 %v11392_v37, %v14658_v8  ;;  %v14659_v50 = vld [vmem:[#allocation25_spill] sm:$0xff]  ;;  %v11584_v9 = vmul.f32 %v11392_v37, %v14660_v49  ;;  %v14661_v57 = vld [vmem:[#allocation26_spill] sm:$0xff] }
 0x504   :  { %14656 = vst [vmem:[#allocation62_spill] sm:$0xff] %v11566_v11  ;;  %v11580_v47 = vmul.f32 %v11392_v37, %v14659_v50  ;;  %v11588_v11 = vmul.f32 %v11392_v37, %v14661_v57  ;;  %v11594_v62 = vmul.f32 %v11392_v37, %v14637_v20  ;;  %v11598_v8 = vmul.f32 %v11392_v37, %v14638_v13 }
 0x505   :  { %v11602_v50 = vmul.f32 %v11392_v37, %v14639_v18  ;;  %v11606_v49 = vmul.f32 %v11392_v37, %v11019_v22  ;;  %v11612_v57 = vmul.f32 %v11392_v37, %v11030_v31  ;;  %v11616_v20 = vmul.f32 %v11392_v37, %v11041_v3 }
 0x506   :  { %v11620_v13 = vmul.f32 %v11392_v37, %v11050_v6  ;;  %v11624_v18 = vmul.f32 %v11392_v37, %v11061_v61  ;;  %v11630_v22 = vmul.f32 %v11392_v37, %v11074_v30  ;;  %v11634_v31 = vmul.f32 %v11392_v37, %v11083_v32 }
 0x507   :  { %v11638_v3 = vmul.f32 %v11392_v37, %v11092_v48  ;;  %v11641_v6 = vadd.f32 %v11404_v14, %v3030_v1  ;;  %v11646_v61 = vadd.f32 %v11404_v14, %v3031_v39  ;;  %v11649_v30 = vadd.f32 %v11404_v14, %v3032_v29 }
 0x508   :  { %14662 = vst [vmem:[#allocation32_spill] sm:$0xff] %v11630_v22  ;;  %v11652_v22 = vadd.f32 %v11404_v14, %v3033_v45  ;;  %v11655_v32 = vadd.f32 %v11404_v14, %v3034_v56  ;;  %v11661_v48 = vmul.f32 %v11392_v37, %v11101_v24  ;;  %v11664_v1 = vadd.f32 %v11404_v14, %v3035_v10 }
 0x509   :  { %14663 = vst [vmem:[#allocation33_spill] sm:$0xff] %v11638_v3  ;;  %v11667_v39 = vadd.f32 %v11404_v14, %v3036_v54  ;;  %v11670_v29 = vadd.f32 %v11404_v14, %v3037_v16  ;;  %v3059_v45 = vmul.f32 %v11392_v37, %v11110_v59  ;;  %v11676_v56 = vmul.f32 %v11392_v37, %v11119_v19  ;;  %v14669_v59 = vld [vmem:[#allocation30_spill] sm:$0xff]  ;;  %v14670_v19 = vld [vmem:[#allocation61_spill] sm:$0xff] }
 0x50a   :  { %14664 = vst [vmem:[#allocation70_spill] sm:$0xff] %v11661_v48  ;;  %v3061_v24 = vmul.f32 %v11392_v37, %v11128_v52  ;;  %v3062_v10 = vmul.f32 %v11392_v37, %v11137_v46  ;;  %v3063_v54 = vmul.f32 %v11392_v37, %v11146_v34  ;;  %v3064_v16 = vmul.f32 %v11392_v37, %v14667_v5  ;;  %v14668_v48 = vld [vmem:[#allocation29_spill] sm:$0xff] }
 0x50b   :  { %14665 = vst [vmem:[#allocation34_spill] sm:$0xff] %v11670_v29  ;;  %v3065_v3 = vmul.f32 %v11392_v37, %v14668_v48  ;;  %v3066_v29 = vmul.f32 %v11392_v37, %v14669_v59  ;;  %v11694_v52 = vadd.f32 %v11404_v14, %v11426_v42  ;;  %v11698_v46 = vadd.f32 %v11404_v14, %v11430_v36 }
 0x50c   :  { %14666 = vst [vmem:[#allocation67_spill] sm:$0xff] %v11676_v56  ;;  %v3068_v56 = vmul.f32 %v11392_v37, %v14670_v19  ;;  %v11702_v34 = vadd.f32 %v11404_v14, %v11434_v27  ;;  %v11706_v5 = vadd.f32 %v11404_v14, %v11438_v26  ;;  %v11710_v48 = vadd.f32 %v11404_v14, %v11442_v2 }
 0x50d   :  { %v11714_v37 = vadd.f32 %v11404_v14, %v11448_v28  ;;  %v11718_v42 = vadd.f32 %v11404_v14, %v11452_v4  ;;  %v11722_v36 = vadd.f32 %v11404_v14, %v11456_v43  ;;  %v11726_v27 = vadd.f32 %v11404_v14, %v11460_v17 }
 0x50e   :  { %v11730_v26 = vadd.f32 %v11404_v14, %v11466_v44  ;;  %v11734_v2 = vadd.f32 %v11404_v14, %v11470_v23  ;;  %v11738_v28 = vadd.f32 %v11404_v14, %v11474_v58  ;;  %v11741_v4 = vadd.f32 %v11404_v14, %v3059_v45 }
 0x50f   :  { %v11744_v43 = vadd.f32 %v11404_v14, %v3061_v24  ;;  %v11747_v17 = vadd.f32 %v11404_v14, %v3062_v10  ;;  %v11750_v44 = vadd.f32 %v11404_v14, %v3063_v54  ;;  %v11753_v59 = vadd.f32 %v11404_v14, %v3064_v16  ;;  %v14675_v16 = vld [vmem:[#allocation62_spill] sm:$0xff]  ;;  %v14677_v19 = vld [vmem:[#allocation32_spill] sm:$0xff] }
 0x510   :  { %v11756_v23 = vadd.f32 %v11404_v14, %v3065_v3  ;;  %v11759_v58 = vadd.f32 %v11404_v14, %v3066_v29  ;;  %v11763_v45 = vadd.f32 %v11404_v14, %v11478_v0  ;;  %v11767_v24 = vadd.f32 %v11404_v14, %v11484_v51 }
 0x511   :  { %v11771_v10 = vadd.f32 %v11404_v14, %v11488_v33  ;;  %v11774_v54 = vadd.f32 %v11404_v14, %v3068_v56  ;;  %v11778_v3 = vadd.f32 %v11404_v14, %v11492_v41  ;;  %v11782_v29 = vadd.f32 %v11404_v14, %v11496_v35 }
 0x512   :  { %14671 = vst [vmem:[#allocation65_spill] sm:$0xff] %v11767_v24  ;;  %v11786_v0 = vadd.f32 %v11404_v14, %v11502_v60  ;;  %v11790_v51 = vadd.f32 %v11404_v14, %v11506_v7  ;;  %v11794_v33 = vadd.f32 %v11404_v14, %v11510_v63  ;;  %v11798_v41 = vadd.f32 %v11404_v14, %v11514_v25  ;;  %v14680_v24 = vld [vmem:[#allocation34_spill] sm:$0xff] }
 0x513   :  { %v11802_v35 = vadd.f32 %v11404_v14, %v11520_v12  ;;  %v11806_v60 = vadd.f32 %v11404_v14, %v11524_v38  ;;  %v3105_v7 = vadd.f32 %v11404_v14, %v11552_v15  ;;  %v3106_v56 = vadd.f32 %v11404_v14, %v11558_v55 }
 0x514   :  { %14672 = vst [vmem:[#allocation35_spill] sm:$0xff] %v11798_v41  ;;  %v3107_v63 = vadd.f32 %v11404_v14, %v11562_v53  ;;  %v3108_v25 = vadd.f32 %v11404_v14, %v14675_v16  ;;  %v11818_v12 = vadd.f32 %v11404_v14, %v11570_v21  ;;  %v11822_v38 = vadd.f32 %v11404_v14, %v11576_v40 }
 0x515   :  { %14673 = vst [vmem:[#allocation64_spill] sm:$0xff] %v11802_v35  ;;  %v11826_v15 = vadd.f32 %v11404_v14, %v11580_v47  ;;  %v11830_v55 = vadd.f32 %v11404_v14, %v11584_v9  ;;  %v11834_v53 = vadd.f32 %v11404_v14, %v11588_v11  ;;  %v11838_v21 = vadd.f32 %v11404_v14, %v11594_v62 }
 0x516   :  { %14674 = vst [vmem:[#allocation36_spill] sm:$0xff] %v11806_v60  ;;  %v11842_v40 = vadd.f32 %v11404_v14, %v11598_v8  ;;  %v11846_v47 = vadd.f32 %v11404_v14, %v11602_v50  ;;  %v11850_v9 = vadd.f32 %v11404_v14, %v11606_v49  ;;  %v11854_v11 = vadd.f32 %v11404_v14, %v11612_v57 }
 0x517   :  { %v11858_v62 = vadd.f32 %v11404_v14, %v11616_v20  ;;  %v11862_v8 = vadd.f32 %v11404_v14, %v11620_v13  ;;  %v11866_v50 = vadd.f32 %v11404_v14, %v11624_v18  ;;  %v11870_v49 = vadd.f32 %v11404_v14, %v14677_v19 }
 0x518   :  { %v11874_v57 = vadd.f32 %v11404_v14, %v11634_v31  ;;  %v3137_v16 = vmax.f32 %v11694_v52, 0.0  ;;  %v3138_v20 = vmax.f32 %v11698_v46, 0.0  ;;  %v3139_v35 = vmax.f32 %v11702_v34, 0.0 }
 0x519   :  { %14676 = vst [vmem:[#allocation68_spill] sm:$0xff] %v11866_v50  ;;  %v3140_v13 = vmax.f32 %v11706_v5, 0.0  ;;  %v3141_v60 = vmax.f32 %v11710_v48, 0.0  ;;  %v3142_v18 = vmax.f32 %v11714_v37, 0.0  ;;  %v3143_v41 = vmax.f32 %v11718_v42, 0.0 }
 0x51a   :  { %14678 = vst [vmem:[#allocation37_spill] sm:$0xff] %v11870_v49  ;;  %v3144_v19 = vmax.f32 %v11722_v36, 0.0  ;;  %v3145_v49 = vmax.f32 %v11726_v27, 0.0  ;;  %v3146_v31 = vmax.f32 %v11730_v26, 0.0  ;;  %v3147_v52 = vmax.f32 %v11734_v2, 0.0 }
 0x51b   :  { %14679 = vst [vmem:[#allocation75_spill] sm:$0xff] %v11874_v57  ;;  %v3148_v46 = vmax.f32 %v11738_v28, 0.0  ;;  %v3161_v42 = vmax.f32 %v11641_v6, 0.0  ;;  %v3169_v57 = vmax.f32 %v3105_v7, 0.0  ;;  %v3170_v36 = vmax.f32 %v3106_v56, 0.0 }
 0x51c   :  { %v3171_v50 = vmax.f32 %v3107_v63, 0.0  ;;  %v3172_v27 = vmax.f32 %v3108_v25, 0.0  ;;  %v3162_v26 = vmax.f32 %v11646_v61, 0.0  ;;  %v3163_v2 = vmax.f32 %v11649_v30, 0.0 }
 0x51d   :  { %v3164_v28 = vmax.f32 %v11652_v22, 0.0  ;;  %v3165_v34 = vmax.f32 %v11655_v32, 0.0  ;;  %v3166_v5 = vmax.f32 %v11664_v1, 0.0  ;;  %v3167_v48 = vmax.f32 %v11667_v39, 0.0 }
 0x51e   :  { %v3168_v37 = vmax.f32 %v14680_v24, 0.0  ;;  %v3173_v6 = vmax.f32 %v11818_v12, 0.0  ;;  %v3174_v7 = vmax.f32 %v11822_v38, 0.0  ;;  %v3175_v56 = vmax.f32 %v11826_v15, 0.0 }
 0x51f   :  { %v3176_v61 = vmax.f32 %v11830_v55, 0.0  ;;  %v3201_v63 = vmax.f32 %v3137_v16, %v3139_v35  ;;  %v3177_v30 = vmax.f32 %v11834_v53, 0.0  ;;  %v3202_v22 = vmax.f32 %v3138_v20, %v3140_v13  ;;  %v14681_v13 = vld [vmem:[#allocation33_spill] sm:$0xff] }
 0x520   :  { %v3203_v25 = vmax.f32 %v3169_v57, %v3171_v50  ;;  %v3204_v32 = vmax.f32 %v3170_v36, %v3172_v27  ;;  %v3190_v1 = vmax.f32 %v11741_v4, 0.0  ;;  %v3192_v39 = vmax.f32 %v11744_v43, 0.0 }
 0x521   :  { %v3193_v24 = vmax.f32 %v11747_v17, 0.0  ;;  %3205 = vst.msk [vmem:[#allocation2] sm:$0xff] %vm2585_vm2, %v3201_v63  ;;  %v3209_v12 = vmax.f32 %v3141_v60, %v3143_v41  ;;  %v3194_v38 = vmax.f32 %v11750_v44, 0.0  ;;  %v3195_v15 = vmax.f32 %v11753_v59, 0.0 }
 0x522   :  { %v3196_v35 = vmax.f32 %v11756_v23, 0.0  ;;  %3206 = vst.msk [vmem:[#allocation2 + $0x8] sm:$0xff] %vm2585_vm2, %v3202_v22  ;;  %v3210_v55 = vmax.f32 %v3142_v18, %v3144_v19  ;;  %v3179_v53 = vmax.f32 %v11842_v40, 0.0  ;;  %v3197_v4 = vmax.f32 %v11759_v58, 0.0 }
 0x523   :  { %v3199_v43 = vmax.f32 %v11774_v54, 0.0  ;;  %3207 = vst.msk [vmem:[#allocation2 + $0x80] sm:$0xff] %vm2585_vm2, %v3203_v25  ;;  %v3211_v17 = vmax.f32 %v3173_v6, %v3175_v56  ;;  %v3178_v41 = vmax.f32 %v11838_v21, 0.0  ;;  %v3180_v44 = vmax.f32 %v11846_v47, 0.0  ;;  %v14690_v6 = vld [vmem:[#allocation68_spill] sm:$0xff] }
 0x524   :  { %v3181_v59 = vmax.f32 %v11850_v9, 0.0  ;;  %3208 = vst.msk [vmem:[#allocation2 + $0x88] sm:$0xff] %vm2585_vm2, %v3204_v32  ;;  %v3212_v23 = vmax.f32 %v3174_v7, %v3176_v61  ;;  %v3218_v60 = vmax.f32 %v3145_v49, %v3147_v52  ;;  %v3219_v40 = vmax.f32 %v3146_v31, %v3148_v46  ;;  %v14682_v46 = vld [vmem:[#allocation31_spill] sm:$0xff]  ;;  %v14694_v25 = vld [vmem:[#allocation36_spill] sm:$0xff] }
 0x525   :  { %3214 = vst.msk [vmem:[#allocation2 + $0x10] sm:$0xff] %vm2585_vm2, %v3209_v12  ;;  %v11922_v50 = vmax.f32 %v3190_v1, %v3192_v39  ;;  %v11924_v58 = vmax.f32 %v3161_v42, %v3163_v2  ;;  %v11927_v54 = vmax.f32 %v3162_v26, %v3164_v28  ;;  %v11929_v21 = vmax.f32 %v3193_v24, %v3195_v15  ;;  %v14687_v26 = vld [vmem:[#allocation65_spill] sm:$0xff]  ;;  %v14689_v28 = vld [vmem:[#allocation67_spill] sm:$0xff]  ;;  %v14695_v1 = vld [vmem:[#allocation64_spill] sm:$0xff] }
 0x526   :  { %3215 = vst.msk [vmem:[#allocation2 + $0x18] sm:$0xff] %vm2585_vm2, %v3210_v55  ;;  %v11931_v47 = vmax.f32 %v3194_v38, %v3196_v35  ;;  %v11933_v9 = vmax.f32 %v3165_v34, %v3167_v48  ;;  %v3183_v57 = vmax.f32 %v11858_v62, 0.0  ;;  %v3220_v49 = vmax.f32 %v3177_v30, %v3179_v53  ;;  %v14691_v7 = vld [vmem:[#allocation75_spill] sm:$0xff] }
 0x527   :  { %3216 = vst.msk [vmem:[#allocation2 + $0x90] sm:$0xff] %vm2585_vm2, %v3211_v17  ;;  %v11937_v16 = vmax.f32 %v3166_v5, %v3168_v37  ;;  %v11939_v20 = vmax.f32 %v3197_v4, %v3199_v43  ;;  %v3124_v18 = vadd.f32 %v11404_v14, %v14681_v13  ;;  %v3182_v19 = vmax.f32 %v11854_v11, 0.0  ;;  %v14685_v11 = vld [vmem:[#allocation70_spill] sm:$0xff]  ;;  %v3836_v17 = vld [vmem:[#allocation3 + $0x10] sm:$0xff] }
 0x528   :  { %v3184_v31 = vmax.f32 %v11862_v8, 0.0  ;;  %3217 = vst.msk [vmem:[#allocation2 + $0x98] sm:$0xff] %vm2585_vm2, %v3212_v23  ;;  %v3221_v52 = vmax.f32 %v3178_v41, %v3180_v44  ;;  %v3096_v62 = vadd.f32 %v11404_v14, %v14682_v46  ;;  %v3153_v34 = vmax.f32 %v11782_v29, 0.0  ;;  %8900 = vmatmul.msk.f32.gmra.mxu2 %vm2585_vm2, %v3836_v17  ;;  %v8952_v41 = vld [vmem:[%s14241_s4 + $0x48] sm:$0xff]  ;;  %v8970_v44 = vld [vmem:[%s14241_s4 + $0x58] sm:$0xff]  ;;  %v9095_v23 = vld [vmem:[%s14241_s4 + $0xc0] sm:$0xff] }
 0x529   :  { %v3155_v5 = vmax.f32 %v11790_v51, 0.0  ;;  %3223 = vst.msk [vmem:[#allocation2 + $0x20] sm:$0xff] %vm2585_vm2, %v3218_v60  ;;  %v14683_v48 = vmax.f32 %v11771_v10, 0.0  ;;  %v14684_v37 = vmax.f32 %v11763_v45, 0.0  ;;  %v3125_v8 = vadd.f32 %v11404_v14, %v14685_v11  ;;  %4475 = vmatpush.msrb.mxu2 %v8952_v41  ;;  %4624 = vmatpush.msrb.mxu3 %v8970_v44  ;;  %v3531_v13 = vld [vmem:[#allocation2 + $0x7] sm:$0x1] }
 0x52a   :  { %v3154_v36 = vmax.f32 %v11786_v0, 0.0  ;;  %v3156_v27 = vmax.f32 %v11794_v33, 0.0  ;;  %3224 = vst.msk [vmem:[#allocation2 + $0x28] sm:$0xff] %vm2585_vm2, %v3219_v40  ;;  %v14686_v29 = vmax.f32 %v11778_v3, 0.0  ;;  %v14688_v51 = vmax.f32 %v14687_v26, 0.0  ;;  %v14692_v0 = vld [vmem:[#allocation37_spill] sm:$0xff]  ;;  %5661 = vmatpush.msra.mxu0 %v9095_v23 }
 0x52b   :  { %v3227_v42 = vmax.f32 %v14684_v37, %v14683_v48  ;;  %v3127_v10 = vadd.f32 %v11404_v14, %v14689_v28  ;;  %v3185_v45 = vmax.f32 %v14690_v6, 0.0  ;;  %v3187_v56 = vmax.f32 %v14691_v7, 0.0  ;;  %3225 = vst.msk [vmem:[#allocation2 + $0xa0] sm:$0xff] %vm2585_vm2, %v3220_v49  ;;  %v14693_v3 = vld [vmem:[#allocation35_spill] sm:$0xff]  ;;  %v3659_v46 = vld [vmem:[#allocation2 + $0xb] sm:$0x1] }
 0x52c   :  { %v3228_v2 = vmax.f32 %v14688_v51, %v14686_v29  ;;  %v3229_v61 = vmax.f32 %v3181_v59, %v3183_v57  ;;  %v3186_v63 = vmax.f32 %v14692_v0, 0.0  ;;  %v3188_v33 = vmax.f32 %v3124_v18, 0.0  ;;  %3226 = vst.msk [vmem:[#allocation2 + $0xa8] sm:$0xff] %vm2585_vm2, %v3221_v52  ;;  %v8934_v59 = vld [vmem:[%s14241_s4 + $0x38] sm:$0xff]  ;;  %v3403_v57 = vld [vmem:[#allocation2 + $0x3] sm:$0x1] }
 0x52d   :  { %v3230_v30 = vmax.f32 %v3182_v19, %v3184_v31  ;;  %v3157_v22 = vmax.f32 %v14693_v3, 0.0  ;;  %v3159_v32 = vmax.f32 %v14694_v25, 0.0  ;;  %3232 = vst.msk [vmem:[#allocation2 + $0x30] sm:$0xff] %vm2585_vm2, %v3227_v42  ;;  %v3236_v14 = vmax.f32 %v3153_v34, %v3155_v5  ;;  %4327 = vmatpush.msrb.mxu1 %v8934_v59  ;;  %v3451_v49 = vld [vmem:[#allocation2 + $0x4] sm:$0x1] }
 0x52e   :  { %v3158_v39 = vmax.f32 %v14695_v1, 0.0  ;;  %v3160_v24 = vmax.f32 %v3096_v62, 0.0  ;;  %3233 = vst.msk [vmem:[#allocation2 + $0x38] sm:$0xff] %vm2585_vm2, %v3228_v2  ;;  %v3237_v12 = vmax.f32 %v3154_v36, %v3156_v27  ;;  %v3189_v38 = vmax.f32 %v3125_v8, 0.0  ;;  %v3579_v18 = vld [vmem:[#allocation2 + $0x8] sm:$0x1] }
 0x52f   :  { %v3191_v15 = vmax.f32 %v3127_v10, 0.0  ;;  %3234 = vst.msk [vmem:[#allocation2 + $0xb0] sm:$0xff] %vm2585_vm2, %v3229_v61  ;;  %v3238_v35 = vmax.f32 %v3185_v45, %v3187_v56  ;;  %v3239_v55 = vmax.f32 %v3186_v63, %v3188_v33  ;;  %v3245_v53 = vmax.f32 %v3157_v22, %v3159_v32  ;;  %v3595_v19 = vld [vmem:[#allocation2 + $0x9] sm:$0x1]  ;;  %v3643_v52 = vld [vmem:[#allocation2 + $0xa] sm:$0x1] }
 0x530   :  { %3235 = vst.msk [vmem:[#allocation2 + $0xb8] sm:$0xff] %vm2585_vm2, %v3230_v30  ;;  %v3246_v4 = vmax.f32 %v3158_v39, %v3160_v24  ;;  %v14696_v60 = vmov 0.0   ;;  %v3707_v34 = vld [vmem:[#allocation2 + $0xc] sm:$0x1]  ;;  %v3723_v5 = vld [vmem:[#allocation2 + $0xd] sm:$0x1]  ;;  %v3611_v27 = vmax.f32 %v3579_v18, %v3595_v19  ;;  %v3675_v51 = vmax.f32 %v3643_v52, %v3659_v46 }
 0x531   :  { %3241 = vst.msk [vmem:[#allocation2 + $0x40] sm:$0xff] %vm2585_vm2, %v3236_v14  ;;  %v3247_v43 = vmax.f32 %v3189_v38, %v3191_v15  ;;  %v3771_v37 = vld [vmem:[#allocation2 + $0xe] sm:$0x1]  ;;  %v3787_v42 = vld [vmem:[#allocation2 + $0xf] sm:$0x1]  ;;  %v3739_v10 = vmax.f32 %v3707_v34, %v3723_v5 }
 0x532   :  { %3242 = vst.msk [vmem:[#allocation2 + $0x48] sm:$0xff] %vm2585_vm2, %v3237_v12  ;;  %v3322_v8 = vld [vmem:[#allocation2 + $0x10] sm:$0x1]  ;;  %v3338_v36 = vld [vmem:[#allocation2 + $0x11] sm:$0x1]  ;;  %v3803_v7 = vmax.f32 %v3771_v37, %v3787_v42 }
 0x533   :  { %3243 = vst.msk [vmem:[#allocation2 + $0xc0] sm:$0xff] %vm2585_vm2, %v3238_v35  ;;  %v3388_v29 = vld [vmem:[#allocation2 + $0x12] sm:$0x1]  ;;  %v3404_v26 = vld [vmem:[#allocation2 + $0x13] sm:$0x1]  ;;  %v3354_v0 = vmax.f32 %v3322_v8, %v3338_v36 }
 0x534   :  { %3244 = vst.msk [vmem:[#allocation2 + $0xc8] sm:$0xff] %vm2585_vm2, %v3239_v55  ;;  %v3452_v2 = vld [vmem:[#allocation2 + $0x14] sm:$0x1]  ;;  %v3468_v28 = vld [vmem:[#allocation2 + $0x15] sm:$0x1]  ;;  %v3420_v30 = vmax.f32 %v3388_v29, %v3404_v26 }
 0x535   :  { %3250 = vst.msk [vmem:[#allocation2 + $0x50] sm:$0xff] %vm2585_vm2, %v3245_v53  ;;  %v3516_v6 = vld [vmem:[#allocation2 + $0x16] sm:$0x1]  ;;  %v3532_v45 = vld [vmem:[#allocation2 + $0x17] sm:$0x1]  ;;  %v3484_v25 = vmax.f32 %v3452_v2, %v3468_v28 }
 0x536   :  { %3251 = vst.msk [vmem:[#allocation2 + $0x58] sm:$0xff] %vm2585_vm2, %v3246_v4  ;;  %v3580_v56 = vld [vmem:[#allocation2 + $0x18] sm:$0x1]  ;;  %v3596_v61 = vld [vmem:[#allocation2 + $0x19] sm:$0x1]  ;;  %v3548_v1 = vmax.f32 %v3516_v6, %v3532_v45 }
 0x537   :  { %3252 = vst.msk [vmem:[#allocation2 + $0xd0] sm:$0xff] %vm2585_vm2, %v3247_v43  ;;  %v3644_v63 = vld [vmem:[#allocation2 + $0x1a] sm:$0x1]  ;;  %v3660_v33 = vld [vmem:[#allocation2 + $0x1b] sm:$0x1]  ;;  %v3612_v12 = vmax.f32 %v3580_v56, %v3596_v61 }
 0x538   :  { %3253 = vst.msk [vmem:[#allocation2 + $0xd8] sm:$0xff] %vm2585_vm2, %v11922_v50  ;;  %v3708_v3 = vld [vmem:[#allocation2 + $0x1c] sm:$0x1]  ;;  %v3724_v22 = vld [vmem:[#allocation2 + $0x1d] sm:$0x1]  ;;  %v3676_v35 = vmax.f32 %v3644_v63, %v3660_v33 }
 0x539   :  { %3259 = vst.msk [vmem:[#allocation2 + $0x60] sm:$0xff] %vm2585_vm2, %v11924_v58  ;;  %v3772_v32 = vld [vmem:[#allocation2 + $0x1e] sm:$0x1]  ;;  %v3788_v14 = vld [vmem:[#allocation2 + $0x1f] sm:$0x1]  ;;  %v3740_v4 = vmax.f32 %v3708_v3, %v3724_v22 }
 0x53a   :  { %3260 = vst.msk [vmem:[#allocation2 + $0x68] sm:$0xff] %vm2585_vm2, %v11927_v54  ;;  %v3323_v39 = vld [vmem:[#allocation2 + $0x20] sm:$0x1]  ;;  %v3339_v24 = vld [vmem:[#allocation2 + $0x21] sm:$0x1]  ;;  %v3804_v41 = vmax.f32 %v3772_v32, %v3788_v14 }
 0x53b   :  { %3261 = vst.msk [vmem:[#allocation2 + $0xe0] sm:$0xff] %vm2585_vm2, %v11929_v21  ;;  %v3321_v21 = vld [vmem:[#allocation2] sm:$0x1]  ;;  %v3389_v38 = vld [vmem:[#allocation2 + $0x22] sm:$0x1] }
 0x53c   :  { %3262 = vst.msk [vmem:[#allocation2 + $0xe8] sm:$0xff] %vm2585_vm2, %v11931_v47  ;;  %v3337_v47 = vld [vmem:[#allocation2 + $0x1] sm:$0x1]  ;;  %v3405_v15 = vld [vmem:[#allocation2 + $0x23] sm:$0x1] }
 0x53d   :  { %3268 = vst.msk [vmem:[#allocation2 + $0x70] sm:$0xff] %vm2585_vm2, %v11933_v9  ;;  %v3387_v9 = vld [vmem:[#allocation2 + $0x2] sm:$0x1]  ;;  %v3353_v31 = vmax.f32 %v3321_v21, %v3337_v47  ;;  %v3453_v55 = vld [vmem:[#allocation2 + $0x24] sm:$0x1] }
 0x53e   :  { %3269 = vst.msk [vmem:[#allocation2 + $0x78] sm:$0xff] %vm2585_vm2, %v11937_v16  ;;  %v3467_v16 = vld [vmem:[#allocation2 + $0x5] sm:$0x1]  ;;  %v3419_v62 = vmax.f32 %v3387_v9, %v3403_v57  ;;  %v3517_v43 = vld [vmem:[#allocation2 + $0x26] sm:$0x1] }
 0x53f   :  { %3270 = vst.msk [vmem:[#allocation2 + $0xf0] sm:$0xff] %vm2585_vm2, %v11939_v20  ;;  %v3515_v20 = vld [vmem:[#allocation2 + $0x6] sm:$0x1]  ;;  %v3483_v48 = vmax.f32 %v3451_v49, %v3467_v16  ;;  %v3469_v53 = vld [vmem:[#allocation2 + $0x25] sm:$0x1] }
 0x540   :  { %3274 = vst.msk [vmem:[#allocation3 + $0x8] sm:$0xf] %vm3273_vm7, %v14696_v60  ;;  %v3547_v11 = vmax.f32 %v3515_v20, %v3531_v13  ;;  %v3533_v17 = vld [vmem:[#allocation2 + $0x27] sm:$0x1]  ;;  %v3581_v44 = vld [vmem:[#allocation2 + $0x28] sm:$0x1]  ;;  %v3485_v57 = vmax.f32 %v3453_v55, %v3469_v53 }
 0x541   :  { %3276 = vst.msk [vmem:[#allocation3 + $0x18] sm:$0xf] %vm3273_vm7, %v14696_v60  ;;  %v3597_v59 = vld [vmem:[#allocation2 + $0x29] sm:$0x1]  ;;  %v3709_v21 = vld [vmem:[#allocation2 + $0x2c] sm:$0x1]  ;;  %v3549_v20 = vmax.f32 %v3517_v43, %v3533_v17 }
 0x542   :  { %3278 = vst.msk [vmem:[#allocation3 + $0x28] sm:$0xf] %vm3273_vm7, %v14696_v60  ;;  %v3725_v47 = vld [vmem:[#allocation2 + $0x2d] sm:$0x1]  ;;  %v3773_v49 = vld [vmem:[#allocation2 + $0x2e] sm:$0x1]  ;;  %v3613_v19 = vmax.f32 %v3581_v44, %v3597_v59 }
 0x543   :  { %3280 = vst.msk [vmem:[#allocation3 + $0x38] sm:$0xf] %vm3273_vm7, %v14696_v60  ;;  %v3789_v16 = vld [vmem:[#allocation2 + $0x2f] sm:$0x1]  ;;  %v3324_v13 = vld [vmem:[#allocation2 + $0x30] sm:$0x1]  ;;  %v3741_v5 = vmax.f32 %v3709_v21, %v3725_v47 }
 0x544   :  { %3282 = vst.msk [vmem:[#allocation3 + $0x48] sm:$0xf] %vm3273_vm7, %v14696_v60  ;;  %v3340_v18 = vld [vmem:[#allocation2 + $0x31] sm:$0x1]  ;;  %v3406_v52 = vld [vmem:[#allocation2 + $0x33] sm:$0x1]  ;;  %v3805_v42 = vmax.f32 %v3773_v49, %v3789_v16 }
 0x545   :  { %3284 = vst.msk [vmem:[#allocation3 + $0x58] sm:$0xf] %vm3273_vm7, %v14696_v60  ;;  %v3470_v34 = vld [vmem:[#allocation2 + $0x35] sm:$0x1]  ;;  %v3534_v37 = vld [vmem:[#allocation2 + $0x37] sm:$0x1] }
 0x546   :  { %3286 = vst.msk [vmem:[#allocation3 + $0x68] sm:$0xf] %vm3273_vm7, %v14696_v60  ;;  %v3598_v8 = vld [vmem:[#allocation2 + $0x39] sm:$0x1]  ;;  %v3646_v29 = vld [vmem:[#allocation2 + $0x3a] sm:$0x1] }
 0x547   :  { %v3853_v40 = vld [vmem:[#allocation3 + $0x1] sm:$0xff]  ;;  %3288 = vst.msk [vmem:[#allocation3 + $0x78] sm:$0xf] %vm3273_vm7, %v14696_v60  ;;  %v3662_v26 = vld [vmem:[#allocation2 + $0x3b] sm:$0x1]  ;;  %v8969_v21 = vld [vmem:[%s14241_s4 + $0x50] sm:$0xff] }
 0x548   :  { %v4098_v50 = vld [vmem:[#allocation3 + $0x2] sm:$0xff]  ;;  %8883 = vmatmul.msk.f32.vlgmr.msra.gmra.mxu1 %vm2585_vm2, %v3853_v40  ;;  %3290 = vst.msk [vmem:[#allocation3 + $0x88] sm:$0xf] %vm3273_vm7, %v14696_v60  ;;  %v3854_v58 = vld [vmem:[#allocation3 + $0x11] sm:$0xff]  ;;  %v3645_v40 = vld [vmem:[#allocation2 + $0x2a] sm:$0x1]  ;;  %v3678_v22 = vmax.f32 %v3646_v29, %v3662_v26  ;;  %4625 = vmatpush.msrb.mxu3 %v8969_v21 }
 0x549   :  { %8917 = vmatmul.msk.f32.vlgmr.msra.gmra.mxu3 %vm2585_vm2, %v4098_v50  ;;  %3292 = vst.msk [vmem:[#allocation3 + $0x98] sm:$0xf] %vm3273_vm7, %v14696_v60  ;;  %v4099_v54 = vld [vmem:[#allocation3 + $0x12] sm:$0xff]  ;;  %v3661_v50 = vld [vmem:[#allocation2 + $0x2b] sm:$0x1] }
 0x54a   :  { %3294 = vst.msk [vmem:[#allocation3 + $0xa8] sm:$0xf] %vm3273_vm7, %v14696_v60  ;;  %v3677_v46 = vmax.f32 %v3645_v40, %v3661_v50  ;;  %v3710_v28 = vld [vmem:[#allocation2 + $0x3c] sm:$0x1]  ;;  %v3790_v56 = vld [vmem:[#allocation2 + $0x3f] sm:$0x1] }
 0x54b   :  { %3296 = vst.msk [vmem:[#allocation3 + $0xb8] sm:$0xf] %vm3273_vm7, %v14696_v60  ;;  %v3341_v63 = vld [vmem:[#allocation2 + $0x41] sm:$0x1]  ;;  %v3407_v3 = vld [vmem:[#allocation2 + $0x43] sm:$0x1] }
 0x54c   :  { %3298 = vst.msk [vmem:[#allocation3 + $0xc8] sm:$0xf] %vm3273_vm7, %v14696_v60  ;;  %v3471_v32 = vld [vmem:[#allocation2 + $0x45] sm:$0x1]  ;;  %v3647_v55 = vld [vmem:[#allocation2 + $0x4a] sm:$0x1] }
 0x54d   :  { %3300 = vst.msk [vmem:[#allocation3 + $0xd8] sm:$0xf] %vm3273_vm7, %v14696_v60  ;;  %v3663_v53 = vld [vmem:[#allocation2 + $0x4b] sm:$0x1]  ;;  %v3711_v17 = vld [vmem:[#allocation2 + $0x4c] sm:$0x1] }
 0x54e   :  { %3302 = vst.msk [vmem:[#allocation3 + $0xe8] sm:$0xf] %vm3273_vm7, %v14696_v60  ;;  %v3326_v50 = vld [vmem:[#allocation2 + $0x50] sm:$0x1]  ;;  %v3408_v49 = vld [vmem:[#allocation2 + $0x53] sm:$0x1]  ;;  %v3679_v16 = vmax.f32 %v3647_v55, %v3663_v53 }
 0x54f   :  { %3304 = vst.msk [vmem:[#allocation3 + $0xf8] sm:$0xf] %vm3273_vm7, %v14696_v60  ;;  %v8933_v47 = vld [vmem:[%s14241_s4 + $0x30] sm:$0xff]  ;;  %v3776_v26 = vld [vmem:[#allocation2 + $0x5e] sm:$0x1] }
 0x550   :  { %3306 = vst.msk [vmem:[#allocation3 + $0x108] sm:$0xf] %vm3273_vm7, %v14696_v60  ;;  %8884 = vmatmul.msk.f32.gmra.mxu1 %vm2585_vm2, %v3854_v58  ;;  %v3777_v53 = vld [vmem:[#allocation2 + $0x6e] sm:$0x1]  ;;  %v3538_v21 = vld [vmem:[#allocation2 + $0x77] sm:$0x1] }
 0x551   :  { %8918 = vmatmul.msk.f32.gmra.mxu3 %vm2585_vm2, %v4099_v54  ;;  %3308 = vst.msk [vmem:[#allocation3 + $0x118] sm:$0xf] %vm3273_vm7, %v14696_v60  ;;  %v3421_v54 = vmax.f32 %v3389_v38, %v3405_v15  ;;  %v3599_v38 = vld [vmem:[#allocation2 + $0x49] sm:$0x1]  ;;  %4328 = vmatpush.msrb.mxu1 %v8933_v47 }
 0x552   :  { %3310 = vst.msk [vmem:[#allocation3 + $0x128] sm:$0xf] %vm3273_vm7, %v14696_v60 }
 0x553   :  { %3312 = vst.msk [vmem:[#allocation3 + $0x138] sm:$0xf] %vm3273_vm7, %v14696_v60 }
 0x554   :  { %3314 = vst.msk [vmem:[#allocation3 + $0x148] sm:$0xf] %vm3273_vm7, %v14696_v60 }
 0x555   :  { %3316 = vst.msk [vmem:[#allocation3 + $0x158] sm:$0xf] %vm3273_vm7, %v14696_v60 }
 0x556   :  { %3318 = vst.msk [vmem:[#allocation3 + $0x168] sm:$0xf] %vm3273_vm7, %v14696_v60 }
 0x557   :  { %3320 = vst.msk [vmem:[#allocation3 + $0x178] sm:$0xf] %vm3273_vm7, %v14696_v60  ;;  %v3355_v60 = vmax.f32 %v3323_v39, %v3339_v24  ;;  %v3535_v39 = vld [vmem:[#allocation2 + $0x47] sm:$0x1] }
 0x558   :  { %3371 = vst.msk [vmem:[#allocation3 + $0x22] sm:$0x1] %vm3370_vm8, %v3353_v31  ;;  %v3390_v31 = vld [vmem:[#allocation2 + $0x32] sm:$0x1] }
 0x559   :  { %3435 = vst.msk [vmem:[#allocation3 + $0x23] sm:$0x1] %vm3370_vm8, %v3419_v62  ;;  %v3454_v62 = vld [vmem:[#allocation2 + $0x34] sm:$0x1]  ;;  %v3422_v2 = vmax.f32 %v3390_v31, %v3406_v52  ;;  %v3536_v31 = vld [vmem:[#allocation2 + $0x57] sm:$0x1] }
 0x55a   :  { %3499 = vst.msk [vmem:[#allocation3 + $0x24] sm:$0x1] %vm3370_vm8, %v3483_v48  ;;  %v3518_v48 = vld [vmem:[#allocation2 + $0x36] sm:$0x1]  ;;  %v3486_v45 = vmax.f32 %v3454_v62, %v3470_v34  ;;  %v3600_v62 = vld [vmem:[#allocation2 + $0x59] sm:$0x1] }
 0x55b   :  { %3563 = vst.msk [vmem:[#allocation3 + $0x25] sm:$0x1] %vm3370_vm8, %v3547_v11  ;;  %v3582_v11 = vld [vmem:[#allocation2 + $0x38] sm:$0x1]  ;;  %v3550_v61 = vmax.f32 %v3518_v48, %v3534_v37  ;;  %v3648_v48 = vld [vmem:[#allocation2 + $0x5a] sm:$0x1] }
 0x55c   :  { %3627 = vst.msk [vmem:[#allocation3 + $0x26] sm:$0x1] %vm3370_vm8, %v3611_v27  ;;  %v3356_v27 = vmax.f32 %v3324_v13, %v3340_v18  ;;  %v3614_v33 = vmax.f32 %v3582_v11, %v3598_v8  ;;  %v3472_v13 = vld [vmem:[#allocation2 + $0x55] sm:$0x1]  ;;  %v3664_v37 = vld [vmem:[#allocation2 + $0x5b] sm:$0x1] }
 0x55d   :  { %3691 = vst.msk [vmem:[#allocation3 + $0x27] sm:$0x1] %vm3370_vm8, %v3675_v51  ;;  %v3712_v8 = vld [vmem:[#allocation2 + $0x5c] sm:$0x1] }
 0x55e   :  { %3755 = vst.msk [vmem:[#allocation3 + $0x28] sm:$0x1] %vm3370_vm8, %v3739_v10  ;;  %v3726_v10 = vld [vmem:[#allocation2 + $0x3d] sm:$0x1] }
 0x55f   :  { %3819 = vst.msk [vmem:[#allocation3 + $0x29] sm:$0x1] %vm3370_vm8, %v3803_v7  ;;  %v3774_v7 = vld [vmem:[#allocation2 + $0x3e] sm:$0x1]  ;;  %v3742_v14 = vmax.f32 %v3710_v28, %v3726_v10  ;;  %v3327_v28 = vld [vmem:[#allocation2 + $0x60] sm:$0x1] }
 0x560   :  { %3372 = vst.msk [vmem:[#allocation3 + $0x32] sm:$0x1] %vm3370_vm8, %v3354_v0  ;;  %v3325_v0 = vld [vmem:[#allocation2 + $0x40] sm:$0x1]  ;;  %v3806_v24 = vmax.f32 %v3774_v7, %v3790_v56  ;;  %v3343_v10 = vld [vmem:[#allocation2 + $0x61] sm:$0x1]  ;;  %v3680_v56 = vmax.f32 %v3648_v48, %v3664_v37 }
 0x561   :  { %3436 = vst.msk [vmem:[#allocation3 + $0x33] sm:$0x1] %vm3370_vm8, %v3420_v30  ;;  %v3391_v30 = vld [vmem:[#allocation2 + $0x42] sm:$0x1]  ;;  %v3409_v7 = vld [vmem:[#allocation2 + $0x63] sm:$0x1] }
 0x562   :  { %3500 = vst.msk [vmem:[#allocation3 + $0x34] sm:$0x1] %vm3370_vm8, %v3484_v25  ;;  %v3455_v25 = vld [vmem:[#allocation2 + $0x44] sm:$0x1]  ;;  %v3423_v43 = vmax.f32 %v3391_v30, %v3407_v3  ;;  %v3537_v30 = vld [vmem:[#allocation2 + $0x67] sm:$0x1] }
 0x563   :  { %3564 = vst.msk [vmem:[#allocation3 + $0x35] sm:$0x1] %vm3370_vm8, %v3548_v1  ;;  %v3519_v1 = vld [vmem:[#allocation2 + $0x46] sm:$0x1]  ;;  %v3487_v59 = vmax.f32 %v3455_v25, %v3471_v32  ;;  %v3601_v25 = vld [vmem:[#allocation2 + $0x69] sm:$0x1] }
 0x564   :  { %v3837_v23 = vld [vmem:[#allocation3 + $0x20] sm:$0xff]  ;;  %3628 = vst.msk [vmem:[#allocation3 + $0x36] sm:$0x1] %vm3370_vm8, %v3612_v12  ;;  %v3583_v12 = vld [vmem:[#allocation2 + $0x48] sm:$0x1]  ;;  %v3551_v40 = vmax.f32 %v3519_v1, %v3535_v39 }
 0x565   :  { %v3855_v58 = vld [vmem:[#allocation3 + $0x21] sm:$0xff]  ;;  %8901 = vmatmul.msk.f32.gmra.mxu2 %vm2585_vm2, %v3837_v23  ;;  %3692 = vst.msk [vmem:[#allocation3 + $0x37] sm:$0x1] %vm3370_vm8, %v3676_v35  ;;  %v3357_v35 = vmax.f32 %v3325_v0, %v3341_v63  ;;  %v3775_v23 = vld [vmem:[#allocation2 + $0x4e] sm:$0x1] }
 0x566   :  { %8885 = vmatmul.msk.f32.gmra.mxu1 %vm2585_vm2, %v3855_v58  ;;  %v4100_v9 = vld [vmem:[#allocation3 + $0x22] sm:$0xff]  ;;  %3756 = vst.msk [vmem:[#allocation3 + $0x38] sm:$0x1] %vm3370_vm8, %v3740_v4  ;;  %v3342_v58 = vld [vmem:[#allocation2 + $0x51] sm:$0x1] }
 0x567   :  { %8919 = vmatmul.msk.f32.gmra.mxu3 %vm2585_vm2, %v4100_v9  ;;  %9097 = vmatmul.msk.f32.vlgmr.msra.gmra.mxu0 %vm2585_vm2, %v4100_v9  ;;  %3820 = vst.msk [vmem:[#allocation3 + $0x39] sm:$0x1] %vm3370_vm8, %v3804_v41  ;;  %v3727_v41 = vld [vmem:[#allocation2 + $0x4d] sm:$0x1]  ;;  %v3615_v9 = vmax.f32 %v3583_v12, %v3599_v38  ;;  %v3473_v0 = vld [vmem:[#allocation2 + $0x65] sm:$0x1] }
 0x568   :  { %3373 = vst.msk [vmem:[#allocation3 + $0x42] sm:$0x1] %vm3370_vm8, %v3355_v60  ;;  %v3791_v60 = vld [vmem:[#allocation2 + $0x4f] sm:$0x1]  ;;  %v3743_v18 = vmax.f32 %v3711_v17, %v3727_v41  ;;  %v3649_v1 = vld [vmem:[#allocation2 + $0x6a] sm:$0x1] }
 0x569   :  { %3437 = vst.msk [vmem:[#allocation3 + $0x43] sm:$0x1] %vm3370_vm8, %v3421_v54  ;;  %v8951_v54 = vld [vmem:[%s14241_s4 + $0x40] sm:$0xff]  ;;  %v3807_v52 = vmax.f32 %v3775_v23, %v3791_v60  ;;  %v3665_v39 = vld [vmem:[#allocation2 + $0x6b] sm:$0x1] }
 0x56a   :  { %3501 = vst.msk [vmem:[#allocation3 + $0x44] sm:$0x1] %vm3370_vm8, %v3485_v57  ;;  %v3392_v57 = vld [vmem:[#allocation2 + $0x52] sm:$0x1]  ;;  %4476 = vmatpush.msrb.mxu2 %v8951_v54  ;;  %v3713_v38 = vld [vmem:[#allocation2 + $0x6c] sm:$0x1]  ;;  %v3681_v60 = vmax.f32 %v3649_v1, %v3665_v39 }
 0x56b   :  { %3565 = vst.msk [vmem:[#allocation3 + $0x45] sm:$0x1] %vm3370_vm8, %v3549_v20  ;;  %v3456_v20 = vld [vmem:[#allocation2 + $0x54] sm:$0x1]  ;;  %v3424_v11 = vmax.f32 %v3392_v57, %v3408_v49  ;;  %v3328_v17 = vld [vmem:[#allocation2 + $0x70] sm:$0x1] }
 0x56c   :  { %v3838_v36 = vld [vmem:[#allocation3 + $0x30] sm:$0xff]  ;;  %3629 = vst.msk [vmem:[#allocation3 + $0x46] sm:$0x1] %vm3370_vm8, %v3613_v19  ;;  %v3488_v29 = vmax.f32 %v3456_v20, %v3472_v13  ;;  %v3602_v57 = vld [vmem:[#allocation2 + $0x79] sm:$0x1] }
 0x56d   :  { %v3856_v51 = vld [vmem:[#allocation3 + $0x31] sm:$0xff]  ;;  %8902 = vmatmul.msk.f32.gmra.mxu2 %vm2585_vm2, %v3838_v36  ;;  %3693 = vst.msk [vmem:[#allocation3 + $0x47] sm:$0x1] %vm3370_vm8, %v3677_v46  ;;  %v3728_v36 = vld [vmem:[#allocation2 + $0x5d] sm:$0x1] }
 0x56e   :  { %8886 = vmatmul.msk.f32.gmra.mxu1 %vm2585_vm2, %v3856_v51  ;;  %v4101_v6 = vld [vmem:[#allocation3 + $0x32] sm:$0xff]  ;;  %3757 = vst.msk [vmem:[#allocation3 + $0x48] sm:$0x1] %vm3370_vm8, %v3741_v5  ;;  %v3358_v5 = vmax.f32 %v3326_v50, %v3342_v58  ;;  %v3792_v51 = vld [vmem:[#allocation2 + $0x5f] sm:$0x1]  ;;  %v3744_v63 = vmax.f32 %v3712_v8, %v3728_v36 }
 0x56f   :  { %8920 = vmatmul.msk.f32.gmra.mxu3 %vm2585_vm2, %v4101_v6  ;;  %9098 = vmatmul.msk.f32.gmra.mxu0 %vm2585_vm2, %v4101_v6  ;;  %3821 = vst.msk [vmem:[#allocation3 + $0x49] sm:$0x1] %vm3370_vm8, %v3805_v42  ;;  %v3520_v19 = vld [vmem:[#allocation2 + $0x56] sm:$0x1]  ;;  %v3584_v46 = vld [vmem:[#allocation2 + $0x58] sm:$0x1]  ;;  %v3808_v3 = vmax.f32 %v3776_v26, %v3792_v51 }
 0x570   :  { %3374 = vst.msk [vmem:[#allocation3 + $0x52] sm:$0x1] %vm3370_vm8, %v3356_v27  ;;  %v3616_v6 = vmax.f32 %v3584_v46, %v3600_v62  ;;  %v3344_v41 = vld [vmem:[#allocation2 + $0x71] sm:$0x1]  ;;  %v3410_v23 = vld [vmem:[#allocation2 + $0x73] sm:$0x1] }
 0x571   :  { %3438 = vst.msk [vmem:[#allocation3 + $0x53] sm:$0x1] %vm3370_vm8, %v3422_v2  ;;  %v3552_v2 = vmax.f32 %v3520_v19, %v3536_v31  ;;  %v3474_v50 = vld [vmem:[#allocation2 + $0x75] sm:$0x1]  ;;  %v3522_v54 = vld [vmem:[#allocation2 + $0x76] sm:$0x1] }
 0x572   :  { %3502 = vst.msk [vmem:[#allocation3 + $0x54] sm:$0x1] %vm3370_vm8, %v3486_v45  ;;  %v3393_v45 = vld [vmem:[#allocation2 + $0x62] sm:$0x1]  ;;  %v3650_v20 = vld [vmem:[#allocation2 + $0x7a] sm:$0x1]  ;;  %v3554_v48 = vmax.f32 %v3522_v54, %v3538_v21 }
 0x573   :  { %3566 = vst.msk [vmem:[#allocation3 + $0x55] sm:$0x1] %vm3370_vm8, %v3550_v61  ;;  %v3457_v61 = vld [vmem:[#allocation2 + $0x64] sm:$0x1]  ;;  %v3425_v12 = vmax.f32 %v3393_v45, %v3409_v7  ;;  %v3666_v13 = vld [vmem:[#allocation2 + $0x7b] sm:$0x1] }
 0x574   :  { %v3839_v15 = vld [vmem:[#allocation3 + $0x40] sm:$0xff]  ;;  %3630 = vst.msk [vmem:[#allocation3 + $0x56] sm:$0x1] %vm3370_vm8, %v3614_v33  ;;  %v3489_v55 = vmax.f32 %v3457_v61, %v3473_v0  ;;  %v3714_v31 = vld [vmem:[#allocation2 + $0x7c] sm:$0x1]  ;;  %v3682_v26 = vmax.f32 %v3650_v20, %v3666_v13 }
 0x575   :  { %v3857_v4 = vld [vmem:[#allocation3 + $0x41] sm:$0xff]  ;;  %8903 = vmatmul.msk.f32.gmra.mxu2 %vm2585_vm2, %v3839_v15  ;;  %3694 = vst.msk [vmem:[#allocation3 + $0x57] sm:$0x1] %vm3370_vm8, %v3678_v22  ;;  %v3729_v15 = vld [vmem:[#allocation2 + $0x6d] sm:$0x1] }
 0x576   :  { %8887 = vmatmul.msk.f32.gmra.mxu1 %vm2585_vm2, %v3857_v4  ;;  %v4102_v44 = vld [vmem:[#allocation3 + $0x42] sm:$0xff]  ;;  %3758 = vst.msk [vmem:[#allocation3 + $0x58] sm:$0x1] %vm3370_vm8, %v3742_v14  ;;  %v3359_v14 = vmax.f32 %v3327_v28, %v3343_v10  ;;  %v3793_v4 = vld [vmem:[#allocation2 + $0x6f] sm:$0x1]  ;;  %v3745_v58 = vmax.f32 %v3713_v38, %v3729_v15  ;;  %v12173_v38 = vld [vmem:[#allocation3 + $0xd0] sm:$0xff] }
 0x577   :  { %8921 = vmatmul.msk.f32.gmra.mxu3 %vm2585_vm2, %v4102_v44  ;;  %9099 = vmatmul.msk.f32.gmra.mxu0 %vm2585_vm2, %v4102_v44  ;;  %3822 = vst.msk [vmem:[#allocation3 + $0x59] sm:$0x1] %vm3370_vm8, %v3806_v24  ;;  %v3521_v33 = vld [vmem:[#allocation2 + $0x66] sm:$0x1]  ;;  %v3585_v22 = vld [vmem:[#allocation2 + $0x68] sm:$0x1]  ;;  %v3809_v47 = vmax.f32 %v3777_v53, %v3793_v4 }
 0x578   :  { %3375 = vst.msk [vmem:[#allocation3 + $0x62] sm:$0x1] %vm3370_vm8, %v3357_v35  ;;  %v3617_v44 = vmax.f32 %v3585_v22, %v3601_v25  ;;  %v3329_v37 = vld [vmem:[#allocation2 + $0x80] sm:$0x1]  ;;  %v3395_v36 = vld [vmem:[#allocation2 + $0x82] sm:$0x1] }
 0x579   :  { %3439 = vst.msk [vmem:[#allocation3 + $0x63] sm:$0x1] %vm3370_vm8, %v3423_v43  ;;  %v3553_v43 = vmax.f32 %v3521_v33, %v3537_v30  ;;  %v3459_v51 = vld [vmem:[#allocation2 + $0x84] sm:$0x1]  ;;  %v3539_v45 = vld [vmem:[#allocation2 + $0x87] sm:$0x1] }
 0x57a   :  { %3503 = vst.msk [vmem:[#allocation3 + $0x64] sm:$0x1] %vm3370_vm8, %v3487_v59  ;;  %v3394_v59 = vld [vmem:[#allocation2 + $0x72] sm:$0x1]  ;;  %v4106_v28 = vld [vmem:[#allocation3 + $0xc2] sm:$0xff] }
 0x57b   :  { %3567 = vst.msk [vmem:[#allocation3 + $0x65] sm:$0x1] %vm3370_vm8, %v3551_v40  ;;  %v3458_v40 = vld [vmem:[#allocation2 + $0x74] sm:$0x1]  ;;  %v3426_v19 = vmax.f32 %v3394_v59, %v3410_v23  ;;  %v3603_v61 = vld [vmem:[#allocation2 + $0x89] sm:$0x1] }
 0x57c   :  { %v3840_v34 = vld [vmem:[#allocation3 + $0x50] sm:$0xff]  ;;  %3631 = vst.msk [vmem:[#allocation3 + $0x66] sm:$0x1] %vm3370_vm8, %v3615_v9  ;;  %v3586_v9 = vld [vmem:[#allocation2 + $0x78] sm:$0x1]  ;;  %v3490_v62 = vmax.f32 %v3458_v40, %v3474_v50 }
 0x57d   :  { %v3858_v42 = vld [vmem:[#allocation3 + $0x51] sm:$0xff]  ;;  %8904 = vmatmul.msk.f32.gmra.mxu2 %vm2585_vm2, %v3840_v34  ;;  %3695 = vst.msk [vmem:[#allocation3 + $0x67] sm:$0x1] %vm3370_vm8, %v3679_v16  ;;  %v3360_v16 = vmax.f32 %v3328_v17, %v3344_v41  ;;  %v3778_v34 = vld [vmem:[#allocation2 + $0x7e] sm:$0x1]  ;;  %v3618_v8 = vmax.f32 %v3586_v9, %v3602_v57 }
 0x57e   :  { %8888 = vmatmul.msk.f32.gmra.mxu1 %vm2585_vm2, %v3858_v42  ;;  %v4103_v27 = vld [vmem:[#allocation3 + $0x52] sm:$0xff]  ;;  %3759 = vst.msk [vmem:[#allocation3 + $0x68] sm:$0x1] %vm3370_vm8, %v3743_v18  ;;  %v3345_v42 = vld [vmem:[#allocation2 + $0x81] sm:$0x1] }
 0x57f   :  { %8922 = vmatmul.msk.f32.gmra.mxu3 %vm2585_vm2, %v4103_v27  ;;  %9100 = vmatmul.msk.f32.gmra.mxu0 %vm2585_vm2, %v4103_v27  ;;  %3823 = vst.msk [vmem:[#allocation3 + $0x69] sm:$0x1] %vm3370_vm8, %v3807_v52  ;;  %v3730_v52 = vld [vmem:[#allocation2 + $0x7d] sm:$0x1]  ;;  %v3411_v27 = vld [vmem:[#allocation2 + $0x83] sm:$0x1]  ;;  %v3361_v0 = vmax.f32 %v3329_v37, %v3345_v42 }
 0x580   :  { %3376 = vst.msk [vmem:[#allocation3 + $0x72] sm:$0x1] %vm3370_vm8, %v3358_v5  ;;  %v3794_v5 = vld [vmem:[#allocation2 + $0x7f] sm:$0x1]  ;;  %v3746_v10 = vmax.f32 %v3714_v31, %v3730_v52  ;;  %v3667_v33 = vld [vmem:[#allocation2 + $0x8b] sm:$0x1]  ;;  %v3427_v30 = vmax.f32 %v3395_v36, %v3411_v27 }
 0x581   :  { %3440 = vst.msk [vmem:[#allocation3 + $0x73] sm:$0x1] %vm3370_vm8, %v3424_v11  ;;  %v3843_v11 = vld [vmem:[#allocation3 + $0xc0] sm:$0xff]  ;;  %v3810_v7 = vmax.f32 %v3778_v34, %v3794_v5  ;;  %v3731_v22 = vld [vmem:[#allocation2 + $0x8d] sm:$0x1]  ;;  %v3862_v53 = vld [vmem:[#allocation3 + $0xd1] sm:$0xff] }
 0x582   :  { %3504 = vst.msk [vmem:[#allocation3 + $0x74] sm:$0x1] %vm3370_vm8, %v3488_v29  ;;  %v3861_v29 = vld [vmem:[#allocation3 + $0xc1] sm:$0xff]  ;;  %v3795_v1 = vld [vmem:[#allocation2 + $0x8f] sm:$0x1]  ;;  %v4107_v41 = vld [vmem:[#allocation3 + $0xd2] sm:$0xff] }
 0x583   :  { %3568 = vst.msk [vmem:[#allocation3 + $0x75] sm:$0x1] %vm3370_vm8, %v3552_v2  ;;  %v3475_v2 = vld [vmem:[#allocation2 + $0x85] sm:$0x1]  ;;  %v3476_v17 = vld [vmem:[#allocation2 + $0x95] sm:$0x1] }
 0x584   :  { %v3841_v32 = vld [vmem:[#allocation3 + $0x60] sm:$0xff]  ;;  %3632 = vst.msk [vmem:[#allocation3 + $0x76] sm:$0x1] %vm3370_vm8, %v3616_v6  ;;  %v3524_v59 = vld [vmem:[#allocation2 + $0x96] sm:$0x1] }
 0x585   :  { %v3859_v24 = vld [vmem:[#allocation3 + $0x61] sm:$0xff]  ;;  %8905 = vmatmul.msk.f32.gmra.mxu2 %vm2585_vm2, %v3841_v32  ;;  %3696 = vst.msk [vmem:[#allocation3 + $0x77] sm:$0x1] %vm3370_vm8, %v3680_v56  ;;  %v3491_v32 = vmax.f32 %v3459_v51, %v3475_v2  ;;  %v3540_v23 = vld [vmem:[#allocation2 + $0x97] sm:$0x1] }
 0x586   :  { %8889 = vmatmul.msk.f32.gmra.mxu1 %vm2585_vm2, %v3859_v24  ;;  %v4104_v35 = vld [vmem:[#allocation3 + $0x62] sm:$0xff]  ;;  %3760 = vst.msk [vmem:[#allocation3 + $0x78] sm:$0x1] %vm3370_vm8, %v3744_v63  ;;  %v3651_v63 = vld [vmem:[#allocation2 + $0x8a] sm:$0x1]  ;;  %v3556_v31 = vmax.f32 %v3524_v59, %v3540_v23 }
 0x587   :  { %8923 = vmatmul.msk.f32.gmra.mxu3 %vm2585_vm2, %v4104_v35  ;;  %9101 = vmatmul.msk.f32.gmra.mxu0 %vm2585_vm2, %v4104_v35  ;;  %3824 = vst.msk [vmem:[#allocation3 + $0x79] sm:$0x1] %vm3370_vm8, %v3808_v3  ;;  %v3523_v6 = vld [vmem:[#allocation2 + $0x86] sm:$0x1]  ;;  %v3587_v56 = vld [vmem:[#allocation2 + $0x88] sm:$0x1]  ;;  %v3683_v4 = vmax.f32 %v3651_v63, %v3667_v33 }
 0x588   :  { %3377 = vst.msk [vmem:[#allocation3 + $0x82] sm:$0x1] %vm3370_vm8, %v3359_v14  ;;  %v3715_v3 = vld [vmem:[#allocation2 + $0x8c] sm:$0x1]  ;;  %v3779_v14 = vld [vmem:[#allocation2 + $0x8e] sm:$0x1]  ;;  %v3555_v39 = vmax.f32 %v3523_v6, %v3539_v45  ;;  %v3619_v15 = vmax.f32 %v3587_v56, %v3603_v61 }
 0x589   :  { %3441 = vst.msk [vmem:[#allocation3 + $0x83] sm:$0x1] %vm3370_vm8, %v3425_v12  ;;  %v3330_v24 = vld [vmem:[#allocation2 + $0x90] sm:$0x1]  ;;  %v3346_v12 = vld [vmem:[#allocation2 + $0x91] sm:$0x1] }
 0x58a   :  { %3505 = vst.msk [vmem:[#allocation3 + $0x84] sm:$0x1] %vm3370_vm8, %v3489_v55  ;;  %v3396_v35 = vld [vmem:[#allocation2 + $0x92] sm:$0x1]  ;;  %v3412_v55 = vld [vmem:[#allocation2 + $0x93] sm:$0x1] }
 0x58b   :  { %3569 = vst.msk [vmem:[#allocation3 + $0x85] sm:$0x1] %vm3370_vm8, %v3553_v43  ;;  %v3460_v43 = vld [vmem:[#allocation2 + $0x94] sm:$0x1]  ;;  %v3588_v40 = vld [vmem:[#allocation2 + $0x98] sm:$0x1] }
 0x58c   :  { %v12147_v49 = vld [vmem:[#allocation3 + $0x70] sm:$0xff]  ;;  %3633 = vst.msk [vmem:[#allocation3 + $0x86] sm:$0x1] %vm3370_vm8, %v3617_v44  ;;  %v3747_v44 = vmax.f32 %v3715_v3, %v3731_v22  ;;  %v3604_v50 = vld [vmem:[#allocation2 + $0x99] sm:$0x1]  ;;  %v3492_v20 = vmax.f32 %v3460_v43, %v3476_v17 }
 0x58d   :  { %v12150_v18 = vld [vmem:[#allocation3 + $0x71] sm:$0xff]  ;;  %8906 = vmatmul.msk.f32.gmra.mxu2 %vm2585_vm2, %v12147_v49  ;;  %3697 = vst.msk [vmem:[#allocation3 + $0x87] sm:$0x1] %vm3370_vm8, %v3681_v60  ;;  %v3811_v60 = vmax.f32 %v3779_v14, %v3795_v1  ;;  %v3652_v54 = vld [vmem:[#allocation2 + $0x9a] sm:$0x1] }
 0x58e   :  { %8890 = vmatmul.msk.f32.gmra.mxu1 %vm2585_vm2, %v12150_v18  ;;  %v4105_v46 = vld [vmem:[#allocation3 + $0x72] sm:$0xff]  ;;  %3761 = vst.msk [vmem:[#allocation3 + $0x88] sm:$0x1] %vm3370_vm8, %v3745_v58  ;;  %v3362_v58 = vmax.f32 %v3330_v24, %v3346_v12  ;;  %v3668_v21 = vld [vmem:[#allocation2 + $0x9b] sm:$0x1] }
 0x58f   :  { %8924 = vmatmul.msk.f32.gmra.mxu3 %vm2585_vm2, %v4105_v46  ;;  %9102 = vmatmul.msk.f32.gmra.mxu0 %vm2585_vm2, %v4105_v46  ;;  %3825 = vst.msk [vmem:[#allocation3 + $0x89] sm:$0x1] %vm3370_vm8, %v3809_v47  ;;  %v3428_v47 = vmax.f32 %v3396_v35, %v3412_v55  ;;  %v3716_v9 = vld [vmem:[#allocation2 + $0x9c] sm:$0x1]  ;;  %v3732_v57 = vld [vmem:[#allocation2 + $0x9d] sm:$0x1] }
 0x590   :  { %3378 = vst.msk [vmem:[#allocation3 + $0x92] sm:$0x1] %vm3370_vm8, %v3360_v16  ;;  %v3780_v13 = vld [vmem:[#allocation2 + $0x9e] sm:$0x1]  ;;  %v3331_v52 = vld [vmem:[#allocation2 + $0xa0] sm:$0x1] }
 0x591   :  { %3442 = vst.msk [vmem:[#allocation3 + $0x93] sm:$0x1] %vm3370_vm8, %v3426_v19  ;;  %v3796_v19 = vld [vmem:[#allocation2 + $0x9f] sm:$0x1]  ;;  %v3347_v46 = vld [vmem:[#allocation2 + $0xa1] sm:$0x1] }
 0x592   :  { %3506 = vst.msk [vmem:[#allocation3 + $0x94] sm:$0x1] %vm3370_vm8, %v3490_v62  ;;  %v3620_v62 = vmax.f32 %v3588_v40, %v3604_v50  ;;  %v3397_v34 = vld [vmem:[#allocation2 + $0xa2] sm:$0x1]  ;;  %v3413_v5 = vld [vmem:[#allocation2 + $0xa3] sm:$0x1]  ;;  %v3812_v27 = vmax.f32 %v3780_v13, %v3796_v19  ;;  %v3363_v2 = vmax.f32 %v3331_v52, %v3347_v46 }
 0x593   :  { %3570 = vst.msk [vmem:[#allocation3 + $0x95] sm:$0x1] %vm3370_vm8, %v3554_v48  ;;  %v3684_v48 = vmax.f32 %v3652_v54, %v3668_v21  ;;  %v3461_v37 = vld [vmem:[#allocation2 + $0xa4] sm:$0x1]  ;;  %v3477_v42 = vld [vmem:[#allocation2 + $0xa5] sm:$0x1]  ;;  %v3429_v45 = vmax.f32 %v3397_v34, %v3413_v5 }
 0x594   :  { %3634 = vst.msk [vmem:[#allocation3 + $0x96] sm:$0x1] %vm3370_vm8, %v3618_v8  ;;  %v3525_v8 = vld [vmem:[#allocation2 + $0xa6] sm:$0x1]  ;;  %v3541_v36 = vld [vmem:[#allocation2 + $0xa7] sm:$0x1] }
 0x595   :  { %8907 = vmatmul.msk.f32.gmra.mxu2 %vm2585_vm2, %v3843_v11  ;;  %3698 = vst.msk [vmem:[#allocation3 + $0x97] sm:$0x1] %vm3370_vm8, %v3682_v26  ;;  %v3748_v11 = vmax.f32 %v3716_v9, %v3732_v57  ;;  %v3605_v26 = vld [vmem:[#allocation2 + $0xa9] sm:$0x1]  ;;  %v3733_v56 = vld [vmem:[#allocation2 + $0xad] sm:$0x1] }
 0x596   :  { %8891 = vmatmul.msk.f32.gmra.mxu1 %vm2585_vm2, %v3861_v29  ;;  %v5585_v25 = vld [vmem:[#allocation3 + $0x82] sm:$0xff]  ;;  %3762 = vst.msk [vmem:[#allocation3 + $0x98] sm:$0x1] %vm3370_vm8, %v3746_v10  ;;  %v3669_v10 = vld [vmem:[#allocation2 + $0xab] sm:$0x1] }
 0x597   :  { %8925 = vmatmul.msk.f32.gmra.mxu3 %vm2585_vm2, %v4106_v28  ;;  %9103 = vmatmul.msk.f32.gmra.mxu0 %vm2585_vm2, %v5585_v25  ;;  %3826 = vst.msk [vmem:[#allocation3 + $0x99] sm:$0x1] %vm3370_vm8, %v3810_v7  ;;  %v3589_v29 = vld [vmem:[#allocation2 + $0xa8] sm:$0x1]  ;;  %v3653_v28 = vld [vmem:[#allocation2 + $0xaa] sm:$0x1] }
 0x598   :  { %3379 = vst.msk [vmem:[#allocation3 + $0xe2] sm:$0x1] %vm3370_vm8, %v3361_v0  ;;  %v3717_v7 = vld [vmem:[#allocation2 + $0xac] sm:$0x1]  ;;  %v3493_v0 = vmax.f32 %v3461_v37, %v3477_v42  ;;  %v3781_v63 = vld [vmem:[#allocation2 + $0xae] sm:$0x1]  ;;  %v3621_v25 = vmax.f32 %v3589_v29, %v3605_v26  ;;  %v3685_v1 = vmax.f32 %v3653_v28, %v3669_v10 }
 0x599   :  { %3443 = vst.msk [vmem:[#allocation3 + $0xe3] sm:$0x1] %vm3370_vm8, %v3427_v30  ;;  %v3797_v33 = vld [vmem:[#allocation2 + $0xaf] sm:$0x1]  ;;  %v3557_v30 = vmax.f32 %v3525_v8, %v3541_v36  ;;  %v3332_v3 = vld [vmem:[#allocation2 + $0xb0] sm:$0x1]  ;;  %v3749_v12 = vmax.f32 %v3717_v7, %v3733_v56 }
 0x59a   :  { %3507 = vst.msk [vmem:[#allocation3 + $0xe4] sm:$0x1] %vm3370_vm8, %v3491_v32  ;;  %v3348_v22 = vld [vmem:[#allocation2 + $0xb1] sm:$0x1]  ;;  %v3398_v32 = vld [vmem:[#allocation2 + $0xb2] sm:$0x1]  ;;  %v3813_v55 = vmax.f32 %v3781_v63, %v3797_v33 }
 0x59b   :  { %3571 = vst.msk [vmem:[#allocation3 + $0xe5] sm:$0x1] %vm3370_vm8, %v3555_v39  ;;  %v3414_v14 = vld [vmem:[#allocation2 + $0xb3] sm:$0x1]  ;;  %v3462_v39 = vld [vmem:[#allocation2 + $0xb4] sm:$0x1]  ;;  %v3364_v17 = vmax.f32 %v3332_v3, %v3348_v22 }
 0x59c   :  { %3635 = vst.msk [vmem:[#allocation3 + $0xe6] sm:$0x1] %vm3370_vm8, %v3619_v15  ;;  %v3478_v24 = vld [vmem:[#allocation2 + $0xb5] sm:$0x1]  ;;  %v3526_v15 = vld [vmem:[#allocation2 + $0xb6] sm:$0x1]  ;;  %v3430_v23 = vmax.f32 %v3398_v32, %v3414_v14 }
 0x59d   :  { %8908 = vmatmul.msk.f32.gmra.mxu2 %vm2585_vm2, %v12173_v38  ;;  %3699 = vst.msk [vmem:[#allocation3 + $0xe7] sm:$0x1] %vm3370_vm8, %v3683_v4  ;;  %v3542_v35 = vld [vmem:[#allocation2 + $0xb7] sm:$0x1]  ;;  %v3606_v4 = vld [vmem:[#allocation2 + $0xb9] sm:$0x1] }
 0x59e   :  { %8892 = vmatmul.msk.f32.gmra.mxu1 %vm2585_vm2, %v3862_v53  ;;  %v5586_v16 = vld [vmem:[#allocation3 + $0x92] sm:$0xff]  ;;  %3763 = vst.msk [vmem:[#allocation3 + $0xe8] sm:$0x1] %vm3370_vm8, %v3747_v44  ;;  %v3670_v44 = vld [vmem:[#allocation2 + $0xbb] sm:$0x1] }
 0x59f   :  { %8926 = vmatmul.msk.f32.gmra.mxu3 %vm2585_vm2, %v4107_v41  ;;  %9104 = vmatmul.msk.f32.gmra.mxu0 %vm2585_vm2, %v5586_v16  ;;  %3827 = vst.msk [vmem:[#allocation3 + $0xe9] sm:$0x1] %vm3370_vm8, %v3811_v60  ;;  %v3590_v53 = vld [vmem:[#allocation2 + $0xb8] sm:$0x1]  ;;  %v3654_v41 = vld [vmem:[#allocation2 + $0xba] sm:$0x1] }
 0x5a0   :  { %3380 = vst.msk [vmem:[#allocation3 + $0xf2] sm:$0x1] %vm3370_vm8, %v3362_v58  ;;  %v3718_v60 = vld [vmem:[#allocation2 + $0xbc] sm:$0x1]  ;;  %v3734_v40 = vld [vmem:[#allocation2 + $0xbd] sm:$0x1]  ;;  %v3494_v58 = vmax.f32 %v3462_v39, %v3478_v24  ;;  %v3622_v16 = vmax.f32 %v3590_v53, %v3606_v4  ;;  %v3686_v19 = vmax.f32 %v3654_v41, %v3670_v44 }
 0x5a1   :  { %3444 = vst.msk [vmem:[#allocation3 + $0xf3] sm:$0x1] %vm3370_vm8, %v3428_v47  ;;  %v3782_v54 = vld [vmem:[#allocation2 + $0xbe] sm:$0x1]  ;;  %v3798_v21 = vld [vmem:[#allocation2 + $0xbf] sm:$0x1]  ;;  %v3558_v47 = vmax.f32 %v3526_v15, %v3542_v35  ;;  %v3750_v46 = vmax.f32 %v3718_v60, %v3734_v40 }
 0x5a2   :  { %3508 = vst.msk [vmem:[#allocation3 + $0xf4] sm:$0x1] %vm3370_vm8, %v3492_v20  ;;  %v3333_v9 = vld [vmem:[#allocation2 + $0xc0] sm:$0x1]  ;;  %v3349_v57 = vld [vmem:[#allocation2 + $0xc1] sm:$0x1]  ;;  %v3814_v5 = vmax.f32 %v3782_v54, %v3798_v21 }
 0x5a3   :  { %3572 = vst.msk [vmem:[#allocation3 + $0xf5] sm:$0x1] %vm3370_vm8, %v3556_v31  ;;  %v3399_v20 = vld [vmem:[#allocation2 + $0xc2] sm:$0x1]  ;;  %v3415_v13 = vld [vmem:[#allocation2 + $0xc3] sm:$0x1] }
 0x5a4   :  { %v12192_v51 = vld [vmem:[#allocation3 + $0xe0] sm:$0xff]  ;;  %3636 = vst.msk [vmem:[#allocation3 + $0xf6] sm:$0x1] %vm3370_vm8, %v3620_v62  ;;  %v3607_v37 = vld [vmem:[#allocation2 + $0xc9] sm:$0x1]  ;;  %v3431_v29 = vmax.f32 %v3399_v20, %v3415_v13 }
 0x5a5   :  { %v3863_v6 = vld [vmem:[#allocation3 + $0xe1] sm:$0xff]  ;;  %8909 = vmatmul.msk.f32.gmra.mxu2 %vm2585_vm2, %v12192_v51  ;;  %3700 = vst.msk [vmem:[#allocation3 + $0xf7] sm:$0x1] %vm3370_vm8, %v3684_v48  ;;  %v3655_v8 = vld [vmem:[#allocation2 + $0xca] sm:$0x1] }
 0x5a6   :  { %8893 = vmatmul.msk.f32.gmra.mxu1 %vm2585_vm2, %v3863_v6  ;;  %v4108_v61 = vld [vmem:[#allocation3 + $0xe2] sm:$0xff]  ;;  %3764 = vst.msk [vmem:[#allocation3 + $0xf8] sm:$0x1] %vm3370_vm8, %v3748_v11  ;;  %v3365_v11 = vmax.f32 %v3333_v9, %v3349_v57  ;;  %v3671_v36 = vld [vmem:[#allocation2 + $0xcb] sm:$0x1] }
 0x5a7   :  { %8927 = vmatmul.msk.f32.gmra.mxu3 %vm2585_vm2, %v4108_v61  ;;  %9105 = vmatmul.msk.f32.gmra.mxu0 %vm2585_vm2, %v4108_v61  ;;  %3828 = vst.msk [vmem:[#allocation3 + $0xf9] sm:$0x1] %vm3370_vm8, %v3812_v27  ;;  %v3463_v31 = vld [vmem:[#allocation2 + $0xc4] sm:$0x1]  ;;  %v3479_v52 = vld [vmem:[#allocation2 + $0xc5] sm:$0x1]  ;;  %v3687_v3 = vmax.f32 %v3655_v8, %v3671_v36 }
 0x5a8   :  { %3381 = vst.msk [vmem:[#allocation3 + $0x102] sm:$0x1] %vm3370_vm8, %v3363_v2  ;;  %v3527_v62 = vld [vmem:[#allocation2 + $0xc6] sm:$0x1]  ;;  %v3543_v34 = vld [vmem:[#allocation2 + $0xc7] sm:$0x1]  ;;  %v3495_v10 = vmax.f32 %v3463_v31, %v3479_v52 }
 0x5a9   :  { %3445 = vst.msk [vmem:[#allocation3 + $0x103] sm:$0x1] %vm3370_vm8, %v3429_v45  ;;  %v3591_v48 = vld [vmem:[#allocation2 + $0xc8] sm:$0x1]  ;;  %v3719_v26 = vld [vmem:[#allocation2 + $0xcc] sm:$0x1]  ;;  %v3559_v7 = vmax.f32 %v3527_v62, %v3543_v34 }
 0x5aa   :  { %3509 = vst.msk [vmem:[#allocation3 + $0x104] sm:$0x1] %vm3370_vm8, %v3493_v0  ;;  %v3735_v2 = vld [vmem:[#allocation2 + $0xcd] sm:$0x1]  ;;  %v3783_v6 = vld [vmem:[#allocation2 + $0xce] sm:$0x1]  ;;  %v3623_v63 = vmax.f32 %v3591_v48, %v3607_v37 }
 0x5ab   :  { %3573 = vst.msk [vmem:[#allocation3 + $0x105] sm:$0x1] %vm3370_vm8, %v3557_v30  ;;  %v3799_v45 = vld [vmem:[#allocation2 + $0xcf] sm:$0x1]  ;;  %v3334_v56 = vld [vmem:[#allocation2 + $0xd0] sm:$0x1]  ;;  %v3751_v32 = vmax.f32 %v3719_v26, %v3735_v2 }
 0x5ac   :  { %v12207_v43 = vld [vmem:[#allocation3 + $0xf0] sm:$0xff]  ;;  %3637 = vst.msk [vmem:[#allocation3 + $0x106] sm:$0x1] %vm3370_vm8, %v3621_v25  ;;  %v9006_v0 = vld [vmem:[%s14241_s4 + $0x78] sm:$0xff]  ;;  %v3815_v39 = vmax.f32 %v3783_v6, %v3799_v45  ;;  %v9024_v4 = vld [vmem:[%s14241_s4 + $0x88] sm:$0xff] }
 0x5ad   :  { %v12210_v59 = vld [vmem:[#allocation3 + $0xf1] sm:$0xff]  ;;  %8910 = vmatmul.msk.f32.gmra.mxu2 %vm2585_vm2, %v12207_v43  ;;  %3701 = vst.msk [vmem:[#allocation3 + $0x107] sm:$0x1] %vm3370_vm8, %v3685_v1  ;;  %v3672_v53 = vld [vmem:[#allocation2 + $0xdb] sm:$0x1]  ;;  %5068 = vmatpush.msra.mxu3 %v9024_v4  ;;  %v8988_v60 = vld [vmem:[%s14241_s4 + $0x68] sm:$0xff] }
 0x5ae   :  { %8894 = vmatmul.msk.f32.gmra.mxu1 %vm2585_vm2, %v12210_v59  ;;  %v4109_v50 = vld [vmem:[#allocation3 + $0xf2] sm:$0xff]  ;;  %3765 = vst.msk [vmem:[#allocation3 + $0x108] sm:$0x1] %vm3370_vm8, %v3749_v12  ;;  %v3350_v61 = vld [vmem:[#allocation2 + $0xd1] sm:$0x1]  ;;  %4920 = vmatpush.msra.mxu2 %v9006_v0  ;;  %v9167_v6 = vld [vmem:[%s14241_s4 + $0x100] sm:$0xff] }
 0x5af   :  { %8928 = vmatmul.msk.f32.gmra.mxu3 %vm2585_vm2, %v4109_v50  ;;  %9106 = vmatmul.msk.f32.gmra.mxu0 %vm2585_vm2, %v4109_v50  ;;  %3829 = vst.msk [vmem:[#allocation3 + $0x109] sm:$0x1] %vm3370_vm8, %v3813_v55  ;;  %v3400_v33 = vld [vmem:[#allocation2 + $0xd2] sm:$0x1]  ;;  %v3416_v30 = vld [vmem:[#allocation2 + $0xd3] sm:$0x1]  ;;  %v3366_v35 = vmax.f32 %v3334_v56, %v3350_v61 }
 0x5b0   :  { %3382 = vst.msk [vmem:[#allocation3 + $0x112] sm:$0x1] %vm3370_vm8, %v3364_v17  ;;  %v3464_v22 = vld [vmem:[#allocation2 + $0xd4] sm:$0x1]  ;;  %v3480_v25 = vld [vmem:[#allocation2 + $0xd5] sm:$0x1]  ;;  %v3432_v41 = vmax.f32 %v3400_v33, %v3416_v30  ;;  %4772 = vmatpush.msra.mxu1 %v8988_v60 }
 0x5b1   :  { %3446 = vst.msk [vmem:[#allocation3 + $0x113] sm:$0x1] %vm3370_vm8, %v3430_v23  ;;  %v3528_v14 = vld [vmem:[#allocation2 + $0xd6] sm:$0x1]  ;;  %v3544_v1 = vld [vmem:[#allocation2 + $0xd7] sm:$0x1]  ;;  %v3496_v50 = vmax.f32 %v3464_v22, %v3480_v25 }
 0x5b2   :  { %3510 = vst.msk [vmem:[#allocation3 + $0x114] sm:$0x1] %vm3370_vm8, %v3494_v58  ;;  %v3592_v24 = vld [vmem:[#allocation2 + $0xd8] sm:$0x1]  ;;  %v3608_v12 = vld [vmem:[#allocation2 + $0xd9] sm:$0x1]  ;;  %v3560_v21 = vmax.f32 %v3528_v14, %v3544_v1 }
 0x5b3   :  { %3574 = vst.msk [vmem:[#allocation3 + $0x115] sm:$0x1] %vm3370_vm8, %v3558_v47  ;;  %v3656_v55 = vld [vmem:[#allocation2 + $0xda] sm:$0x1]  ;;  %v3720_v44 = vld [vmem:[#allocation2 + $0xdc] sm:$0x1]  ;;  %v3624_v57 = vmax.f32 %v3592_v24, %v3608_v12 }
 0x5b4   :  { %v12225_v42 = vld [vmem:[#allocation3 + $0x100] sm:$0xff]  ;;  %3638 = vst.msk [vmem:[#allocation3 + $0x116] sm:$0x1] %vm3370_vm8, %v3622_v16  ;;  %v3736_v23 = vld [vmem:[#allocation2 + $0xdd] sm:$0x1]  ;;  %v3688_v13 = vmax.f32 %v3656_v55, %v3672_v53 }
 0x5b5   :  { %v12228_v27 = vld [vmem:[#allocation3 + $0x101] sm:$0xff]  ;;  %8911 = vmatmul.msk.f32.gmra.mxu2 %vm2585_vm2, %v12225_v42  ;;  %3702 = vst.msk [vmem:[#allocation3 + $0x117] sm:$0x1] %vm3370_vm8, %v3686_v19  ;;  %v3784_v58 = vld [vmem:[#allocation2 + $0xde] sm:$0x1]  ;;  %v3752_v52 = vmax.f32 %v3720_v44, %v3736_v23 }
 0x5b6   :  { %8895 = vmatmul.msk.f32.gmra.mxu1 %vm2585_vm2, %v12228_v27  ;;  %v4110_v28 = vld [vmem:[#allocation3 + $0x102] sm:$0xff]  ;;  %3766 = vst.msk [vmem:[#allocation3 + $0x118] sm:$0x1] %vm3370_vm8, %v3750_v46  ;;  %v3800_v54 = vld [vmem:[#allocation2 + $0xdf] sm:$0x1] }
 0x5b7   :  { %8929 = vmatmul.msk.f32.gmra.mxu3 %vm2585_vm2, %v4110_v28  ;;  %9107 = vmatmul.msk.f32.gmra.mxu0 %vm2585_vm2, %v4110_v28  ;;  %3830 = vst.msk [vmem:[#allocation3 + $0x119] sm:$0x1] %vm3370_vm8, %v3814_v5  ;;  %v3335_v47 = vld [vmem:[#allocation2 + $0xe0] sm:$0x1]  ;;  %v3351_v9 = vld [vmem:[#allocation2 + $0xe1] sm:$0x1]  ;;  %v3816_v34 = vmax.f32 %v3784_v58, %v3800_v54 }
 0x5b8   :  { %3383 = vst.msk [vmem:[#allocation3 + $0x122] sm:$0x1] %vm3370_vm8, %v3365_v11  ;;  %v3401_v16 = vld [vmem:[#allocation2 + $0xe2] sm:$0x1]  ;;  %v3417_v20 = vld [vmem:[#allocation2 + $0xe3] sm:$0x1]  ;;  %v3367_v11 = vmax.f32 %v3335_v47, %v3351_v9 }
 0x5b9   :  { %3447 = vst.msk [vmem:[#allocation3 + $0x123] sm:$0x1] %vm3370_vm8, %v3431_v29  ;;  %v3465_v19 = vld [vmem:[#allocation2 + $0xe4] sm:$0x1]  ;;  %v3481_v31 = vld [vmem:[#allocation2 + $0xe5] sm:$0x1]  ;;  %v3433_v2 = vmax.f32 %v3401_v16, %v3417_v20 }
 0x5ba   :  { %3511 = vst.msk [vmem:[#allocation3 + $0x124] sm:$0x1] %vm3370_vm8, %v3495_v10  ;;  %v3529_v46 = vld [vmem:[#allocation2 + $0xe6] sm:$0x1]  ;;  %v3545_v62 = vld [vmem:[#allocation2 + $0xe7] sm:$0x1] }
 0x5bb   :  { %3575 = vst.msk [vmem:[#allocation3 + $0x125] sm:$0x1] %vm3370_vm8, %v3559_v7  ;;  %v3593_v5 = vld [vmem:[#allocation2 + $0xe8] sm:$0x1]  ;;  %v3609_v48 = vld [vmem:[#allocation2 + $0xe9] sm:$0x1]  ;;  %v3497_v7 = vmax.f32 %v3465_v19, %v3481_v31  ;;  %v3561_v61 = vmax.f32 %v3529_v46, %v3545_v62 }
 0x5bc   :  { %v12246_v15 = vld [vmem:[#allocation3 + $0x110] sm:$0xff]  ;;  %3639 = vst.msk [vmem:[#allocation3 + $0x126] sm:$0x1] %vm3370_vm8, %v3623_v63  ;;  %v3657_v8 = vld [vmem:[#allocation2 + $0xea] sm:$0x1]  ;;  %v3625_v33 = vmax.f32 %v3593_v5, %v3609_v48 }
 0x5bd   :  { %v12252_v17 = vld [vmem:[#allocation3 + $0x111] sm:$0xff]  ;;  %8912 = vmatmul.msk.f32.gmra.mxu2 %vm2585_vm2, %v12246_v15  ;;  %3703 = vst.msk [vmem:[#allocation3 + $0x127] sm:$0x1] %vm3370_vm8, %v3687_v3  ;;  %v3673_v36 = vld [vmem:[#allocation2 + $0xeb] sm:$0x1]  ;;  %v4246_v31 = vld [vmem:[#allocation3 + $0x3] sm:$0xff] }
 0x5be   :  { %8896 = vmatmul.msk.f32.gmra.mxu1 %vm2585_vm2, %v12252_v17  ;;  %v4111_v40 = vld [vmem:[#allocation3 + $0x112] sm:$0xff]  ;;  %3767 = vst.msk [vmem:[#allocation3 + $0x128] sm:$0x1] %vm3370_vm8, %v3751_v32  ;;  %v9168_v29 = vld [vmem:[%s14241_s4 + $0x108] sm:$0xff]  ;;  %v3336_v63 = vld [vmem:[#allocation2 + $0xf0] sm:$0x1]  ;;  %v3689_v22 = vmax.f32 %v3657_v8, %v3673_v36 }
 0x5bf   :  { %8930 = vmatmul.msk.f32.gmra.mxu3 %vm2585_vm2, %v4111_v40  ;;  %9108 = vmatmul.msk.f32.gmra.mxu0 %vm2585_vm2, %v4111_v40  ;;  %3831 = vst.msk [vmem:[#allocation3 + $0x129] sm:$0x1] %vm3370_vm8, %v3815_v39  ;;  %v3721_v28 = vld [vmem:[#allocation2 + $0xec] sm:$0x1]  ;;  %v3737_v10 = vld [vmem:[#allocation2 + $0xed] sm:$0x1] }
 0x5c0   :  { %3384 = vst.msk [vmem:[#allocation3 + $0x132] sm:$0x1] %vm3370_vm8, %v3366_v35  ;;  %6253 = vmatpush.msrb.mxu0 %v9168_v29  ;;  %v3785_v56 = vld [vmem:[#allocation2 + $0xee] sm:$0x1]  ;;  %v3801_v0 = vld [vmem:[#allocation2 + $0xef] sm:$0x1]  ;;  %v3753_v14 = vmax.f32 %v3721_v28, %v3737_v10 }
 0x5c1   :  { %3448 = vst.msk [vmem:[#allocation3 + $0x133] sm:$0x1] %vm3370_vm8, %v3432_v41  ;;  %v3352_v30 = vld [vmem:[#allocation2 + $0xf1] sm:$0x1]  ;;  %v3402_v3 = vld [vmem:[#allocation2 + $0xf2] sm:$0x1]  ;;  %v3817_v24 = vmax.f32 %v3785_v56, %v3801_v0 }
 0x5c2   :  { %3512 = vst.msk [vmem:[#allocation3 + $0x134] sm:$0x1] %vm3370_vm8, %v3496_v50  ;;  %6254 = vmatpush.msrb.mxu0 %v9167_v6  ;;  %v3418_v25 = vld [vmem:[#allocation2 + $0xf3] sm:$0x1]  ;;  %v3466_v32 = vld [vmem:[#allocation2 + $0xf4] sm:$0x1]  ;;  %v3368_v53 = vmax.f32 %v3336_v63, %v3352_v30 }
 0x5c3   :  { %3576 = vst.msk [vmem:[#allocation3 + $0x135] sm:$0x1] %vm3370_vm8, %v3560_v21  ;;  %v3482_v1 = vld [vmem:[#allocation2 + $0xf5] sm:$0x1]  ;;  %v3530_v39 = vld [vmem:[#allocation2 + $0xf6] sm:$0x1]  ;;  %v3434_v44 = vmax.f32 %v3402_v3, %v3418_v25 }
 0x5c4   :  { %v12270_v37 = vld [vmem:[#allocation3 + $0x120] sm:$0xff]  ;;  %3640 = vst.msk [vmem:[#allocation3 + $0x136] sm:$0x1] %vm3370_vm8, %v3624_v57  ;;  %v3546_v12 = vld [vmem:[#allocation2 + $0xf7] sm:$0x1]  ;;  %v3498_v40 = vmax.f32 %v3466_v32, %v3482_v1 }
 0x5c5   :  { %v12276_v26 = vld [vmem:[#allocation3 + $0x121] sm:$0xff]  ;;  %8913 = vmatmul.msk.f32.gmra.mxu2 %vm2585_vm2, %v12270_v37  ;;  %3704 = vst.msk [vmem:[#allocation3 + $0x137] sm:$0x1] %vm3370_vm8, %v3688_v13  ;;  %v3594_v35 = vld [vmem:[#allocation2 + $0xf8] sm:$0x1]  ;;  %v12307_v58 = vpop.f32.mrf.mxu1  ;;  %v3562_v54 = vmax.f32 %v3530_v39, %v3546_v12  ;;  %v4543_v46 = vld [vmem:[#allocation3 + $0x10] sm:$0xff] }
 0x5c6   :  { %8897 = vmatmul.msk.f32.gmra.mxu1 %vm2585_vm2, %v12276_v26  ;;  %v4112_v45 = vld [vmem:[#allocation3 + $0x122] sm:$0xff]  ;;  %3768 = vst.msk [vmem:[#allocation3 + $0x138] sm:$0x1] %vm3370_vm8, %v3752_v52  ;;  %v3610_v4 = vld [vmem:[#allocation2 + $0xf9] sm:$0x1]  ;;  %v12358_v56 = vld [vmem:[#allocation3 + $0x30] sm:$0xff] }
 0x5c7   :  { %8931 = vmatmul.msk.f32.gmra.mxu3 %vm2585_vm2, %v4112_v45  ;;  %9109 = vmatmul.msk.f32.gmra.mxu0 %vm2585_vm2, %v4112_v45  ;;  %3832 = vst.msk [vmem:[#allocation3 + $0x139] sm:$0x1] %vm3370_vm8, %v3816_v34  ;;  %v3658_v23 = vld [vmem:[#allocation2 + $0xfa] sm:$0x1]  ;;  %v3674_v50 = vld [vmem:[#allocation2 + $0xfb] sm:$0x1]  ;;  %v3626_v9 = vmax.f32 %v3594_v35, %v3610_v4  ;;  %v12320_v34 = vpop.f32.mrf.mxu2 }
 0x5c8   :  { %3385 = vst.msk [vmem:[#allocation3 + $0x142] sm:$0x1] %vm3370_vm8, %v3367_v11  ;;  %v3722_v21 = vld [vmem:[#allocation2 + $0xfc] sm:$0x1]  ;;  %v3738_v47 = vld [vmem:[#allocation2 + $0xfd] sm:$0x1]  ;;  %v3690_v20 = vmax.f32 %v3658_v23, %v3674_v50 }
 0x5c9   :  { %3449 = vst.msk [vmem:[#allocation3 + $0x143] sm:$0x1] %vm3370_vm8, %v3433_v2  ;;  %v3786_v57 = vld [vmem:[#allocation2 + $0xfe] sm:$0x1]  ;;  %v3802_v16 = vld [vmem:[#allocation2 + $0xff] sm:$0x1]  ;;  %v3754_v19 = vmax.f32 %v3722_v21, %v3738_v47 }
 0x5ca   :  { %3513 = vst.msk [vmem:[#allocation3 + $0x144] sm:$0x1] %vm3370_vm8, %v3497_v7  ;;  %v4394_v13 = vld [vmem:[#allocation3 + $0x4] sm:$0xff]  ;;  %v3818_v52 = vmax.f32 %v3786_v57, %v3802_v16  ;;  %v12331_v11 = vld [vmem:[#allocation3 + $0x14] sm:$0xff] }
 0x5cb   :  { %3577 = vst.msk [vmem:[#allocation3 + $0x145] sm:$0x1] %vm3370_vm8, %v3561_v61  ;;  %v12333_v8 = vld [vmem:[#allocation3 + $0x13] sm:$0xff]  ;;  %v12339_v36 = vld [vmem:[#allocation3 + $0x20] sm:$0xff] }
 0x5cc   :  { %v12294_v55 = vld [vmem:[#allocation3 + $0x130] sm:$0xff]  ;;  %3641 = vst.msk [vmem:[#allocation3 + $0x146] sm:$0x1] %vm3370_vm8, %v3625_v33  ;;  %v12322_v5 = vpop.f32.mrf.mxu3  ;;  %v12350_v45 = vld [vmem:[#allocation3 + $0x24] sm:$0xff] }
 0x5cd   :  { %v12297_v41 = vld [vmem:[#allocation3 + $0x131] sm:$0xff]  ;;  %8914 = vmatmul.msk.f32.gmra.mxu2 %vm2585_vm2, %v12294_v55  ;;  %3705 = vst.msk [vmem:[#allocation3 + $0x147] sm:$0x1] %vm3370_vm8, %v3689_v22  ;;  %v12329_v48 = vpop.f32.mrf.mxu1  ;;  %v12352_v7 = vld [vmem:[#allocation3 + $0x23] sm:$0xff] }
 0x5ce   :  { %8898 = vmatmul.msk.f32.gmra.mxu1 %vm2585_vm2, %v12297_v41  ;;  %v4113_v60 = vld [vmem:[#allocation3 + $0x132] sm:$0xff]  ;;  %3769 = vst.msk [vmem:[#allocation3 + $0x148] sm:$0x1] %vm3370_vm8, %v3753_v14  ;;  %v12378_v14 = vld [vmem:[#allocation3 + $0x40] sm:$0xff] }
 0x5cf   :  { %8932 = vmatmul.msk.f32.gmra.mxu3 %vm2585_vm2, %v4113_v60  ;;  %9110 = vmatmul.msk.f32.gmra.mxu0 %vm2585_vm2, %v4113_v60  ;;  %3833 = vst.msk [vmem:[#allocation3 + $0x149] sm:$0x1] %vm3370_vm8, %v3817_v24  ;;  %v12344_v2 = vpop.f32.mrf.mxu2  ;;  %v12360_v61 = vld [vmem:[#allocation3 + $0x31] sm:$0xff]  ;;  %v12380_v1 = vld [vmem:[#allocation3 + $0x41] sm:$0xff] }
 0x5d0   :  { %3386 = vst.msk [vmem:[#allocation3 + $0x152] sm:$0x1] %vm3370_vm8, %v3368_v53  ;;  %v12370_v25 = vld [vmem:[#allocation3 + $0x34] sm:$0xff]  ;;  %v12392_v23 = vld [vmem:[#allocation3 + $0x43] sm:$0xff] }
 0x5d1   :  { %3450 = vst.msk [vmem:[#allocation3 + $0x153] sm:$0x1] %vm3370_vm8, %v3434_v44  ;;  %v12372_v32 = vld [vmem:[#allocation3 + $0x33] sm:$0xff]  ;;  %v12390_v44 = vld [vmem:[#allocation3 + $0x44] sm:$0xff] }
 0x5d2   :  { %3514 = vst.msk [vmem:[#allocation3 + $0x154] sm:$0x1] %vm3370_vm8, %v3498_v40  ;;  %v12398_v60 = vld [vmem:[#allocation3 + $0x50] sm:$0xff] }
 0x5d3   :  { %3578 = vst.msk [vmem:[#allocation3 + $0x155] sm:$0x1] %vm3370_vm8, %v3562_v54  ;;  %v12400_v40 = vld [vmem:[#allocation3 + $0x51] sm:$0xff]  ;;  %v9023_v54 = vld [vmem:[%s14241_s4 + $0x80] sm:$0xff] }
 0x5d4   :  { %3642 = vst.msk [vmem:[#allocation3 + $0x156] sm:$0x1] %vm3370_vm8, %v3626_v9  ;;  %v12346_v28 = vpop.f32.mrf.mxu3  ;;  %v9005_v50 = vld [vmem:[%s14241_s4 + $0x70] sm:$0xff]  ;;  %5069 = vmatpush.msra.mxu3 %v9023_v54 }
 0x5d5   :  { %8953 = vmatmul.msk.f32.vlgmr.msrb.gmra.mxu2 %vm2585_vm2, %v4394_v13  ;;  %3706 = vst.msk [vmem:[#allocation3 + $0x157] sm:$0x1] %vm3370_vm8, %v3690_v20  ;;  %v8987_v20 = vld [vmem:[%s14241_s4 + $0x60] sm:$0xff] }
 0x5d6   :  { %8935 = vmatmul.msk.f32.vlgmr.msrb.gmra.mxu1 %vm2585_vm2, %v4246_v31  ;;  %v12318_v62 = vld [vmem:[#allocation3 + $0x142] sm:$0xff]  ;;  %3770 = vst.msk [vmem:[#allocation3 + $0x158] sm:$0x1] %vm3370_vm8, %v3754_v19  ;;  %4921 = vmatpush.msra.mxu2 %v9005_v50  ;;  %v12419_v19 = vld [vmem:[#allocation3 + $0x54] sm:$0xff] }
 0x5d7   :  { %8971 = vmatmul.msk.f32.vlgmr.msrb.gmra.mxu3 %vm2585_vm2, %v4543_v46  ;;  %9111 = vmatmul.msk.f32.gmra.mxu0 %vm2585_vm2, %v12318_v62  ;;  %3834 = vst.msk [vmem:[#allocation3 + $0x159] sm:$0x1] %vm3370_vm8, %v3818_v52  ;;  %v12421_v31 = vld [vmem:[#allocation3 + $0x53] sm:$0xff]  ;;  %v12427_v52 = vld [vmem:[#allocation3 + $0x60] sm:$0xff] }
 0x5d8   :  { %14701 = vst [vmem:[#allocation39_spill] sm:$0xff] %v12419_v19  ;;  %4773 = vmatpush.msra.mxu1 %v8987_v20  ;;  %v12429_v46 = vld [vmem:[#allocation3 + $0x61] sm:$0xff] }
 0x5dd   :  { %8954 = vmatmul.msk.f32.gmra.mxu2 %vm2585_vm2, %v12331_v11 }
 0x5de   :  { %8936 = vmatmul.msk.f32.gmra.mxu1 %vm2585_vm2, %v12333_v8  ;;  %v5594_v29 = vld [vmem:[#allocation3 + $0x152] sm:$0xff] }
 0x5df   :  { %8972 = vmatmul.msk.f32.gmra.mxu3 %vm2585_vm2, %v12339_v36  ;;  %9112 = vmatmul.msk.f32.gmra.mxu0 %vm2585_vm2, %v5594_v29 }
 0x5e3   :  { %v3943_v10 = vpop.f32.mrf.mxu1 }
 0x5e4   :  { %v12348_v6 = vpop.f32.mrf.mxu0 }
 0x5e5   :  { %14697 = vst [vmem:[#allocation38_spill] sm:$0xff] %v12348_v6  ;;  %8955 = vmatmul.msk.f32.gmra.mxu2 %vm2585_vm2, %v12350_v45  ;;  %v12518_v6 = vld [vmem:[#allocation3 + $0xf3] sm:$0xff] }
 0x5e6   :  { %8937 = vmatmul.msk.f32.gmra.mxu1 %vm2585_vm2, %v12352_v7 }
 0x5e7   :  { %8973 = vmatmul.msk.f32.gmra.mxu3 %vm2585_vm2, %v12358_v56  ;;  %9169 = vmatmul.msk.f32.vlgmr.msrb.gmra.mxu0 %vm2585_vm2, %v12360_v61 }
 0x5e8   :  { %v4056_v0 = vpop.f32.mrf.mxu2 }
 0x5e9   :  { %v4057_v63 = vadd.f32 %v4056_v0, %v3943_v10 }
 0x5ea   :  { %v4188_v33 = vpop.f32.mrf.mxu3 }
 0x5eb   :  { %v12366_v30 = vadd.f32 %v4188_v33, %v4057_v63  ;;  %v3946_v3 = vpop.f32.mrf.mxu1 }
 0x5ec   :  { %v12368_v22 = vpop.f32.mrf.mxu0 }
 0x5ed   :  { %14698 = vst [vmem:[#allocation73_spill] sm:$0xff] %v12368_v22  ;;  %8956 = vmatmul.msk.f32.gmra.mxu2 %vm2585_vm2, %v12370_v25  ;;  %v12502_v22 = vld [vmem:[#allocation3 + $0xe3] sm:$0xff] }
 0x5ee   :  { %8938 = vmatmul.msk.f32.gmra.mxu1 %vm2585_vm2, %v12372_v32 }
 0x5ef   :  { %8974 = vmatmul.msk.f32.gmra.mxu3 %vm2585_vm2, %v12378_v14  ;;  %9170 = vmatmul.msk.f32.gmra.mxu0 %vm2585_vm2, %v12380_v1 }
 0x5f0   :  { %v4059_v39 = vpop.f32.mrf.mxu2 }
 0x5f1   :  { %v4060_v24 = vadd.f32 %v4059_v39, %v3946_v3  ;;  %v12437_v3 = vld [vmem:[#allocation3 + $0x64] sm:$0xff] }
 0x5f2   :  { %v4191_v12 = vpop.f32.mrf.mxu3  ;;  %14702 = vst [vmem:[#allocation74_spill] sm:$0xff] %v12437_v3 }
 0x5f3   :  { %v12386_v35 = vadd.f32 %v4191_v12, %v4060_v24  ;;  %v3949_v53 = vpop.f32.mrf.mxu1  ;;  %v12441_v24 = vld [vmem:[#allocation3 + $0x63] sm:$0xff] }
 0x5f4   :  { %v12388_v4 = vpop.f32.mrf.mxu0 }
 0x5f5   :  { %14699 = vst [vmem:[#allocation66_spill] sm:$0xff] %v12388_v4  ;;  %8957 = vmatmul.msk.f32.gmra.mxu2 %vm2585_vm2, %v12390_v44  ;;  %v12500_v4 = vld [vmem:[#allocation3 + $0xe4] sm:$0xff] }
 0x5f6   :  { %8939 = vmatmul.msk.f32.gmra.mxu1 %vm2585_vm2, %v12392_v23  ;;  %14710 = vst [vmem:[#allocation41_spill] sm:$0xff] %v12500_v4 }
 0x5f7   :  { %8975 = vmatmul.msk.f32.gmra.mxu3 %vm2585_vm2, %v12398_v60  ;;  %9171 = vmatmul.msk.f32.gmra.mxu0 %vm2585_vm2, %v12400_v40 }
 0x5f8   :  { %v4062_v21 = vpop.f32.mrf.mxu2 }
 0x5f9   :  { %v4063_v47 = vadd.f32 %v4062_v21, %v3949_v53 }
 0x5fa   :  { %v4194_v9 = vpop.f32.mrf.mxu3 }
 0x5fb   :  { %v12412_v57 = vadd.f32 %v4194_v9, %v4063_v47  ;;  %v3952_v16 = vpop.f32.mrf.mxu1  ;;  %v12453_v47 = vld [vmem:[#allocation3 + $0x74] sm:$0xff] }
 0x5fc   :  { %v12417_v13 = vpop.f32.mrf.mxu0  ;;  %14704 = vst [vmem:[#allocation77_spill] sm:$0xff] %v12453_v47  ;;  %v12455_v9 = vld [vmem:[#allocation3 + $0x73] sm:$0xff] }
 0x5fd   :  { %14700 = vst [vmem:[#allocation71_spill] sm:$0xff] %v12417_v13  ;;  %8958 = vmatmul.msk.f32.gmra.mxu2 %vm2585_vm2, %v12419_v19  ;;  %v12487_v13 = vld [vmem:[#allocation3 + $0xd3] sm:$0xff] }
 0x5fe   :  { %8940 = vmatmul.msk.f32.gmra.mxu1 %vm2585_vm2, %v12421_v31 }
 0x5ff   :  { %8976 = vmatmul.msk.f32.gmra.mxu3 %vm2585_vm2, %v12427_v52  ;;  %9172 = vmatmul.msk.f32.gmra.mxu0 %vm2585_vm2, %v12429_v46 }
 0x600   :  { %v4065_v29 = vpop.f32.mrf.mxu2 }
 0x601   :  { %v4066_v10 = vadd.f32 %v4065_v29, %v3952_v16  ;;  %v12463_v16 = vld [vmem:[#allocation3 + $0x81] sm:$0xff] }
 0x602   :  { %v4197_v0 = vpop.f32.mrf.mxu3 }
 0x603   :  { %v12435_v63 = vadd.f32 %v4197_v0, %v4066_v10  ;;  %v3955_v33 = vpop.f32.mrf.mxu1  ;;  %v4402_v0 = vld [vmem:[#allocation3 + $0xc4] sm:$0xff] }
 0x604   :  { %v12439_v39 = vpop.f32.mrf.mxu0 }
 0x605   :  { %14703 = vst [vmem:[#allocation69_spill] sm:$0xff] %v12439_v39  ;;  %8959 = vmatmul.msk.f32.gmra.mxu2 %vm2585_vm2, %v12437_v3  ;;  %v12618_v3 = vld [vmem:[#allocation3 + $0x151] sm:$0xff] }
 0x606   :  { %8941 = vmatmul.msk.f32.gmra.mxu1 %vm2585_vm2, %v12441_v24 }
 0x607   :  { %8977 = vmatmul.msk.f32.gmra.mxu3 %vm2585_vm2, %v12147_v49  ;;  %9173 = vmatmul.msk.f32.gmra.mxu0 %vm2585_vm2, %v12150_v18  ;;  %v12461_v49 = vld [vmem:[#allocation3 + $0x80] sm:$0xff] }
 0x608   :  { %v4068_v12 = vpop.f32.mrf.mxu2 }
 0x609   :  { %v4069_v53 = vadd.f32 %v4068_v12, %v3955_v33 }
 0x60a   :  { %v4200_v50 = vpop.f32.mrf.mxu3 }
 0x60b   :  { %v12451_v54 = vadd.f32 %v4200_v50, %v4069_v53  ;;  %v3958_v21 = vpop.f32.mrf.mxu1  ;;  %v4254_v53 = vld [vmem:[#allocation3 + $0xc3] sm:$0xff]  ;;  %v12475_v50 = vld [vmem:[#allocation3 + $0x91] sm:$0xff] }
 0x60c   :  { %v12465_v18 = vpop.f32.mrf.mxu0  ;;  %14706 = vst [vmem:[#allocation40_spill] sm:$0xff] %v12475_v50 }
 0x60d   :  { %8960 = vmatmul.msk.f32.gmra.mxu2 %vm2585_vm2, %v12453_v47  ;;  %14705 = vst [vmem:[#allocation72_spill] sm:$0xff] %v12465_v18 }
 0x60e   :  { %8942 = vmatmul.msk.f32.gmra.mxu1 %vm2585_vm2, %v12455_v9 }
 0x60f   :  { %8978 = vmatmul.msk.f32.gmra.mxu3 %vm2585_vm2, %v12461_v49  ;;  %9174 = vmatmul.msk.f32.gmra.mxu0 %vm2585_vm2, %v12463_v16 }
 0x610   :  { %v4071_v20 = vpop.f32.mrf.mxu2 }
 0x611   :  { %v4072_v29 = vadd.f32 %v4071_v20, %v3958_v21 }
 0x612   :  { %v4203_v10 = vpop.f32.mrf.mxu3 }
 0x613   :  { %v12471_v33 = vadd.f32 %v4203_v10, %v4072_v29  ;;  %v3961_v12 = vpop.f32.mrf.mxu1  ;;  %v12483_v10 = vld [vmem:[#allocation3 + $0xd4] sm:$0xff] }
 0x614   :  { %v12481_v21 = vpop.f32.mrf.mxu0  ;;  %14708 = vst [vmem:[#allocation82_spill] sm:$0xff] %v12483_v10 }
 0x615   :  { %8961 = vmatmul.msk.f32.gmra.mxu2 %vm2585_vm2, %v4402_v0  ;;  %14707 = vst [vmem:[#allocation79_spill] sm:$0xff] %v12481_v21 }
 0x616   :  { %8943 = vmatmul.msk.f32.gmra.mxu1 %vm2585_vm2, %v4254_v53  ;;  %v6179_v53 = vld [vmem:[#allocation3 + $0xa1] sm:$0xff] }
 0x617   :  { %8979 = vmatmul.msk.f32.gmra.mxu3 %vm2585_vm2, %v12173_v38  ;;  %9175 = vmatmul.msk.f32.gmra.mxu0 %vm2585_vm2, %v12475_v50 }
 0x618   :  { %v4074_v18 = vpop.f32.mrf.mxu2 }
 0x619   :  { %v4075_v20 = vadd.f32 %v4074_v18, %v3961_v12 }
 0x61a   :  { %v4206_v29 = vpop.f32.mrf.mxu3 }
 0x61b   :  { %v12485_v39 = vadd.f32 %v4206_v29, %v4075_v20  ;;  %v3964_v0 = vpop.f32.mrf.mxu1 }
 0x61c   :  { %v12496_v20 = vpop.f32.mrf.mxu0 }
 0x61d   :  { %8962 = vmatmul.msk.f32.gmra.mxu2 %vm2585_vm2, %v12483_v10  ;;  %14709 = vst [vmem:[#allocation76_spill] sm:$0xff] %v12496_v20  ;;  %v4691_v10 = vld [vmem:[#allocation3 + $0x11] sm:$0xff] }
 0x61e   :  { %8944 = vmatmul.msk.f32.gmra.mxu1 %vm2585_vm2, %v12487_v13 }
 0x61f   :  { %8980 = vmatmul.msk.f32.gmra.mxu3 %vm2585_vm2, %v12192_v51  ;;  %9176 = vmatmul.msk.f32.gmra.mxu0 %vm2585_vm2, %v6179_v53 }
 0x620   :  { %v4077_v38 = vpop.f32.mrf.mxu2 }
 0x621   :  { %v4078_v18 = vadd.f32 %v4077_v38, %v3964_v0 }
 0x622   :  { %v4209_v12 = vpop.f32.mrf.mxu3 }
 0x623   :  { %v12498_v29 = vadd.f32 %v4209_v12, %v4078_v18  ;;  %v3967_v21 = vpop.f32.mrf.mxu1  ;;  %v12514_v12 = vld [vmem:[#allocation3 + $0xf4] sm:$0xff] }
 0x624   :  { %14711 = vst [vmem:[#allocation80_spill] sm:$0xff] %v12514_v12  ;;  %v12516_v20 = vpop.f32.mrf.mxu0 }
 0x625   :  { %8963 = vmatmul.msk.f32.gmra.mxu2 %vm2585_vm2, %v12500_v4  ;;  %14712 = vst [vmem:[#allocation78_spill] sm:$0xff] %v12516_v20  ;;  %v12532_v20 = vld [vmem:[#allocation3 + $0x103] sm:$0xff] }
 0x626   :  { %8945 = vmatmul.msk.f32.gmra.mxu1 %vm2585_vm2, %v12502_v22  ;;  %v12576_v4 = vld [vmem:[#allocation3 + $0x123] sm:$0xff] }
 0x627   :  { %8981 = vmatmul.msk.f32.gmra.mxu3 %vm2585_vm2, %v12207_v43  ;;  %9177 = vmatmul.msk.f32.gmra.mxu0 %vm2585_vm2, %v12210_v59 }
 0x628   :  { %v4080_v51 = vpop.f32.mrf.mxu2 }
 0x629   :  { %v4081_v0 = vadd.f32 %v4080_v51, %v3967_v21 }
 0x62a   :  { %v4212_v53 = vpop.f32.mrf.mxu3 }
 0x62b   :  { %v12512_v38 = vadd.f32 %v4212_v53, %v4081_v0  ;;  %v3970_v18 = vpop.f32.mrf.mxu1  ;;  %v12530_v53 = vld [vmem:[#allocation3 + $0x104] sm:$0xff] }
 0x62c   :  { %14713 = vst [vmem:[#allocation42_spill] sm:$0xff] %v12530_v53 }
 0x62d   :  { %8964 = vmatmul.msk.f32.gmra.mxu2 %vm2585_vm2, %v12514_v12  ;;  %v12557_v12 = vld [vmem:[#allocation3 + $0x113] sm:$0xff] }
 0x62e   :  { %8946 = vmatmul.msk.f32.gmra.mxu1 %vm2585_vm2, %v12518_v6 }
 0x62f   :  { %8982 = vmatmul.msk.f32.gmra.mxu3 %vm2585_vm2, %v12225_v42  ;;  %9178 = vmatmul.msk.f32.gmra.mxu0 %vm2585_vm2, %v12228_v27  ;;  %v12538_v42 = vpop.f32.mrf.mxu0  ;;  %v9060_v27 = vld [vmem:[%s14241_s4 + $0xa8] sm:$0xff] }
 0x630   :  { %v4083_v43 = vpop.f32.mrf.mxu2  ;;  %14714 = vst [vmem:[#allocation85_spill] sm:$0xff] %v12538_v42  ;;  %5364 = vmatpush.msrb.mxu2 %v9060_v27 }
 0x631   :  { %v4084_v59 = vadd.f32 %v4083_v43, %v3970_v18  ;;  %v9078_v18 = vld [vmem:[%s14241_s4 + $0xb8] sm:$0xff] }
 0x632   :  { %v4215_v21 = vpop.f32.mrf.mxu3  ;;  %5512 = vmatpush.msrb.mxu3 %v9078_v18 }
 0x633   :  { %v12528_v51 = vadd.f32 %v4215_v21, %v4084_v59  ;;  %v3973_v0 = vpop.f32.mrf.mxu1 }
 0x635   :  { %8965 = vmatmul.msk.f32.gmra.mxu2 %vm2585_vm2, %v12530_v53 }
 0x636   :  { %8947 = vmatmul.msk.f32.gmra.mxu1 %vm2585_vm2, %v12532_v20 }
 0x637   :  { %8983 = vmatmul.msk.f32.gmra.mxu3 %vm2585_vm2, %v12246_v15  ;;  %9179 = vmatmul.msk.f32.gmra.mxu0 %vm2585_vm2, %v12252_v17  ;;  %v9042_v15 = vld [vmem:[%s14241_s4 + $0x98] sm:$0xff]  ;;  %v12567_v27 = vpop.f32.mrf.mxu0 }
 0x638   :  { %v4086_v43 = vpop.f32.mrf.mxu2  ;;  %v12555_v17 = vld [vmem:[#allocation3 + $0x114] sm:$0xff]  ;;  %5216 = vmatpush.msrb.mxu1 %v9042_v15  ;;  %14716 = vst [vmem:[#allocation43_spill] sm:$0xff] %v12567_v27  ;;  %v12571_v15 = vld [vmem:[#allocation3 + $0x124] sm:$0xff] }
 0x639   :  { %v4087_v59 = vadd.f32 %v4086_v43, %v3973_v0  ;;  %14715 = vst [vmem:[#allocation83_spill] sm:$0xff] %v12555_v17  ;;  %v12593_v27 = vld [vmem:[#allocation3 + $0x134] sm:$0xff] }
 0x63a   :  { %v4218_v21 = vpop.f32.mrf.mxu3  ;;  %14717 = vst [vmem:[#allocation88_spill] sm:$0xff] %v12571_v15 }
 0x63b   :  { %v12550_v42 = vadd.f32 %v4218_v21, %v4087_v59  ;;  %v3976_v53 = vpop.f32.mrf.mxu1  ;;  %14719 = vst [vmem:[#allocation86_spill] sm:$0xff] %v12593_v27 }
 0x63d   :  { %8966 = vmatmul.msk.f32.gmra.mxu2 %vm2585_vm2, %v12555_v17  ;;  %v9240_v17 = vld [vmem:[%s14241_s4 + $0x148] sm:$0xff] }
 0x63e   :  { %8948 = vmatmul.msk.f32.gmra.mxu1 %vm2585_vm2, %v12557_v12  ;;  %6846 = vmatpush.msra.mxu0 %v9240_v17 }
 0x63f   :  { %8984 = vmatmul.msk.f32.gmra.mxu3 %vm2585_vm2, %v12270_v37  ;;  %9180 = vmatmul.msk.f32.gmra.mxu0 %vm2585_vm2, %v12276_v26  ;;  %v9239_v37 = vld [vmem:[%s14241_s4 + $0x140] sm:$0xff] }
 0x640   :  { %v4089_v0 = vpop.f32.mrf.mxu2  ;;  %6847 = vmatpush.msra.mxu0 %v9239_v37  ;;  %v4051_v37 = vadd.f32 %v12320_v34, %v12307_v58  ;;  %v4054_v34 = vadd.f32 %v12344_v2, %v12329_v48 }
 0x641   :  { %v4090_v18 = vadd.f32 %v4089_v0, %v3976_v53 }
 0x642   :  { %v4221_v43 = vpop.f32.mrf.mxu3  ;;  %v4230_v50 = vadd.f32 %v12322_v5, %v4051_v37 }
 0x643   :  { %v12569_v59 = vadd.f32 %v4221_v43, %v4090_v18  ;;  %v3979_v21 = vpop.f32.mrf.mxu1  ;;  %v12589_v18 = vpop.f32.mrf.mxu0 }
 0x644   :  { %14718 = vst [vmem:[#allocation81_spill] sm:$0xff] %v12589_v18 }
 0x645   :  { %8967 = vmatmul.msk.f32.gmra.mxu2 %vm2585_vm2, %v12571_v15  ;;  %v12595_v15 = vld [vmem:[#allocation3 + $0x133] sm:$0xff] }
 0x646   :  { %8949 = vmatmul.msk.f32.gmra.mxu1 %vm2585_vm2, %v12576_v4 }
 0x647   :  { %8985 = vmatmul.msk.f32.gmra.mxu3 %vm2585_vm2, %v12294_v55  ;;  %9181 = vmatmul.msk.f32.gmra.mxu0 %vm2585_vm2, %v12297_v41  ;;  %v12601_v55 = vld [vmem:[#allocation3 + $0x140] sm:$0xff] }
 0x648   :  { %v4092_v26 = vpop.f32.mrf.mxu2  ;;  %v12603_v41 = vld [vmem:[#allocation3 + $0x141] sm:$0xff] }
 0x649   :  { %v4093_v53 = vadd.f32 %v4092_v26, %v3979_v21 }
 0x64a   :  { %v4224_v0 = vpop.f32.mrf.mxu3 }
 0x64b   :  { %v12591_v17 = vadd.f32 %v4224_v0, %v4093_v53  ;;  %v3982_v43 = vpop.f32.mrf.mxu1  ;;  %v4839_v0 = vld [vmem:[#allocation3 + $0x12] sm:$0xff]  ;;  %v12614_v47 = vpop.f32.mrf.mxu0 }
 0x64d   :  { %8968 = vmatmul.msk.f32.gmra.mxu2 %vm2585_vm2, %v12593_v27 }
 0x64e   :  { %8950 = vmatmul.msk.f32.gmra.mxu1 %vm2585_vm2, %v12595_v15 }
 0x64f   :  { %8986 = vmatmul.msk.f32.gmra.mxu3 %vm2585_vm2, %v12601_v55  ;;  %9182 = vmatmul.msk.f32.gmra.mxu0 %vm2585_vm2, %v12603_v41 }
 0x650   :  { %v4095_v21 = vpop.f32.mrf.mxu2 }
 0x651   :  { %v4096_v26 = vadd.f32 %v4095_v21, %v3982_v43 }
 0x652   :  { %v4227_v53 = vpop.f32.mrf.mxu3 }
 0x653   :  { %v12611_v18 = vadd.f32 %v4227_v53, %v4096_v26  ;;  %v4330_v27 = vpop.f32.mrf.mxu1  ;;  %v4840_v26 = vld [vmem:[#allocation3 + $0x22] sm:$0xff]  ;;  %v4231_v53 = vadd.f32 %v12346_v28, %v4054_v34 }
 0x654   :  { %v4378_v19 = vadd.f32 %v4330_v27, %v4230_v50  ;;  %v12629_v50 = vld [vmem:[#allocation3 + $0x21] sm:$0xff] }
 0x655   :  { %9007 = vmatmul.msk.f32.vlgmr.msra.gmra.mxu2 %vm2585_vm2, %v4839_v0 }
 0x656   :  { %8989 = vmatmul.msk.f32.vlgmr.msra.gmra.mxu1 %vm2585_vm2, %v4691_v10  ;;  %v6187_v10 = vld [vmem:[#allocation3 + $0x161] sm:$0xff] }
 0x657   :  { %9025 = vmatmul.msk.f32.vlgmr.msra.gmra.mxu3 %vm2585_vm2, %v12333_v8  ;;  %9183 = vmatmul.msk.f32.gmra.mxu0 %vm2585_vm2, %v12618_v3  ;;  %v12634_v8 = vpop.f32.mrf.mxu0 }
 0x658   :  { %v4478_v58 = vpop.f32.mrf.mxu2 }
 0x659   :  { %v4526_v5 = vadd.f32 %v4478_v58, %v4378_v19  ;;  %v4841_v58 = vld [vmem:[#allocation3 + $0x32] sm:$0xff] }
 0x65a   :  { %v4627_v43 = vpop.f32.mrf.mxu3 }
 0x65b   :  { %v12626_v21 = vadd.f32 %v4627_v43, %v4526_v5  ;;  %v4333_v37 = vpop.f32.mrf.mxu1 }
 0x65c   :  { %v4379_v27 = vadd.f32 %v4333_v37, %v4231_v53  ;;  %v4842_v53 = vld [vmem:[#allocation3 + $0x42] sm:$0xff] }
 0x65d   :  { %9008 = vmatmul.msk.f32.gmra.mxu2 %vm2585_vm2, %v4840_v26 }
 0x65e   :  { %8990 = vmatmul.msk.f32.gmra.mxu1 %vm2585_vm2, %v12629_v50 }
 0x65f   :  { %9026 = vmatmul.msk.f32.gmra.mxu3 %vm2585_vm2, %v12352_v7  ;;  %9184 = vmatmul.msk.f32.gmra.mxu0 %vm2585_vm2, %v6187_v10  ;;  %v12649_v5 = vpop.f32.mrf.mxu0 }
 0x660   :  { %v4481_v48 = vpop.f32.mrf.mxu2  ;;  %14720 = vst [vmem:[#allocation90_spill] sm:$0xff] %v12649_v5  ;;  %v9312_v5 = vld [vmem:[%s14241_s4 + $0x188] sm:$0xff] }
 0x661   :  { %v4527_v2 = vadd.f32 %v4481_v48, %v4379_v27  ;;  %7438 = vmatpush.msrb.mxu0 %v9312_v5 }
 0x662   :  { %v4630_v19 = vpop.f32.mrf.mxu3 }
 0x663   :  { %v12639_v0 = vadd.f32 %v4630_v19, %v4527_v2  ;;  %v4336_v28 = vpop.f32.mrf.mxu1 }
 0x664   :  { %v4380_v34 = vadd.f32 %v4336_v28, %v12366_v30 }
 0x665   :  { %9009 = vmatmul.msk.f32.gmra.mxu2 %vm2585_vm2, %v4841_v58  ;;  %v4843_v58 = vld [vmem:[#allocation3 + $0x52] sm:$0xff] }
 0x666   :  { %8991 = vmatmul.msk.f32.gmra.mxu1 %vm2585_vm2, %v12360_v61 }
 0x667   :  { %9027 = vmatmul.msk.f32.gmra.mxu3 %vm2585_vm2, %v12372_v32  ;;  %9241 = vmatmul.msk.f32.vlgmr.msra.gmra.mxu0 %vm2585_vm2, %v12378_v14  ;;  %v12661_v2 = vpop.f32.mrf.mxu0 }
 0x668   :  { %v4484_v7 = vpop.f32.mrf.mxu2  ;;  %14721 = vst [vmem:[#allocation44_spill] sm:$0xff] %v12661_v2  ;;  %v12809_v2 = vld [vmem:[#allocation3 + $0x121] sm:$0xff] }
 0x669   :  { %v4528_v43 = vadd.f32 %v4484_v7, %v4380_v34  ;;  %v9077_v34 = vld [vmem:[%s14241_s4 + $0xb0] sm:$0xff] }
 0x66a   :  { %v4633_v37 = vpop.f32.mrf.mxu3  ;;  %5513 = vmatpush.msrb.mxu3 %v9077_v34  ;;  %v4845_v34 = vld [vmem:[#allocation3 + $0x72] sm:$0xff] }
 0x66b   :  { %v12651_v26 = vadd.f32 %v4633_v37, %v4528_v43  ;;  %v4339_v10 = vpop.f32.mrf.mxu1 }
 0x66c   :  { %v4381_v30 = vadd.f32 %v4339_v10, %v12386_v35 }
 0x66d   :  { %9010 = vmatmul.msk.f32.gmra.mxu2 %vm2585_vm2, %v4842_v53  ;;  %v4844_v53 = vld [vmem:[#allocation3 + $0x62] sm:$0xff] }
 0x66e   :  { %8992 = vmatmul.msk.f32.gmra.mxu1 %vm2585_vm2, %v12380_v1 }
 0x66f   :  { %9028 = vmatmul.msk.f32.gmra.mxu3 %vm2585_vm2, %v12392_v23  ;;  %9242 = vmatmul.msk.f32.gmra.mxu0 %vm2585_vm2, %v12398_v60  ;;  %v9059_v23 = vld [vmem:[%s14241_s4 + $0xa0] sm:$0xff] }
 0x670   :  { %v4487_v32 = vpop.f32.mrf.mxu2  ;;  %5365 = vmatpush.msrb.mxu2 %v9059_v23 }
 0x671   :  { %v4529_v27 = vadd.f32 %v4487_v32, %v4381_v30  ;;  %v12684_v30 = vpop.f32.mrf.mxu0  ;;  %v12689_v32 = vld [vmem:[#allocation3 + $0x70] sm:$0xff] }
 0x672   :  { %v4636_v48 = vpop.f32.mrf.mxu3  ;;  %14722 = vst [vmem:[#allocation92_spill] sm:$0xff] %v12684_v30  ;;  %v12741_v30 = vld [vmem:[#allocation3 + $0xe1] sm:$0xff] }
 0x673   :  { %v12663_v19 = vadd.f32 %v4636_v48, %v4529_v27  ;;  %v4342_v28 = vpop.f32.mrf.mxu1 }
 0x674   :  { %v4382_v35 = vadd.f32 %v4342_v28, %v12412_v57 }
 0x675   :  { %9011 = vmatmul.msk.f32.gmra.mxu2 %vm2585_vm2, %v4843_v58 }
 0x676   :  { %8993 = vmatmul.msk.f32.gmra.mxu1 %vm2585_vm2, %v12400_v40 }
 0x677   :  { %9029 = vmatmul.msk.f32.gmra.mxu3 %vm2585_vm2, %v12421_v31  ;;  %9243 = vmatmul.msk.f32.gmra.mxu0 %vm2585_vm2, %v12427_v52  ;;  %v9041_v31 = vld [vmem:[%s14241_s4 + $0x90] sm:$0xff] }
 0x678   :  { %v4490_v7 = vpop.f32.mrf.mxu2  ;;  %5217 = vmatpush.msrb.mxu1 %v9041_v31 }
 0x679   :  { %v4530_v43 = vadd.f32 %v4490_v7, %v4382_v35  ;;  %v12698_v7 = vld [vmem:[#allocation3 + $0x71] sm:$0xff] }
 0x67a   :  { %v4639_v37 = vpop.f32.mrf.mxu3 }
 0x67b   :  { %v12679_v57 = vadd.f32 %v4639_v37, %v4530_v43  ;;  %v4345_v10 = vpop.f32.mrf.mxu1 }
 0x67c   :  { %v4383_v27 = vadd.f32 %v4345_v10, %v12435_v63  ;;  %v12703_v63 = vpop.f32.mrf.mxu0 }
 0x67d   :  { %9012 = vmatmul.msk.f32.gmra.mxu2 %vm2585_vm2, %v4844_v53  ;;  %14723 = vst [vmem:[#allocation89_spill] sm:$0xff] %v12703_v63  ;;  %v4848_v63 = vld [vmem:[#allocation3 + $0xe2] sm:$0xff] }
 0x67e   :  { %8994 = vmatmul.msk.f32.gmra.mxu1 %vm2585_vm2, %v12429_v46 }
 0x67f   :  { %9030 = vmatmul.msk.f32.gmra.mxu3 %vm2585_vm2, %v12441_v24  ;;  %9244 = vmatmul.msk.f32.gmra.mxu0 %vm2585_vm2, %v12689_v32 }
 0x680   :  { %v4493_v48 = vpop.f32.mrf.mxu2 }
 0x681   :  { %v4531_v28 = vadd.f32 %v4493_v48, %v4383_v27  ;;  %v4846_v27 = vld [vmem:[#allocation3 + $0x82] sm:$0xff] }
 0x682   :  { %v4642_v58 = vpop.f32.mrf.mxu3  ;;  %v12715_v48 = vld [vmem:[#allocation3 + $0x83] sm:$0xff] }
 0x683   :  { %v12696_v35 = vadd.f32 %v4642_v58, %v4531_v28  ;;  %v4348_v23 = vpop.f32.mrf.mxu1 }
 0x684   :  { %v4384_v24 = vadd.f32 %v4348_v23, %v12451_v54  ;;  %v12717_v54 = vld [vmem:[#allocation3 + $0x90] sm:$0xff]  ;;  %v12724_v58 = vpop.f32.mrf.mxu0 }
 0x685   :  { %9013 = vmatmul.msk.f32.gmra.mxu2 %vm2585_vm2, %v4845_v34  ;;  %14724 = vst [vmem:[#allocation84_spill] sm:$0xff] %v12724_v58 }
 0x686   :  { %8995 = vmatmul.msk.f32.gmra.mxu1 %vm2585_vm2, %v12698_v7 }
 0x687   :  { %9031 = vmatmul.msk.f32.gmra.mxu3 %vm2585_vm2, %v12455_v9  ;;  %9245 = vmatmul.msk.f32.gmra.mxu0 %vm2585_vm2, %v12461_v49 }
 0x688   :  { %v4496_v43 = vpop.f32.mrf.mxu2 }
 0x689   :  { %v4532_v37 = vadd.f32 %v4496_v43, %v4384_v24  ;;  %v4847_v24 = vld [vmem:[#allocation3 + $0xd2] sm:$0xff] }
 0x68a   :  { %v4645_v10 = vpop.f32.mrf.mxu3 }
 0x68b   :  { %v12710_v31 = vadd.f32 %v4645_v10, %v4532_v37  ;;  %v4351_v53 = vpop.f32.mrf.mxu1  ;;  %v4699_v10 = vld [vmem:[#allocation3 + $0xd1] sm:$0xff] }
 0x68c   :  { %v4385_v9 = vadd.f32 %v4351_v53, %v12471_v33 }
 0x68d   :  { %9014 = vmatmul.msk.f32.gmra.mxu2 %vm2585_vm2, %v4846_v27  ;;  %v12728_v27 = vld [vmem:[#allocation3 + $0xa0] sm:$0xff] }
 0x68e   :  { %8996 = vmatmul.msk.f32.gmra.mxu1 %vm2585_vm2, %v12463_v16 }
 0x68f   :  { %9032 = vmatmul.msk.f32.gmra.mxu3 %vm2585_vm2, %v12715_v48  ;;  %9246 = vmatmul.msk.f32.gmra.mxu0 %vm2585_vm2, %v12717_v54 }
 0x690   :  { %v4499_v28 = vpop.f32.mrf.mxu2 }
 0x691   :  { %v4533_v23 = vadd.f32 %v4499_v28, %v4385_v9 }
 0x692   :  { %v4648_v34 = vpop.f32.mrf.mxu3 }
 0x693   :  { %v12726_v43 = vadd.f32 %v4648_v34, %v4533_v23  ;;  %v4354_v37 = vpop.f32.mrf.mxu1  ;;  %v12737_v23 = vpop.f32.mrf.mxu0 }
 0x694   :  { %v4386_v33 = vadd.f32 %v4354_v37, %v12485_v39  ;;  %14725 = vst [vmem:[#allocation93_spill] sm:$0xff] %v12737_v23  ;;  %v12784_v23 = vld [vmem:[#allocation3 + $0x111] sm:$0xff] }
 0x695   :  { %9015 = vmatmul.msk.f32.gmra.mxu2 %vm2585_vm2, %v4847_v24  ;;  %v6772_v24 = vld [vmem:[#allocation3 + $0xb0] sm:$0xff] }
 0x696   :  { %8997 = vmatmul.msk.f32.gmra.mxu1 %vm2585_vm2, %v4699_v10 }
 0x697   :  { %9033 = vmatmul.msk.f32.gmra.mxu3 %vm2585_vm2, %v12487_v13  ;;  %9247 = vmatmul.msk.f32.gmra.mxu0 %vm2585_vm2, %v12728_v27 }
 0x698   :  { %v4502_v53 = vpop.f32.mrf.mxu2 }
 0x699   :  { %v4534_v9 = vadd.f32 %v4502_v53, %v4386_v33 }
 0x69a   :  { %v4651_v28 = vpop.f32.mrf.mxu3 }
 0x69b   :  { %v12739_v34 = vadd.f32 %v4651_v28, %v4534_v9  ;;  %v4357_v58 = vpop.f32.mrf.mxu1  ;;  %v4849_v9 = vld [vmem:[#allocation3 + $0xf2] sm:$0xff]  ;;  %v12752_v28 = vpop.f32.mrf.mxu0 }
 0x69c   :  { %v4387_v13 = vadd.f32 %v4357_v58, %v12498_v29  ;;  %14726 = vst [vmem:[#allocation87_spill] sm:$0xff] %v12752_v28  ;;  %v12759_v29 = vld [vmem:[#allocation3 + $0x100] sm:$0xff]  ;;  %v4851_v28 = vld [vmem:[#allocation3 + $0x112] sm:$0xff] }
 0x69d   :  { %9016 = vmatmul.msk.f32.gmra.mxu2 %vm2585_vm2, %v4848_v63  ;;  %v12754_v63 = vld [vmem:[#allocation3 + $0xf1] sm:$0xff] }
 0x69e   :  { %8998 = vmatmul.msk.f32.gmra.mxu1 %vm2585_vm2, %v12741_v30 }
 0x69f   :  { %9034 = vmatmul.msk.f32.gmra.mxu3 %vm2585_vm2, %v12502_v22  ;;  %9248 = vmatmul.msk.f32.gmra.mxu0 %vm2585_vm2, %v6772_v24 }
 0x6a0   :  { %v4505_v39 = vpop.f32.mrf.mxu2 }
 0x6a1   :  { %v4535_v37 = vadd.f32 %v4505_v39, %v4387_v13 }
 0x6a2   :  { %v4654_v10 = vpop.f32.mrf.mxu3 }
 0x6a3   :  { %v12750_v33 = vadd.f32 %v4654_v10, %v4535_v37  ;;  %v4360_v53 = vpop.f32.mrf.mxu1  ;;  %v4850_v10 = vld [vmem:[#allocation3 + $0x102] sm:$0xff] }
 0x6a4   :  { %v4388_v22 = vadd.f32 %v4360_v53, %v12512_v38  ;;  %v12773_v38 = vld [vmem:[#allocation3 + $0x110] sm:$0xff] }
 0x6a5   :  { %9017 = vmatmul.msk.f32.gmra.mxu2 %vm2585_vm2, %v4849_v9  ;;  %v12768_v9 = vld [vmem:[#allocation3 + $0x101] sm:$0xff] }
 0x6a6   :  { %8999 = vmatmul.msk.f32.gmra.mxu1 %vm2585_vm2, %v12754_v63 }
 0x6a7   :  { %9035 = vmatmul.msk.f32.gmra.mxu3 %vm2585_vm2, %v12518_v6  ;;  %9249 = vmatmul.msk.f32.gmra.mxu0 %vm2585_vm2, %v12759_v29  ;;  %v12775_v6 = vpop.f32.mrf.mxu0 }
 0x6a8   :  { %v4508_v58 = vpop.f32.mrf.mxu2  ;;  %14727 = vst [vmem:[#allocation45_spill] sm:$0xff] %v12775_v6  ;;  %v4852_v6 = vld [vmem:[#allocation3 + $0x122] sm:$0xff] }
 0x6a9   :  { %v4536_v24 = vadd.f32 %v4508_v58, %v4388_v22 }
 0x6aa   :  { %v4657_v13 = vpop.f32.mrf.mxu3 }
 0x6ab   :  { %v12766_v39 = vadd.f32 %v4657_v13, %v4536_v24  ;;  %v4363_v37 = vpop.f32.mrf.mxu1 }
 0x6ac   :  { %v4389_v53 = vadd.f32 %v4363_v37, %v12528_v51  ;;  %v12789_v51 = vld [vmem:[#allocation3 + $0x120] sm:$0xff]  ;;  %v9132_v37 = vld [vmem:[%s14241_s4 + $0xe8] sm:$0xff] }
 0x6ad   :  { %9018 = vmatmul.msk.f32.gmra.mxu2 %vm2585_vm2, %v4850_v10 }
 0x6ae   :  { %9000 = vmatmul.msk.f32.gmra.mxu1 %vm2585_vm2, %v12768_v9  ;;  %5956 = vmatpush.msra.mxu2 %v9132_v37  ;;  %v12814_v37 = vld [vmem:[#allocation3 + $0x130] sm:$0xff] }
 0x6af   :  { %9036 = vmatmul.msk.f32.gmra.mxu3 %vm2585_vm2, %v12532_v20  ;;  %9250 = vmatmul.msk.f32.gmra.mxu0 %vm2585_vm2, %v12773_v38 }
 0x6b0   :  { %v4511_v22 = vpop.f32.mrf.mxu2 }
 0x6b1   :  { %v4537_v58 = vadd.f32 %v4511_v22, %v4389_v53  ;;  %v12802_v22 = vpop.f32.mrf.mxu0 }
 0x6b2   :  { %v4660_v24 = vpop.f32.mrf.mxu3  ;;  %14728 = vst [vmem:[#allocation96_spill] sm:$0xff] %v12802_v22  ;;  %v4853_v22 = vld [vmem:[#allocation3 + $0x132] sm:$0xff] }
 0x6b3   :  { %v12782_v13 = vadd.f32 %v4660_v24, %v4537_v58  ;;  %v4366_v10 = vpop.f32.mrf.mxu1 }
 0x6b4   :  { %v4390_v20 = vadd.f32 %v4366_v10, %v12550_v42  ;;  %v9114_v10 = vld [vmem:[%s14241_s4 + $0xd8] sm:$0xff] }
 0x6b5   :  { %9019 = vmatmul.msk.f32.gmra.mxu2 %vm2585_vm2, %v4851_v28  ;;  %v9150_v28 = vld [vmem:[%s14241_s4 + $0xf8] sm:$0xff]  ;;  %5808 = vmatpush.msra.mxu1 %v9114_v10 }
 0x6b6   :  { %9001 = vmatmul.msk.f32.gmra.mxu1 %vm2585_vm2, %v12784_v23  ;;  %6105 = vmatpush.msra.mxu3 %v9150_v28 }
 0x6b7   :  { %9037 = vmatmul.msk.f32.gmra.mxu3 %vm2585_vm2, %v12557_v12  ;;  %9251 = vmatmul.msk.f32.gmra.mxu0 %vm2585_vm2, %v12789_v51 }
 0x6b8   :  { %v4514_v53 = vpop.f32.mrf.mxu2 }
 0x6b9   :  { %v4538_v42 = vadd.f32 %v4514_v53, %v4390_v20 }
 0x6ba   :  { %v4663_v58 = vpop.f32.mrf.mxu3 }
 0x6bb   :  { %v12804_v24 = vadd.f32 %v4663_v58, %v4538_v42  ;;  %v4369_v12 = vpop.f32.mrf.mxu1  ;;  %v12821_v58 = vpop.f32.mrf.mxu0 }
 0x6bc   :  { %v4391_v20 = vadd.f32 %v4369_v12, %v12569_v59  ;;  %v12828_v59 = vld [vmem:[#allocation3 + $0x131] sm:$0xff] }
 0x6bd   :  { %9020 = vmatmul.msk.f32.gmra.mxu2 %vm2585_vm2, %v4852_v6 }
 0x6be   :  { %9002 = vmatmul.msk.f32.gmra.mxu1 %vm2585_vm2, %v12809_v2 }
 0x6bf   :  { %9038 = vmatmul.msk.f32.gmra.mxu3 %vm2585_vm2, %v12576_v4  ;;  %9252 = vmatmul.msk.f32.gmra.mxu0 %vm2585_vm2, %v12814_v37  ;;  %v9311_v4 = vld [vmem:[%s14241_s4 + $0x180] sm:$0xff] }
 0x6c0   :  { %v4517_v28 = vpop.f32.mrf.mxu2  ;;  %7439 = vmatpush.msrb.mxu0 %v9311_v4 }
 0x6c1   :  { %v4539_v53 = vadd.f32 %v4517_v28, %v4391_v20 }
 0x6c2   :  { %v4666_v42 = vpop.f32.mrf.mxu3 }
 0x6c3   :  { %v12823_v10 = vadd.f32 %v4666_v42, %v4539_v53  ;;  %v4372_v6 = vpop.f32.mrf.mxu1  ;;  %v12843_v42 = vpop.f32.mrf.mxu0 }
 0x6c4   :  { %v4392_v12 = vadd.f32 %v4372_v6, %v12591_v17  ;;  %14729 = vst [vmem:[#allocation95_spill] sm:$0xff] %v12843_v42  ;;  %v12849_v17 = vld [vmem:[#allocation3 + $0x143] sm:$0xff] }
 0x6c5   :  { %9021 = vmatmul.msk.f32.gmra.mxu2 %vm2585_vm2, %v4853_v22 }
 0x6c6   :  { %9003 = vmatmul.msk.f32.gmra.mxu1 %vm2585_vm2, %v12828_v59 }
 0x6c7   :  { %9039 = vmatmul.msk.f32.gmra.mxu3 %vm2585_vm2, %v12595_v15  ;;  %9253 = vmatmul.msk.f32.gmra.mxu0 %vm2585_vm2, %v12601_v55  ;;  %v12851_v15 = vld [vmem:[#allocation3 + $0x150] sm:$0xff] }
 0x6c8   :  { %v4520_v20 = vpop.f32.mrf.mxu2 }
 0x6c9   :  { %v4540_v28 = vadd.f32 %v4520_v20, %v4392_v12 }
 0x6ca   :  { %v4669_v22 = vpop.f32.mrf.mxu3 }
 0x6cb   :  { %v12841_v5 = vadd.f32 %v4669_v22, %v4540_v28  ;;  %v4375_v53 = vpop.f32.mrf.mxu1  ;;  %v12860_v22 = vld [vmem:[#allocation3 + $0x160] sm:$0xff] }
 0x6cc   :  { %v4393_v6 = vadd.f32 %v4375_v53, %v12611_v18  ;;  %v12866_v18 = vpop.f32.mrf.mxu0 }
 0x6cd   :  { %9022 = vmatmul.msk.f32.gmra.mxu2 %vm2585_vm2, %v12318_v62  ;;  %14730 = vst [vmem:[#allocation91_spill] sm:$0xff] %v12866_v18 }
 0x6ce   :  { %9004 = vmatmul.msk.f32.gmra.mxu1 %vm2585_vm2, %v12603_v41 }
 0x6cf   :  { %9040 = vmatmul.msk.f32.gmra.mxu3 %vm2585_vm2, %v12849_v17  ;;  %9254 = vmatmul.msk.f32.gmra.mxu0 %vm2585_vm2, %v12851_v15 }
 0x6d0   :  { %v4523_v4 = vpop.f32.mrf.mxu2 }
 0x6d1   :  { %v4541_v12 = vadd.f32 %v4523_v4, %v4393_v6 }
 0x6d2   :  { %v4672_v20 = vpop.f32.mrf.mxu3 }
 0x6d3   :  { %v12858_v28 = vadd.f32 %v4672_v20, %v4541_v12  ;;  %v4775_v62 = vpop.f32.mrf.mxu1 }
 0x6d4   :  { %v4823_v53 = vadd.f32 %v4775_v62, %v12626_v21 }
 0x6d5   :  { %9061 = vmatmul.msk.f32.vlgmr.msrb.gmra.mxu2 %vm2585_vm2, %v12339_v36  ;;  %v6780_v36 = vld [vmem:[#allocation3 + $0x170] sm:$0xff] }
 0x6d6   :  { %9043 = vmatmul.msk.f32.vlgmr.msrb.gmra.mxu1 %vm2585_vm2, %v12331_v11 }
 0x6d7   :  { %9079 = vmatmul.msk.f32.vlgmr.msrb.gmra.mxu3 %vm2585_vm2, %v12629_v50  ;;  %9255 = vmatmul.msk.f32.gmra.mxu0 %vm2585_vm2, %v12860_v22  ;;  %v12883_v50 = vpop.f32.mrf.mxu0 }
 0x6d8   :  { %v4923_v6 = vpop.f32.mrf.mxu2  ;;  %14731 = vst [vmem:[#allocation46_spill] sm:$0xff] %v12883_v50 }
 0x6d9   :  { %v4971_v4 = vadd.f32 %v4923_v6, %v4823_v53 }
 0x6da   :  { %v5071_v12 = vpop.f32.mrf.mxu3 }
 0x6db   :  { %v12873_v20 = vadd.f32 %v5071_v12, %v4971_v4  ;;  %v4778_v42 = vpop.f32.mrf.mxu1 }
 0x6dc   :  { %v4824_v11 = vadd.f32 %v4778_v42, %v12639_v0 }
 0x6dd   :  { %9062 = vmatmul.msk.f32.gmra.mxu2 %vm2585_vm2, %v12358_v56 }
 0x6de   :  { %9044 = vmatmul.msk.f32.gmra.mxu1 %vm2585_vm2, %v12350_v45 }
 0x6df   :  { %9080 = vmatmul.msk.f32.gmra.mxu3 %vm2585_vm2, %v12360_v61  ;;  %9256 = vmatmul.msk.f32.gmra.mxu0 %vm2585_vm2, %v6780_v36  ;;  %v12896_v42 = vpop.f32.mrf.mxu0 }
 0x6e0   :  { %v4926_v21 = vpop.f32.mrf.mxu2  ;;  %14732 = vst [vmem:[#allocation94_spill] sm:$0xff] %v12896_v42 }
 0x6e1   :  { %v4972_v62 = vadd.f32 %v4926_v21, %v4824_v11 }
 0x6e2   :  { %v5074_v53 = vpop.f32.mrf.mxu3 }
 0x6e3   :  { %v12885_v6 = vadd.f32 %v5074_v53, %v4972_v62  ;;  %v4781_v4 = vpop.f32.mrf.mxu1 }
 0x6e4   :  { %v4825_v45 = vadd.f32 %v4781_v4, %v12651_v26 }
 0x6e5   :  { %9063 = vmatmul.msk.f32.gmra.mxu2 %vm2585_vm2, %v12378_v14  ;;  %v14733_v14 = vld [vmem:[#allocation39_spill] sm:$0xff] }
 0x6e6   :  { %9045 = vmatmul.msk.f32.gmra.mxu1 %vm2585_vm2, %v12370_v25 }
 0x6e7   :  { %9081 = vmatmul.msk.f32.gmra.mxu3 %vm2585_vm2, %v12380_v1  ;;  %9313 = vmatmul.msk.f32.vlgmr.msrb.gmra.mxu0 %vm2585_vm2, %v12390_v44  ;;  %v12911_v53 = vpop.f32.mrf.mxu0 }
 0x6e8   :  { %v4929_v56 = vpop.f32.mrf.mxu2  ;;  %14734 = vst [vmem:[#allocation47_spill] sm:$0xff] %v12911_v53  ;;  %v13135_v53 = vld [vmem:[#allocation3 + $0x63] sm:$0xff] }
 0x6e9   :  { %v4973_v61 = vadd.f32 %v4929_v56, %v4825_v45 }
 0x6ea   :  { %v5077_v0 = vpop.f32.mrf.mxu3 }
 0x6eb   :  { %v12898_v12 = vadd.f32 %v5077_v0, %v4973_v61  ;;  %v4784_v36 = vpop.f32.mrf.mxu1 }
 0x6ec   :  { %v4826_v25 = vadd.f32 %v4784_v36, %v12663_v19  ;;  %v9149_v19 = vld [vmem:[%s14241_s4 + $0xf0] sm:$0xff] }
 0x6ed   :  { %9064 = vmatmul.msk.f32.gmra.mxu2 %vm2585_vm2, %v12398_v60  ;;  %v14735_v60 = vld [vmem:[#allocation74_spill] sm:$0xff]  ;;  %6106 = vmatpush.msra.mxu3 %v9149_v19  ;;  %v14736_v36 = vld [vmem:[#allocation77_spill] sm:$0xff] }
 0x6ee   :  { %9046 = vmatmul.msk.f32.gmra.mxu1 %vm2585_vm2, %v12390_v44 }
 0x6ef   :  { %9082 = vmatmul.msk.f32.gmra.mxu3 %vm2585_vm2, %v12400_v40  ;;  %9314 = vmatmul.msk.f32.gmra.mxu0 %vm2585_vm2, %v14733_v14  ;;  %v9131_v40 = vld [vmem:[%s14241_s4 + $0xe0] sm:$0xff]  ;;  %v12937_v61 = vpop.f32.mrf.mxu0 }
 0x6f0   :  { %v4932_v1 = vpop.f32.mrf.mxu2  ;;  %5957 = vmatpush.msra.mxu2 %v9131_v40 }
 0x6f1   :  { %v4974_v26 = vadd.f32 %v4932_v1, %v4826_v25 }
 0x6f2   :  { %v5080_v11 = vpop.f32.mrf.mxu3 }
 0x6f3   :  { %v12909_v21 = vadd.f32 %v5080_v11, %v4974_v26  ;;  %v4787_v62 = vpop.f32.mrf.mxu1 }
 0x6f4   :  { %v4827_v44 = vadd.f32 %v4787_v62, %v12679_v57  ;;  %v12950_v62 = vld [vmem:[#allocation3 + $0x84] sm:$0xff] }
 0x6f5   :  { %9065 = vmatmul.msk.f32.gmra.mxu2 %vm2585_vm2, %v12427_v52 }
 0x6f6   :  { %9047 = vmatmul.msk.f32.gmra.mxu1 %vm2585_vm2, %v14733_v14 }
 0x6f7   :  { %9083 = vmatmul.msk.f32.gmra.mxu3 %vm2585_vm2, %v12429_v46  ;;  %9315 = vmatmul.msk.f32.gmra.mxu0 %vm2585_vm2, %v14735_v60  ;;  %v9113_v46 = vld [vmem:[%s14241_s4 + $0xd0] sm:$0xff] }
 0x6f8   :  { %v4935_v52 = vpop.f32.mrf.mxu2  ;;  %5809 = vmatpush.msra.mxu1 %v9113_v46 }
 0x6f9   :  { %v4975_v4 = vadd.f32 %v4935_v52, %v4827_v44  ;;  %v12957_v44 = vpop.f32.mrf.mxu0  ;;  %v14737_v52 = vld [vmem:[#allocation40_spill] sm:$0xff] }
 0x6fa   :  { %v5083_v45 = vpop.f32.mrf.mxu3 }
 0x6fb   :  { %v12928_v57 = vadd.f32 %v5083_v45, %v4975_v4  ;;  %v4790_v56 = vpop.f32.mrf.mxu1 }
 0x6fc   :  { %v4828_v0 = vadd.f32 %v4790_v56, %v12696_v35 }
 0x6fd   :  { %9066 = vmatmul.msk.f32.gmra.mxu2 %vm2585_vm2, %v12689_v32 }
 0x6fe   :  { %9048 = vmatmul.msk.f32.gmra.mxu1 %vm2585_vm2, %v14735_v60 }
 0x6ff   :  { %9084 = vmatmul.msk.f32.gmra.mxu3 %vm2585_vm2, %v12698_v7  ;;  %9316 = vmatmul.msk.f32.gmra.mxu0 %vm2585_vm2, %v14736_v36 }
 0x700   :  { %v4938_v25 = vpop.f32.mrf.mxu2 }
 0x701   :  { %v4976_v14 = vadd.f32 %v4938_v25, %v4828_v0  ;;  %v12972_v46 = vpop.f32.mrf.mxu0  ;;  %v5291_v25 = vld [vmem:[#allocation3 + $0xe0] sm:$0xff] }
 0x702   :  { %v5086_v1 = vpop.f32.mrf.mxu3 }
 0x703   :  { %v12944_v26 = vadd.f32 %v5086_v1, %v4976_v14  ;;  %v4793_v11 = vpop.f32.mrf.mxu1  ;;  %v12976_v14 = vld [vmem:[#allocation3 + $0xa4] sm:$0xff] }
 0x704   :  { %v4829_v35 = vadd.f32 %v4793_v11, %v12710_v31  ;;  %v12965_v31 = vld [vmem:[#allocation3 + $0x94] sm:$0xff] }
 0x705   :  { %9067 = vmatmul.msk.f32.gmra.mxu2 %vm2585_vm2, %v12461_v49 }
 0x706   :  { %9049 = vmatmul.msk.f32.gmra.mxu1 %vm2585_vm2, %v14736_v36 }
 0x707   :  { %9085 = vmatmul.msk.f32.gmra.mxu3 %vm2585_vm2, %v12463_v16  ;;  %9317 = vmatmul.msk.f32.gmra.mxu0 %vm2585_vm2, %v12950_v62 }
 0x708   :  { %v4941_v7 = vpop.f32.mrf.mxu2 }
 0x709   :  { %v4977_v60 = vadd.f32 %v4941_v7, %v4829_v35 }
 0x70a   :  { %v5089_v40 = vpop.f32.mrf.mxu3 }
 0x70b   :  { %v12959_v19 = vadd.f32 %v5089_v40, %v4977_v60  ;;  %v4796_v49 = vpop.f32.mrf.mxu1 }
 0x70c   :  { %v4830_v16 = vadd.f32 %v4796_v49, %v12726_v43  ;;  %v14738_v43 = vld [vmem:[#allocation82_spill] sm:$0xff]  ;;  %v12988_v49 = vld [vmem:[#allocation3 + $0xf0] sm:$0xff] }
 0x70d   :  { %9068 = vmatmul.msk.f32.gmra.mxu2 %vm2585_vm2, %v12717_v54 }
 0x70e   :  { %9050 = vmatmul.msk.f32.gmra.mxu1 %vm2585_vm2, %v12950_v62 }
 0x70f   :  { %9086 = vmatmul.msk.f32.gmra.mxu3 %vm2585_vm2, %v14737_v52  ;;  %9318 = vmatmul.msk.f32.gmra.mxu0 %vm2585_vm2, %v12965_v31  ;;  %v12990_v52 = vpop.f32.mrf.mxu0 }
 0x710   :  { %v4944_v4 = vpop.f32.mrf.mxu2 }
 0x711   :  { %v4978_v45 = vadd.f32 %v4944_v4, %v4830_v16  ;;  %v7364_v16 = vld [vmem:[#allocation3 + $0xb4] sm:$0xff] }
 0x712   :  { %v5092_v56 = vpop.f32.mrf.mxu3 }
 0x713   :  { %v12974_v0 = vadd.f32 %v5092_v56, %v4978_v45  ;;  %v4799_v36 = vpop.f32.mrf.mxu1 }
 0x714   :  { %v4831_v1 = vadd.f32 %v4799_v36, %v12739_v34  ;;  %v14739_v34 = vld [vmem:[#allocation41_spill] sm:$0xff] }
 0x715   :  { %9069 = vmatmul.msk.f32.gmra.mxu2 %vm2585_vm2, %v5291_v25 }
 0x716   :  { %9051 = vmatmul.msk.f32.gmra.mxu1 %vm2585_vm2, %v14738_v43  ;;  %v14740_v43 = vld [vmem:[#allocation80_spill] sm:$0xff] }
 0x717   :  { %9087 = vmatmul.msk.f32.gmra.mxu3 %vm2585_vm2, %v12741_v30  ;;  %9319 = vmatmul.msk.f32.gmra.mxu0 %vm2585_vm2, %v12976_v14 }
 0x718   :  { %v4947_v11 = vpop.f32.mrf.mxu2 }
 0x719   :  { %v4979_v35 = vadd.f32 %v4947_v11, %v4831_v1  ;;  %v13006_v1 = vpop.f32.mrf.mxu0 }
 0x71a   :  { %v5095_v7 = vpop.f32.mrf.mxu3 }
 0x71b   :  { %v12986_v60 = vadd.f32 %v5095_v7, %v4979_v35  ;;  %v4802_v40 = vpop.f32.mrf.mxu1 }
 0x71c   :  { %v4832_v30 = vadd.f32 %v4802_v40, %v12750_v33 }
 0x71d   :  { %9070 = vmatmul.msk.f32.gmra.mxu2 %vm2585_vm2, %v12988_v49 }
 0x71e   :  { %9052 = vmatmul.msk.f32.gmra.mxu1 %vm2585_vm2, %v14739_v34 }
 0x71f   :  { %9088 = vmatmul.msk.f32.gmra.mxu3 %vm2585_vm2, %v12754_v63  ;;  %9320 = vmatmul.msk.f32.gmra.mxu0 %vm2585_vm2, %v7364_v16  ;;  %v14741_v63 = vld [vmem:[#allocation42_spill] sm:$0xff] }
 0x720   :  { %v4950_v4 = vpop.f32.mrf.mxu2 }
 0x721   :  { %v4980_v45 = vadd.f32 %v4950_v4, %v4832_v30  ;;  %v13024_v30 = vpop.f32.mrf.mxu0 }
 0x722   :  { %v5098_v56 = vpop.f32.mrf.mxu3 }
 0x723   :  { %v13000_v36 = vadd.f32 %v5098_v56, %v4980_v45  ;;  %v4805_v25 = vpop.f32.mrf.mxu1 }
 0x724   :  { %v4833_v33 = vadd.f32 %v4805_v25, %v12766_v39 }
 0x725   :  { %9071 = vmatmul.msk.f32.gmra.mxu2 %vm2585_vm2, %v12759_v29 }
 0x726   :  { %9053 = vmatmul.msk.f32.gmra.mxu1 %vm2585_vm2, %v14740_v43  ;;  %v9204_v43 = vld [vmem:[%s14241_s4 + $0x128] sm:$0xff] }
 0x727   :  { %9089 = vmatmul.msk.f32.gmra.mxu3 %vm2585_vm2, %v12768_v9  ;;  %9321 = vmatmul.msk.f32.gmra.mxu0 %vm2585_vm2, %v14741_v63  ;;  %v14742_v9 = vld [vmem:[#allocation83_spill] sm:$0xff] }
 0x728   :  { %v4953_v11 = vpop.f32.mrf.mxu2  ;;  %6549 = vmatpush.msrb.mxu2 %v9204_v43 }
 0x729   :  { %v4981_v35 = vadd.f32 %v4953_v11, %v4833_v33  ;;  %v9222_v33 = vld [vmem:[%s14241_s4 + $0x138] sm:$0xff] }
 0x72a   :  { %v5101_v7 = vpop.f32.mrf.mxu3  ;;  %6697 = vmatpush.msrb.mxu3 %v9222_v33 }
 0x72b   :  { %v13013_v40 = vadd.f32 %v5101_v7, %v4981_v35  ;;  %v4808_v16 = vpop.f32.mrf.mxu1 }
 0x72c   :  { %v4834_v39 = vadd.f32 %v4808_v16, %v12782_v13  ;;  %v9186_v16 = vld [vmem:[%s14241_s4 + $0x118] sm:$0xff] }
 0x72d   :  { %9072 = vmatmul.msk.f32.gmra.mxu2 %vm2585_vm2, %v12773_v38  ;;  %6401 = vmatpush.msrb.mxu1 %v9186_v16 }
 0x72e   :  { %9054 = vmatmul.msk.f32.gmra.mxu1 %vm2585_vm2, %v14741_v63 }
 0x72f   :  { %9090 = vmatmul.msk.f32.gmra.mxu3 %vm2585_vm2, %v12784_v23  ;;  %9322 = vmatmul.msk.f32.gmra.mxu0 %vm2585_vm2, %v14742_v9  ;;  %v14743_v23 = vld [vmem:[#allocation88_spill] sm:$0xff] }
 0x730   :  { %v4956_v34 = vpop.f32.mrf.mxu2 }
 0x731   :  { %v4982_v4 = vadd.f32 %v4956_v34, %v4834_v39 }
 0x732   :  { %v5104_v45 = vpop.f32.mrf.mxu3 }
 0x733   :  { %v13026_v56 = vadd.f32 %v5104_v45, %v4982_v4  ;;  %v4811_v25 = vpop.f32.mrf.mxu1 }
 0x734   :  { %v4835_v13 = vadd.f32 %v4811_v25, %v12804_v24  ;;  %v13043_v24 = vpop.f32.mrf.mxu0 }
 0x735   :  { %9073 = vmatmul.msk.f32.gmra.mxu2 %vm2585_vm2, %v12789_v51  ;;  %14744 = vst [vmem:[#allocation48_spill] sm:$0xff] %v13043_v24 }
 0x736   :  { %9055 = vmatmul.msk.f32.gmra.mxu1 %vm2585_vm2, %v14742_v9  ;;  %v14745_v9 = vld [vmem:[#allocation86_spill] sm:$0xff] }
 0x737   :  { %9091 = vmatmul.msk.f32.gmra.mxu3 %vm2585_vm2, %v12809_v2  ;;  %9323 = vmatmul.msk.f32.gmra.mxu0 %vm2585_vm2, %v14743_v23 }
 0x738   :  { %v4959_v63 = vpop.f32.mrf.mxu2 }
 0x739   :  { %v4983_v11 = vadd.f32 %v4959_v63, %v4835_v13 }
 0x73a   :  { %v5107_v35 = vpop.f32.mrf.mxu3 }
 0x73b   :  { %v13045_v7 = vadd.f32 %v5107_v35, %v4983_v11  ;;  %v4814_v2 = vpop.f32.mrf.mxu1 }
 0x73c   :  { %v4836_v39 = vadd.f32 %v4814_v2, %v12823_v10  ;;  %v13061_v43 = vpop.f32.mrf.mxu0  ;;  %v13067_v10 = vld [vmem:[#allocation3 + $0x144] sm:$0xff] }
 0x73d   :  { %9074 = vmatmul.msk.f32.gmra.mxu2 %vm2585_vm2, %v12814_v37  ;;  %14746 = vst [vmem:[#allocation97_spill] sm:$0xff] %v13061_v43 }
 0x73e   :  { %9056 = vmatmul.msk.f32.gmra.mxu1 %vm2585_vm2, %v14743_v23 }
 0x73f   :  { %9092 = vmatmul.msk.f32.gmra.mxu3 %vm2585_vm2, %v12828_v59  ;;  %9324 = vmatmul.msk.f32.gmra.mxu0 %vm2585_vm2, %v14745_v9 }
 0x740   :  { %v4962_v34 = vpop.f32.mrf.mxu2 }
 0x741   :  { %v4984_v4 = vadd.f32 %v4962_v34, %v4836_v39 }
 0x742   :  { %v5110_v45 = vpop.f32.mrf.mxu3 }
 0x743   :  { %v13059_v25 = vadd.f32 %v5110_v45, %v4984_v4  ;;  %v4817_v13 = vpop.f32.mrf.mxu1  ;;  %v5875_v4 = vld [vmem:[#allocation3 + $0x24] sm:$0xff] }
 0x744   :  { %v4837_v59 = vadd.f32 %v4817_v13, %v12841_v5  ;;  %v13082_v5 = vpop.f32.mrf.mxu0  ;;  %v5727_v45 = vld [vmem:[#allocation3 + $0x23] sm:$0xff]  ;;  %v6024_v13 = vld [vmem:[#allocation3 + $0x30] sm:$0xff] }
 0x745   :  { %9075 = vmatmul.msk.f32.gmra.mxu2 %vm2585_vm2, %v12601_v55  ;;  %v13080_v55 = vld [vmem:[#allocation3 + $0x154] sm:$0xff]  ;;  %14747 = vst [vmem:[#allocation49_spill] sm:$0xff] %v13082_v5 }
 0x746   :  { %9057 = vmatmul.msk.f32.gmra.mxu1 %vm2585_vm2, %v14745_v9 }
 0x747   :  { %9093 = vmatmul.msk.f32.gmra.mxu3 %vm2585_vm2, %v12603_v41  ;;  %9325 = vmatmul.msk.f32.gmra.mxu0 %vm2585_vm2, %v13067_v10 }
 0x748   :  { %v4965_v23 = vpop.f32.mrf.mxu2 }
 0x749   :  { %v4985_v33 = vadd.f32 %v4965_v23, %v4837_v59 }
 0x74a   :  { %v5113_v63 = vpop.f32.mrf.mxu3 }
 0x74b   :  { %v13074_v11 = vadd.f32 %v5113_v63, %v4985_v33  ;;  %v4820_v35 = vpop.f32.mrf.mxu1 }
 0x74c   :  { %v4838_v41 = vadd.f32 %v4820_v35, %v12858_v28  ;;  %v13097_v35 = vld [vmem:[#allocation3 + $0x34] sm:$0xff] }
 0x74d   :  { %9076 = vmatmul.msk.f32.gmra.mxu2 %vm2585_vm2, %v12851_v15 }
 0x74e   :  { %9058 = vmatmul.msk.f32.gmra.mxu1 %vm2585_vm2, %v13067_v10 }
 0x74f   :  { %9094 = vmatmul.msk.f32.gmra.mxu3 %vm2585_vm2, %v12618_v3  ;;  %9326 = vmatmul.msk.f32.gmra.mxu0 %vm2585_vm2, %v13080_v55 }
 0x750   :  { %v4968_v2 = vpop.f32.mrf.mxu2 }
 0x751   :  { %v4986_v16 = vadd.f32 %v4968_v2, %v4838_v41  ;;  %v13099_v41 = vld [vmem:[#allocation3 + $0x33] sm:$0xff]  ;;  %v6025_v2 = vld [vmem:[#allocation3 + $0x40] sm:$0xff] }
 0x752   :  { %v5116_v39 = vpop.f32.mrf.mxu3 }
 0x753   :  { %v13089_v9 = vadd.f32 %v5116_v39, %v4986_v16  ;;  %v5219_v34 = vpop.f32.mrf.mxu1 }
 0x754   :  { %v5267_v28 = vadd.f32 %v5219_v34, %v12873_v20 }
 0x755   :  { %9133 = vmatmul.msk.f32.vlgmr.msra.gmra.mxu2 %vm2585_vm2, %v5875_v4 }
 0x756   :  { %9115 = vmatmul.msk.f32.vlgmr.msra.gmra.mxu1 %vm2585_vm2, %v5727_v45 }
 0x757   :  { %9151 = vmatmul.msk.f32.vlgmr.msra.gmra.mxu3 %vm2585_vm2, %v6024_v13  ;;  %v13109_v13 = vld [vmem:[#allocation3 + $0x44] sm:$0xff] }
 0x758   :  { %v5367_v3 = vpop.f32.mrf.mxu2 }
 0x759   :  { %v5415_v59 = vadd.f32 %v5367_v3, %v5267_v28  ;;  %v13111_v28 = vld [vmem:[#allocation3 + $0x43] sm:$0xff]  ;;  %v6026_v3 = vld [vmem:[#allocation3 + $0x50] sm:$0xff] }
 0x75a   :  { %v5515_v23 = vpop.f32.mrf.mxu3 }
 0x75b   :  { %v13095_v33 = vadd.f32 %v5515_v23, %v5415_v59  ;;  %v5222_v63 = vpop.f32.mrf.mxu1 }
 0x75c   :  { %v5268_v20 = vadd.f32 %v5222_v63, %v12885_v6 }
 0x75d   :  { %9134 = vmatmul.msk.f32.gmra.mxu2 %vm2585_vm2, %v13097_v35 }
 0x75e   :  { %9116 = vmatmul.msk.f32.gmra.mxu1 %vm2585_vm2, %v13099_v41 }
 0x75f   :  { %9152 = vmatmul.msk.f32.gmra.mxu3 %vm2585_vm2, %v6025_v2 }
 0x760   :  { %v5370_v16 = vpop.f32.mrf.mxu2 }
 0x761   :  { %v5416_v39 = vadd.f32 %v5370_v16, %v5268_v20  ;;  %v13121_v16 = vld [vmem:[#allocation3 + $0x54] sm:$0xff] }
 0x762   :  { %v5518_v34 = vpop.f32.mrf.mxu3 }
 0x763   :  { %v13107_v4 = vadd.f32 %v5518_v34, %v5416_v39  ;;  %v5225_v45 = vpop.f32.mrf.mxu1  ;;  %v13123_v39 = vld [vmem:[#allocation3 + $0x53] sm:$0xff]  ;;  %v6027_v34 = vld [vmem:[#allocation3 + $0x60] sm:$0xff] }
 0x764   :  { %v5269_v6 = vadd.f32 %v5225_v45, %v12898_v12 }
 0x765   :  { %9135 = vmatmul.msk.f32.gmra.mxu2 %vm2585_vm2, %v13109_v13 }
 0x766   :  { %9117 = vmatmul.msk.f32.gmra.mxu1 %vm2585_vm2, %v13111_v28 }
 0x767   :  { %9153 = vmatmul.msk.f32.gmra.mxu3 %vm2585_vm2, %v6026_v3 }
 0x768   :  { %v5373_v59 = vpop.f32.mrf.mxu2 }
 0x769   :  { %v5417_v23 = vadd.f32 %v5373_v59, %v5269_v6 }
 0x76a   :  { %v5521_v63 = vpop.f32.mrf.mxu3 }
 0x76b   :  { %v13119_v2 = vadd.f32 %v5521_v63, %v5417_v23  ;;  %v5228_v20 = vpop.f32.mrf.mxu1  ;;  %v13133_v63 = vld [vmem:[#allocation3 + $0x64] sm:$0xff] }
 0x76c   :  { %v5270_v12 = vadd.f32 %v5228_v20, %v12909_v21  ;;  %v9203_v20 = vld [vmem:[%s14241_s4 + $0x120] sm:$0xff] }
 0x76d   :  { %9136 = vmatmul.msk.f32.gmra.mxu2 %vm2585_vm2, %v13121_v16 }
 0x76e   :  { %9118 = vmatmul.msk.f32.gmra.mxu1 %vm2585_vm2, %v13123_v39  ;;  %6550 = vmatpush.msrb.mxu2 %v9203_v20 }
 0x76f   :  { %9154 = vmatmul.msk.f32.gmra.mxu3 %vm2585_vm2, %v6027_v34  ;;  %v9221_v34 = vld [vmem:[%s14241_s4 + $0x130] sm:$0xff] }
 0x770   :  { %v5376_v45 = vpop.f32.mrf.mxu2  ;;  %6698 = vmatpush.msrb.mxu3 %v9221_v34 }
 0x771   :  { %v5418_v3 = vadd.f32 %v5376_v45, %v5270_v12 }
 0x772   :  { %v5524_v6 = vpop.f32.mrf.mxu3 }
 0x773   :  { %v13131_v59 = vadd.f32 %v5524_v6, %v5418_v3  ;;  %v5231_v23 = vpop.f32.mrf.mxu1 }
 0x774   :  { %v5271_v21 = vadd.f32 %v5231_v23, %v12928_v57  ;;  %v13155_v57 = vld [vmem:[#allocation3 + $0x74] sm:$0xff] }
 0x775   :  { %9137 = vmatmul.msk.f32.gmra.mxu2 %vm2585_vm2, %v13133_v63  ;;  %v13157_v23 = vld [vmem:[#allocation3 + $0x73] sm:$0xff] }
 0x776   :  { %9119 = vmatmul.msk.f32.gmra.mxu1 %vm2585_vm2, %v13135_v53 }
 0x777   :  { %9155 = vmatmul.msk.f32.gmra.mxu3 %vm2585_vm2, %v12689_v32  ;;  %v9185_v32 = vld [vmem:[%s14241_s4 + $0x110] sm:$0xff] }
 0x778   :  { %v5379_v12 = vpop.f32.mrf.mxu2  ;;  %6402 = vmatpush.msrb.mxu1 %v9185_v32 }
 0x779   :  { %v5419_v45 = vadd.f32 %v5379_v12, %v5271_v21  ;;  %v6029_v21 = vld [vmem:[#allocation3 + $0x80] sm:$0xff] }
 0x77a   :  { %v5527_v3 = vpop.f32.mrf.mxu3 }
 0x77b   :  { %v13150_v6 = vadd.f32 %v5527_v3, %v5419_v45  ;;  %v5234_v42 = vpop.f32.mrf.mxu1 }
 0x77c   :  { %v5272_v20 = vadd.f32 %v5234_v42, %v12944_v26 }
 0x77d   :  { %9138 = vmatmul.msk.f32.gmra.mxu2 %vm2585_vm2, %v13155_v57 }
 0x77e   :  { %9120 = vmatmul.msk.f32.gmra.mxu1 %vm2585_vm2, %v13157_v23 }
 0x77f   :  { %9156 = vmatmul.msk.f32.gmra.mxu3 %vm2585_vm2, %v6029_v21 }
 0x780   :  { %v5382_v34 = vpop.f32.mrf.mxu2 }
 0x781   :  { %v5420_v12 = vadd.f32 %v5382_v34, %v5272_v20  ;;  %v13176_v34 = vld [vmem:[#allocation3 + $0x93] sm:$0xff] }
 0x782   :  { %v5530_v45 = vpop.f32.mrf.mxu3 }
 0x783   :  { %v13165_v3 = vadd.f32 %v5530_v45, %v5420_v12  ;;  %v5237_v5 = vpop.f32.mrf.mxu1 }
 0x784   :  { %v5273_v32 = vadd.f32 %v5237_v5, %v12959_v19 }
 0x785   :  { %9139 = vmatmul.msk.f32.gmra.mxu2 %vm2585_vm2, %v12950_v62 }
 0x786   :  { %9121 = vmatmul.msk.f32.gmra.mxu1 %vm2585_vm2, %v12715_v48 }
 0x787   :  { %9157 = vmatmul.msk.f32.gmra.mxu3 %vm2585_vm2, %v12717_v54 }
 0x788   :  { %v5385_v42 = vpop.f32.mrf.mxu2 }
 0x789   :  { %v5421_v26 = vadd.f32 %v5385_v42, %v5273_v32  ;;  %v5883_v32 = vld [vmem:[#allocation3 + $0xe4] sm:$0xff] }
 0x78a   :  { %v5533_v21 = vpop.f32.mrf.mxu3  ;;  %v5735_v42 = vld [vmem:[#allocation3 + $0xe3] sm:$0xff] }
 0x78b   :  { %v13174_v50 = vadd.f32 %v5533_v21, %v5421_v26  ;;  %v5240_v20 = vpop.f32.mrf.mxu1 }
 0x78c   :  { %v5274_v48 = vadd.f32 %v5240_v20, %v12974_v0 }
 0x78d   :  { %9140 = vmatmul.msk.f32.gmra.mxu2 %vm2585_vm2, %v12965_v31 }
 0x78e   :  { %9122 = vmatmul.msk.f32.gmra.mxu1 %vm2585_vm2, %v13176_v34 }
 0x78f   :  { %9158 = vmatmul.msk.f32.gmra.mxu3 %vm2585_vm2, %v12728_v27 }
 0x790   :  { %v5388_v54 = vpop.f32.mrf.mxu2 }
 0x791   :  { %v5422_v19 = vadd.f32 %v5388_v54, %v5274_v48  ;;  %v13194_v54 = vld [vmem:[#allocation3 + $0xf4] sm:$0xff] }
 0x792   :  { %v5536_v5 = vpop.f32.mrf.mxu3 }
 0x793   :  { %v13185_v12 = vadd.f32 %v5536_v5, %v5422_v19  ;;  %v5243_v45 = vpop.f32.mrf.mxu1  ;;  %v13196_v19 = vld [vmem:[#allocation3 + $0xf3] sm:$0xff] }
 0x794   :  { %v5275_v26 = vadd.f32 %v5243_v45, %v12986_v60 }
 0x795   :  { %9141 = vmatmul.msk.f32.gmra.mxu2 %vm2585_vm2, %v5883_v32 }
 0x796   :  { %9123 = vmatmul.msk.f32.gmra.mxu1 %vm2585_vm2, %v5735_v42 }
 0x797   :  { %9159 = vmatmul.msk.f32.gmra.mxu3 %vm2585_vm2, %v12988_v49 }
 0x798   :  { %v5391_v0 = vpop.f32.mrf.mxu2 }
 0x799   :  { %v5423_v21 = vadd.f32 %v5391_v0, %v5275_v26  ;;  %v13207_v26 = vld [vmem:[#allocation3 + $0x104] sm:$0xff] }
 0x79a   :  { %v5539_v27 = vpop.f32.mrf.mxu3  ;;  %v13209_v0 = vld [vmem:[#allocation3 + $0x103] sm:$0xff] }
 0x79b   :  { %v13192_v20 = vadd.f32 %v5539_v27, %v5423_v21  ;;  %v5246_v48 = vpop.f32.mrf.mxu1 }
 0x79c   :  { %v5276_v60 = vadd.f32 %v5246_v48, %v13000_v36 }
 0x79d   :  { %9142 = vmatmul.msk.f32.gmra.mxu2 %vm2585_vm2, %v13194_v54 }
 0x79e   :  { %9124 = vmatmul.msk.f32.gmra.mxu1 %vm2585_vm2, %v13196_v19 }
 0x79f   :  { %9160 = vmatmul.msk.f32.gmra.mxu3 %vm2585_vm2, %v12759_v29 }
 0x7a0   :  { %v5394_v49 = vpop.f32.mrf.mxu2 }
 0x7a1   :  { %v5424_v5 = vadd.f32 %v5394_v49, %v5276_v60  ;;  %v13220_v49 = vld [vmem:[#allocation3 + $0x114] sm:$0xff] }
 0x7a2   :  { %v5542_v45 = vpop.f32.mrf.mxu3 }
 0x7a3   :  { %v13205_v32 = vadd.f32 %v5542_v45, %v5424_v5  ;;  %v5249_v42 = vpop.f32.mrf.mxu1  ;;  %v13222_v5 = vld [vmem:[#allocation3 + $0x113] sm:$0xff] }
 0x7a4   :  { %v5277_v36 = vadd.f32 %v5249_v42, %v13013_v40 }
 0x7a5   :  { %9143 = vmatmul.msk.f32.gmra.mxu2 %vm2585_vm2, %v13207_v26 }
 0x7a6   :  { %9125 = vmatmul.msk.f32.gmra.mxu1 %vm2585_vm2, %v13209_v0 }
 0x7a7   :  { %9161 = vmatmul.msk.f32.gmra.mxu3 %vm2585_vm2, %v12773_v38 }
 0x7a8   :  { %v5397_v29 = vpop.f32.mrf.mxu2 }
 0x7a9   :  { %v5425_v21 = vadd.f32 %v5397_v29, %v5277_v36 }
 0x7aa   :  { %v5545_v27 = vpop.f32.mrf.mxu3 }
 0x7ab   :  { %v13218_v48 = vadd.f32 %v5545_v27, %v5425_v21  ;;  %v5252_v60 = vpop.f32.mrf.mxu1  ;;  %v13233_v21 = vld [vmem:[#allocation3 + $0x124] sm:$0xff] }
 0x7ac   :  { %v5278_v40 = vadd.f32 %v5252_v60, %v13026_v56  ;;  %v13235_v27 = vld [vmem:[#allocation3 + $0x123] sm:$0xff]  ;;  %v9294_v60 = vld [vmem:[%s14241_s4 + $0x178] sm:$0xff] }
 0x7ad   :  { %9144 = vmatmul.msk.f32.gmra.mxu2 %vm2585_vm2, %v13220_v49  ;;  %7290 = vmatpush.msra.mxu3 %v9294_v60 }
 0x7ae   :  { %9126 = vmatmul.msk.f32.gmra.mxu1 %vm2585_vm2, %v13222_v5 }
 0x7af   :  { %9162 = vmatmul.msk.f32.gmra.mxu3 %vm2585_vm2, %v12789_v51  ;;  %v9276_v51 = vld [vmem:[%s14241_s4 + $0x168] sm:$0xff] }
 0x7b0   :  { %v5400_v38 = vpop.f32.mrf.mxu2  ;;  %7142 = vmatpush.msra.mxu2 %v9276_v51 }
 0x7b1   :  { %v5426_v45 = vadd.f32 %v5400_v38, %v5278_v40 }
 0x7b2   :  { %v5548_v42 = vpop.f32.mrf.mxu3 }
 0x7b3   :  { %v13231_v36 = vadd.f32 %v5548_v42, %v5426_v45  ;;  %v5255_v29 = vpop.f32.mrf.mxu1 }
 0x7b4   :  { %v5279_v56 = vadd.f32 %v5255_v29, %v13045_v7  ;;  %v13255_v7 = vld [vmem:[#allocation3 + $0x134] sm:$0xff] }
 0x7b5   :  { %9145 = vmatmul.msk.f32.gmra.mxu2 %vm2585_vm2, %v13233_v21  ;;  %v13257_v29 = vld [vmem:[#allocation3 + $0x133] sm:$0xff] }
 0x7b6   :  { %9127 = vmatmul.msk.f32.gmra.mxu1 %vm2585_vm2, %v13235_v27 }
 0x7b7   :  { %9163 = vmatmul.msk.f32.gmra.mxu3 %vm2585_vm2, %v12814_v37  ;;  %v9258_v37 = vld [vmem:[%s14241_s4 + $0x158] sm:$0xff] }
 0x7b8   :  { %v5403_v40 = vpop.f32.mrf.mxu2  ;;  %6994 = vmatpush.msra.mxu1 %v9258_v37 }
 0x7b9   :  { %v5427_v38 = vadd.f32 %v5403_v40, %v5279_v56  ;;  %v6037_v56 = vld [vmem:[#allocation3 + $0x140] sm:$0xff] }
 0x7ba   :  { %v5551_v45 = vpop.f32.mrf.mxu3 }
 0x7bb   :  { %v13250_v42 = vadd.f32 %v5551_v45, %v5427_v38  ;;  %v5258_v18 = vpop.f32.mrf.mxu1 }
 0x7bc   :  { %v5280_v51 = vadd.f32 %v5258_v18, %v13059_v25 }
 0x7bd   :  { %9146 = vmatmul.msk.f32.gmra.mxu2 %vm2585_vm2, %v13255_v7 }
 0x7be   :  { %9128 = vmatmul.msk.f32.gmra.mxu1 %vm2585_vm2, %v13257_v29 }
 0x7bf   :  { %9164 = vmatmul.msk.f32.gmra.mxu3 %vm2585_vm2, %v6037_v56 }
 0x7c0   :  { %v5406_v60 = vpop.f32.mrf.mxu2 }
 0x7c1   :  { %v5428_v40 = vadd.f32 %v5406_v60, %v5280_v51  ;;  %v13276_v60 = vld [vmem:[#allocation3 + $0x153] sm:$0xff] }
 0x7c2   :  { %v5554_v38 = vpop.f32.mrf.mxu3 }
 0x7c3   :  { %v13265_v45 = vadd.f32 %v5554_v38, %v5428_v40  ;;  %v5261_v43 = vpop.f32.mrf.mxu1 }
 0x7c4   :  { %v5281_v37 = vadd.f32 %v5261_v43, %v13074_v11 }
 0x7c5   :  { %9147 = vmatmul.msk.f32.gmra.mxu2 %vm2585_vm2, %v13067_v10 }
 0x7c6   :  { %9129 = vmatmul.msk.f32.gmra.mxu1 %vm2585_vm2, %v12849_v17 }
 0x7c7   :  { %9165 = vmatmul.msk.f32.gmra.mxu3 %vm2585_vm2, %v12851_v15 }
 0x7c8   :  { %v5409_v18 = vpop.f32.mrf.mxu2 }
 0x7c9   :  { %v5429_v25 = vadd.f32 %v5409_v18, %v5281_v37  ;;  %v14748_v37 = vld [vmem:[#allocation38_spill] sm:$0xff] }
 0x7ca   :  { %v5557_v56 = vpop.f32.mrf.mxu3  ;;  %v5711_v18 = vadd.f32 %v14748_v37, %v13095_v33  ;;  %v13298_v33 = vld [vmem:[#allocation3 + $0x42] sm:$0xff] }
 0x7cb   :  { %v13274_v24 = vadd.f32 %v5557_v56, %v5429_v25  ;;  %v5264_v51 = vpop.f32.mrf.mxu1  ;;  %v6320_v25 = vld [vmem:[#allocation3 + $0x32] sm:$0xff] }
 0x7cc   :  { %v5282_v17 = vadd.f32 %v5264_v51, %v13089_v9 }
 0x7cd   :  { %9148 = vmatmul.msk.f32.gmra.mxu2 %vm2585_vm2, %v13080_v55 }
 0x7ce   :  { %9130 = vmatmul.msk.f32.gmra.mxu1 %vm2585_vm2, %v13276_v60 }
 0x7cf   :  { %9166 = vmatmul.msk.f32.gmra.mxu3 %vm2585_vm2, %v12860_v22 }
 0x7d0   :  { %v5412_v15 = vpop.f32.mrf.mxu2 }
 0x7d1   :  { %v5430_v43 = vadd.f32 %v5412_v15, %v5282_v17 }
 0x7d2   :  { %v5560_v11 = vpop.f32.mrf.mxu3 }
 0x7d3   :  { %v13285_v40 = vadd.f32 %v5560_v11, %v5430_v43  ;;  %v5811_v38 = vpop.f32.mrf.mxu1  ;;  %v14749_v43 = vld [vmem:[#allocation73_spill] sm:$0xff] }
 0x7d4   :  { %v5859_v56 = vadd.f32 %v5811_v38, %v5711_v18  ;;  %v5712_v11 = vadd.f32 %v14749_v43, %v13107_v4  ;;  %v14750_v4 = vld [vmem:[#allocation66_spill] sm:$0xff] }
 0x7d5   :  { %9205 = vmatmul.msk.f32.vlgmr.msrb.gmra.mxu2 %vm2585_vm2, %v13099_v41 }
 0x7d6   :  { %9187 = vmatmul.msk.f32.vlgmr.msrb.gmra.mxu1 %vm2585_vm2, %v6320_v25 }
 0x7d7   :  { %9223 = vmatmul.msk.f32.vlgmr.msrb.gmra.mxu3 %vm2585_vm2, %v13097_v35 }
 0x7d8   :  { %v5959_v22 = vpop.f32.mrf.mxu2 }
 0x7d9   :  { %v6007_v9 = vadd.f32 %v5959_v22, %v5859_v56  ;;  %v5713_v56 = vadd.f32 %v14750_v4, %v13119_v2  ;;  %v13310_v22 = vld [vmem:[#allocation3 + $0x52] sm:$0xff]  ;;  %v14751_v2 = vld [vmem:[#allocation71_spill] sm:$0xff] }
 0x7da   :  { %v6108_v51 = vpop.f32.mrf.mxu3 }
 0x7db   :  { %v13294_v17 = vadd.f32 %v6108_v51, %v6007_v9  ;;  %v5814_v15 = vpop.f32.mrf.mxu1 }
 0x7dc   :  { %v5860_v41 = vadd.f32 %v5814_v15, %v5712_v11 }
 0x7dd   :  { %9206 = vmatmul.msk.f32.gmra.mxu2 %vm2585_vm2, %v13111_v28 }
 0x7de   :  { %9188 = vmatmul.msk.f32.gmra.mxu1 %vm2585_vm2, %v13298_v33 }
 0x7df   :  { %9224 = vmatmul.msk.f32.gmra.mxu3 %vm2585_vm2, %v13109_v13 }
 0x7e0   :  { %v5962_v35 = vpop.f32.mrf.mxu2 }
 0x7e1   :  { %v6008_v38 = vadd.f32 %v5962_v35, %v5860_v41  ;;  %v5714_v41 = vadd.f32 %v14751_v2, %v13131_v59  ;;  %v13322_v35 = vld [vmem:[#allocation3 + $0x62] sm:$0xff]  ;;  %v14752_v59 = vld [vmem:[#allocation69_spill] sm:$0xff] }
 0x7e2   :  { %v6111_v37 = vpop.f32.mrf.mxu3 }
 0x7e3   :  { %v13306_v18 = vadd.f32 %v6111_v37, %v6008_v38  ;;  %v5817_v25 = vpop.f32.mrf.mxu1 }
 0x7e4   :  { %v5861_v9 = vadd.f32 %v5817_v25, %v5713_v56 }
 0x7e5   :  { %9207 = vmatmul.msk.f32.gmra.mxu2 %vm2585_vm2, %v13123_v39 }
 0x7e6   :  { %9189 = vmatmul.msk.f32.gmra.mxu1 %vm2585_vm2, %v13310_v22 }
 0x7e7   :  { %9225 = vmatmul.msk.f32.gmra.mxu3 %vm2585_vm2, %v13121_v16 }
 0x7e8   :  { %v5965_v13 = vpop.f32.mrf.mxu2 }
 0x7e9   :  { %v6009_v51 = vadd.f32 %v5965_v13, %v5861_v9  ;;  %v5715_v9 = vadd.f32 %v14752_v59, %v13150_v6  ;;  %v13334_v13 = vld [vmem:[#allocation3 + $0x72] sm:$0xff] }
 0x7ea   :  { %v6114_v15 = vpop.f32.mrf.mxu3  ;;  %v9293_v6 = vld [vmem:[%s14241_s4 + $0x170] sm:$0xff] }
 0x7eb   :  { %v13318_v43 = vadd.f32 %v6114_v15, %v6009_v51  ;;  %v5820_v11 = vpop.f32.mrf.mxu1  ;;  %7291 = vmatpush.msra.mxu3 %v9293_v6 }
 0x7ec   :  { %v5862_v38 = vadd.f32 %v5820_v11, %v5714_v41 }
 0x7ed   :  { %9208 = vmatmul.msk.f32.gmra.mxu2 %vm2585_vm2, %v13135_v53 }
 0x7ee   :  { %9190 = vmatmul.msk.f32.gmra.mxu1 %vm2585_vm2, %v13322_v35 }
 0x7ef   :  { %9226 = vmatmul.msk.f32.gmra.mxu3 %vm2585_vm2, %v13133_v63  ;;  %v9275_v63 = vld [vmem:[%s14241_s4 + $0x160] sm:$0xff] }
 0x7f0   :  { %v5968_v16 = vpop.f32.mrf.mxu2  ;;  %7143 = vmatpush.msra.mxu2 %v9275_v63 }
 0x7f1   :  { %v6010_v37 = vadd.f32 %v5968_v16, %v5862_v38  ;;  %v13353_v16 = vld [vmem:[#allocation3 + $0x83] sm:$0xff] }
 0x7f2   :  { %v6117_v25 = vpop.f32.mrf.mxu3 }
 0x7f3   :  { %v13330_v4 = vadd.f32 %v6117_v25, %v6010_v37  ;;  %v5823_v56 = vpop.f32.mrf.mxu1  ;;  %v14753_v37 = vld [vmem:[#allocation72_spill] sm:$0xff] }
 0x7f4   :  { %v5863_v51 = vadd.f32 %v5823_v56, %v5715_v9  ;;  %v5716_v25 = vadd.f32 %v14753_v37, %v13165_v3  ;;  %v13357_v56 = vld [vmem:[#allocation3 + $0x82] sm:$0xff] }
 0x7f5   :  { %9209 = vmatmul.msk.f32.gmra.mxu2 %vm2585_vm2, %v13157_v23  ;;  %v14754_v3 = vld [vmem:[#allocation79_spill] sm:$0xff] }
 0x7f6   :  { %9191 = vmatmul.msk.f32.gmra.mxu1 %vm2585_vm2, %v13334_v13 }
 0x7f7   :  { %9227 = vmatmul.msk.f32.gmra.mxu3 %vm2585_vm2, %v13155_v57  ;;  %v9257_v57 = vld [vmem:[%s14241_s4 + $0x150] sm:$0xff] }
 0x7f8   :  { %v5971_v15 = vpop.f32.mrf.mxu2  ;;  %6995 = vmatpush.msra.mxu1 %v9257_v57 }
 0x7f9   :  { %v6011_v11 = vadd.f32 %v5971_v15, %v5863_v51 }
 0x7fa   :  { %v6120_v2 = vpop.f32.mrf.mxu3 }
 0x7fb   :  { %v13348_v41 = vadd.f32 %v6120_v2, %v6011_v11  ;;  %v5826_v38 = vpop.f32.mrf.mxu1  ;;  %v5717_v11 = vadd.f32 %v14754_v3, %v13174_v50  ;;  %v13369_v2 = vld [vmem:[#allocation3 + $0x92] sm:$0xff] }
 0x7fc   :  { %v5864_v59 = vadd.f32 %v5826_v38, %v5716_v25  ;;  %v13377_v25 = vld [vmem:[#allocation3 + $0xa3] sm:$0xff] }
 0x7fd   :  { %9210 = vmatmul.msk.f32.gmra.mxu2 %vm2585_vm2, %v13353_v16 }
 0x7fe   :  { %9192 = vmatmul.msk.f32.gmra.mxu1 %vm2585_vm2, %v13357_v56 }
 0x7ff   :  { %9228 = vmatmul.msk.f32.gmra.mxu3 %vm2585_vm2, %v12950_v62 }
 0x800   :  { %v5974_v9 = vpop.f32.mrf.mxu2 }
 0x801   :  { %v6012_v51 = vadd.f32 %v5974_v9, %v5864_v59  ;;  %v13381_v9 = vld [vmem:[#allocation3 + $0xa2] sm:$0xff] }
 0x802   :  { %v6123_v63 = vpop.f32.mrf.mxu3 }
 0x803   :  { %v13365_v6 = vadd.f32 %v6123_v63, %v6012_v51  ;;  %v5829_v15 = vpop.f32.mrf.mxu1  ;;  %v14755_v51 = vld [vmem:[#allocation76_spill] sm:$0xff] }
 0x804   :  { %v5865_v38 = vadd.f32 %v5829_v15, %v5717_v11  ;;  %v5718_v63 = vadd.f32 %v14755_v51, %v13185_v12  ;;  %v6328_v12 = vld [vmem:[#allocation3 + $0xf2] sm:$0xff] }
 0x805   :  { %9211 = vmatmul.msk.f32.gmra.mxu2 %vm2585_vm2, %v13176_v34 }
 0x806   :  { %9193 = vmatmul.msk.f32.gmra.mxu1 %vm2585_vm2, %v13369_v2 }
 0x807   :  { %9229 = vmatmul.msk.f32.gmra.mxu3 %vm2585_vm2, %v12965_v31 }
 0x808   :  { %v5977_v62 = vpop.f32.mrf.mxu2 }
 0x809   :  { %v6013_v57 = vadd.f32 %v5977_v62, %v5865_v38 }
 0x80a   :  { %v6126_v37 = vpop.f32.mrf.mxu3 }
 0x80b   :  { %v13379_v59 = vadd.f32 %v6126_v37, %v6013_v57  ;;  %v5832_v50 = vpop.f32.mrf.mxu1  ;;  %v14756_v57 = vld [vmem:[#allocation78_spill] sm:$0xff] }
 0x80c   :  { %v5866_v31 = vadd.f32 %v5832_v50, %v5718_v63  ;;  %v5719_v37 = vadd.f32 %v14756_v57, %v13192_v20  ;;  %v13404_v20 = vld [vmem:[#allocation3 + $0x102] sm:$0xff] }
 0x80d   :  { %9212 = vmatmul.msk.f32.gmra.mxu2 %vm2585_vm2, %v13377_v25 }
 0x80e   :  { %9194 = vmatmul.msk.f32.gmra.mxu1 %vm2585_vm2, %v13381_v9 }
 0x80f   :  { %9230 = vmatmul.msk.f32.gmra.mxu3 %vm2585_vm2, %v12976_v14 }
 0x810   :  { %v5980_v15 = vpop.f32.mrf.mxu2 }
 0x811   :  { %v6014_v3 = vadd.f32 %v5980_v15, %v5866_v31 }
 0x812   :  { %v6129_v11 = vpop.f32.mrf.mxu3 }
 0x813   :  { %v13391_v38 = vadd.f32 %v6129_v11, %v6014_v3  ;;  %v5835_v62 = vpop.f32.mrf.mxu1  ;;  %v14757_v3 = vld [vmem:[#allocation85_spill] sm:$0xff] }
 0x814   :  { %v5867_v51 = vadd.f32 %v5835_v62, %v5719_v37  ;;  %v5720_v11 = vadd.f32 %v14757_v3, %v13205_v32  ;;  %v14758_v32 = vld [vmem:[#allocation43_spill] sm:$0xff] }
 0x815   :  { %9213 = vmatmul.msk.f32.gmra.mxu2 %vm2585_vm2, %v13196_v19 }
 0x816   :  { %9195 = vmatmul.msk.f32.gmra.mxu1 %vm2585_vm2, %v6328_v12 }
 0x817   :  { %9231 = vmatmul.msk.f32.gmra.mxu3 %vm2585_vm2, %v13194_v54 }
 0x818   :  { %v5983_v14 = vpop.f32.mrf.mxu2 }
 0x819   :  { %v6015_v50 = vadd.f32 %v5983_v14, %v5867_v51  ;;  %v5721_v51 = vadd.f32 %v14758_v32, %v13218_v48  ;;  %v13416_v14 = vld [vmem:[#allocation3 + $0x112] sm:$0xff] }
 0x81a   :  { %v6132_v63 = vpop.f32.mrf.mxu3  ;;  %v14759_v48 = vld [vmem:[#allocation81_spill] sm:$0xff] }
 0x81b   :  { %v13400_v31 = vadd.f32 %v6132_v63, %v6015_v50  ;;  %v5838_v15 = vpop.f32.mrf.mxu1 }
 0x81c   :  { %v5868_v19 = vadd.f32 %v5838_v15, %v5720_v11 }
 0x81d   :  { %9214 = vmatmul.msk.f32.gmra.mxu2 %vm2585_vm2, %v13209_v0 }
 0x81e   :  { %9196 = vmatmul.msk.f32.gmra.mxu1 %vm2585_vm2, %v13404_v20 }
 0x81f   :  { %9232 = vmatmul.msk.f32.gmra.mxu3 %vm2585_vm2, %v13207_v26 }
 0x820   :  { %v5986_v54 = vpop.f32.mrf.mxu2 }
 0x821   :  { %v6016_v62 = vadd.f32 %v5986_v54, %v5868_v19  ;;  %v5722_v19 = vadd.f32 %v14759_v48, %v13231_v36  ;;  %v13428_v54 = vld [vmem:[#allocation3 + $0x122] sm:$0xff] }
 0x822   :  { %v6135_v57 = vpop.f32.mrf.mxu3 }
 0x823   :  { %v13412_v37 = vadd.f32 %v6135_v57, %v6016_v62  ;;  %v5841_v12 = vpop.f32.mrf.mxu1  ;;  %v6631_v62 = vld [vmem:[#allocation3 + $0x164] sm:$0xff]  ;;  %v13434_v57 = vpop.f32.mrf.mxu0 }
 0x824   :  { %v5869_v50 = vadd.f32 %v5841_v12, %v5721_v51  ;;  %14760 = vst [vmem:[#allocation7_spill] sm:$0xff] %v13434_v57  ;;  %9327 = vmatmul.msk.f32.gmra.mxu0 %vm2585_vm2, %v6631_v62  ;;  %v6913_v57 = vld [vmem:[#allocation3 + $0x41] sm:$0xff] }
 0x825   :  { %9215 = vmatmul.msk.f32.gmra.mxu2 %vm2585_vm2, %v13222_v5 }
 0x826   :  { %9197 = vmatmul.msk.f32.gmra.mxu1 %vm2585_vm2, %v13416_v14 }
 0x827   :  { %9233 = vmatmul.msk.f32.gmra.mxu3 %vm2585_vm2, %v13220_v49 }
 0x828   :  { %v5989_v26 = vpop.f32.mrf.mxu2 }
 0x829   :  { %v6017_v63 = vadd.f32 %v5989_v26, %v5869_v50  ;;  %v5723_v26 = vadd.f32 %v12614_v47, %v13250_v42  ;;  %v5724_v47 = vadd.f32 %v12634_v8, %v13265_v45  ;;  %v13457_v42 = vld [vmem:[#allocation3 + $0x142] sm:$0xff]  ;;  %v14761_v8 = vld [vmem:[#allocation90_spill] sm:$0xff] }
 0x82a   :  { %v6138_v15 = vpop.f32.mrf.mxu3  ;;  %v5725_v45 = vadd.f32 %v14761_v8, %v13274_v24 }
 0x82b   :  { %v13424_v3 = vadd.f32 %v6138_v15, %v6017_v63  ;;  %v5844_v11 = vpop.f32.mrf.mxu1  ;;  %v13443_v63 = vld [vmem:[#allocation3 + $0x132] sm:$0xff] }
 0x82c   :  { %v5870_v49 = vadd.f32 %v5844_v11, %v5722_v19 }
 0x82d   :  { %9216 = vmatmul.msk.f32.gmra.mxu2 %vm2585_vm2, %v13235_v27 }
 0x82e   :  { %9198 = vmatmul.msk.f32.gmra.mxu1 %vm2585_vm2, %v13428_v54 }
 0x82f   :  { %9234 = vmatmul.msk.f32.gmra.mxu3 %vm2585_vm2, %v13233_v21 }
 0x830   :  { %v5992_v12 = vpop.f32.mrf.mxu2 }
 0x831   :  { %v6018_v32 = vadd.f32 %v5992_v12, %v5870_v49  ;;  %v13453_v12 = vld [vmem:[#allocation3 + $0x143] sm:$0xff] }
 0x832   :  { %v6141_v36 = vpop.f32.mrf.mxu3 }
 0x833   :  { %v13439_v51 = vadd.f32 %v6141_v36, %v6018_v32  ;;  %v5847_v50 = vpop.f32.mrf.mxu1 }
 0x834   :  { %v5871_v21 = vadd.f32 %v5847_v50, %v5723_v26 }
 0x835   :  { %9217 = vmatmul.msk.f32.gmra.mxu2 %vm2585_vm2, %v13257_v29 }
 0x836   :  { %9199 = vmatmul.msk.f32.gmra.mxu1 %vm2585_vm2, %v13443_v63 }
 0x837   :  { %9235 = vmatmul.msk.f32.gmra.mxu3 %vm2585_vm2, %v13255_v7 }
 0x838   :  { %v5995_v15 = vpop.f32.mrf.mxu2 }
 0x839   :  { %v6019_v11 = vadd.f32 %v5995_v15, %v5871_v21  ;;  %v13469_v15 = vld [vmem:[#allocation3 + $0x152] sm:$0xff] }
 0x83a   :  { %v6144_v48 = vpop.f32.mrf.mxu3 }
 0x83b   :  { %v13451_v19 = vadd.f32 %v6144_v48, %v6019_v11  ;;  %v5850_v49 = vpop.f32.mrf.mxu1 }
 0x83c   :  { %v5872_v7 = vadd.f32 %v5850_v49, %v5724_v47  ;;  %v13477_v47 = vld [vmem:[#allocation3 + $0x163] sm:$0xff] }
 0x83d   :  { %9218 = vmatmul.msk.f32.gmra.mxu2 %vm2585_vm2, %v13453_v12 }
 0x83e   :  { %9200 = vmatmul.msk.f32.gmra.mxu1 %vm2585_vm2, %v13457_v42 }
 0x83f   :  { %9236 = vmatmul.msk.f32.gmra.mxu3 %vm2585_vm2, %v13067_v10 }
 0x840   :  { %v5998_v32 = vpop.f32.mrf.mxu2 }
 0x841   :  { %v6020_v36 = vadd.f32 %v5998_v32, %v5872_v7  ;;  %v13481_v32 = vld [vmem:[#allocation3 + $0x162] sm:$0xff] }
 0x842   :  { %v6147_v50 = vpop.f32.mrf.mxu3 }
 0x843   :  { %v13465_v26 = vadd.f32 %v6147_v50, %v6020_v36  ;;  %v5853_v21 = vpop.f32.mrf.mxu1  ;;  %v14762_v36 = vld [vmem:[#allocation44_spill] sm:$0xff] }
 0x844   :  { %v5873_v11 = vadd.f32 %v5853_v21, %v5725_v45  ;;  %v5726_v50 = vadd.f32 %v14762_v36, %v13285_v40 }
 0x845   :  { %9219 = vmatmul.msk.f32.gmra.mxu2 %vm2585_vm2, %v13276_v60 }
 0x846   :  { %9201 = vmatmul.msk.f32.gmra.mxu1 %vm2585_vm2, %v13469_v15 }
 0x847   :  { %9237 = vmatmul.msk.f32.gmra.mxu3 %vm2585_vm2, %v13080_v55 }
 0x848   :  { %v6001_v10 = vpop.f32.mrf.mxu2 }
 0x849   :  { %v6021_v48 = vadd.f32 %v6001_v10, %v5873_v11 }
 0x84a   :  { %v6150_v49 = vpop.f32.mrf.mxu3 }
 0x84b   :  { %v13479_v7 = vadd.f32 %v6150_v49, %v6021_v48  ;;  %v5856_v24 = vpop.f32.mrf.mxu1  ;;  %v14763_v48 = vld [vmem:[#allocation92_spill] sm:$0xff] }
 0x84c   :  { %v5874_v55 = vadd.f32 %v5856_v24, %v5726_v50  ;;  %v6304_v49 = vadd.f32 %v14763_v48, %v13294_v17  ;;  %v6914_v17 = vld [vmem:[#allocation3 + $0x51] sm:$0xff] }
 0x84d   :  { %9220 = vmatmul.msk.f32.gmra.mxu2 %vm2585_vm2, %v13477_v47 }
 0x84e   :  { %9202 = vmatmul.msk.f32.gmra.mxu1 %vm2585_vm2, %v13481_v32 }
 0x84f   :  { %9238 = vmatmul.msk.f32.gmra.mxu3 %vm2585_vm2, %v6631_v62 }
 0x850   :  { %v6004_v21 = vpop.f32.mrf.mxu2 }
 0x851   :  { %v6022_v8 = vadd.f32 %v6004_v21, %v5874_v55  ;;  %v14764_v21 = vld [vmem:[#allocation89_spill] sm:$0xff] }
 0x852   :  { %v6153_v45 = vpop.f32.mrf.mxu3 }
 0x853   :  { %v13490_v11 = vadd.f32 %v6153_v45, %v6022_v8  ;;  %v6404_v10 = vpop.f32.mrf.mxu1  ;;  %v6305_v8 = vadd.f32 %v14764_v21, %v13306_v18  ;;  %v14765_v18 = vld [vmem:[#allocation84_spill] sm:$0xff] }
 0x854   :  { %v6452_v40 = vadd.f32 %v6404_v10, %v6304_v49  ;;  %v13510_v49 = vpop.f32.mrf.mxu0 }
 0x855   :  { %9277 = vmatmul.msk.f32.vlgmr.msra.gmra.mxu2 %vm2585_vm2, %v13298_v33 }
 0x856   :  { %9259 = vmatmul.msk.f32.vlgmr.msra.gmra.mxu1 %vm2585_vm2, %v6913_v57 }
 0x857   :  { %9295 = vmatmul.msk.f32.vlgmr.msra.gmra.mxu3 %vm2585_vm2, %v13111_v28 }
 0x858   :  { %v6552_v62 = vpop.f32.mrf.mxu2 }
 0x859   :  { %v6600_v24 = vadd.f32 %v6552_v62, %v6452_v40  ;;  %v6306_v40 = vadd.f32 %v14765_v18, %v13318_v43  ;;  %v6915_v62 = vld [vmem:[#allocation3 + $0x61] sm:$0xff]  ;;  %v6916_v43 = vld [vmem:[#allocation3 + $0x71] sm:$0xff] }
 0x85a   :  { %v6700_v36 = vpop.f32.mrf.mxu3 }
 0x85b   :  { %v13499_v50 = vadd.f32 %v6700_v36, %v6600_v24  ;;  %v6407_v55 = vpop.f32.mrf.mxu1 }
 0x85c   :  { %v6453_v33 = vadd.f32 %v6407_v55, %v6305_v8  ;;  %v14766_v8 = vld [vmem:[#allocation93_spill] sm:$0xff] }
 0x85d   :  { %9278 = vmatmul.msk.f32.gmra.mxu2 %vm2585_vm2, %v13310_v22 }
 0x85e   :  { %9260 = vmatmul.msk.f32.gmra.mxu1 %vm2585_vm2, %v6914_v17  ;;  %v6307_v17 = vadd.f32 %v14766_v8, %v13330_v4  ;;  %v14767_v4 = vld [vmem:[#allocation87_spill] sm:$0xff]  ;;  %v6918_v8 = vld [vmem:[#allocation3 + $0x91] sm:$0xff] }
 0x85f   :  { %9296 = vmatmul.msk.f32.gmra.mxu3 %vm2585_vm2, %v13123_v39  ;;  %v6308_v18 = vadd.f32 %v14767_v4, %v13348_v41  ;;  %v14768_v41 = vld [vmem:[#allocation45_spill] sm:$0xff] }
 0x860   :  { %v6555_v28 = vpop.f32.mrf.mxu2 }
 0x861   :  { %v6601_v57 = vadd.f32 %v6555_v28, %v6453_v33 }
 0x862   :  { %v6703_v45 = vpop.f32.mrf.mxu3 }
 0x863   :  { %v13508_v10 = vadd.f32 %v6703_v45, %v6601_v57  ;;  %v6410_v48 = vpop.f32.mrf.mxu1 }
 0x864   :  { %v6454_v22 = vadd.f32 %v6410_v48, %v6306_v40  ;;  %v6917_v40 = vld [vmem:[#allocation3 + $0x81] sm:$0xff] }
 0x865   :  { %9279 = vmatmul.msk.f32.gmra.mxu2 %vm2585_vm2, %v13322_v35  ;;  %v13525_v35 = vpop.f32.mrf.mxu0 }
 0x866   :  { %9261 = vmatmul.msk.f32.gmra.mxu1 %vm2585_vm2, %v6915_v62 }
 0x867   :  { %9297 = vmatmul.msk.f32.gmra.mxu3 %vm2585_vm2, %v13135_v53 }
 0x868   :  { %v6558_v39 = vpop.f32.mrf.mxu2 }
 0x869   :  { %v6602_v24 = vadd.f32 %v6558_v39, %v6454_v22 }
 0x86a   :  { %v6706_v36 = vpop.f32.mrf.mxu3 }
 0x86b   :  { %v13519_v55 = vadd.f32 %v6706_v36, %v6602_v24  ;;  %v6413_v21 = vpop.f32.mrf.mxu1 }
 0x86c   :  { %v6455_v33 = vadd.f32 %v6413_v21, %v6307_v17  ;;  %v6309_v21 = vadd.f32 %v14768_v41, %v13365_v6  ;;  %v14769_v6 = vld [vmem:[#allocation96_spill] sm:$0xff] }
 0x86d   :  { %9280 = vmatmul.msk.f32.gmra.mxu2 %vm2585_vm2, %v13334_v13 }
 0x86e   :  { %9262 = vmatmul.msk.f32.gmra.mxu1 %vm2585_vm2, %v6916_v43 }
 0x86f   :  { %9298 = vmatmul.msk.f32.gmra.mxu3 %vm2585_vm2, %v13157_v23  ;;  %v13539_v23 = vpop.f32.mrf.mxu0 }
 0x870   :  { %v6561_v53 = vpop.f32.mrf.mxu2 }
 0x871   :  { %v6603_v28 = vadd.f32 %v6561_v53, %v6455_v33 }
 0x872   :  { %v6709_v57 = vpop.f32.mrf.mxu3 }
 0x873   :  { %v13530_v45 = vadd.f32 %v6709_v57, %v6603_v28  ;;  %v6416_v48 = vpop.f32.mrf.mxu1  ;;  %v6919_v57 = vld [vmem:[#allocation3 + $0xa1] sm:$0xff] }
 0x874   :  { %v6456_v13 = vadd.f32 %v6416_v48, %v6308_v18  ;;  %v6310_v48 = vadd.f32 %v14769_v6, %v13379_v59  ;;  %v7216_v59 = vld [vmem:[#allocation3 + $0xb3] sm:$0xff] }
 0x875   :  { %9281 = vmatmul.msk.f32.gmra.mxu2 %vm2585_vm2, %v13357_v56 }
 0x876   :  { %9263 = vmatmul.msk.f32.gmra.mxu1 %vm2585_vm2, %v6917_v40  ;;  %v7068_v40 = vld [vmem:[#allocation3 + $0xb2] sm:$0xff] }
 0x877   :  { %9299 = vmatmul.msk.f32.gmra.mxu3 %vm2585_vm2, %v13353_v16  ;;  %v13550_v43 = vpop.f32.mrf.mxu0 }
 0x878   :  { %v6564_v62 = vpop.f32.mrf.mxu2 }
 0x879   :  { %v6604_v22 = vadd.f32 %v6564_v62, %v6456_v13 }
 0x87a   :  { %v6712_v39 = vpop.f32.mrf.mxu3 }
 0x87b   :  { %v13541_v24 = vadd.f32 %v6712_v39, %v6604_v22  ;;  %v6419_v36 = vpop.f32.mrf.mxu1  ;;  %v6920_v22 = vld [vmem:[#allocation3 + $0xb1] sm:$0xff] }
 0x87c   :  { %v6457_v56 = vadd.f32 %v6419_v36, %v6309_v21 }
 0x87d   :  { %9282 = vmatmul.msk.f32.gmra.mxu2 %vm2585_vm2, %v13369_v2 }
 0x87e   :  { %9264 = vmatmul.msk.f32.gmra.mxu1 %vm2585_vm2, %v6918_v8 }
 0x87f   :  { %9300 = vmatmul.msk.f32.gmra.mxu3 %vm2585_vm2, %v13176_v34  ;;  %v13563_v39 = vpop.f32.mrf.mxu0 }
 0x880   :  { %v6567_v16 = vpop.f32.mrf.mxu2 }
 0x881   :  { %v6605_v17 = vadd.f32 %v6567_v16, %v6457_v56  ;;  %v6921_v16 = vld [vmem:[#allocation3 + $0x101] sm:$0xff] }
 0x882   :  { %v6715_v33 = vpop.f32.mrf.mxu3 }
 0x883   :  { %v13552_v53 = vadd.f32 %v6715_v33, %v6605_v17  ;;  %v6422_v28 = vpop.f32.mrf.mxu1 }
 0x884   :  { %v6458_v2 = vadd.f32 %v6422_v28, %v6310_v48  ;;  %v6922_v28 = vld [vmem:[#allocation3 + $0x111] sm:$0xff]  ;;  %v6923_v48 = vld [vmem:[#allocation3 + $0x121] sm:$0xff] }
 0x885   :  { %9283 = vmatmul.msk.f32.gmra.mxu2 %vm2585_vm2, %v13381_v9  ;;  %v6311_v9 = vadd.f32 %v12821_v58, %v13391_v38 }
 0x886   :  { %9265 = vmatmul.msk.f32.gmra.mxu1 %vm2585_vm2, %v6919_v57 }
 0x887   :  { %9301 = vmatmul.msk.f32.gmra.mxu3 %vm2585_vm2, %v13377_v25  ;;  %v13576_v17 = vpop.f32.mrf.mxu0 }
 0x888   :  { %v6570_v34 = vpop.f32.mrf.mxu2  ;;  %14770 = vst [vmem:[#allocation9_spill] sm:$0xff] %v13576_v17 }
 0x889   :  { %v6606_v4 = vadd.f32 %v6570_v34, %v6458_v2 }
 0x88a   :  { %v6718_v18 = vpop.f32.mrf.mxu3 }
 0x88b   :  { %v13561_v13 = vadd.f32 %v6718_v18, %v6606_v4  ;;  %v6425_v62 = vpop.f32.mrf.mxu1  ;;  %v6924_v4 = vld [vmem:[#allocation3 + $0x131] sm:$0xff] }
 0x88c   :  { %v6459_v36 = vadd.f32 %v6425_v62, %v6311_v9  ;;  %v7372_v62 = vld [vmem:[#allocation3 + $0x174] sm:$0xff]  ;;  %v6317_v9 = vadd.f32 %v12937_v61, %v13465_v26  ;;  %v6927_v26 = vld [vmem:[#allocation3 + $0x161] sm:$0xff] }
 0x88d   :  { %9284 = vmatmul.msk.f32.gmra.mxu2 %vm2585_vm2, %v7068_v40  ;;  %9328 = vmatmul.msk.f32.gmra.mxu0 %vm2585_vm2, %v7372_v62 }
 0x88e   :  { %9266 = vmatmul.msk.f32.gmra.mxu1 %vm2585_vm2, %v6920_v22  ;;  %v6925_v22 = vld [vmem:[#allocation3 + $0x141] sm:$0xff] }
 0x88f   :  { %9302 = vmatmul.msk.f32.gmra.mxu3 %vm2585_vm2, %v7216_v59 }
 0x890   :  { %v6573_v25 = vpop.f32.mrf.mxu2 }
 0x891   :  { %v6607_v41 = vadd.f32 %v6573_v25, %v6459_v36  ;;  %v6926_v36 = vld [vmem:[#allocation3 + $0x151] sm:$0xff] }
 0x892   :  { %v6721_v21 = vpop.f32.mrf.mxu3 }
 0x893   :  { %v13570_v8 = vadd.f32 %v6721_v21, %v6607_v41  ;;  %v13572_v56 = vpop.f32.mrf.mxu1 }
 0x895   :  { %9285 = vmatmul.msk.f32.gmra.mxu2 %vm2585_vm2, %v13404_v20  ;;  %v13592_v20 = vpop.f32.mrf.mxu0 }
 0x896   :  { %9267 = vmatmul.msk.f32.gmra.mxu1 %vm2585_vm2, %v6921_v16  ;;  %14771 = vst [vmem:[#allocation8_spill] sm:$0xff] %v13592_v20  ;;  %v6318_v16 = vadd.f32 %v12957_v44, %v13479_v7  ;;  %v6319_v44 = vadd.f32 %v12972_v46, %v13490_v11  ;;  %v7076_v7 = vld [vmem:[#allocation3 + $0x172] sm:$0xff]  ;;  %v6897_v46 = vadd.f32 %v12990_v52, %v13499_v50 }
 0x897   :  { %9303 = vmatmul.msk.f32.gmra.mxu3 %vm2585_vm2, %v13209_v0  ;;  %v6899_v52 = vadd.f32 %v13024_v30, %v13519_v55  ;;  %v14778_v55 = vld [vmem:[#allocation97_spill] sm:$0xff] }
 0x898   :  { %v13581_v58 = vpop.f32.mrf.mxu2 }
 0x89a   :  { %v13583_v38 = vpop.f32.mrf.mxu3 }
 0x89b   :  { %v13585_v33 = vpop.f32.mrf.mxu1 }
 0x89d   :  { %9286 = vmatmul.msk.f32.gmra.mxu2 %vm2585_vm2, %v13416_v14 }
 0x89e   :  { %9268 = vmatmul.msk.f32.gmra.mxu1 %vm2585_vm2, %v6922_v28 }
 0x89f   :  { %9304 = vmatmul.msk.f32.gmra.mxu3 %vm2585_vm2, %v13222_v5  ;;  %v13607_v5 = vpop.f32.mrf.mxu0 }
 0x8a0   :  { %v13594_v57 = vpop.f32.mrf.mxu2  ;;  %14772 = vst [vmem:[#allocation11_spill] sm:$0xff] %v13607_v5  ;;  %v7704_v5 = vld [vmem:[%s14244_s7 + $0x18] sm:$0xff] }
 0x8a1   :  { %7754 = vmatpush.msrb.mxu2 %v7704_v5 }
 0x8a2   :  { %v13596_v0 = vpop.f32.mrf.mxu3 }
 0x8a3   :  { %v13598_v6 = vpop.f32.mrf.mxu1 }
 0x8a5   :  { %9287 = vmatmul.msk.f32.gmra.mxu2 %vm2585_vm2, %v13428_v54 }
 0x8a6   :  { %9269 = vmatmul.msk.f32.gmra.mxu1 %vm2585_vm2, %v6923_v48 }
 0x8a7   :  { %9305 = vmatmul.msk.f32.gmra.mxu3 %vm2585_vm2, %v13235_v27  ;;  %v13624_v40 = vpop.f32.mrf.mxu0 }
 0x8a8   :  { %v13605_v14 = vpop.f32.mrf.mxu2  ;;  %14773 = vst [vmem:[#allocation13_spill] sm:$0xff] %v13624_v40 }
 0x8aa   :  { %v13609_v2 = vpop.f32.mrf.mxu3 }
 0x8ab   :  { %v13611_v34 = vpop.f32.mrf.mxu1 }
 0x8ad   :  { %9288 = vmatmul.msk.f32.gmra.mxu2 %vm2585_vm2, %v13443_v63 }
 0x8ae   :  { %9270 = vmatmul.msk.f32.gmra.mxu1 %vm2585_vm2, %v6924_v4 }
 0x8af   :  { %9306 = vmatmul.msk.f32.gmra.mxu3 %vm2585_vm2, %v13257_v29 }
 0x8b0   :  { %v13618_v54 = vpop.f32.mrf.mxu2 }
 0x8b2   :  { %v13620_v27 = vpop.f32.mrf.mxu3 }
 0x8b3   :  { %v13622_v18 = vpop.f32.mrf.mxu1 }
 0x8b5   :  { %9289 = vmatmul.msk.f32.gmra.mxu2 %vm2585_vm2, %v13457_v42  ;;  %v13640_v42 = vpop.f32.mrf.mxu0 }
 0x8b6   :  { %9271 = vmatmul.msk.f32.gmra.mxu1 %vm2585_vm2, %v6925_v22 }
 0x8b7   :  { %9307 = vmatmul.msk.f32.gmra.mxu3 %vm2585_vm2, %v13453_v12 }
 0x8b8   :  { %v13632_v29 = vpop.f32.mrf.mxu2 }
 0x8ba   :  { %v13634_v63 = vpop.f32.mrf.mxu3 }
 0x8bb   :  { %v6443_v59 = vpop.f32.mrf.mxu1 }
 0x8bc   :  { %v6465_v25 = vadd.f32 %v6443_v59, %v6317_v9  ;;  %v6928_v9 = vld [vmem:[#allocation3 + $0x171] sm:$0xff] }
 0x8bd   :  { %9290 = vmatmul.msk.f32.gmra.mxu2 %vm2585_vm2, %v13469_v15 }
 0x8be   :  { %9272 = vmatmul.msk.f32.gmra.mxu1 %vm2585_vm2, %v6926_v36 }
 0x8bf   :  { %9308 = vmatmul.msk.f32.gmra.mxu3 %vm2585_vm2, %v13276_v60  ;;  %v13654_v60 = vpop.f32.mrf.mxu0 }
 0x8c0   :  { %v6591_v12 = vpop.f32.mrf.mxu2 }
 0x8c1   :  { %v6613_v41 = vadd.f32 %v6591_v12, %v6465_v25 }
 0x8c2   :  { %v6739_v21 = vpop.f32.mrf.mxu3 }
 0x8c3   :  { %v13647_v28 = vadd.f32 %v6739_v21, %v6613_v41  ;;  %v6446_v61 = vpop.f32.mrf.mxu1 }
 0x8c4   :  { %v6466_v48 = vadd.f32 %v6446_v61, %v6318_v16 }
 0x8c5   :  { %14774 = vst [vmem:[#allocation23_spill] sm:$0xff] %v13647_v28  ;;  %9291 = vmatmul.msk.f32.gmra.mxu2 %vm2585_vm2, %v13481_v32  ;;  %v7224_v32 = vld [vmem:[#allocation3 + $0x173] sm:$0xff] }
 0x8c6   :  { %9273 = vmatmul.msk.f32.gmra.mxu1 %vm2585_vm2, %v6927_v26 }
 0x8c7   :  { %9309 = vmatmul.msk.f32.gmra.mxu3 %vm2585_vm2, %v13477_v47  ;;  %v13663_v12 = vpop.f32.mrf.mxu0 }
 0x8c8   :  { %v6594_v15 = vpop.f32.mrf.mxu2 }
 0x8c9   :  { %v6614_v4 = vadd.f32 %v6594_v15, %v6466_v48  ;;  %v6898_v15 = vadd.f32 %v13006_v1, %v13508_v10  ;;  %v14777_v10 = vld [vmem:[#allocation48_spill] sm:$0xff] }
 0x8ca   :  { %v6742_v62 = vpop.f32.mrf.mxu3 }
 0x8cb   :  { %v13658_v22 = vadd.f32 %v6742_v62, %v6614_v4  ;;  %v6449_v59 = vpop.f32.mrf.mxu1 }
 0x8cc   :  { %v6467_v36 = vadd.f32 %v6449_v59, %v6319_v44 }
 0x8cd   :  { %14775 = vst [vmem:[#allocation10_spill] sm:$0xff] %v13658_v22  ;;  %9292 = vmatmul.msk.f32.gmra.mxu2 %vm2585_vm2, %v7076_v7  ;;  %v9332_v22 = vld [vmem:[%s14244_s7 + $0x38] sm:$0xff] }
 0x8ce   :  { %9274 = vmatmul.msk.f32.gmra.mxu1 %vm2585_vm2, %v6928_v9 }
 0x8cf   :  { %9310 = vmatmul.msk.f32.gmra.mxu3 %vm2585_vm2, %v7224_v32  ;;  %v13673_v44 = vpop.f32.mrf.mxu0  ;;  %7730 = vmatpush.msrb.mxu1 %v9332_v22  ;;  %v14792_v22 = vld [vmem:[#allocation46_spill] sm:$0xff] }
 0x8d0   :  { %v6597_v47 = vpop.f32.mrf.mxu2 }
 0x8d1   :  { %v6615_v25 = vadd.f32 %v6597_v47, %v6467_v36 }
 0x8d2   :  { %v6745_v41 = vpop.f32.mrf.mxu3 }
 0x8d3   :  { %v13667_v11 = vadd.f32 %v6745_v41, %v6615_v25  ;;  %v6997_v21 = vpop.f32.mrf.mxu1 }
 0x8d4   :  { %v7045_v16 = vadd.f32 %v6997_v21, %v6897_v46  ;;  %v6900_v21 = vadd.f32 %v14777_v10, %v13530_v45 }
 0x8d5   :  { %14776 = vst [vmem:[#allocation24_spill] sm:$0xff] %v13667_v11 }
 0x8d7   :  { %v7453_v25 = vpop.f32.mrf.mxu0 }
 0x8d8   :  { %v7145_v61 = vpop.f32.mrf.mxu2 }
 0x8d9   :  { %v7193_v26 = vadd.f32 %v7145_v61, %v7045_v16 }
 0x8da   :  { %v7293_v48 = vpop.f32.mrf.mxu3 }
 0x8db   :  { %v13671_v4 = vadd.f32 %v7293_v48, %v7193_v26  ;;  %v7000_v62 = vpop.f32.mrf.mxu1 }
 0x8dc   :  { %v7046_v7 = vadd.f32 %v7000_v62, %v6898_v15 }
 0x8df   :  { %v13683_v48 = vpop.f32.mrf.mxu0 }
 0x8e0   :  { %v7148_v59 = vpop.f32.mrf.mxu2 }
 0x8e1   :  { %v7194_v9 = vadd.f32 %v7148_v59, %v7046_v7  ;;  %v6901_v7 = vadd.f32 %v14778_v55, %v13541_v24 }
 0x8e2   :  { %v7296_v36 = vpop.f32.mrf.mxu3 }
 0x8e3   :  { %v13677_v50 = vadd.f32 %v7296_v36, %v7194_v9  ;;  %v7003_v32 = vpop.f32.mrf.mxu1 }
 0x8e4   :  { %v7047_v47 = vadd.f32 %v7003_v32, %v6899_v52 }
 0x8e8   :  { %v7151_v41 = vpop.f32.mrf.mxu2 }
 0x8e9   :  { %v7195_v46 = vadd.f32 %v7151_v41, %v7047_v47  ;;  %v13689_v47 = vpop.f32.mrf.mxu0 }
 0x8ea   :  { %v7299_v1 = vpop.f32.mrf.mxu3  ;;  %14779 = vst [vmem:[#allocation12_spill] sm:$0xff] %v13689_v47  ;;  %v14791_v47 = vld [vmem:[#allocation91_spill] sm:$0xff] }
 0x8eb   :  { %v13681_v16 = vadd.f32 %v7299_v1, %v7195_v46  ;;  %v7006_v61 = vpop.f32.mrf.mxu1 }
 0x8ec   :  { %v7048_v26 = vadd.f32 %v7006_v61, %v6900_v21 }
 0x8f0   :  { %v7154_v15 = vpop.f32.mrf.mxu2 }
 0x8f1   :  { %v7196_v62 = vadd.f32 %v7154_v15, %v7048_v26  ;;  %v13695_v26 = vpop.f32.mrf.mxu0 }
 0x8f2   :  { %v7302_v30 = vpop.f32.mrf.mxu3  ;;  %14781 = vst [vmem:[#allocation99_spill] sm:$0xff] %v13695_v26 }
 0x8f3   :  { %v13687_v59 = vadd.f32 %v7302_v30, %v7196_v62  ;;  %v7009_v9 = vpop.f32.mrf.mxu1 }
 0x8f4   :  { %v7049_v36 = vadd.f32 %v7009_v9, %v6901_v7 }
 0x8f8   :  { %v7157_v52 = vpop.f32.mrf.mxu2 }
 0x8f9   :  { %v7197_v32 = vadd.f32 %v7157_v52, %v7049_v36  ;;  %v13699_v30 = vpop.f32.mrf.mxu0 }
 0x8fa   :  { %v7305_v45 = vpop.f32.mrf.mxu3  ;;  %14782 = vst [vmem:[#allocation98_spill] sm:$0xff] %v13699_v30 }
 0x8fb   :  { %v7345_v41 = vadd.f32 %v7305_v45, %v7197_v32  ;;  %v7012_v46 = vpop.f32.mrf.mxu1 }
 0x8fd   :  { %v13691_v1 = vadd.f32 %v7453_v25, %v7345_v41 }
 0x8ff   :  { %14780 = vst [vmem:[#allocation14_spill] sm:$0xff] %v13691_v1 }
 0x900   :  { %v7160_v10 = vpop.f32.mrf.mxu2 }
 0x901   :  { %v13703_v36 = vpop.f32.mrf.mxu0 }
 0x902   :  { %v13693_v21 = vpop.f32.mrf.mxu3  ;;  %14783 = vst [vmem:[#allocation100_spill] sm:$0xff] %v13703_v36  ;;  %v9338_v36 = vld [vmem:[%s14244_s7 + $0x58] sm:$0xff] }
 0x903   :  { %v7015_v61 = vpop.f32.mrf.mxu1  ;;  %7784 = vmatpush.msrb.mxu3 %v9338_v36  ;;  %v6314_v36 = vadd.f32 %v14792_v22, %v13424_v3 }
 0x908   :  { %v7163_v24 = vpop.f32.mrf.mxu2 }
 0x909   :  { %v13711_v41 = vpop.f32.mrf.mxu0 }
 0x90a   :  { %v13697_v15 = vpop.f32.mrf.mxu3  ;;  %14785 = vst [vmem:[#allocation102_spill] sm:$0xff] %v13711_v41  ;;  %v14787_v41 = vld [vmem:[#allocation95_spill] sm:$0xff] }
 0x90b   :  { %v7018_v62 = vpop.f32.mrf.mxu1  ;;  %v6312_v20 = vadd.f32 %v14787_v41, %v13400_v31  ;;  %v14793_v31 = vld [vmem:[#allocation49_spill] sm:$0xff] }
 0x90c   :  { %v6902_v41 = vadd.f32 %v14793_v31, %v13552_v53 }
 0x90d   :  { %v6460_v17 = vadd.f32 %v13572_v56, %v6312_v20  ;;  %v14794_v56 = vld [vmem:[#allocation94_spill] sm:$0xff] }
 0x90e   :  { %v6315_v20 = vadd.f32 %v14794_v56, %v13439_v51  ;;  %v6904_v51 = vadd.f32 %v13510_v49, %v13570_v8 }
 0x90f   :  { %v6608_v1 = vadd.f32 %v13581_v58, %v6460_v17  ;;  %v14795_v17 = vld [vmem:[#allocation47_spill] sm:$0xff] }
 0x910   :  { %v7166_v55 = vpop.f32.mrf.mxu2  ;;  %v6316_v58 = vadd.f32 %v14795_v17, %v13451_v19  ;;  %v6463_v53 = vadd.f32 %v13611_v34, %v6315_v20 }
 0x911   :  { %v13734_v26 = vpop.f32.mrf.mxu0 }
 0x912   :  { %v13701_v7 = vpop.f32.mrf.mxu3  ;;  %14790 = vst [vmem:[#allocation106_spill] sm:$0xff] %v13734_v26  ;;  %v6462_v26 = vadd.f32 %v13598_v6, %v6314_v36  ;;  %v6464_v6 = vadd.f32 %v13622_v18, %v6316_v58  ;;  %v6611_v19 = vadd.f32 %v13618_v54, %v6463_v53  ;;  %v13774_v18 = vadd.f32 %v13640_v42, %v13671_v4 }
 0x913   :  { %v7021_v9 = vpop.f32.mrf.mxu1 }
 0x914   :  { %v6610_v3 = vadd.f32 %v13605_v14, %v6462_v26  ;;  %v7508_v4 = vsel %vm7507_vm9, %v13774_v18, 0.0 }
 0x916   :  { %v6758_v8 = vadd.f32 %v13609_v2, %v6610_v3 }
 0x918   :  { %v7169_v25 = vpop.f32.mrf.mxu2 }
 0x919   :  { %v13769_v34 = vpop.f32.mrf.mxu0 }
 0x91a   :  { %v13705_v52 = vpop.f32.mrf.mxu3 }
 0x91b   :  { %14784 = vst [vmem:[#allocation101_spill] sm:$0xff] %v13705_v52  ;;  %v13707_v32 = vpop.f32.mrf.mxu1  ;;  %v6313_v52 = vadd.f32 %v14791_v47, %v13412_v37  ;;  %v6756_v37 = vadd.f32 %v13583_v38, %v6608_v1  ;;  %v7052_v1 = vadd.f32 %v7018_v62, %v6904_v51 }
 0x91d   :  { %v6461_v5 = vadd.f32 %v13585_v33, %v6313_v52  ;;  %v7050_v33 = vadd.f32 %v7012_v46, %v6902_v41  ;;  %v14796_v52 = vld [vmem:[#allocation7_spill] sm:$0xff]  ;;  %v13767_v46 = vadd.f32 %v13654_v60, %v13677_v50  ;;  %v6905_v49 = vadd.f32 %v13525_v35, %v6756_v37  ;;  %v14799_v41 = vld [vmem:[#allocation12_spill] sm:$0xff]  ;;  %v14801_v37 = vld [vmem:[#allocation9_spill] sm:$0xff] }
 0x91e   :  { %v7200_v60 = vadd.f32 %v7166_v55, %v7052_v1  ;;  %v13788_v35 = vadd.f32 %v13673_v44, %v13687_v59 }
 0x91f   :  { %v7198_v22 = vadd.f32 %v7160_v10, %v7050_v33  ;;  %v7053_v50 = vadd.f32 %v7021_v9, %v6905_v49  ;;  %v6759_v10 = vadd.f32 %v13620_v27, %v6611_v19  ;;  %v7509_v42 = vsel %vm7507_vm9, %v13767_v46, 0.0  ;;  %v14806_v19 = vld [vmem:[#allocation98_spill] sm:$0xff] }
 0x920   :  { %v13709_v45 = vpop.f32.mrf.mxu2  ;;  %v7510_v59 = vadd.f32 %v7509_v42, %v7508_v4  ;;  %v7513_v62 = vsel %vm7507_vm9, %v13788_v35, 0.0  ;;  %v14810_v4 = vld [vmem:[#allocation11_spill] sm:$0xff] }
 0x922   :  { %v13713_v40 = vpop.f32.mrf.mxu3  ;;  %v14798_v36 = vld [vmem:[#allocation101_spill] sm:$0xff] }
 0x923   :  { %14786 = vst [vmem:[#allocation103_spill] sm:$0xff] %v13713_v40  ;;  %v13715_v11 = vpop.f32.mrf.mxu1 }
 0x928   :  { %v13726_v30 = vpop.f32.mrf.mxu2 }
 0x92a   :  { %v13730_v28 = vpop.f32.mrf.mxu3  ;;  %v14803_v53 = vld [vmem:[#allocation103_spill] sm:$0xff] }
 0x92b   :  { %14788 = vst [vmem:[#allocation104_spill] sm:$0xff] %v13730_v28  ;;  %v13732_v40 = vpop.f32.mrf.mxu1 }
 0x92c   :  { %14789 = vst [vmem:[#allocation105_spill] sm:$0xff] %v13732_v40  ;;  %v6609_v40 = vadd.f32 %v13594_v57, %v6461_v5  ;;  %v6903_v57 = vadd.f32 %v14796_v52, %v13561_v13  ;;  %v6612_v13 = vadd.f32 %v13632_v29, %v6464_v6 }
 0x92e   :  { %v6757_v38 = vadd.f32 %v13596_v0, %v6609_v40  ;;  %v7051_v14 = vadd.f32 %v7015_v61, %v6903_v57  ;;  %v13780_v0 = vadd.f32 %v13663_v12, %v13681_v16  ;;  %v7346_v40 = vadd.f32 %v13693_v21, %v7198_v22  ;;  %v14804_v22 = vld [vmem:[#allocation23_spill] sm:$0xff] }
 0x92f   :  { %v6760_v12 = vadd.f32 %v13634_v63, %v6612_v13  ;;  %v7201_v16 = vadd.f32 %v7169_v25, %v7053_v50  ;;  %v7348_v63 = vadd.f32 %v13701_v7, %v7200_v60 }
 0x930   :  { %v13745_v28 = vpop.f32.mrf.mxu2  ;;  %v7199_v54 = vadd.f32 %v7163_v24, %v7051_v14  ;;  %v6906_v2 = vadd.f32 %v13539_v23, %v6757_v38  ;;  %v7511_v61 = vsel %vm7507_vm9, %v13780_v0, 0.0  ;;  %v6907_v24 = vadd.f32 %v13550_v43, %v6758_v8 }
 0x931   :  { %v13800_v23 = vadd.f32 %v13683_v48, %v7346_v40  ;;  %v7512_v25 = vadd.f32 %v7511_v61, %v7510_v59  ;;  %v7349_v31 = vadd.f32 %v14798_v36, %v7201_v16  ;;  %v6909_v17 = vadd.f32 %v14801_v37, %v6760_v12  ;;  %v14809_v12 = vld [vmem:[#allocation10_spill] sm:$0xff] }
 0x932   :  { %v13754_v47 = vpop.f32.mrf.mxu3  ;;  %v7347_v27 = vadd.f32 %v13697_v15, %v7199_v54  ;;  %v7054_v26 = vadd.f32 %v13707_v32, %v6906_v2  ;;  %v7055_v9 = vadd.f32 %v13715_v11, %v6907_v24  ;;  %v6908_v15 = vadd.f32 %v13563_v39, %v6759_v10  ;;  %v14797_v32 = vld [vmem:[#allocation14_spill] sm:$0xff]  ;;  %v14802_v11 = vld [vmem:[#allocation99_spill] sm:$0xff]  ;;  %v14807_v49 = vld [vmem:[#allocation104_spill] sm:$0xff] }
 0x933   :  { %v7033_v5 = vpop.f32.mrf.mxu1  ;;  %v7515_v43 = vsel %vm7507_vm9, %v14797_v32, 0.0  ;;  %v14800_v56 = vld [vmem:[#allocation105_spill] sm:$0xff]  ;;  %v7514_v58 = vadd.f32 %v7513_v62, %v7512_v25  ;;  %v7517_v39 = vsel %vm7507_vm9, %v13800_v23, 0.0  ;;  %v13820_v33 = vadd.f32 %v14802_v11, %v7348_v63 }
 0x934   :  { %v7202_v55 = vadd.f32 %v13709_v45, %v7054_v26  ;;  %v13812_v48 = vadd.f32 %v14799_v41, %v7347_v27  ;;  %v7203_v7 = vadd.f32 %v13726_v30, %v7055_v9  ;;  %v7056_v20 = vadd.f32 %v14800_v56, %v6908_v15  ;;  %v7480_v45 = vpop.f32.mrf.mxu0  ;;  %v14805_v30 = vld [vmem:[#allocation8_spill] sm:$0xff] }
 0x935   :  { %v7057_v6 = vadd.f32 %v7033_v5, %v6909_v17  ;;  %v6910_v51 = vadd.f32 %v14805_v30, %v14804_v22  ;;  %v7516_v38 = vadd.f32 %v7515_v43, %v7514_v58  ;;  %v13827_v14 = vadd.f32 %v14806_v19, %v7349_v31  ;;  %v14808_v5 = vld [vmem:[#allocation100_spill] sm:$0xff] }
 0x936   :  { %v7350_v52 = vadd.f32 %v14803_v53, %v7202_v55  ;;  %v7204_v57 = vadd.f32 %v13745_v28, %v7056_v20  ;;  %v7519_v1 = vsel %vm7507_vm9, %v13812_v48, 0.0  ;;  %v7351_v8 = vadd.f32 %v14807_v49, %v7203_v7  ;;  %v14813_v58 = vld [vmem:[#allocation24_spill] sm:$0xff] }
 0x937   :  { %v7518_v50 = vadd.f32 %v7517_v39, %v7516_v38  ;;  %v7521_v28 = vsel %vm7507_vm9, %v13820_v33, 0.0  ;;  %v6911_v16 = vadd.f32 %v14810_v4, %v14809_v12  ;;  %v7523_v27 = vsel %vm7507_vm9, %v13827_v14, 0.0  ;;  %v14814_v39 = vld [vmem:[#allocation13_spill] sm:$0xff] }
 0x938   :  { %v7181_v29 = vpop.f32.mrf.mxu2  ;;  %v13835_v10 = vadd.f32 %v14808_v5, %v7350_v52  ;;  %v7352_v42 = vadd.f32 %v13754_v47, %v7204_v57  ;;  %v14812_v47 = vld [vmem:[#allocation106_spill] sm:$0xff]  ;;  %v9453_v31 = vmov 128.0   ;;  %v6912_v11 = vadd.f32 %v14814_v39, %v14813_v58 }
 0x939   :  { %v7205_v54 = vadd.f32 %v7181_v29, %v7057_v6  ;;  %v7520_v61 = vadd.f32 %v7519_v1, %v7518_v50  ;;  %v14811_v29 = vld [vmem:[#allocation102_spill] sm:$0xff]  ;;  %9417 = vrcp.f32 %v9453_v31 }
 0x93a   :  { %v7329_v21 = vpop.f32.mrf.mxu3  ;;  %v13843_v26 = vadd.f32 %v14811_v29, %v7351_v8  ;;  %v7525_v55 = vsel %vm7507_vm9, %v13835_v10, 0.0  ;;  %v13848_v9 = vadd.f32 %v14812_v47, %v7352_v42 }
 0x93b   :  { %v7036_v44 = vpop.f32.mrf.mxu1  ;;  %v7353_v24 = vadd.f32 %v7329_v21, %v7205_v54  ;;  %v7522_v59 = vadd.f32 %v7521_v28, %v7520_v61 }
 0x93c   :  { %v7058_v40 = vadd.f32 %v7036_v44, %v6910_v51  ;;  %v7483_v62 = vpop.f32.mrf.mxu0  ;;  %v7527_v41 = vsel %vm7507_vm9, %v13843_v26, 0.0  ;;  %v7529_v37 = vsel %vm7507_vm9, %v13848_v9, 0.0 }
 0x93d   :  { %v7524_v43 = vadd.f32 %v7523_v27, %v7522_v59  ;;  %v13853_v21 = vadd.f32 %v13769_v34, %v7353_v24 }
 0x93f   :  { %v7526_v56 = vadd.f32 %v7525_v55, %v7524_v43  ;;  %v7531_v53 = vsel %vm7507_vm9, %v13853_v21, 0.0  ;;  %v9418_v34 = vpop.eup %9417 }
 0x940   :  { %v7184_v3 = vpop.f32.mrf.mxu2  ;;  %v7546_v49 = vmul.f32 128.0, %v9418_v34  ;;  %vm7550_vm10 = vweird.f32 %v9418_v34 }
 0x941   :  { %v7206_v2 = vadd.f32 %v7184_v3, %v7058_v40  ;;  %v7528_v3 = vadd.f32 %v7527_v41, %v7526_v56 }
 0x942   :  { %v7332_v13 = vpop.f32.mrf.mxu3  ;;  %v7547_v50 = vsub.f32 1.0, %v7546_v49 }
 0x943   :  { %v7039_v60 = vpop.f32.mrf.mxu1  ;;  %v7354_v15 = vadd.f32 %v7332_v13, %v7206_v2  ;;  %v7530_v6 = vadd.f32 %v7529_v37, %v7528_v3 }
 0x944   :  { %v7059_v44 = vadd.f32 %v7039_v60, %v6911_v16  ;;  %v7486_v19 = vpop.f32.mrf.mxu0  ;;  %v7548_v42 = vmul.f32 %v9418_v34, %v7547_v50 }
 0x945   :  { %v13857_v17 = vadd.f32 %v7480_v45, %v7354_v15  ;;  %v7532_v38 = vadd.f32 %v7531_v53, %v7530_v6 }
 0x946   :  { %v7549_v4 = vadd.f32 %v9418_v34, %v7548_v42 }
 0x947   :  { %v7533_v30 = vsel %vm7507_vm9, %v13857_v17, 0.0 }
 0x948   :  { %v7187_v63 = vpop.f32.mrf.mxu2  ;;  %v7534_v8 = vadd.f32 %v7533_v30, %v7532_v38  ;;  %v13873_v27 = vsel %vm7550_vm10, %v9418_v34, %v7549_v4 }
 0x949   :  { %v7207_v25 = vadd.f32 %v7187_v63, %v7059_v44 }
 0x94a   :  { %v7335_v36 = vpop.f32.mrf.mxu3 }
 0x94b   :  { %v7355_v7 = vadd.f32 %v7335_v36, %v7207_v25  ;;  %v7042_v20 = vpop.f32.mrf.mxu1 }
 0x94c   :  { %v7060_v52 = vadd.f32 %v7042_v20, %v6912_v11 }
 0x94d   :  { %v13863_v57 = vadd.f32 %v7483_v62, %v7355_v7 }
 0x94f   :  { %v7535_v13 = vsel %vm7507_vm9, %v13863_v57, 0.0 }
 0x950   :  { %v7190_v22 = vpop.f32.mrf.mxu2  ;;  %v7536_v40 = vadd.f32 %v7535_v13, %v7534_v8 }
 0x951   :  { %v7208_v51 = vadd.f32 %v7190_v22, %v7060_v52 }
 0x952   :  { %v7338_v45 = vpop.f32.mrf.mxu3 }
 0x953   :  { %v7356_v1 = vadd.f32 %v7338_v45, %v7208_v51 }
 0x955   :  { %v13869_v54 = vadd.f32 %v7486_v19, %v7356_v1 }
 0x957   :  { %v7537_v60 = vsel %vm7507_vm9, %v13869_v54, 0.0 }
 0x958   :  { %v7538_v28 = vadd.f32 %v7537_v60, %v7536_v40 }
 0x95a   :  { %v7539_v5 = vrot.slane %v7538_v28, 4 }
 0x95c   :  { %v7540_v2 = vadd.f32 %v7539_v5, %v7538_v28 }
 0x95e   :  { %v7541_v12 = vrot.slane %v7540_v2, 2 }
 0x960   :  { %v7542_v16 = vadd.f32 %v7541_v12, %v7540_v2 }
 0x962   :  { %v7543_v61 = vrot.slane %v7542_v16, 1 }
 0x964   :  { %v7544_v29 = vadd.f32 %v7543_v61, %v7542_v16 }
 0x966   :  { %v13876_v24 = vmul.f32 %v13873_v27, %v7544_v29 }
 0x968   :  { %v7553_v44 = vsub.f32 %v13774_v18, %v13876_v24  ;;  %v7554_v59 = vsub.f32 %v13767_v46, %v13876_v24  ;;  %v7555_v63 = vsub.f32 %v13780_v0, %v13876_v24  ;;  %v7556_v62 = vsub.f32 %v13788_v35, %v13876_v24 }
 0x969   :  { %v7557_v15 = vsub.f32 %v14797_v32, %v13876_v24  ;;  %v7558_v43 = vsub.f32 %v13800_v23, %v13876_v24  ;;  %v7559_v56 = vsub.f32 %v13812_v48, %v13876_v24  ;;  %v7560_v39 = vsub.f32 %v13820_v33, %v13876_v24 }
 0x96a   :  { %v7569_v55 = vmul.f32 %v7553_v44, %v7553_v44  ;;  %v7570_v47 = vmul.f32 %v7554_v59, %v7554_v59  ;;  %v7571_v25 = vmul.f32 %v7555_v63, %v7555_v63  ;;  %v7572_v36 = vmul.f32 %v7556_v62, %v7556_v62 }
 0x96b   :  { %v7573_v20 = vmul.f32 %v7557_v15, %v7557_v15  ;;  %v7574_v11 = vmul.f32 %v7558_v43, %v7558_v43  ;;  %v7561_v52 = vsub.f32 %v13827_v14, %v13876_v24  ;;  %v7575_v34 = vmul.f32 %v7559_v56, %v7559_v56 }
 0x96c   :  { %v7585_v31 = vsel %vm7507_vm9, %v7569_v55, 0.0  ;;  %v7586_v41 = vsel %vm7507_vm9, %v7570_v47, 0.0  ;;  %v7588_v37 = vsel %vm7507_vm9, %v7571_v25, 0.0  ;;  %v7590_v3 = vsel %vm7507_vm9, %v7572_v36, 0.0 }
 0x96d   :  { %v7587_v7 = vadd.f32 %v7586_v41, %v7585_v31  ;;  %v7592_v6 = vsel %vm7507_vm9, %v7573_v20, 0.0  ;;  %v7562_v30 = vsub.f32 %v13835_v10, %v13876_v24  ;;  %v7576_v51 = vmul.f32 %v7560_v39, %v7560_v39 }
 0x96e   :  { %v7594_v38 = vsel %vm7507_vm9, %v7574_v11, 0.0  ;;  %v7563_v19 = vsub.f32 %v13843_v26, %v13876_v24  ;;  %v7577_v13 = vmul.f32 %v7561_v52, %v7561_v52  ;;  %v7596_v1 = vsel %vm7507_vm9, %v7575_v34, 0.0 }
 0x96f   :  { %v7589_v58 = vadd.f32 %v7588_v37, %v7587_v7  ;;  %v7564_v8 = vsub.f32 %v13848_v9, %v13876_v24  ;;  %v7578_v40 = vmul.f32 %v7562_v30, %v7562_v30  ;;  %v7598_v60 = vsel %vm7507_vm9, %v7576_v51, 0.0  ;;  %v7703_v30 = vld [vmem:[%s14244_s7 + $0x10] sm:$0xff] }
 0x970   :  { %v7565_v28 = vsub.f32 %v13853_v21, %v13876_v24  ;;  %v7579_v5 = vmul.f32 %v7563_v19, %v7563_v19  ;;  %v7600_v42 = vsel %vm7507_vm9, %v7577_v13, 0.0  ;;  %v7566_v12 = vsub.f32 %v13857_v17, %v13876_v24  ;;  %v9331_v51 = vld [vmem:[%s14244_s7 + $0x30] sm:$0xff]  ;;  %7755 = vmatpush.msrb.mxu2 %v7703_v30  ;;  %v9336_v19 = vld [vmem:[%s14244_s7 + $0x48] sm:$0xff]  ;;  %v7701_v13 = vld [vmem:[%s14244_s7] sm:$0xff] }
 0x971   :  { %v7591_v53 = vadd.f32 %v7590_v3, %v7589_v58  ;;  %v7580_v4 = vmul.f32 %v7564_v8, %v7564_v8  ;;  %v7602_v16 = vsel %vm7507_vm9, %v7578_v40, 0.0  ;;  %v7567_v29 = vsub.f32 %v13863_v57, %v13876_v24  ;;  %7731 = vmatpush.msrb.mxu1 %v9331_v51 }
 0x972   :  { %v7581_v44 = vmul.f32 %v7565_v28, %v7565_v28  ;;  %v7604_v59 = vsel %vm7507_vm9, %v7579_v5, 0.0  ;;  %v7568_v62 = vsub.f32 %v13869_v54, %v13876_v24  ;;  %v7582_v55 = vmul.f32 %v7566_v12, %v7566_v12  ;;  %v9343_v28 = vld [vmem:[%s14244_s7 + $0x78] sm:$0xff]  ;;  %v9352_v12 = vld [vmem:[%s14244_s7 + $0xb0] sm:$0xff] }
 0x973   :  { %v7593_v22 = vadd.f32 %v7592_v6, %v7591_v53  ;;  %v7606_v47 = vsel %vm7507_vm9, %v7580_v4, 0.0  ;;  %v7583_v25 = vmul.f32 %v7567_v29, %v7567_v29  ;;  %v9353_v5 = vld [vmem:[%s14244_s7 + $0xb8] sm:$0xff]  ;;  %v9351_v29 = vld [vmem:[%s14244_s7 + $0xa8] sm:$0xff] }
 0x974   :  { %v7608_v43 = vsel %vm7507_vm9, %v7581_v44, 0.0  ;;  %v7584_v31 = vmul.f32 %v7568_v62, %v7568_v62  ;;  %v7610_v41 = vsel %vm7507_vm9, %v7582_v55, 0.0  ;;  %v9350_v62 = vld [vmem:[%s14244_s7 + $0xa0] sm:$0xff] }
 0x975   :  { %v7595_v45 = vadd.f32 %v7594_v38, %v7593_v22  ;;  %v7612_v56 = vsel %vm7507_vm9, %v7583_v25, 0.0  ;;  %v9337_v38 = vld [vmem:[%s14244_s7 + $0x50] sm:$0xff]  ;;  %v7505_v55 = vld [vmem:[%s14242_s5] sm:$0x1] }
 0x976   :  { %v7614_v37 = vsel %vm7507_vm9, %v7584_v31, 0.0  ;;  %7785 = vmatpush.msrb.mxu3 %v9337_v38 }
 0x977   :  { %v7597_v49 = vadd.f32 %v7596_v1, %v7595_v45  ;;  %v9330_v45 = vld [vmem:[%s14244_s7 + $0x28] sm:$0xff]  ;;  %v9329_v1 = vld [vmem:[%s14244_s7 + $0x20] sm:$0xff] }
 0x978   :  { %7732 = vmatpush.msrb.mxu1 %v9330_v45  ;;  %7786 = vmatpush.msrb.mxu3 %v9336_v19 }
 0x979   :  { %v7599_v50 = vadd.f32 %v7598_v60, %v7597_v49  ;;  %v9335_v49 = vld [vmem:[%s14244_s7 + $0x40] sm:$0xff] }
 0x97a   :  { %7733 = vmatpush.msrb.mxu1 %v9329_v1  ;;  %7787 = vmatpush.msrb.mxu3 %v9335_v49 }
 0x97b   :  { %v7601_v2 = vadd.f32 %v7600_v42, %v7599_v50  ;;  %v9348_v50 = vld [vmem:[%s14244_s7 + $0x98] sm:$0xff]  ;;  %v9347_v42 = vld [vmem:[%s14244_s7 + $0x90] sm:$0xff] }
 0x97c   :  { %7815 = vmatpush.msra.mxu1 %v9343_v28  ;;  %7888 = vmatpush.msra.mxu3 %v9353_v5 }
 0x97d   :  { %v7603_v61 = vadd.f32 %v7602_v16, %v7601_v2  ;;  %v9342_v2 = vld [vmem:[%s14244_s7 + $0x70] sm:$0xff]  ;;  %v9346_v16 = vld [vmem:[%s14244_s7 + $0x88] sm:$0xff] }
 0x97e   :  { %7816 = vmatpush.msra.mxu1 %v9342_v2  ;;  %7889 = vmatpush.msra.mxu3 %v9352_v12 }
 0x97f   :  { %v7605_v63 = vadd.f32 %v7604_v59, %v7603_v61  ;;  %v9341_v61 = vld [vmem:[%s14244_s7 + $0x68] sm:$0xff]  ;;  %v9345_v59 = vld [vmem:[%s14244_s7 + $0x80] sm:$0xff] }
 0x980   :  { %7817 = vmatpush.msra.mxu1 %v9341_v61  ;;  %7890 = vmatpush.msra.mxu3 %v9351_v29 }
 0x981   :  { %v7607_v15 = vadd.f32 %v7606_v47, %v7605_v63  ;;  %v9340_v63 = vld [vmem:[%s14244_s7 + $0x60] sm:$0xff] }
 0x982   :  { %7818 = vmatpush.msra.mxu1 %v9340_v63  ;;  %7891 = vmatpush.msra.mxu3 %v9350_v62 }
 0x983   :  { %v7609_v36 = vadd.f32 %v7608_v43, %v7607_v15  ;;  %v7506_v43 = vld [vmem:[%s14243_s6] sm:$0x1] }
 0x985   :  { %v7611_v7 = vadd.f32 %v7610_v41, %v7609_v36 }
 0x987   :  { %v7613_v20 = vadd.f32 %v7612_v56, %v7611_v7 }
 0x989   :  { %v7615_v58 = vadd.f32 %v7614_v37, %v7613_v20 }
 0x98b   :  { %v7616_v39 = vrot.slane %v7615_v58, 4 }
 0x98d   :  { %v7617_v11 = vadd.f32 %v7616_v39, %v7615_v58 }
 0x98f   :  { %v7618_v3 = vrot.slane %v7617_v11, 2 }
 0x991   :  { %v7619_v53 = vadd.f32 %v7618_v3, %v7617_v11 }
 0x993   :  { %v7620_v52 = vrot.slane %v7619_v53, 1 }
 0x995   :  { %v7621_v34 = vadd.f32 %v7620_v52, %v7619_v53 }
 0x997   :  { %v7622_v6 = vmul.f32 %v7621_v34, %v13873_v27  ;;  %v7702_v27 = vld [vmem:[%s14244_s7 + $0x8] sm:$0xff] }
 0x998   :  { %7756 = vmatpush.msrb.mxu2 %v7702_v27 }
 0x999   :  { %v7623_v22 = vadd.f32 1e-05, %v7622_v6 }
 0x99a   :  { %7757 = vmatpush.msrb.mxu2 %v7701_v13 }
 0x99b   :  { %9419 = vrsqrt.f32 %v7623_v22  ;;  %vm7630_vm12 = vweird.f32 %v7623_v22 }
 0x99c   :  { %7857 = vmatpush.msra.mxu2 %v9348_v50 }
 0x99e   :  { %7858 = vmatpush.msra.mxu2 %v9347_v42 }
 0x9a0   :  { %7859 = vmatpush.msra.mxu2 %v9346_v16 }
 0x9a1   :  { %v9420_v8 = vpop.eup %9419 }
 0x9a2   :  { %v7625_v40 = vmul.f32 %v9420_v8, %v7623_v22  ;;  %vm7631_vm11 = vweird.f32 %v9420_v8  ;;  %7860 = vmatpush.msra.mxu2 %v9345_v59 }
 0x9a3   :  { %vm7632_vm13 = vmor %vm7630_vm12, %vm7631_vm11 }
 0x9a4   :  { %v7626_v60 = vmul.f32 %v9420_v8, %v7625_v40 }
 0x9a6   :  { %v7627_v4 = vmul.f32 0.5, %v7626_v60 }
 0x9a8   :  { %v7628_v44 = vsub.f32 1.5, %v7627_v4 }
 0x9aa   :  { %v7629_v47 = vmul.f32 %v9420_v8, %v7628_v44 }
 0x9ac   :  { %v7633_v15 = vsel %vm7632_vm13, %v9420_v8, %v7629_v47 }
 0x9ad   :  { %v7634_v25 = vmul.f32 %v7633_v15, %v7505_v55  ;;  %v9358_v15 = vld [vmem:[%s14244_s7 + $0xd8] sm:$0xff] }
 0x9af   :  { %v7635_v36 = vmul.f32 %v7634_v25, %v13876_v24  ;;  %v13997_v31 = vperm.slane %v7634_v25, 0  ;;  %v9368_v25 = vld [vmem:[%s14244_s7 + $0x118] sm:$0xff] }
 0x9b1   :  { %v7636_v41 = vsub.f32 %v7506_v43, %v7635_v36  ;;  %v7640_v56 = vmul.f32 %v13997_v31, %v13774_v18  ;;  %v7641_v20 = vmul.f32 %v13997_v31, %v13767_v46  ;;  %v7648_v37 = vmul.f32 %v13997_v31, %v13827_v14  ;;  %v9362_v36 = vld [vmem:[%s14244_s7 + $0xf0] sm:$0xff] }
 0x9b2   :  { %v7649_v58 = vmul.f32 %v13997_v31, %v13835_v10  ;;  %v7642_v24 = vmul.f32 %v13997_v31, %v13780_v0  ;;  %v7643_v39 = vmul.f32 %v13997_v31, %v13788_v35  ;;  %v7650_v18 = vmul.f32 %v13997_v31, %v13843_v26 }
 0x9b3   :  { %v13999_v7 = vperm.slane %v7636_v41, 0  ;;  %v7651_v46 = vmul.f32 %v13997_v31, %v13848_v9  ;;  %v7652_v1 = vmul.f32 %v13997_v31, %v13853_v21  ;;  %v7644_v5 = vmul.f32 %v13997_v31, %v14797_v32  ;;  %v9363_v32 = vld [vmem:[%s14244_s7 + $0xf8] sm:$0xff]  ;;  %v9357_v41 = vld [vmem:[%s14244_s7 + $0xd0] sm:$0xff] }
 0x9b4   :  { %v7653_v42 = vmul.f32 %v13997_v31, %v13857_v17  ;;  %v7645_v4 = vmul.f32 %v13997_v31, %v13800_v23 }
 0x9b5   :  { %v7659_v11 = vadd.f32 %v13999_v7, %v7640_v56  ;;  %v7660_v3 = vadd.f32 %v13999_v7, %v7641_v20  ;;  %v7667_v14 = vadd.f32 %v13999_v7, %v7648_v37  ;;  %v7668_v10 = vadd.f32 %v13999_v7, %v7649_v58  ;;  %v9367_v56 = vld [vmem:[%s14244_s7 + $0x110] sm:$0xff]  ;;  %v9361_v58 = vld [vmem:[%s14244_s7 + $0xe8] sm:$0xff] }
 0x9b6   :  { %v7661_v53 = vadd.f32 %v13999_v7, %v7642_v24  ;;  %v7662_v0 = vadd.f32 %v13999_v7, %v7643_v39  ;;  %v7669_v22 = vadd.f32 %v13999_v7, %v7650_v18  ;;  %v7670_v30 = vadd.f32 %v13999_v7, %v7651_v46  ;;  %v9356_v46 = vld [vmem:[%s14244_s7 + $0xc8] sm:$0xff] }
 0x9b7   :  { %v7675_v52 = vmax.f32 %v7659_v11, 0.0  ;;  %v7676_v35 = vmax.f32 %v7660_v3, 0.0  ;;  %v7683_v34 = vmax.f32 %v7667_v14, 0.0  ;;  %v7684_v6 = vmax.f32 %v7668_v10, 0.0 }
 0x9b8   :  { %v7677_v51 = vmax.f32 %v7661_v53, 0.0  ;;  %v7678_v38 = vmax.f32 %v7662_v0, 0.0  ;;  %v7685_v27 = vmax.f32 %v7669_v22, 0.0  ;;  %v7686_v45 = vmax.f32 %v7670_v30, 0.0  ;;  %v9355_v30 = vld [vmem:[%s14244_s7 + $0xc0] sm:$0xff] }
 0x9b9   :  { %v7691_v26 = vmax.f32 %v7675_v52, %v7676_v35  ;;  %v7692_v9 = vmax.f32 %v7683_v34, %v7684_v6  ;;  %v7671_v60 = vadd.f32 %v13999_v7, %v7652_v1  ;;  %v7672_v44 = vadd.f32 %v13999_v7, %v7653_v42  ;;  %v9360_v52 = vld [vmem:[%s14244_s7 + $0xe0] sm:$0xff] }
 0x9ba   :  { %v7824_v13 = vmax.f32 %v7677_v51, %v7678_v38  ;;  %v7825_v8 = vmax.f32 %v7685_v27, %v7686_v45  ;;  %v7663_v59 = vadd.f32 %v13999_v7, %v7644_v5  ;;  %v7664_v17 = vadd.f32 %v13999_v7, %v7645_v4 }
 0x9bb   :  { %v7695_v19 = vrot.slane %v7691_v26, 1  ;;  %v7696_v49 = vrot.slane %v7692_v9, 1  ;;  %v7687_v63 = vmax.f32 %v7671_v60, 0.0  ;;  %v7688_v20 = vmax.f32 %v7672_v44, 0.0 }
 0x9bc   :  { %v7829_v28 = vrot.slane %v7825_v8, 1  ;;  %v7828_v21 = vrot.slane %v7824_v13, 1  ;;  %v7654_v37 = vmul.f32 %v13997_v31, %v13863_v57  ;;  %v7679_v24 = vmax.f32 %v7663_v59, 0.0  ;;  %v9366_v57 = vld [vmem:[%s14244_s7 + $0x108] sm:$0xff] }
 0x9bd   :  { %v14027_v40 = vmax.f32 %v7691_v26, %v7695_v19  ;;  %v7700_v50 = vmax.f32 %v7692_v9, %v7696_v49  ;;  %v7680_v39 = vmax.f32 %v7664_v17, 0.0  ;;  %v7960_v14 = vmax.f32 %v7687_v63, %v7688_v20  ;;  %v9373_v19 = vld [vmem:[%s14244_s7 + $0x138] sm:$0xff]  ;;  %v9370_v63 = vld [vmem:[%s14244_s7 + $0x120] sm:$0xff] }
 0x9be   :  { %v14048_v47 = vmax.f32 %v7825_v8, %v7829_v28  ;;  %v14058_v43 = vmax.f32 %v7824_v13, %v7828_v21  ;;  %v7655_v10 = vmul.f32 %v13997_v31, %v13869_v54  ;;  %v7673_v35 = vadd.f32 %v13999_v7, %v7654_v37  ;;  %v9383_v13 = vld [vmem:[%s14244_s7 + $0x178] sm:$0xff]  ;;  %v9382_v28 = vld [vmem:[%s14244_s7 + $0x170] sm:$0xff] }
 0x9bf   :  { %v7712_v2 = vrot.slane %v14027_v40, 2  ;;  %v7767_v12 = vrot.slane %v14027_v40, 4  ;;  %v7713_v16 = vrot.slane %v7700_v50, 1  ;;  %v7738_v61 = vrot.slane %v7700_v50, 7 }
 0x9c0   :  { %v7768_v29 = vrot.slane %v7700_v50, 3  ;;  %v7798_v11 = vrot.slane %v14027_v40, 6  ;;  %v7799_v3 = vrot.slane %v7700_v50, 5  ;;  %v7841_v18 = vrot.slane %v14048_v47, 7  ;;  %v9372_v50 = vld [vmem:[%s14244_s7 + $0x130] sm:$0xff] }
 0x9c1   :  { %v7715_v62 = vsel %vm7714_vm14, %v7713_v16, %v7712_v2  ;;  %v7739_v55 = vsel %vm7714_vm14, %v7738_v61, %v14027_v40  ;;  %v7871_v53 = vrot.slane %v14058_v43, 2  ;;  %v7872_v0 = vrot.slane %v14048_v47, 1  ;;  %v9376_v2 = vld [vmem:[%s14244_s7 + $0x148] sm:$0xff] }
 0x9c2   :  { %v7769_v23 = vsel %vm7714_vm14, %v7768_v29, %v7767_v12  ;;  %9333 = vmatmul.msk.f32.vlgmr.msrb.gmra.mxu1 %vm7507_vm9, %v7715_v62  ;;  %9334 = vmatmul.msk.f32.vlgmr.msrb.gmra.mxu2 %vm7507_vm9, %v7739_v55  ;;  %v7964_v34 = vrot.slane %v7960_v14, 1  ;;  %v7646_v6 = vmul.f32 %v13997_v31, %v13812_v48  ;;  %v7647_v54 = vmul.f32 %v13997_v31, %v13820_v33  ;;  %v9365_v48 = vld [vmem:[%s14244_s7 + $0x100] sm:$0xff]  ;;  %v9378_v33 = vld [vmem:[%s14244_s7 + $0x158] sm:$0xff]  ;;  %v9371_v16 = vld [vmem:[%s14244_s7 + $0x128] sm:$0xff] }
 0x9c3   :  { %9339 = vmatmul.msk.f32.vlgmr.msrb.gmra.mxu3 %vm7507_vm9, %v7769_v23  ;;  %7950 = vmatpush.msrb.mxu2 %v9363_v32  ;;  %v7674_v22 = vadd.f32 %v13999_v7, %v7655_v10  ;;  %v7959_v26 = vmax.f32 %v7679_v24, %v7680_v39  ;;  %v7800_v51 = vsel %vm7714_vm14, %v7799_v3, %v7798_v11  ;;  %v7689_v1 = vmax.f32 %v7673_v35, 0.0  ;;  %v9381_v61 = vld [vmem:[%s14244_s7 + $0x168] sm:$0xff]  ;;  %v9375_v32 = vld [vmem:[%s14244_s7 + $0x140] sm:$0xff]  ;;  %v9397_v24 = vld [vmem:[%s14244_s7 + $0x1d0] sm:$0xff] }
 0x9c4   :  { %7919 = vmatpush.msrb.mxu1 %v9358_v15  ;;  %7992 = vmatpush.msrb.mxu3 %v9368_v25  ;;  %v7842_v38 = vsel %vm7714_vm14, %v7841_v18, %v14058_v43  ;;  %v7665_v31 = vadd.f32 %v13999_v7, %v7646_v6  ;;  %v7666_v9 = vadd.f32 %v13999_v7, %v7647_v54  ;;  %v9377_v7 = vld [vmem:[%s14244_s7 + $0x150] sm:$0xff]  ;;  %v7902_v8 = vrot.slane %v14058_v43, 4  ;;  %v9380_v62 = vld [vmem:[%s14244_s7 + $0x160] sm:$0xff]  ;;  %v9388_v15 = vld [vmem:[%s14244_s7 + $0x198] sm:$0xff] }
 0x9c5   :  { %7951 = vmatpush.msrb.mxu2 %v9362_v36  ;;  %v7873_v27 = vsel %vm7714_vm14, %v7872_v0, %v7871_v53  ;;  %v14113_v45 = vmax.f32 %v7960_v14, %v7964_v34  ;;  %v7690_v49 = vmax.f32 %v7674_v22, 0.0  ;;  %v7933_v40 = vrot.slane %v14058_v43, 6  ;;  %v9398_v25 = vld [vmem:[%s14244_s7 + $0x1d8] sm:$0xff]  ;;  %v9391_v18 = vld [vmem:[%s14244_s7 + $0x1a8] sm:$0xff]  ;;  %v9390_v14 = vld [vmem:[%s14244_s7 + $0x1a0] sm:$0xff] }
 0x9c6   :  { %7920 = vmatpush.msrb.mxu1 %v9357_v41  ;;  %7993 = vmatpush.msrb.mxu3 %v9367_v56  ;;  %v7963_v60 = vrot.slane %v7959_v26, 1  ;;  %v7903_v5 = vrot.slane %v14048_v47, 3  ;;  %v7934_v42 = vrot.slane %v14048_v47, 5  ;;  %v7681_v12 = vmax.f32 %v7665_v31, 0.0  ;;  %v9393_v47 = vld [vmem:[%s14244_s7 + $0x1b8] sm:$0xff]  ;;  %v9392_v41 = vld [vmem:[%s14244_s7 + $0x1b0] sm:$0xff] }
 0x9c7   :  { %7952 = vmatpush.msrb.mxu2 %v9361_v58  ;;  %v7682_v21 = vmax.f32 %v7666_v9, 0.0  ;;  %v7976_v4 = vrot.slane %v14113_v45, 7  ;;  %v8095_v29 = vmax.f32 %v7689_v1, %v7690_v49  ;;  %v9387_v56 = vld [vmem:[%s14244_s7 + $0x190] sm:$0xff]  ;;  %v8007_v20 = vrot.slane %v14113_v45, 1  ;;  %v9396_v0 = vld [vmem:[%s14244_s7 + $0x1c8] sm:$0xff]  ;;  %v9403_v6 = vld [vmem:[%s14244_s7 + $0x1f8] sm:$0xff] }
 0x9c8   :  { %7921 = vmatpush.msrb.mxu1 %v9356_v46  ;;  %7994 = vmatpush.msrb.mxu3 %v9366_v57  ;;  %v7967_v44 = vmax.f32 %v7959_v26, %v7963_v60  ;;  %v7904_v59 = vsel %vm7714_vm14, %v7903_v5, %v7902_v8  ;;  %v7935_v17 = vsel %vm7714_vm14, %v7934_v42, %v7933_v40  ;;  %v8038_v58 = vrot.slane %v14113_v45, 3  ;;  %v9386_v46 = vld [vmem:[%s14244_s7 + $0x188] sm:$0xff]  ;;  %v9395_v54 = vld [vmem:[%s14244_s7 + $0x1c0] sm:$0xff]  ;;  %v9402_v22 = vld [vmem:[%s14244_s7 + $0x1f0] sm:$0xff] }
 0x9c9   :  { %7953 = vmatpush.msrb.mxu2 %v9360_v52  ;;  %v8094_v55 = vmax.f32 %v7681_v12, %v7682_v21  ;;  %v8099_v43 = vrot.slane %v8095_v29, 1  ;;  %v8069_v3 = vrot.slane %v14113_v45, 5  ;;  %v9385_v52 = vld [vmem:[%s14244_s7 + $0x180] sm:$0xff] }
 0x9ca   :  { %9344 = vmatmul.msk.f32.vlgmr.msra.gmra.mxu1 %vm7507_vm9, %v7800_v51  ;;  %9349 = vmatmul.msk.f32.vlgmr.msra.gmra.mxu2 %vm7507_vm9, %v7842_v38  ;;  %v7977_v23 = vsel %vm7714_vm14, %v7976_v4, %v7967_v44  ;;  %v8006_v36 = vrot.slane %v7967_v44, 2  ;;  %v8037_v37 = vrot.slane %v7967_v44, 4  ;;  %v8068_v11 = vrot.slane %v7967_v44, 6  ;;  %v9400_v31 = vld [vmem:[%s14244_s7 + $0x1e0] sm:$0xff] }
 0x9cb   :  { %9354 = vmatmul.msk.f32.vlgmr.msra.gmra.mxu3 %vm7507_vm9, %v7873_v27  ;;  %7922 = vmatpush.msrb.mxu1 %v9355_v30  ;;  %v8098_v39 = vrot.slane %v8094_v55, 1  ;;  %v8103_v57 = vmax.f32 %v8095_v29, %v8099_v43 }
 0x9cc   :  { %7995 = vmatpush.msrb.mxu3 %v9365_v48  ;;  %8054 = vmatpush.msra.mxu2 %v9378_v33  ;;  %v8008_v10 = vsel %vm7714_vm14, %v8007_v20, %v8006_v36  ;;  %v8039_v53 = vsel %vm7714_vm14, %v8038_v58, %v8037_v37  ;;  %v8070_v34 = vsel %vm7714_vm14, %v8069_v3, %v8068_v11  ;;  %v9401_v33 = vld [vmem:[%s14244_s7 + $0x1e8] sm:$0xff] }
 0x9cd   :  { %8023 = vmatpush.msra.mxu1 %v9373_v19  ;;  %v8102_v35 = vmax.f32 %v8094_v55, %v8098_v39  ;;  %v8111_v30 = vrot.slane %v8103_v57, 7  ;;  %v8142_v51 = vrot.slane %v8103_v57, 1  ;;  %v8173_v48 = vrot.slane %v8103_v57, 3 }
 0x9ce   :  { %8085 = vmatpush.msra.mxu3 %v9383_v13  ;;  %8055 = vmatpush.msra.mxu2 %v9377_v7  ;;  %v8204_v13 = vrot.slane %v8103_v57, 5 }
 0x9cf   :  { %8024 = vmatpush.msra.mxu1 %v9372_v50  ;;  %v8141_v26 = vrot.slane %v8102_v35, 2  ;;  %v8172_v38 = vrot.slane %v8102_v35, 4  ;;  %v8112_v9 = vsel %vm7714_vm14, %v8111_v30, %v8102_v35  ;;  %v8203_v19 = vrot.slane %v8102_v35, 6 }
 0x9d0   :  { %8086 = vmatpush.msra.mxu3 %v9382_v28  ;;  %8056 = vmatpush.msra.mxu2 %v9376_v2 }
 0x9d1   :  { %8025 = vmatpush.msra.mxu1 %v9371_v16  ;;  %v8143_v27 = vsel %vm7714_vm14, %v8142_v51, %v8141_v26  ;;  %v8174_v45 = vsel %vm7714_vm14, %v8173_v48, %v8172_v38  ;;  %v8205_v1 = vsel %vm7714_vm14, %v8204_v13, %v8203_v19  ;;  %v8229_v13 = vld [vmem:[%s14245_s8] sm:$0x1] }
 0x9d2   :  { %8087 = vmatpush.msra.mxu3 %v9381_v61  ;;  %9359 = vmatmul.msk.f32.vlgmr.msrb.gmra.mxu1 %vm7507_vm9, %v7904_v59 }
 0x9d3   :  { %9364 = vmatmul.msk.f32.vlgmr.msrb.gmra.mxu2 %vm7507_vm9, %v7935_v17  ;;  %9369 = vmatmul.msk.f32.vlgmr.msrb.gmra.mxu3 %vm7507_vm9, %v7977_v23 }
 0x9d4   :  { %8057 = vmatpush.msra.mxu2 %v9375_v32  ;;  %8026 = vmatpush.msra.mxu1 %v9370_v63  ;;  %v9454_v63 = vmov 2.0  }
 0x9d5   :  { %8088 = vmatpush.msra.mxu3 %v9380_v62  ;;  %9421 = vrcp.f32 %v9454_v63 }
 0x9d6   :  { %8158 = vmatpush.msrb.mxu2 %v9393_v47  ;;  %8127 = vmatpush.msrb.mxu1 %v9388_v15 }
 0x9d7   :  { %8189 = vmatpush.msrb.mxu3 %v9398_v25 }
 0x9d8   :  { %8159 = vmatpush.msrb.mxu2 %v9392_v41  ;;  %8128 = vmatpush.msrb.mxu1 %v9387_v56 }
 0x9d9   :  { %8190 = vmatpush.msrb.mxu3 %v9397_v24 }
 0x9da   :  { %8160 = vmatpush.msrb.mxu2 %v9391_v18  ;;  %8129 = vmatpush.msrb.mxu1 %v9386_v46 }
 0x9db   :  { %9374 = vmatmul.msk.f32.vlgmr.msra.gmra.mxu1 %vm7507_vm9, %v8008_v10  ;;  %9379 = vmatmul.msk.f32.vlgmr.msra.gmra.mxu2 %vm7507_vm9, %v8039_v53  ;;  %v9422_v15 = vpop.eup %9421 }
 0x9dc   :  { %9384 = vmatmul.msk.f32.vlgmr.msra.gmra.mxu3 %vm7507_vm9, %v8070_v34  ;;  %8161 = vmatpush.msrb.mxu2 %v9390_v14  ;;  %v8240_v41 = vmul.f32 2.0, %v9422_v15  ;;  %vm8244_vm0 = vweird.f32 %v9422_v15 }
 0x9dd   :  { %8191 = vmatpush.msrb.mxu3 %v9396_v0  ;;  %8130 = vmatpush.msrb.mxu1 %v9385_v52 }
 0x9de   :  { %v8241_v24 = vsub.f32 1.0, %v8240_v41 }
 0x9df   :  { %8220 = vmatpush.msra.mxu1 %v9403_v6  ;;  %8192 = vmatpush.msrb.mxu3 %v9395_v54 }
 0x9e0   :  { %v8242_v3 = vmul.f32 %v9422_v15, %v8241_v24 }
 0x9e1   :  { %8221 = vmatpush.msra.mxu1 %v9402_v22 }
 0x9e2   :  { %v8243_v57 = vadd.f32 %v9422_v15, %v8242_v3 }
 0x9e3   :  { %8222 = vmatpush.msra.mxu1 %v9401_v33  ;;  %9394 = vmatmul.msk.f32.vlgmr.msrb.gmra.mxu2 %vm7507_vm9, %v8143_v27 }
 0x9e4   :  { %9389 = vmatmul.msk.f32.vlgmr.msrb.gmra.mxu1 %vm7507_vm9, %v8112_v9  ;;  %9399 = vmatmul.msk.f32.vlgmr.msrb.gmra.mxu3 %vm7507_vm9, %v8174_v45  ;;  %v8245_v53 = vsel %vm8244_vm0, %v9422_v15, %v8243_v57 }
 0x9e5   :  { %8223 = vmatpush.msra.mxu1 %v9400_v31 }
 0x9ec   :  { %9404 = vmatmul.msk.f32.vlgmr.msra.gmra.mxu1 %vm7507_vm9, %v8205_v1 }
 0xa3f   :  { %v7735_v7 = vpop.f32.mrf.mxu1 }
 0xa45   :  { %v7759_v49 = vpop.f32.mrf.mxu2 }
 0xa46   :  { %v7760_v8 = vadd.f32 %v7759_v49, %v7735_v7  ;;  %v7789_v40 = vpop.f32.mrf.mxu3 }
 0xa47   :  { %v7820_v60 = vpop.f32.mrf.mxu1 }
 0xa48   :  { %v7792_v50 = vadd.f32 %v7789_v40, %v7760_v8  ;;  %v8230_v8 = vld [vmem:[%s14246_s9] sm:$0x1] }
 0xa4a   :  { %v7823_v28 = vadd.f32 %v7820_v60, %v7792_v50 }
 0xa4d   :  { %v7862_v5 = vpop.f32.mrf.mxu2 }
 0xa4e   :  { %v7865_v42 = vadd.f32 %v7862_v5, %v7823_v28  ;;  %v7893_v2 = vpop.f32.mrf.mxu3 }
 0xa4f   :  { %v7924_v12 = vpop.f32.mrf.mxu1 }
 0xa50   :  { %v7896_v21 = vadd.f32 %v7893_v2, %v7865_v42 }
 0xa52   :  { %v7927_v4 = vadd.f32 %v7924_v12, %v7896_v21 }
 0xa56   :  { %v7955_v16 = vpop.f32.mrf.mxu2  ;;  %v7997_v29 = vpop.f32.mrf.mxu3 }
 0xa57   :  { %v7958_v61 = vadd.f32 %v7955_v16, %v7927_v4 }
 0xa58   :  { %v8028_v44 = vpop.f32.mrf.mxu1 }
 0xa59   :  { %v8000_v32 = vadd.f32 %v7997_v29, %v7958_v61 }
 0xa5b   :  { %v8031_v59 = vadd.f32 %v8028_v44, %v8000_v32 }
 0xa5e   :  { %v8059_v17 = vpop.f32.mrf.mxu2 }
 0xa5f   :  { %v8062_v62 = vadd.f32 %v8059_v17, %v8031_v59  ;;  %v8090_v55 = vpop.f32.mrf.mxu3 }
 0xa61   :  { %v8132_v23 = vpop.f32.mrf.mxu1  ;;  %v8093_v47 = vadd.f32 %v8090_v55, %v8062_v62 }
 0xa63   :  { %v8135_v25 = vadd.f32 %v8132_v23, %v8093_v47 }
 0xa66   :  { %v8163_v43 = vpop.f32.mrf.mxu2 }
 0xa67   :  { %v8166_v36 = vadd.f32 %v8163_v43, %v8135_v25  ;;  %v8194_v56 = vpop.f32.mrf.mxu3 }
 0xa69   :  { %v8197_v20 = vadd.f32 %v8194_v56, %v8166_v36  ;;  %v8225_v37 = vpop.f32.mrf.mxu1 }
 0xa6b   :  { %v8228_v58 = vadd.f32 %v8225_v37, %v8197_v20 }
 0xa6d   :  { %v8232_v39 = vsel %vm8231_vm15, %v8228_v58, 0.0 }
 0xa6e   :  { %v8233_v11 = vrot.slane %v8232_v39, 4 }
 0xa70   :  { %v8234_v18 = vadd.f32 %v8233_v11, %v8232_v39 }
 0xa72   :  { %v8235_v46 = vrot.slane %v8234_v18, 2 }
 0xa74   :  { %v8236_v14 = vadd.f32 %v8235_v46, %v8234_v18 }
 0xa76   :  { %v8237_v10 = vrot.slane %v8236_v14, 1 }
 0xa78   :  { %v8238_v0 = vadd.f32 %v8237_v10, %v8236_v14 }
 0xa7a   :  { %v8246_v52 = vmul.f32 %v8245_v53, %v8238_v0 }
 0xa7c   :  { %v8247_v35 = vsub.f32 %v8228_v58, %v8246_v52 }
 0xa7e   :  { %v8248_v34 = vmul.f32 %v8247_v35, %v8247_v35 }
 0xa80   :  { %v8249_v6 = vsel %vm8231_vm15, %v8248_v34, 0.0 }
 0xa81   :  { %v8250_v54 = vrot.slane %v8249_v6, 4 }
 0xa83   :  { %v8251_v22 = vadd.f32 %v8250_v54, %v8249_v6 }
 0xa85   :  { %v8252_v30 = vrot.slane %v8251_v22, 2 }
 0xa87   :  { %v8253_v26 = vadd.f32 %v8252_v30, %v8251_v22 }
 0xa89   :  { %v8254_v51 = vrot.slane %v8253_v26, 1 }
 0xa8b   :  { %v8255_v38 = vadd.f32 %v8254_v51, %v8253_v26 }
 0xa8d   :  { %v8256_v48 = vmul.f32 %v8255_v38, %v8245_v53 }
 0xa8f   :  { %v8257_v33 = vadd.f32 1e-05, %v8256_v48 }
 0xa91   :  { %9423 = vrsqrt.f32 %v8257_v33  ;;  %vm8264_vm2 = vweird.f32 %v8257_v33 }
 0xa97   :  { %v9424_v31 = vpop.eup %9423 }
 0xa98   :  { %v8259_v9 = vmul.f32 %v9424_v31, %v8257_v33  ;;  %vm8265_vm1 = vweird.f32 %v9424_v31 }
 0xa99   :  { %vm8266_vm3 = vmor %vm8264_vm2, %vm8265_vm1 }
 0xa9a   :  { %v8260_v27 = vmul.f32 %v9424_v31, %v8259_v9 }
 0xa9c   :  { %v8261_v45 = vmul.f32 0.5, %v8260_v27 }
 0xa9e   :  { %v8262_v19 = vsub.f32 1.5, %v8261_v45 }
 0xaa0   :  { %v8263_v1 = vmul.f32 %v9424_v31, %v8262_v19 }
 0xaa2   :  { %v8267_v7 = vsel %vm8266_vm3, %v9424_v31, %v8263_v1 }
 0xaa3   :  { %v8268_v49 = vmul.f32 %v8267_v7, %v8229_v13 }
 0xaa5   :  { %v8269_v40 = vmul.f32 %v8268_v49, %v8246_v52  ;;  %v8272_v60 = vperm.slane %v8268_v49, 0 }
 0xaa7   :  { %v8270_v50 = vsub.f32 %v8230_v8, %v8269_v40  ;;  %v8274_v28 = vmul.f32 %v8272_v60, %v8228_v58 }
 0xaa9   :  { %v8276_v5 = vperm.slane %v8270_v50, 0 }
 0xaab   :  { %v8278_v42 = vadd.f32 %v8276_v5, %v8274_v28 }
 0xaad   :  { %8279 = vst.msk [vmem:[#allocation4] sm:$0x3] %vm8231_vm15, %v8278_v42 }
 0xaae   :  { %8290 = dma.vmem_to_hbm [thread:$0]  %s8286_s27, 32, %s8288_s30, [#allocation5]  }
 0xaaf   :  { %9449 = dma.done.wait [#allocation5], 32  }
 0xab0   :  { %9450 = vsyncadd [#allocation5], 4294967264 }
 0xab1   :  { %8295 = vsyncpa [#allocation5], 1 }

</bundles_post_ra>
